<compile_context>
chip_gen: v7x
topology: tpu7x:2x2x1
jax: 0.10.0
libtpu: 0.0.40
codegen_flags: <defaults>
</compile_context>

<pallas_src>
import math
import functools

import numpy as np
import jax
import jax.numpy as jnp
from jax import lax
from jax.experimental import pallas as pl
from jax.experimental.pallas import tpu as pltpu

# ----------------------------- model hyper-params ---------------------------
D_MODEL = 512
N_HEADS = 8
HEAD_DIM = D_MODEL // N_HEADS
D_FF = 2048
MOVING_AVG = 25
MODES = 32
E_LAYERS = 2
D_LAYERS = 1

SEQ_LEN = 16
LABEL_LEN = 8          # = seq_len // 2 (standard FEDformer config)
PRED_LEN = 8           # configs.token_len
DEC_LEN = SEQ_LEN // 2 + PRED_LEN   # decoder sequence length = 16

_INV_SQRT2 = 1.0 / math.sqrt(2.0)


def _f32(a):
    return a if a.dtype == jnp.float32 else a.astype(jnp.float32)


def get_frequency_modes(seq_len, modes):
    # mode_select='random' shuffles range(seq_len//2) then keeps `modes` and sorts.
    # With modes >= seq_len//2 (32 >= 8 here) every mode is kept, so the result is
    # deterministic and identical to 'low' selection.
    modes = min(modes, seq_len // 2)
    return list(range(modes))


ENC_SELF_INDEX = get_frequency_modes(SEQ_LEN, MODES)
DEC_SELF_INDEX = get_frequency_modes(DEC_LEN, MODES)
CROSS_INDEX_Q = get_frequency_modes(DEC_LEN, MODES)
CROSS_INDEX_KV = get_frequency_modes(SEQ_LEN, MODES)


# ============================ Pallas kernels =================================

def _linear_kernel(*refs, activation, has_bias):
    if has_bias:
        x_ref, w_ref, b_ref, o_ref = refs
    else:
        x_ref, w_ref, o_ref = refs
    out = jnp.dot(x_ref[...], w_ref[...], preferred_element_type=jnp.float32)
    if has_bias:
        out = out + b_ref[...]
    if activation == "gelu":   # exact (erf-based) GELU, matches F.gelu default
        out = 0.5 * out * (1.0 + lax.erf(out * _INV_SQRT2))
    o_ref[...] = out.astype(o_ref.dtype)


def pallas_linear(x, w, b=None, activation=None, *, tn=512):
    """y = act(x @ w + b).  x: [..., K], w: [K, N], b: [N] or None.

    Full-K single block (no K grid); N tiled by `tn` on a "parallel" axis.
    Padding only happens when a dim is actually misaligned (tiny embedding K,
    N=1 projections), so the big 512/1536-wide weights stream straight from HBM.
    """
    orig_shape = x.shape
    K = orig_shape[-1]
    N = w.shape[1]
    x2 = _f32(x).reshape(-1, K)
    w = _f32(w)
    M = x2.shape[0]

    Mp = -(-M // 8) * 8
    if Mp != M:
        x2 = jnp.pad(x2, ((0, Mp - M), (0, 0)))
    Kp = K if K >= 128 else 128          # only the tiny embedding K (=7) is padded
    if Kp != K:
        x2 = jnp.pad(x2, ((0, 0), (0, Kp - K)))
        w = jnp.pad(w, ((0, Kp - K), (0, 0)))
    Np = N if N % 128 == 0 else -(-N // 128) * 128
    if Np != N:
        w = jnp.pad(w, ((0, 0), (0, Np - N)))
    tn_eff = tn if Np % tn == 0 else 128
    tn_eff = min(tn_eff, Np)
    grid_n = Np // tn_eff

    has_bias = b is not None
    inputs = [x2, w]
    in_specs = [
        pl.BlockSpec((Mp, Kp), lambda j: (0, 0)),
        pl.BlockSpec((Kp, tn_eff), lambda j: (0, j)),
    ]
    if has_bias:
        bp = _f32(b).reshape(1, N)
        if Np != N:
            bp = jnp.pad(bp, ((0, 0), (0, Np - N)))
        inputs.append(bp)
        in_specs.append(pl.BlockSpec((1, tn_eff), lambda j: (0, j)))

    out = pl.pallas_call(
        functools.partial(_linear_kernel, activation=activation,
                          has_bias=has_bias),
        out_shape=jax.ShapeDtypeStruct((Mp, Np), jnp.float32),
        grid_spec=pltpu.PrefetchScalarGridSpec(
            num_scalar_prefetch=0,
            grid=(grid_n,),
            in_specs=in_specs,
            out_specs=pl.BlockSpec((Mp, tn_eff), lambda j: (0, j)),
        ),
        compiler_params=pltpu.CompilerParams(
            dimension_semantics=("parallel",)),
    )(*inputs)
    if Mp != M or Np != N:
        out = out[:M, :N]
    return out.reshape(orig_shape[:-1] + (N,))


def _ffn_kernel(x_ref, w1_ref, w2_ref, o_ref, acc_ref, *, nh):
    h = pl.program_id(0)

    @pl.when(h == 0)
    def _():
        acc_ref[...] = jnp.zeros_like(acc_ref)

    t = jnp.dot(x_ref[...], w1_ref[...], preferred_element_type=jnp.float32)
    t = 0.5 * t * (1.0 + lax.erf(t * _INV_SQRT2))          # exact GELU
    acc_ref[...] += jnp.dot(t, w2_ref[...], preferred_element_type=jnp.float32)

    @pl.when(h == nh - 1)
    def _():
        o_ref[...] = acc_ref[...]


def pallas_ffn(x, w1, w2, *, th=512):
    """GELU(x @ w1) @ w2 fused; intermediate [M, D_FF] never leaves VMEM."""
    orig_shape = x.shape
    K = orig_shape[-1]
    H = w1.shape[1]
    N = w2.shape[1]
    assert K % 128 == 0 and N % 128 == 0 and H % th == 0
    x2 = _f32(x).reshape(-1, K)
    M = x2.shape[0]
    Mp = -(-M // 8) * 8
    if Mp != M:
        x2 = jnp.pad(x2, ((0, Mp - M), (0, 0)))
    nh = H // th
    out = pl.pallas_call(
        functools.partial(_ffn_kernel, nh=nh),
        out_shape=jax.ShapeDtypeStruct((Mp, N), jnp.float32),
        grid_spec=pltpu.PrefetchScalarGridSpec(
            num_scalar_prefetch=0,
            grid=(nh,),
            in_specs=[
                pl.BlockSpec((Mp, K), lambda h: (0, 0)),
                pl.BlockSpec((K, th), lambda h: (0, h)),
                pl.BlockSpec((th, N), lambda h: (h, 0)),
            ],
            out_specs=pl.BlockSpec((Mp, N), lambda h: (0, 0)),
            scratch_shapes=[pltpu.VMEM((Mp, N), jnp.float32)],
        ),
        compiler_params=pltpu.CompilerParams(
            dimension_semantics=("arbitrary",)),
    )(x2, _f32(w1), _f32(w2))
    if Mp != M:
        out = out[:M]
    return out.reshape(orig_shape[:-1] + (N,))


def _decomp_matrix(L, ksize):
    """(L, L) matrix M with trend = M @ x  ==  AvgPool1d(k, stride=1) over the
    replicate-padded series (Autoformer moving_avg, exact)."""
    pad = (ksize - 1) // 2
    m = np.zeros((L, L), np.float32)
    for l in range(L):
        for k in range(ksize):
            s = min(max(l + k - pad, 0), L - 1)
            m[l, s] += 1.0 / ksize
    return m


def _decomp_kernel(*refs, has_add, batch):
    if has_add:
        m_ref, x_ref, y_ref, s_ref, t_ref = refs
    else:
        m_ref, x_ref, s_ref, t_ref = refs
    for b in range(batch):                  # static unroll, B is tiny
        xb = x_ref[b]
        if has_add:
            xb = xb + y_ref[b]              # fused residual add
        tb = jnp.dot(m_ref[...], xb, preferred_element_type=jnp.float32)
        t_ref[b] = tb
        s_ref[b] = xb - tb


def series_decomp(x, add=None, ksize=MOVING_AVG):
    """Autoformer series_decomp of (x [+ add]); returns (seasonal, trend)."""
    B, L, D = x.shape
    x = _f32(x)
    Dp = D if D % 128 == 0 else -(-D // 128) * 128   # only the D=1 input decomp pads
    if Dp != D:
        x = jnp.pad(x, ((0, 0), (0, 0), (0, Dp - D)))
    inputs = [jnp.asarray(_decomp_matrix(L, ksize)), x]
    in_specs = [
        pl.BlockSpec((L, L), lambda i: (0, 0)),
        pl.BlockSpec((B, L, Dp), lambda i: (0, 0, 0)),
    ]
    if add is not None:
        y = _f32(add)
        if Dp != D:
            y = jnp.pad(y, ((0, 0), (0, 0), (0, Dp - D)))
        inputs.append(y)
        in_specs.append(pl.BlockSpec((B, L, Dp), lambda i: (0, 0, 0)))

    seasonal, trend = pl.pallas_call(
        functools.partial(_decomp_kernel, has_add=add is not None, batch=B),
        out_shape=(jax.ShapeDtypeStruct((B, L, Dp), jnp.float32),
                   jax.ShapeDtypeStruct((B, L, Dp), jnp.float32)),
        grid_spec=pltpu.PrefetchScalarGridSpec(
            num_scalar_prefetch=0,
            grid=(1,),
            in_specs=in_specs,
            out_specs=[pl.BlockSpec((B, L, Dp), lambda i: (0, 0, 0)),
                       pl.BlockSpec((B, L, Dp), lambda i: (0, 0, 0))],
        ),
        compiler_params=pltpu.CompilerParams(dimension_semantics=("arbitrary",)),
    )(*inputs)
    if Dp != D:
        seasonal = seasonal[..., :D]
        trend = trend[..., :D]
    return seasonal, trend


def _my_layernorm_kernel(x_ref, g_ref, b_ref, o_ref, *, eps):
    x = x_ref[...]                                   # (B, L, D)
    mean = jnp.mean(x, axis=-1, keepdims=True)
    xc = x - mean
    var = jnp.mean(xc * xc, axis=-1, keepdims=True)
    xh = xc * lax.rsqrt(var + eps)
    xh = xh * g_ref[...][None] + b_ref[...][None]    # affine
    o_ref[...] = xh - jnp.mean(xh, axis=1, keepdims=True)   # my_Layernorm bias sub


def pallas_my_layernorm(x, gamma, beta, eps=1e-5):
    B, L, D = x.shape
    return pl.pallas_call(
        functools.partial(_my_layernorm_kernel, eps=eps),
        out_shape=jax.ShapeDtypeStruct((B, L, D), jnp.float32),
        grid_spec=pltpu.PrefetchScalarGridSpec(
            num_scalar_prefetch=0,
            grid=(1,),
            in_specs=[
                pl.BlockSpec((B, L, D), lambda i: (0, 0, 0)),
                pl.BlockSpec((1, D), lambda i: (0, 0)),
                pl.BlockSpec((1, D), lambda i: (0, 0)),
            ],
            out_specs=pl.BlockSpec((B, L, D), lambda i: (0, 0, 0)),
        ),
        compiler_params=pltpu.CompilerParams(dimension_semantics=("arbitrary",)),
    )(_f32(x), _f32(gamma).reshape(1, D), _f32(beta).reshape(1, D))


# ============================ model glue (plain JAX) =========================

def circular_conv1d_k3(x, w_conv):
    """Conv1d(Cin->Cout, k=3, padding=1, padding_mode='circular', bias=False)
    on a [B, L, Cin] channels-last tensor, realised as a Pallas matmul."""
    B, L, C = x.shape
    xm1 = jnp.roll(x, 1, axis=1)      # x[(l-1) mod L]
    xp1 = jnp.roll(x, -1, axis=1)     # x[(l+1) mod L]
    feat = jnp.concatenate([xm1, x, xp1], axis=-1)                # [B, L, 3C]
    w_mat = jnp.transpose(w_conv, (2, 1, 0)).reshape(3 * C, w_conv.shape[0])
    return pallas_linear(feat, w_mat)


def positional_embedding(L, d_model):
    position = jnp.arange(L, dtype=jnp.float32)[:, None]
    div_term = jnp.exp(jnp.arange(0, d_model, 2, dtype=jnp.float32)
                       * (-math.log(10000.0) / d_model))
    pe = jnp.zeros((L, d_model), jnp.float32)
    pe = pe.at[:, 0::2].set(jnp.sin(position * div_term))
    pe = pe.at[:, 1::2].set(jnp.cos(position * div_term))
    return pe[None]


def data_embedding(x, x_mark, p):
    """TokenEmbedding (circular k=3 conv) + TimeFeatureEmbedding fused into one
    matmul on concatenated features; PositionalEmbedding added after.
    Dropout is an eval-mode identity."""
    B, L, Cin = x.shape
    xm1 = jnp.roll(x, 1, axis=1)
    xp1 = jnp.roll(x, -1, axis=1)
    feat = jnp.concatenate([xm1, x, xp1, x_mark], axis=-1)        # [B, L, 3*Cin+4]
    w_conv = jnp.transpose(p["token_conv"], (2, 1, 0)).reshape(3 * Cin, D_MODEL)
    w = jnp.concatenate([w_conv, p["time_w"]], axis=0)            # [3*Cin+4, 512]
    return pallas_linear(feat, w) + positional_embedding(L, D_MODEL)


# TODO(synk): rfft/irfft + complex-valued mode mixing have no Pallas TPU
# equivalent (no complex dtype / FFT primitive); kept in plain JAX.
def fourier_block(q, weights, index):
    B, L, H, E = q.shape
    x = jnp.transpose(q, (0, 2, 3, 1))                    # [B, H, E, L]
    x_ft = jnp.fft.rfft(x, axis=-1)                       # [B, H, E, L//2+1]
    W = (weights[..., 0] + 1j * weights[..., 1]).astype(jnp.complex64)  # [H,E,E,M]
    x_sel = jnp.take(x_ft, jnp.array(index), axis=-1)     # [B, H, E, M]
    out_sel = jnp.einsum("bhem,heom->bhom", x_sel, W)
    pad = L // 2 + 1 - len(index)                         # out_ft[..., wi], wi=0..M-1
    out_ft = jnp.pad(out_sel, ((0, 0), (0, 0), (0, 0), (0, pad)))
    return jnp.fft.irfft(out_ft, n=L, axis=-1)            # [B, H, E, L]


def fourier_cross_attention(q, k, weights, index_q, index_kv):
    B, L, H, E = q.shape
    xq = jnp.transpose(q, (0, 2, 3, 1))
    xk = jnp.transpose(k, (0, 2, 3, 1))
    xq_ft = jnp.fft.rfft(xq, axis=-1)
    xk_ft = jnp.fft.rfft(xk, axis=-1)
    xq_sel = jnp.take(xq_ft, jnp.array(index_q), axis=-1)
    xk_sel = jnp.take(xk_ft, jnp.array(index_kv), axis=-1)
    xqk = jnp.einsum("bhex,bhey->bhxy", xq_sel, xk_sel)
    xqk = jnp.tanh(xqk.real) + 1j * jnp.tanh(xqk.imag)    # activation='tanh'
    xqkv = jnp.einsum("bhxy,bhey->bhex", xqk, xk_sel)
    W = (weights[..., 0] + 1j * weights[..., 1]).astype(jnp.complex64)
    xqkvw = jnp.einsum("bhex,heox->bhox", xqkv, W)
    # out_ft[..., index_q[i]] = xqkvw[..., i]; index_q is a leading contiguous range.
    assert list(index_q) == list(range(len(index_q)))
    pad = L // 2 + 1 - len(index_q)
    out_ft = jnp.pad(xqkvw, ((0, 0), (0, 0), (0, 0), (0, pad)))
    return jnp.fft.irfft(out_ft / (D_MODEL * D_MODEL), n=L, axis=-1)   # [B,H,E,L]


def fourier_self_layer(x, p, index):
    """AutoCorrelationLayer wrapping a FourierBlock.  The FourierBlock never
    reads k / v, so their projections are skipped (output-identical)."""
    B, L, _ = x.shape
    q = pallas_linear(x, p["wq"], p["bq"]).reshape(B, L, N_HEADS, HEAD_DIM)
    out = fourier_block(q, p["fourier_w"], index)         # [B, H, E, L]
    # Faithful to the PyTorch `out.view(B, L, -1)` applied to the [B,H,E,L]
    # tensor returned by the Fourier block (row-major reinterpretation).
    out = out.reshape(B, L, -1)
    return pallas_linear(out, p["wo"], p["bo"])


def fourier_cross_layer(x, cross, p):
    """AutoCorrelationLayer wrapping FourierCrossAttention (v is never read)."""
    B, Lq, _ = x.shape
    Lkv = cross.shape[1]
    q = pallas_linear(x, p["wq"], p["bq"]).reshape(B, Lq, N_HEADS, HEAD_DIM)
    k = pallas_linear(cross, p["wk"], p["bk"]).reshape(B, Lkv, N_HEADS, HEAD_DIM)
    out = fourier_cross_attention(q, k, p["fourier_w"],
                                  CROSS_INDEX_Q, CROSS_INDEX_KV)
    out = out.reshape(B, Lq, -1)
    return pallas_linear(out, p["wo"], p["bo"])


def encoder_layer(x, p):
    new_x = fourier_self_layer(x, p["attn"], ENC_SELF_INDEX)
    x, _ = series_decomp(x, add=new_x)                 # fused residual + decomp
    y = pallas_ffn(x, p["ffn_w1"], p["ffn_w2"])        # conv1(k=1)+GELU+conv2(k=1)
    res, _ = series_decomp(x, add=y)
    return res


def decoder_layer(x, cross, p):
    sa = fourier_self_layer(x, p["self_attn"], DEC_SELF_INDEX)
    x, trend1 = series_decomp(x, add=sa)
    ca = fourier_cross_layer(x, cross, p["cross_attn"])
    x, trend2 = series_decomp(x, add=ca)
    y = pallas_ffn(x, p["ffn_w1"], p["ffn_w2"])
    x, trend3 = series_decomp(x, add=y)
    residual_trend = trend1 + trend2 + trend3
    residual_trend = circular_conv1d_k3(residual_trend, p["trend_conv"])  # 512 -> 1
    return x, residual_trend


@jax.jit
def forward(params, x_enc, x_mark_enc, x_dec, x_mark_dec):
    # x_dec is unused by FEDformer.forecast (matches the PyTorch reference).
    del x_dec
    mean = jnp.mean(x_enc, axis=1, keepdims=True)
    mean = jnp.repeat(mean, PRED_LEN, axis=1)
    seasonal_init, trend_init = series_decomp(x_enc)
    trend_init = jnp.concatenate([trend_init[:, -LABEL_LEN:, :], mean], axis=1)
    seasonal_init = jnp.pad(seasonal_init[:, -LABEL_LEN:, :],
                            ((0, 0), (0, PRED_LEN), (0, 0)))

    enc_out = data_embedding(x_enc, x_mark_enc, params["enc_embedding"])
    dec_out = data_embedding(seasonal_init, x_mark_dec, params["dec_embedding"])

    x = enc_out
    for lp in params["encoder_layers"]:
        x = encoder_layer(x, lp)
    enc_out = pallas_my_layernorm(x, params["enc_norm_g"], params["enc_norm_b"])

    x = dec_out
    trend = trend_init
    for lp in params["decoder_layers"]:
        x, residual_trend = decoder_layer(x, enc_out, lp)
        trend = trend + residual_trend
    x = pallas_my_layernorm(x, params["dec_norm_g"], params["dec_norm_b"])
    seasonal_part = pallas_linear(x, params["proj_w"], params["proj_b"])  # Linear(512,1)

    dec_out = trend + seasonal_part
    return dec_out[:, -PRED_LEN:, :]


# ============================ deterministic init =============================

def init_params(key):
    keys = iter(jax.random.split(key, 64))
    nxt = lambda: next(keys)

    def dense(shape, scale=0.02):
        return scale * jax.random.normal(nxt(), shape, jnp.float32)

    def zeros(n):
        return jnp.zeros((n,), jnp.float32)

    def fourier_weights(n_modes):
        scale = 1.0 / (D_MODEL * D_MODEL)
        return scale * jax.random.uniform(
            nxt(), (N_HEADS, HEAD_DIM, HEAD_DIM, n_modes, 2), jnp.float32)

    def attn_params(n_modes):
        # wk/wv (and bk/bv) exist in the PyTorch module but the Fourier blocks
        # never read those projections; kept only for structural fidelity.
        return dict(
            wq=dense((D_MODEL, D_MODEL)), bq=zeros(D_MODEL),
            wk=dense((D_MODEL, D_MODEL)), bk=zeros(D_MODEL),
            wv=dense((D_MODEL, D_MODEL)), bv=zeros(D_MODEL),
            wo=dense((D_MODEL, D_MODEL)), bo=zeros(D_MODEL),
            fourier_w=fourier_weights(n_modes),
        )

    def embedding():
        return dict(
            token_conv=dense((D_MODEL, 1, 3)),     # Conv1d(1, 512, 3, circular, no bias)
            time_w=dense((4, D_MODEL)),            # Linear(4, 512, bias=False), freq='h'
        )

    return dict(
        enc_embedding=embedding(),
        dec_embedding=embedding(),
        encoder_layers=[dict(
            attn=attn_params(len(ENC_SELF_INDEX)),
            ffn_w1=dense((D_MODEL, D_FF)),
            ffn_w2=dense((D_FF, D_MODEL)),
        ) for _ in range(E_LAYERS)],
        enc_norm_g=jnp.ones((D_MODEL,), jnp.float32),
        enc_norm_b=jnp.zeros((D_MODEL,), jnp.float32),
        decoder_layers=[dict(
            self_attn=attn_params(len(DEC_SELF_INDEX)),
            cross_attn=attn_params(len(CROSS_INDEX_Q)),
            ffn_w1=dense((D_MODEL, D_FF)),
            ffn_w2=dense((D_FF, D_MODEL)),
            trend_conv=dense((1, D_MODEL, 3)),     # Conv1d(512, 1, 3, circular, no bias)
        ) for _ in range(D_LAYERS)],
        dec_norm_g=jnp.ones((D_MODEL,), jnp.float32),
        dec_norm_b=jnp.zeros((D_MODEL,), jnp.float32),
        proj_w=dense((D_MODEL, 1)),
        proj_b=jnp.zeros((1,), jnp.float32),
    )


# ================================== main =====================================

if __name__ == "__main__":
    key = jax.random.PRNGKey(0)
    pkey, dkey = jax.random.split(key)
    params = init_params(pkey)

    B = 2
    k1, k2, k3, k4 = jax.random.split(dkey, 4)
    x_enc = jax.random.normal(k1, (B, SEQ_LEN, 1), jnp.float32)
    x_mark_enc = jax.random.normal(k2, (B, SEQ_LEN, 4), jnp.float32)
    x_dec = jax.random.normal(k3, (B, LABEL_LEN + PRED_LEN, 1), jnp.float32)
    x_mark_dec = jax.random.normal(k4, (B, LABEL_LEN + PRED_LEN, 4), jnp.float32)

    out = forward(params, x_enc, x_mark_enc, x_dec, x_mark_dec)
    out = jax.block_until_ready(out)
    assert out.shape == (B, PRED_LEN, 1)
    assert bool(jnp.all(jnp.isfinite(out)))
    print("KERNEL_OK")
</pallas_src>

<mosaic_0001>
module attributes {stable_mosaic.version = 11 : i64} {
  func.func @_decomp_kernel(%arg0: i32, %arg1: memref<16x16xf32, #tpu.memory_space<vmem>>, %arg2: memref<2x16x128xf32, #tpu.memory_space<vmem>>, %arg3: memref<2x16x128xf32, #tpu.memory_space<vmem>>, %arg4: memref<2x16x128xf32, #tpu.memory_space<vmem>>) attributes {dimension_semantics = [#tpu.dimension_semantics<arbitrary>], iteration_bounds = array<i64: 1>, scalar_prefetch = 0 : i64, scratch_operands = 0 : i64, tpu.core_type = #tpu.core_type<tc>, window_params = [{pipeline_mode = #tpu.pipeline_mode<synchronous>, transform_indices = @transform_0, window_bounds = array<i64: 16, 16>}, {pipeline_mode = #tpu.pipeline_mode<synchronous>, transform_indices = @transform_1, window_bounds = array<i64: 2, 16, 128>}, {pipeline_mode = #tpu.pipeline_mode<synchronous>, transform_indices = @transform_2, window_bounds = array<i64: 2, 16, 128>}, {pipeline_mode = #tpu.pipeline_mode<synchronous>, transform_indices = @transform_3, window_bounds = array<i64: 2, 16, 128>}]} {
    %c0 = arith.constant 0 : index
    %c0_0 = arith.constant 0 : index
    %c0_1 = arith.constant 0 : index
    %0 = vector.load %arg2[%c0, %c0_0, %c0_1] : memref<2x16x128xf32, #tpu.memory_space<vmem>>, vector<1x16x128xf32>
    %1 = vector.shape_cast %0 : vector<1x16x128xf32> to vector<16x128xf32>
    %c0_2 = arith.constant 0 : index
    %c0_3 = arith.constant 0 : index
    %2 = vector.load %arg1[%c0_2, %c0_3] : memref<16x16xf32, #tpu.memory_space<vmem>>, vector<16x16xf32>
    %cst = arith.constant dense<0.000000e+00> : vector<16x128xf32>
    %3 = tpu.matmul %2, %1, %cst {dimension_numbers = #tpu.dot_dimension_numbers<[1], [0], [0], [1], [0, 0, 1, 1], [], []>} : vector<16x16xf32>, vector<16x128xf32>, vector<16x128xf32> -> vector<16x128xf32>
    %c0_4 = arith.constant 0 : index
    %c0_5 = arith.constant 0 : index
    %c0_6 = arith.constant 0 : index
    %4 = vector.load %arg4[%c0_4, %c0_5, %c0_6] : memref<2x16x128xf32, #tpu.memory_space<vmem>>, vector<1x16x128xf32>
    %5 = vector.shape_cast %4 : vector<1x16x128xf32> to vector<16x128xf32>
    %6 = vector.shape_cast %3 : vector<16x128xf32> to vector<1x16x128xf32>
    tpu.vector_store %arg4[%c0_4, %c0_5, %c0_6], %6 {strides = array<i32>} : memref<2x16x128xf32, #tpu.memory_space<vmem>>, vector<1x16x128xf32>,
    %7 = arith.subf %1, %3 : vector<16x128xf32>
    %c0_7 = arith.constant 0 : index
    %c0_8 = arith.constant 0 : index
    %c0_9 = arith.constant 0 : index
    %8 = vector.load %arg3[%c0_7, %c0_8, %c0_9] : memref<2x16x128xf32, #tpu.memory_space<vmem>>, vector<1x16x128xf32>
    %9 = vector.shape_cast %8 : vector<1x16x128xf32> to vector<16x128xf32>
    %10 = vector.shape_cast %7 : vector<16x128xf32> to vector<1x16x128xf32>
    tpu.vector_store %arg3[%c0_7, %c0_8, %c0_9], %10 {strides = array<i32>} : memref<2x16x128xf32, #tpu.memory_space<vmem>>, vector<1x16x128xf32>,
    %c1 = arith.constant 1 : index
    %c0_10 = arith.constant 0 : index
    %c0_11 = arith.constant 0 : index
    %11 = vector.load %arg2[%c1, %c0_10, %c0_11] : memref<2x16x128xf32, #tpu.memory_space<vmem>>, vector<1x16x128xf32>
    %12 = vector.shape_cast %11 : vector<1x16x128xf32> to vector<16x128xf32>
    %c0_12 = arith.constant 0 : index
    %c0_13 = arith.constant 0 : index
    %13 = vector.load %arg1[%c0_12, %c0_13] : memref<16x16xf32, #tpu.memory_space<vmem>>, vector<16x16xf32>
    %cst_14 = arith.constant dense<0.000000e+00> : vector<16x128xf32>
    %14 = tpu.matmul %13, %12, %cst_14 {dimension_numbers = #tpu.dot_dimension_numbers<[1], [0], [0], [1], [0, 0, 1, 1], [], []>} : vector<16x16xf32>, vector<16x128xf32>, vector<16x128xf32> -> vector<16x128xf32>
    %c1_15 = arith.constant 1 : index
    %c0_16 = arith.constant 0 : index
    %c0_17 = arith.constant 0 : index
    %15 = vector.load %arg4[%c1_15, %c0_16, %c0_17] : memref<2x16x128xf32, #tpu.memory_space<vmem>>, vector<1x16x128xf32>
    %16 = vector.shape_cast %15 : vector<1x16x128xf32> to vector<16x128xf32>
    %17 = vector.shape_cast %14 : vector<16x128xf32> to vector<1x16x128xf32>
    tpu.vector_store %arg4[%c1_15, %c0_16, %c0_17], %17 {strides = array<i32>} : memref<2x16x128xf32, #tpu.memory_space<vmem>>, vector<1x16x128xf32>,
    %18 = arith.subf %12, %14 : vector<16x128xf32>
    %c1_18 = arith.constant 1 : index
    %c0_19 = arith.constant 0 : index
    %c0_20 = arith.constant 0 : index
    %19 = vector.load %arg3[%c1_18, %c0_19, %c0_20] : memref<2x16x128xf32, #tpu.memory_space<vmem>>, vector<1x16x128xf32>
    %20 = vector.shape_cast %19 : vector<1x16x128xf32> to vector<16x128xf32>
    %21 = vector.shape_cast %18 : vector<16x128xf32> to vector<1x16x128xf32>
    tpu.vector_store %arg3[%c1_18, %c0_19, %c0_20], %21 {strides = array<i32>} : memref<2x16x128xf32, #tpu.memory_space<vmem>>, vector<1x16x128xf32>,
    return
  }
  func.func @transform_0(%arg0: i32) -> (i32, i32) {
    %c0_i32 = arith.constant 0 : i32
    %c0_i32_0 = arith.constant 0 : i32
    %c0_i32_1 = arith.constant 0 : i32
    return %c0_i32, %c0_i32_0 : i32, i32
  }
  func.func @transform_1(%arg0: i32) -> (i32, i32, i32) {
    %c0_i32 = arith.constant 0 : i32
    %c0_i32_0 = arith.constant 0 : i32
    %c0_i32_1 = arith.constant 0 : i32
    %c0_i32_2 = arith.constant 0 : i32
    return %c0_i32, %c0_i32_0, %c0_i32_1 : i32, i32, i32
  }
  func.func @transform_2(%arg0: i32) -> (i32, i32, i32) {
    %c0_i32 = arith.constant 0 : i32
    %c0_i32_0 = arith.constant 0 : i32
    %c0_i32_1 = arith.constant 0 : i32
    %c0_i32_2 = arith.constant 0 : i32
    return %c0_i32, %c0_i32_0, %c0_i32_1 : i32, i32, i32
  }
  func.func @transform_3(%arg0: i32) -> (i32, i32, i32) {
    %c0_i32 = arith.constant 0 : i32
    %c0_i32_0 = arith.constant 0 : i32
    %c0_i32_1 = arith.constant 0 : i32
    %c0_i32_2 = arith.constant 0 : i32
    return %c0_i32, %c0_i32_0, %c0_i32_1 : i32, i32, i32
  }
}

module attributes {stable_mosaic.version = 11 : i64} {
  func.func @_linear_kernel(%arg0: i32, %arg1: memref<32x128xf32, #tpu.memory_space<vmem>>, %arg2: memref<128x512xf32, #tpu.memory_space<vmem>>, %arg3: memref<32x512xf32, #tpu.memory_space<vmem>>) attributes {dimension_semantics = [#tpu.dimension_semantics<parallel>], iteration_bounds = array<i64: 1>, scalar_prefetch = 0 : i64, scratch_operands = 0 : i64, tpu.core_type = #tpu.core_type<tc>, window_params = [{pipeline_mode = #tpu.pipeline_mode<synchronous>, transform_indices = @transform_0, window_bounds = array<i64: 32, 128>}, {transform_indices = @transform_1, window_bounds = array<i64: 128, 512>}, {transform_indices = @transform_2, window_bounds = array<i64: 32, 512>}]} {
    %c0 = arith.constant 0 : index
    %c0_0 = arith.constant 0 : index
    %0 = vector.load %arg1[%c0, %c0_0] : memref<32x128xf32, #tpu.memory_space<vmem>>, vector<32x128xf32>
    %c0_1 = arith.constant 0 : index
    %c0_2 = arith.constant 0 : index
    %1 = vector.load %arg2[%c0_1, %c0_2] : memref<128x512xf32, #tpu.memory_space<vmem>>, vector<128x512xf32>
    %cst = arith.constant dense<0.000000e+00> : vector<32x512xf32>
    %2 = tpu.matmul %0, %1, %cst {dimension_numbers = #tpu.dot_dimension_numbers<[1], [0], [0], [1], [0, 0, 1, 1], [], []>} : vector<32x128xf32>, vector<128x512xf32>, vector<32x512xf32> -> vector<32x512xf32>
    %c0_3 = arith.constant 0 : index
    %c0_4 = arith.constant 0 : index
    %3 = vector.load %arg3[%c0_3, %c0_4] : memref<32x512xf32, #tpu.memory_space<vmem>>, vector<32x512xf32>
    tpu.vector_store %arg3[%c0_3, %c0_4], %2 {strides = array<i32>} : memref<32x512xf32, #tpu.memory_space<vmem>>, vector<32x512xf32>,
    return
  }
  func.func @transform_0(%arg0: i32) -> (i32, i32) {
    %c0_i32 = arith.constant 0 : i32
    %c0_i32_0 = arith.constant 0 : i32
    %c0_i32_1 = arith.constant 0 : i32
    return %c0_i32, %c0_i32_0 : i32, i32
  }
  func.func @transform_1(%arg0: i32) -> (i32, i32) {
    %c0_i32 = arith.constant 0 : i32
    %c0_i32_0 = arith.constant 0 : i32
    return %c0_i32, %arg0 : i32, i32
  }
  func.func @transform_2(%arg0: i32) -> (i32, i32) {
    %c0_i32 = arith.constant 0 : i32
    %c0_i32_0 = arith.constant 0 : i32
    return %c0_i32, %arg0 : i32, i32
  }
}

module attributes {stable_mosaic.version = 11 : i64} {
  func.func @_linear_kernel(%arg0: i32, %arg1: memref<32x512xf32, #tpu.memory_space<vmem>>, %arg2: memref<512x512xf32, #tpu.memory_space<vmem>>, %arg3: memref<1x512xf32, #tpu.memory_space<vmem>>, %arg4: memref<32x512xf32, #tpu.memory_space<vmem>>) attributes {dimension_semantics = [#tpu.dimension_semantics<parallel>], iteration_bounds = array<i64: 1>, scalar_prefetch = 0 : i64, scratch_operands = 0 : i64, tpu.core_type = #tpu.core_type<tc>, window_params = [{pipeline_mode = #tpu.pipeline_mode<synchronous>, transform_indices = @transform_0, window_bounds = array<i64: 32, 512>}, {transform_indices = @transform_1, window_bounds = array<i64: 512, 512>}, {transform_indices = @transform_2, window_bounds = array<i64: 1, 512>}, {transform_indices = @transform_3, window_bounds = array<i64: 32, 512>}]} {
    %c0 = arith.constant 0 : index
    %c0_0 = arith.constant 0 : index
    %0 = vector.load %arg1[%c0, %c0_0] : memref<32x512xf32, #tpu.memory_space<vmem>>, vector<32x512xf32>
    %c0_1 = arith.constant 0 : index
    %c0_2 = arith.constant 0 : index
    %1 = vector.load %arg2[%c0_1, %c0_2] : memref<512x512xf32, #tpu.memory_space<vmem>>, vector<512x512xf32>
    %cst = arith.constant dense<0.000000e+00> : vector<32x512xf32>
    %2 = tpu.matmul %0, %1, %cst {dimension_numbers = #tpu.dot_dimension_numbers<[1], [0], [0], [1], [0, 0, 1, 1], [], []>} : vector<32x512xf32>, vector<512x512xf32>, vector<32x512xf32> -> vector<32x512xf32>
    %c0_3 = arith.constant 0 : index
    %c0_4 = arith.constant 0 : index
    %3 = vector.load %arg3[%c0_3, %c0_4] : memref<1x512xf32, #tpu.memory_space<vmem>>, vector<1x512xf32>
    %4 = vector.broadcast %3 : vector<1x512xf32> to vector<32x512xf32>
    %5 = arith.addf %2, %4 : vector<32x512xf32>
    %c0_5 = arith.constant 0 : index
    %c0_6 = arith.constant 0 : index
    %6 = vector.load %arg4[%c0_5, %c0_6] : memref<32x512xf32, #tpu.memory_space<vmem>>, vector<32x512xf32>
    tpu.vector_store %arg4[%c0_5, %c0_6], %5 {strides = array<i32>} : memref<32x512xf32, #tpu.memory_space<vmem>>, vector<32x512xf32>,
    return
  }
  func.func @transform_0(%arg0: i32) -> (i32, i32) {
    %c0_i32 = arith.constant 0 : i32
    %c0_i32_0 = arith.constant 0 : i32
    %c0_i32_1 = arith.constant 0 : i32
    return %c0_i32, %c0_i32_0 : i32, i32
  }
  func.func @transform_1(%arg0: i32) -> (i32, i32) {
    %c0_i32 = arith.constant 0 : i32
    %c0_i32_0 = arith.constant 0 : i32
    return %c0_i32, %arg0 : i32, i32
  }
  func.func @transform_2(%arg0: i32) -> (i32, i32) {
    %c0_i32 = arith.constant 0 : i32
    %c0_i32_0 = arith.constant 0 : i32
    return %c0_i32, %arg0 : i32, i32
  }
  func.func @transform_3(%arg0: i32) -> (i32, i32) {
    %c0_i32 = arith.constant 0 : i32
    %c0_i32_0 = arith.constant 0 : i32
    return %c0_i32, %arg0 : i32, i32
  }
}

module attributes {stable_mosaic.version = 11 : i64} {
  func.func @_decomp_kernel(%arg0: i32, %arg1: memref<16x16xf32, #tpu.memory_space<vmem>>, %arg2: memref<2x16x512xf32, #tpu.memory_space<vmem>>, %arg3: memref<2x16x512xf32, #tpu.memory_space<vmem>>, %arg4: memref<2x16x512xf32, #tpu.memory_space<vmem>>, %arg5: memref<2x16x512xf32, #tpu.memory_space<vmem>>) attributes {dimension_semantics = [#tpu.dimension_semantics<arbitrary>], iteration_bounds = array<i64: 1>, scalar_prefetch = 0 : i64, scratch_operands = 0 : i64, tpu.core_type = #tpu.core_type<tc>, window_params = [{pipeline_mode = #tpu.pipeline_mode<synchronous>, transform_indices = @transform_0, window_bounds = array<i64: 16, 16>}, {pipeline_mode = #tpu.pipeline_mode<synchronous>, transform_indices = @transform_1, window_bounds = array<i64: 2, 16, 512>}, {pipeline_mode = #tpu.pipeline_mode<synchronous>, transform_indices = @transform_2, window_bounds = array<i64: 2, 16, 512>}, {pipeline_mode = #tpu.pipeline_mode<synchronous>, transform_indices = @transform_3, window_bounds = array<i64: 2, 16, 512>}, {pipeline_mode = #tpu.pipeline_mode<synchronous>, transform_indices = @transform_4, window_bounds = array<i64: 2, 16, 512>}]} {
    %c0 = arith.constant 0 : index
    %c0_0 = arith.constant 0 : index
    %c0_1 = arith.constant 0 : index
    %0 = vector.load %arg2[%c0, %c0_0, %c0_1] : memref<2x16x512xf32, #tpu.memory_space<vmem>>, vector<1x16x512xf32>
    %1 = vector.shape_cast %0 : vector<1x16x512xf32> to vector<16x512xf32>
    %c0_2 = arith.constant 0 : index
    %c0_3 = arith.constant 0 : index
    %c0_4 = arith.constant 0 : index
    %2 = vector.load %arg3[%c0_2, %c0_3, %c0_4] : memref<2x16x512xf32, #tpu.memory_space<vmem>>, vector<1x16x512xf32>
    %3 = vector.shape_cast %2 : vector<1x16x512xf32> to vector<16x512xf32>
    %4 = arith.addf %1, %3 : vector<16x512xf32>
    %c0_5 = arith.constant 0 : index
    %c0_6 = arith.constant 0 : index
    %5 = vector.load %arg1[%c0_5, %c0_6] : memref<16x16xf32, #tpu.memory_space<vmem>>, vector<16x16xf32>
    %cst = arith.constant dense<0.000000e+00> : vector<16x512xf32>
    %6 = tpu.matmul %5, %4, %cst {dimension_numbers = #tpu.dot_dimension_numbers<[1], [0], [0], [1], [0, 0, 1, 1], [], []>} : vector<16x16xf32>, vector<16x512xf32>, vector<16x512xf32> -> vector<16x512xf32>
    %c0_7 = arith.constant 0 : index
    %c0_8 = arith.constant 0 : index
    %c0_9 = arith.constant 0 : index
    %7 = vector.load %arg5[%c0_7, %c0_8, %c0_9] : memref<2x16x512xf32, #tpu.memory_space<vmem>>, vector<1x16x512xf32>
    %8 = vector.shape_cast %7 : vector<1x16x512xf32> to vector<16x512xf32>
    %9 = vector.shape_cast %6 : vector<16x512xf32> to vector<1x16x512xf32>
    tpu.vector_store %arg5[%c0_7, %c0_8, %c0_9], %9 {strides = array<i32>} : memref<2x16x512xf32, #tpu.memory_space<vmem>>, vector<1x16x512xf32>,
    %10 = arith.subf %4, %6 : vector<16x512xf32>
    %c0_10 = arith.constant 0 : index
    %c0_11 = arith.constant 0 : index
    %c0_12 = arith.constant 0 : index
    %11 = vector.load %arg4[%c0_10, %c0_11, %c0_12] : memref<2x16x512xf32, #tpu.memory_space<vmem>>, vector<1x16x512xf32>
    %12 = vector.shape_cast %11 : vector<1x16x512xf32> to vector<16x512xf32>
    %13 = vector.shape_cast %10 : vector<16x512xf32> to vector<1x16x512xf32>
    tpu.vector_store %arg4[%c0_10, %c0_11, %c0_12], %13 {strides = array<i32>} : memref<2x16x512xf32, #tpu.memory_space<vmem>>, vector<1x16x512xf32>,
    %c1 = arith.constant 1 : index
    %c0_13 = arith.constant 0 : index
    %c0_14 = arith.constant 0 : index
    %14 = vector.load %arg2[%c1, %c0_13, %c0_14] : memref<2x16x512xf32, #tpu.memory_space<vmem>>, vector<1x16x512xf32>
    %15 = vector.shape_cast %14 : vector<1x16x512xf32> to vector<16x512xf32>
    %c1_15 = arith.constant 1 : index
    %c0_16 = arith.constant 0 : index
    %c0_17 = arith.constant 0 : index
    %16 = vector.load %arg3[%c1_15, %c0_16, %c0_17] : memref<2x16x512xf32, #tpu.memory_space<vmem>>, vector<1x16x512xf32>
    %17 = vector.shape_cast %16 : vector<1x16x512xf32> to vector<16x512xf32>
    %18 = arith.addf %15, %17 : vector<16x512xf32>
    %c0_18 = arith.constant 0 : index
    %c0_19 = arith.constant 0 : index
    %19 = vector.load %arg1[%c0_18, %c0_19] : memref<16x16xf32, #tpu.memory_space<vmem>>, vector<16x16xf32>
    %cst_20 = arith.constant dense<0.000000e+00> : vector<16x512xf32>
    %20 = tpu.matmul %19, %18, %cst_20 {dimension_numbers = #tpu.dot_dimension_numbers<[1], [0], [0], [1], [0, 0, 1, 1], [], []>} : vector<16x16xf32>, vector<16x512xf32>, vector<16x512xf32> -> vector<16x512xf32>
    %c1_21 = arith.constant 1 : index
    %c0_22 = arith.constant 0 : index
    %c0_23 = arith.constant 0 : index
    %21 = vector.load %arg5[%c1_21, %c0_22, %c0_23] : memref<2x16x512xf32, #tpu.memory_space<vmem>>, vector<1x16x512xf32>
    %22 = vector.shape_cast %21 : vector<1x16x512xf32> to vector<16x512xf32>
    %23 = vector.shape_cast %20 : vector<16x512xf32> to vector<1x16x512xf32>
    tpu.vector_store %arg5[%c1_21, %c0_22, %c0_23], %23 {strides = array<i32>} : memref<2x16x512xf32, #tpu.memory_space<vmem>>, vector<1x16x512xf32>,
    %24 = arith.subf %18, %20 : vector<16x512xf32>
    %c1_24 = arith.constant 1 : index
    %c0_25 = arith.constant 0 : index
    %c0_26 = arith.constant 0 : index
    %25 = vector.load %arg4[%c1_24, %c0_25, %c0_26] : memref<2x16x512xf32, #tpu.memory_space<vmem>>, vector<1x16x512xf32>
    %26 = vector.shape_cast %25 : vector<1x16x512xf32> to vector<16x512xf32>
    %27 = vector.shape_cast %24 : vector<16x512xf32> to vector<1x16x512xf32>
    tpu.vector_store %arg4[%c1_24, %c0_25, %c0_26], %27 {strides = array<i32>} : memref<2x16x512xf32, #tpu.memory_space<vmem>>, vector<1x16x512xf32>,
    return
  }
  func.func @transform_0(%arg0: i32) -> (i32, i32) {
    %c0_i32 = arith.constant 0 : i32
    %c0_i32_0 = arith.constant 0 : i32
    %c0_i32_1 = arith.constant 0 : i32
    return %c0_i32, %c0_i32_0 : i32, i32
  }
  func.func @transform_1(%arg0: i32) -> (i32, i32, i32) {
    %c0_i32 = arith.constant 0 : i32
    %c0_i32_0 = arith.constant 0 : i32
    %c0_i32_1 = arith.constant 0 : i32
    %c0_i32_2 = arith.constant 0 : i32
    return %c0_i32, %c0_i32_0, %c0_i32_1 : i32, i32, i32
  }
  func.func @transform_2(%arg0: i32) -> (i32, i32, i32) {
    %c0_i32 = arith.constant 0 : i32
    %c0_i32_0 = arith.constant 0 : i32
    %c0_i32_1 = arith.constant 0 : i32
    %c0_i32_2 = arith.constant 0 : i32
    return %c0_i32, %c0_i32_0, %c0_i32_1 : i32, i32, i32
  }
  func.func @transform_3(%arg0: i32) -> (i32, i32, i32) {
    %c0_i32 = arith.constant 0 : i32
    %c0_i32_0 = arith.constant 0 : i32
    %c0_i32_1 = arith.constant 0 : i32
    %c0_i32_2 = arith.constant 0 : i32
    return %c0_i32, %c0_i32_0, %c0_i32_1 : i32, i32, i32
  }
  func.func @transform_4(%arg0: i32) -> (i32, i32, i32) {
    %c0_i32 = arith.constant 0 : i32
    %c0_i32_0 = arith.constant 0 : i32
    %c0_i32_1 = arith.constant 0 : i32
    %c0_i32_2 = arith.constant 0 : i32
    return %c0_i32, %c0_i32_0, %c0_i32_1 : i32, i32, i32
  }
}

module attributes {stable_mosaic.version = 11 : i64} {
  func.func @_ffn_kernel(%arg0: i32, %arg1: memref<32x512xf32, #tpu.memory_space<vmem>>, %arg2: memref<512x512xf32, #tpu.memory_space<vmem>>, %arg3: memref<512x512xf32, #tpu.memory_space<vmem>>, %arg4: memref<32x512xf32, #tpu.memory_space<vmem>>, %arg5: memref<32x512xf32, #tpu.memory_space<vmem>>) attributes {dimension_semantics = [#tpu.dimension_semantics<arbitrary>], iteration_bounds = array<i64: 4>, scalar_prefetch = 0 : i64, scratch_operands = 1 : i64, tpu.core_type = #tpu.core_type<tc>, window_params = [{pipeline_mode = #tpu.pipeline_mode<synchronous>, transform_indices = @transform_0, window_bounds = array<i64: 32, 512>}, {transform_indices = @transform_1, window_bounds = array<i64: 512, 512>}, {transform_indices = @transform_2, window_bounds = array<i64: 512, 512>}, {pipeline_mode = #tpu.pipeline_mode<synchronous>, transform_indices = @transform_3, window_bounds = array<i64: 32, 512>}]} {
    %c0_i32 = arith.constant 0 : i32
    %0 = arith.cmpi eq, %arg0, %c0_i32 : i32
    %1 = arith.extui %0 : i1 to i32
    %c0_i32_0 = arith.constant 0 : i32
    %2 = arith.cmpi ne, %1, %c0_i32_0 : i32
    scf.if %2 {
      %cst_15 = arith.constant 0.000000e+00 : f32
      %22 = vector.broadcast %cst_15 : f32 to vector<32x512xf32>
      %c0_16 = arith.constant 0 : index
      %c0_17 = arith.constant 0 : index
      %23 = vector.load %arg5[%c0_16, %c0_17] : memref<32x512xf32, #tpu.memory_space<vmem>>, vector<32x512xf32>
      tpu.vector_store %arg5[%c0_16, %c0_17], %22 {strides = array<i32>} : memref<32x512xf32, #tpu.memory_space<vmem>>, vector<32x512xf32>,
    } else {
    }
    %c0 = arith.constant 0 : index
    %c0_1 = arith.constant 0 : index
    %3 = vector.load %arg1[%c0, %c0_1] : memref<32x512xf32, #tpu.memory_space<vmem>>, vector<32x512xf32>
    %c0_2 = arith.constant 0 : index
    %c0_3 = arith.constant 0 : index
    %4 = vector.load %arg2[%c0_2, %c0_3] : memref<512x512xf32, #tpu.memory_space<vmem>>, vector<512x512xf32>
    %cst = arith.constant dense<0.000000e+00> : vector<32x512xf32>
    %5 = tpu.matmul %3, %4, %cst {dimension_numbers = #tpu.dot_dimension_numbers<[1], [0], [0], [1], [0, 0, 1, 1], [], []>} : vector<32x512xf32>, vector<512x512xf32>, vector<32x512xf32> -> vector<32x512xf32>
    %cst_4 = arith.constant 5.000000e-01 : f32
    %6 = vector.broadcast %cst_4 : f32 to vector<32x512xf32>
    %7 = arith.mulf %6, %5 : vector<32x512xf32>
    %cst_5 = arith.constant 0.707106769 : f32
    %8 = vector.broadcast %cst_5 : f32 to vector<32x512xf32>
    %9 = arith.mulf %5, %8 : vector<32x512xf32>
    %10 = math.erf %9 : vector<32x512xf32>
    %cst_6 = arith.constant 1.000000e+00 : f32
    %11 = vector.broadcast %cst_6 : f32 to vector<32x512xf32>
    %12 = arith.addf %11, %10 : vector<32x512xf32>
    %13 = arith.mulf %7, %12 : vector<32x512xf32>
    %c0_7 = arith.constant 0 : index
    %c0_8 = arith.constant 0 : index
    %14 = vector.load %arg5[%c0_7, %c0_8] : memref<32x512xf32, #tpu.memory_space<vmem>>, vector<32x512xf32>
    %c0_9 = arith.constant 0 : index
    %c0_10 = arith.constant 0 : index
    %15 = vector.load %arg3[%c0_9, %c0_10] : memref<512x512xf32, #tpu.memory_space<vmem>>, vector<512x512xf32>
    %cst_11 = arith.constant dense<0.000000e+00> : vector<32x512xf32>
    %16 = tpu.matmul %13, %15, %cst_11 {dimension_numbers = #tpu.dot_dimension_numbers<[1], [0], [0], [1], [0, 0, 1, 1], [], []>} : vector<32x512xf32>, vector<512x512xf32>, vector<32x512xf32> -> vector<32x512xf32>
    %17 = arith.addf %14, %16 : vector<32x512xf32>
    %c0_12 = arith.constant 0 : index
    %c0_13 = arith.constant 0 : index
    %18 = vector.load %arg5[%c0_12, %c0_13] : memref<32x512xf32, #tpu.memory_space<vmem>>, vector<32x512xf32>
    tpu.vector_store %arg5[%c0_12, %c0_13], %17 {strides = array<i32>} : memref<32x512xf32, #tpu.memory_space<vmem>>, vector<32x512xf32>,
    %c3_i32 = arith.constant 3 : i32
    %19 = arith.cmpi eq, %arg0, %c3_i32 : i32
    %20 = arith.extui %19 : i1 to i32
    %c0_i32_14 = arith.constant 0 : i32
    %21 = arith.cmpi ne, %20, %c0_i32_14 : i32
    scf.if %21 {
      %c0_15 = arith.constant 0 : index
      %c0_16 = arith.constant 0 : index
      %22 = vector.load %arg5[%c0_15, %c0_16] : memref<32x512xf32, #tpu.memory_space<vmem>>, vector<32x512xf32>
      %c0_17 = arith.constant 0 : index
      %c0_18 = arith.constant 0 : index
      %23 = vector.load %arg4[%c0_17, %c0_18] : memref<32x512xf32, #tpu.memory_space<vmem>>, vector<32x512xf32>
      tpu.vector_store %arg4[%c0_17, %c0_18], %22 {strides = array<i32>} : memref<32x512xf32, #tpu.memory_space<vmem>>, vector<32x512xf32>,
    } else {
    }
    return
  }
  func.func @transform_0(%arg0: i32) -> (i32, i32) {
    %c0_i32 = arith.constant 0 : i32
    %c0_i32_0 = arith.constant 0 : i32
    %c0_i32_1 = arith.constant 0 : i32
    return %c0_i32, %c0_i32_0 : i32, i32
  }
  func.func @transform_1(%arg0: i32) -> (i32, i32) {
    %c0_i32 = arith.constant 0 : i32
    %c0_i32_0 = arith.constant 0 : i32
    return %c0_i32, %arg0 : i32, i32
  }
  func.func @transform_2(%arg0: i32) -> (i32, i32) {
    %c0_i32 = arith.constant 0 : i32
    %c0_i32_0 = arith.constant 0 : i32
    return %arg0, %c0_i32 : i32, i32
  }
  func.func @transform_3(%arg0: i32) -> (i32, i32) {
    %c0_i32 = arith.constant 0 : i32
    %c0_i32_0 = arith.constant 0 : i32
    %c0_i32_1 = arith.constant 0 : i32
    return %c0_i32, %c0_i32_0 : i32, i32
  }
}

module attributes {stable_mosaic.version = 11 : i64} {
  func.func @_my_layernorm_kernel(%arg0: i32, %arg1: memref<2x16x512xf32, #tpu.memory_space<vmem>>, %arg2: memref<1x512xf32, #tpu.memory_space<vmem>>, %arg3: memref<1x512xf32, #tpu.memory_space<vmem>>, %arg4: memref<2x16x512xf32, #tpu.memory_space<vmem>>) attributes {dimension_semantics = [#tpu.dimension_semantics<arbitrary>], iteration_bounds = array<i64: 1>, scalar_prefetch = 0 : i64, scratch_operands = 0 : i64, tpu.core_type = #tpu.core_type<tc>, window_params = [{pipeline_mode = #tpu.pipeline_mode<synchronous>, transform_indices = @transform_0, window_bounds = array<i64: 2, 16, 512>}, {pipeline_mode = #tpu.pipeline_mode<synchronous>, transform_indices = @transform_1, window_bounds = array<i64: 1, 512>}, {pipeline_mode = #tpu.pipeline_mode<synchronous>, transform_indices = @transform_2, window_bounds = array<i64: 1, 512>}, {pipeline_mode = #tpu.pipeline_mode<synchronous>, transform_indices = @transform_3, window_bounds = array<i64: 2, 16, 512>}]} {
    %c0 = arith.constant 0 : index
    %c0_0 = arith.constant 0 : index
    %c0_1 = arith.constant 0 : index
    %0 = vector.load %arg1[%c0, %c0_0, %c0_1] : memref<2x16x512xf32, #tpu.memory_space<vmem>>, vector<2x16x512xf32>
    %cst = arith.constant dense<0.000000e+00> : vector<2x16xf32>
    %1 = vector.multi_reduction <add>, %0, %cst [2] : vector<2x16x512xf32> to vector<2x16xf32>
    %2 = vector.shape_cast %1 : vector<2x16xf32> to vector<2x16x1xf32>
    %cst_2 = arith.constant 5.120000e+02 : f32
    %3 = vector.broadcast %cst_2 : f32 to vector<2x16x1xf32>
    %4 = arith.divf %2, %3 : vector<2x16x1xf32>
    %5 = vector.broadcast %4 : vector<2x16x1xf32> to vector<2x16x512xf32>
    %6 = arith.subf %0, %5 : vector<2x16x512xf32>
    %7 = arith.mulf %6, %6 : vector<2x16x512xf32>
    %cst_3 = arith.constant dense<0.000000e+00> : vector<2x16xf32>
    %8 = vector.multi_reduction <add>, %7, %cst_3 [2] : vector<2x16x512xf32> to vector<2x16xf32>
    %9 = vector.shape_cast %8 : vector<2x16xf32> to vector<2x16x1xf32>
    %cst_4 = arith.constant 5.120000e+02 : f32
    %10 = vector.broadcast %cst_4 : f32 to vector<2x16x1xf32>
    %11 = arith.divf %9, %10 : vector<2x16x1xf32>
    %cst_5 = arith.constant 9.99999974E-6 : f32
    %12 = vector.broadcast %cst_5 : f32 to vector<2x16x1xf32>
    %13 = arith.addf %11, %12 : vector<2x16x1xf32>
    %14 = math.rsqrt %13 : vector<2x16x1xf32>
    %15 = vector.broadcast %14 : vector<2x16x1xf32> to vector<2x16x512xf32>
    %16 = arith.mulf %6, %15 : vector<2x16x512xf32>
    %c0_6 = arith.constant 0 : index
    %c0_7 = arith.constant 0 : index
    %17 = vector.load %arg2[%c0_6, %c0_7] : memref<1x512xf32, #tpu.memory_space<vmem>>, vector<1x512xf32>
    %18 = vector.shape_cast %17 : vector<1x512xf32> to vector<1x1x512xf32>
    %19 = vector.broadcast %18 : vector<1x1x512xf32> to vector<2x16x512xf32>
    %20 = arith.mulf %16, %19 : vector<2x16x512xf32>
    %c0_8 = arith.constant 0 : index
    %c0_9 = arith.constant 0 : index
    %21 = vector.load %arg3[%c0_8, %c0_9] : memref<1x512xf32, #tpu.memory_space<vmem>>, vector<1x512xf32>
    %22 = vector.shape_cast %21 : vector<1x512xf32> to vector<1x1x512xf32>
    %23 = vector.broadcast %22 : vector<1x1x512xf32> to vector<2x16x512xf32>
    %24 = arith.addf %20, %23 : vector<2x16x512xf32>
    %cst_10 = arith.constant dense<0.000000e+00> : vector<2x512xf32>
    %25 = vector.multi_reduction <add>, %24, %cst_10 [1] : vector<2x16x512xf32> to vector<2x512xf32>
    %26 = vector.shape_cast %25 : vector<2x512xf32> to vector<2x1x512xf32>
    %cst_11 = arith.constant 1.600000e+01 : f32
    %27 = vector.broadcast %cst_11 : f32 to vector<2x1x512xf32>
    %28 = arith.divf %26, %27 : vector<2x1x512xf32>
    %29 = vector.broadcast %28 : vector<2x1x512xf32> to vector<2x16x512xf32>
    %30 = arith.subf %24, %29 : vector<2x16x512xf32>
    %c0_12 = arith.constant 0 : index
    %c0_13 = arith.constant 0 : index
    %c0_14 = arith.constant 0 : index
    %31 = vector.load %arg4[%c0_12, %c0_13, %c0_14] : memref<2x16x512xf32, #tpu.memory_space<vmem>>, vector<2x16x512xf32>
    tpu.vector_store %arg4[%c0_12, %c0_13, %c0_14], %30 {strides = array<i32>} : memref<2x16x512xf32, #tpu.memory_space<vmem>>, vector<2x16x512xf32>,
    return
  }
  func.func @transform_0(%arg0: i32) -> (i32, i32, i32) {
    %c0_i32 = arith.constant 0 : i32
    %c0_i32_0 = arith.constant 0 : i32
    %c0_i32_1 = arith.constant 0 : i32
    %c0_i32_2 = arith.constant 0 : i32
    return %c0_i32, %c0_i32_0, %c0_i32_1 : i32, i32, i32
  }
  func.func @transform_1(%arg0: i32) -> (i32, i32) {
    %c0_i32 = arith.constant 0 : i32
    %c0_i32_0 = arith.constant 0 : i32
    %c0_i32_1 = arith.constant 0 : i32
    return %c0_i32, %c0_i32_0 : i32, i32
  }
  func.func @transform_2(%arg0: i32) -> (i32, i32) {
    %c0_i32 = arith.constant 0 : i32
    %c0_i32_0 = arith.constant 0 : i32
    %c0_i32_1 = arith.constant 0 : i32
    return %c0_i32, %c0_i32_0 : i32, i32
  }
  func.func @transform_3(%arg0: i32) -> (i32, i32, i32) {
    %c0_i32 = arith.constant 0 : i32
    %c0_i32_0 = arith.constant 0 : i32
    %c0_i32_1 = arith.constant 0 : i32
    %c0_i32_2 = arith.constant 0 : i32
    return %c0_i32, %c0_i32_0, %c0_i32_1 : i32, i32, i32
  }
}

module attributes {stable_mosaic.version = 11 : i64} {
  func.func @_decomp_kernel(%arg0: i32, %arg1: memref<16x16xf32, #tpu.memory_space<vmem>>, %arg2: memref<2x16x512xf32, #tpu.memory_space<vmem>>, %arg3: memref<2x16x512xf32, #tpu.memory_space<vmem>>, %arg4: memref<2x16x512xf32, #tpu.memory_space<vmem>>, %arg5: memref<2x16x512xf32, #tpu.memory_space<vmem>>) attributes {dimension_semantics = [#tpu.dimension_semantics<arbitrary>], iteration_bounds = array<i64: 1>, scalar_prefetch = 0 : i64, scratch_operands = 0 : i64, tpu.core_type = #tpu.core_type<tc>, window_params = [{pipeline_mode = #tpu.pipeline_mode<synchronous>, transform_indices = @transform_0, window_bounds = array<i64: 16, 16>}, {pipeline_mode = #tpu.pipeline_mode<synchronous>, transform_indices = @transform_1, window_bounds = array<i64: 2, 16, 512>}, {pipeline_mode = #tpu.pipeline_mode<synchronous>, transform_indices = @transform_2, window_bounds = array<i64: 2, 16, 512>}, {pipeline_mode = #tpu.pipeline_mode<synchronous>, transform_indices = @transform_3, window_bounds = array<i64: 2, 16, 512>}, {pipeline_mode = #tpu.pipeline_mode<synchronous>, transform_indices = @transform_4, window_bounds = array<i64: 2, 16, 512>}]} {
    %c0 = arith.constant 0 : index
    %c0_0 = arith.constant 0 : index
    %c0_1 = arith.constant 0 : index
    %0 = vector.load %arg2[%c0, %c0_0, %c0_1] : memref<2x16x512xf32, #tpu.memory_space<vmem>>, vector<1x16x512xf32>
    %1 = vector.shape_cast %0 : vector<1x16x512xf32> to vector<16x512xf32>
    %c0_2 = arith.constant 0 : index
    %c0_3 = arith.constant 0 : index
    %c0_4 = arith.constant 0 : index
    %2 = vector.load %arg3[%c0_2, %c0_3, %c0_4] : memref<2x16x512xf32, #tpu.memory_space<vmem>>, vector<1x16x512xf32>
    %3 = vector.shape_cast %2 : vector<1x16x512xf32> to vector<16x512xf32>
    %4 = arith.addf %1, %3 : vector<16x512xf32>
    %c0_5 = arith.constant 0 : index
    %c0_6 = arith.constant 0 : index
    %5 = vector.load %arg1[%c0_5, %c0_6] : memref<16x16xf32, #tpu.memory_space<vmem>>, vector<16x16xf32>
    %cst = arith.constant dense<0.000000e+00> : vector<16x512xf32>
    %6 = tpu.matmul %5, %4, %cst {dimension_numbers = #tpu.dot_dimension_numbers<[1], [0], [0], [1], [0, 0, 1, 1], [], []>} : vector<16x16xf32>, vector<16x512xf32>, vector<16x512xf32> -> vector<16x512xf32>
    %c0_7 = arith.constant 0 : index
    %c0_8 = arith.constant 0 : index
    %c0_9 = arith.constant 0 : index
    %7 = vector.load %arg5[%c0_7, %c0_8, %c0_9] : memref<2x16x512xf32, #tpu.memory_space<vmem>>, vector<1x16x512xf32>
    %8 = vector.shape_cast %7 : vector<1x16x512xf32> to vector<16x512xf32>
    %9 = vector.shape_cast %6 : vector<16x512xf32> to vector<1x16x512xf32>
    tpu.vector_store %arg5[%c0_7, %c0_8, %c0_9], %9 {strides = array<i32>} : memref<2x16x512xf32, #tpu.memory_space<vmem>>, vector<1x16x512xf32>,
    %10 = arith.subf %4, %6 : vector<16x512xf32>
    %c0_10 = arith.constant 0 : index
    %c0_11 = arith.constant 0 : index
    %c0_12 = arith.constant 0 : index
    %11 = vector.load %arg4[%c0_10, %c0_11, %c0_12] : memref<2x16x512xf32, #tpu.memory_space<vmem>>, vector<1x16x512xf32>
    %12 = vector.shape_cast %11 : vector<1x16x512xf32> to vector<16x512xf32>
    %13 = vector.shape_cast %10 : vector<16x512xf32> to vector<1x16x512xf32>
    tpu.vector_store %arg4[%c0_10, %c0_11, %c0_12], %13 {strides = array<i32>} : memref<2x16x512xf32, #tpu.memory_space<vmem>>, vector<1x16x512xf32>,
    %c1 = arith.constant 1 : index
    %c0_13 = arith.constant 0 : index
    %c0_14 = arith.constant 0 : index
    %14 = vector.load %arg2[%c1, %c0_13, %c0_14] : memref<2x16x512xf32, #tpu.memory_space<vmem>>, vector<1x16x512xf32>
    %15 = vector.shape_cast %14 : vector<1x16x512xf32> to vector<16x512xf32>
    %c1_15 = arith.constant 1 : index
    %c0_16 = arith.constant 0 : index
    %c0_17 = arith.constant 0 : index
    %16 = vector.load %arg3[%c1_15, %c0_16, %c0_17] : memref<2x16x512xf32, #tpu.memory_space<vmem>>, vector<1x16x512xf32>
    %17 = vector.shape_cast %16 : vector<1x16x512xf32> to vector<16x512xf32>
    %18 = arith.addf %15, %17 : vector<16x512xf32>
    %c0_18 = arith.constant 0 : index
    %c0_19 = arith.constant 0 : index
    %19 = vector.load %arg1[%c0_18, %c0_19] : memref<16x16xf32, #tpu.memory_space<vmem>>, vector<16x16xf32>
    %cst_20 = arith.constant dense<0.000000e+00> : vector<16x512xf32>
    %20 = tpu.matmul %19, %18, %cst_20 {dimension_numbers = #tpu.dot_dimension_numbers<[1], [0], [0], [1], [0, 0, 1, 1], [], []>} : vector<16x16xf32>, vector<16x512xf32>, vector<16x512xf32> -> vector<16x512xf32>
    %c1_21 = arith.constant 1 : index
    %c0_22 = arith.constant 0 : index
    %c0_23 = arith.constant 0 : index
    %21 = vector.load %arg5[%c1_21, %c0_22, %c0_23] : memref<2x16x512xf32, #tpu.memory_space<vmem>>, vector<1x16x512xf32>
    %22 = vector.shape_cast %21 : vector<1x16x512xf32> to vector<16x512xf32>
    %23 = vector.shape_cast %20 : vector<16x512xf32> to vector<1x16x512xf32>
    tpu.vector_store %arg5[%c1_21, %c0_22, %c0_23], %23 {strides = array<i32>} : memref<2x16x512xf32, #tpu.memory_space<vmem>>, vector<1x16x512xf32>,
    %24 = arith.subf %18, %20 : vector<16x512xf32>
    %c1_24 = arith.constant 1 : index
    %c0_25 = arith.constant 0 : index
    %c0_26 = arith.constant 0 : index
    %25 = vector.load %arg4[%c1_24, %c0_25, %c0_26] : memref<2x16x512xf32, #tpu.memory_space<vmem>>, vector<1x16x512xf32>
    %26 = vector.shape_cast %25 : vector<1x16x512xf32> to vector<16x512xf32>
    %27 = vector.shape_cast %24 : vector<16x512xf32> to vector<1x16x512xf32>
    tpu.vector_store %arg4[%c1_24, %c0_25, %c0_26], %27 {strides = array<i32>} : memref<2x16x512xf32, #tpu.memory_space<vmem>>, vector<1x16x512xf32>,
    return
  }
  func.func @transform_0(%arg0: i32) -> (i32, i32) {
    %c0_i32 = arith.constant 0 : i32
    %c0_i32_0 = arith.constant 0 : i32
    %c0_i32_1 = arith.constant 0 : i32
    return %c0_i32, %c0_i32_0 : i32, i32
  }
  func.func @transform_1(%arg0: i32) -> (i32, i32, i32) {
    %c0_i32 = arith.constant 0 : i32
    %c0_i32_0 = arith.constant 0 : i32
    %c0_i32_1 = arith.constant 0 : i32
    %c0_i32_2 = arith.constant 0 : i32
    return %c0_i32, %c0_i32_0, %c0_i32_1 : i32, i32, i32
  }
  func.func @transform_2(%arg0: i32) -> (i32, i32, i32) {
    %c0_i32 = arith.constant 0 : i32
    %c0_i32_0 = arith.constant 0 : i32
    %c0_i32_1 = arith.constant 0 : i32
    %c0_i32_2 = arith.constant 0 : i32
    return %c0_i32, %c0_i32_0, %c0_i32_1 : i32, i32, i32
  }
  func.func @transform_3(%arg0: i32) -> (i32, i32, i32) {
    %c0_i32 = arith.constant 0 : i32
    %c0_i32_0 = arith.constant 0 : i32
    %c0_i32_1 = arith.constant 0 : i32
    %c0_i32_2 = arith.constant 0 : i32
    return %c0_i32, %c0_i32_0, %c0_i32_1 : i32, i32, i32
  }
  func.func @transform_4(%arg0: i32) -> (i32, i32, i32) {
    %c0_i32 = arith.constant 0 : i32
    %c0_i32_0 = arith.constant 0 : i32
    %c0_i32_1 = arith.constant 0 : i32
    %c0_i32_2 = arith.constant 0 : i32
    return %c0_i32, %c0_i32_0, %c0_i32_1 : i32, i32, i32
  }
}

module attributes {stable_mosaic.version = 11 : i64} {
  func.func @_linear_kernel(%arg0: i32, %arg1: memref<32x1536xf32, #tpu.memory_space<vmem>>, %arg2: memref<1536x128xf32, #tpu.memory_space<vmem>>, %arg3: memref<32x128xf32, #tpu.memory_space<vmem>>) attributes {dimension_semantics = [#tpu.dimension_semantics<parallel>], iteration_bounds = array<i64: 1>, scalar_prefetch = 0 : i64, scratch_operands = 0 : i64, tpu.core_type = #tpu.core_type<tc>, window_params = [{pipeline_mode = #tpu.pipeline_mode<synchronous>, transform_indices = @transform_0, window_bounds = array<i64: 32, 1536>}, {transform_indices = @transform_1, window_bounds = array<i64: 1536, 128>}, {transform_indices = @transform_2, window_bounds = array<i64: 32, 128>}]} {
    %c0 = arith.constant 0 : index
    %c0_0 = arith.constant 0 : index
    %0 = vector.load %arg1[%c0, %c0_0] : memref<32x1536xf32, #tpu.memory_space<vmem>>, vector<32x1536xf32>
    %c0_1 = arith.constant 0 : index
    %c0_2 = arith.constant 0 : index
    %1 = vector.load %arg2[%c0_1, %c0_2] : memref<1536x128xf32, #tpu.memory_space<vmem>>, vector<1536x128xf32>
    %cst = arith.constant dense<0.000000e+00> : vector<32x128xf32>
    %2 = tpu.matmul %0, %1, %cst {dimension_numbers = #tpu.dot_dimension_numbers<[1], [0], [0], [1], [0, 0, 1, 1], [], []>} : vector<32x1536xf32>, vector<1536x128xf32>, vector<32x128xf32> -> vector<32x128xf32>
    %c0_3 = arith.constant 0 : index
    %c0_4 = arith.constant 0 : index
    %3 = vector.load %arg3[%c0_3, %c0_4] : memref<32x128xf32, #tpu.memory_space<vmem>>, vector<32x128xf32>
    tpu.vector_store %arg3[%c0_3, %c0_4], %2 {strides = array<i32>} : memref<32x128xf32, #tpu.memory_space<vmem>>, vector<32x128xf32>,
    return
  }
  func.func @transform_0(%arg0: i32) -> (i32, i32) {
    %c0_i32 = arith.constant 0 : i32
    %c0_i32_0 = arith.constant 0 : i32
    %c0_i32_1 = arith.constant 0 : i32
    return %c0_i32, %c0_i32_0 : i32, i32
  }
  func.func @transform_1(%arg0: i32) -> (i32, i32) {
    %c0_i32 = arith.constant 0 : i32
    %c0_i32_0 = arith.constant 0 : i32
    return %c0_i32, %arg0 : i32, i32
  }
  func.func @transform_2(%arg0: i32) -> (i32, i32) {
    %c0_i32 = arith.constant 0 : i32
    %c0_i32_0 = arith.constant 0 : i32
    return %c0_i32, %arg0 : i32, i32
  }
}

module attributes {stable_mosaic.version = 11 : i64} {
  func.func @_linear_kernel(%arg0: i32, %arg1: memref<32x512xf32, #tpu.memory_space<vmem>>, %arg2: memref<512x128xf32, #tpu.memory_space<vmem>>, %arg3: memref<1x128xf32, #tpu.memory_space<vmem>>, %arg4: memref<32x128xf32, #tpu.memory_space<vmem>>) attributes {dimension_semantics = [#tpu.dimension_semantics<parallel>], iteration_bounds = array<i64: 1>, scalar_prefetch = 0 : i64, scratch_operands = 0 : i64, tpu.core_type = #tpu.core_type<tc>, window_params = [{pipeline_mode = #tpu.pipeline_mode<synchronous>, transform_indices = @transform_0, window_bounds = array<i64: 32, 512>}, {transform_indices = @transform_1, window_bounds = array<i64: 512, 128>}, {transform_indices = @transform_2, window_bounds = array<i64: 1, 128>}, {transform_indices = @transform_3, window_bounds = array<i64: 32, 128>}]} {
    %c0 = arith.constant 0 : index
    %c0_0 = arith.constant 0 : index
    %0 = vector.load %arg1[%c0, %c0_0] : memref<32x512xf32, #tpu.memory_space<vmem>>, vector<32x512xf32>
    %c0_1 = arith.constant 0 : index
    %c0_2 = arith.constant 0 : index
    %1 = vector.load %arg2[%c0_1, %c0_2] : memref<512x128xf32, #tpu.memory_space<vmem>>, vector<512x128xf32>
    %cst = arith.constant dense<0.000000e+00> : vector<32x128xf32>
    %2 = tpu.matmul %0, %1, %cst {dimension_numbers = #tpu.dot_dimension_numbers<[1], [0], [0], [1], [0, 0, 1, 1], [], []>} : vector<32x512xf32>, vector<512x128xf32>, vector<32x128xf32> -> vector<32x128xf32>
    %c0_3 = arith.constant 0 : index
    %c0_4 = arith.constant 0 : index
    %3 = vector.load %arg3[%c0_3, %c0_4] : memref<1x128xf32, #tpu.memory_space<vmem>>, vector<1x128xf32>
    %4 = vector.broadcast %3 : vector<1x128xf32> to vector<32x128xf32>
    %5 = arith.addf %2, %4 : vector<32x128xf32>
    %c0_5 = arith.constant 0 : index
    %c0_6 = arith.constant 0 : index
    %6 = vector.load %arg4[%c0_5, %c0_6] : memref<32x128xf32, #tpu.memory_space<vmem>>, vector<32x128xf32>
    tpu.vector_store %arg4[%c0_5, %c0_6], %5 {strides = array<i32>} : memref<32x128xf32, #tpu.memory_space<vmem>>, vector<32x128xf32>,
    return
  }
  func.func @transform_0(%arg0: i32) -> (i32, i32) {
    %c0_i32 = arith.constant 0 : i32
    %c0_i32_0 = arith.constant 0 : i32
    %c0_i32_1 = arith.constant 0 : i32
    return %c0_i32, %c0_i32_0 : i32, i32
  }
  func.func @transform_1(%arg0: i32) -> (i32, i32) {
    %c0_i32 = arith.constant 0 : i32
    %c0_i32_0 = arith.constant 0 : i32
    return %c0_i32, %arg0 : i32, i32
  }
  func.func @transform_2(%arg0: i32) -> (i32, i32) {
    %c0_i32 = arith.constant 0 : i32
    %c0_i32_0 = arith.constant 0 : i32
    return %c0_i32, %arg0 : i32, i32
  }
  func.func @transform_3(%arg0: i32) -> (i32, i32) {
    %c0_i32 = arith.constant 0 : i32
    %c0_i32_0 = arith.constant 0 : i32
    return %c0_i32, %arg0 : i32, i32
  }
}

</mosaic_0001>

<bundles_post_ra>
// kernel: forward.26
= control target key start
LH: loop header
LB: loop body
LE: loop exit
PB: predicated region body
PF: predicated region fallthrough
CT: control target
= control target key end

     0   :  { %9 = vsyncpa [#allocation3], 0  ;;  %s289_s12 = smov [#allocation2]   ;;  %s364_s0 = inlined_call_operand.hbm [shape: f32[16,16], index: 0, kind: input, shape index: {}]   ;;  %s365_s1 = inlined_call_operand.vmem [shape: f32[2,16,128], index: 1, kind: input, shape index: {}]   ;;  %s366_s2 = inlined_call_operand.vmem [shape: f32[2,16,128], index: 2, kind: output, shape index: {0}]   ;;  %s367_s3 = inlined_call_operand.vmem [shape: f32[2,16,128], index: 3, kind: output, shape index: {1}]  }
   0x1   :  { %s15_s13 = sshll.u32 %s289_s12, 4  ;;  %s265_s16 = scalar_lea.hbm %s364_s0, 256  ;;  %s16_s13 = int_to_ptr.vmem [resolvable:$true] %s15_s13 }
   0x2   :  { %p266_p0 = scmp.ne.s32.totalorder %s364_s0, %s265_s16  ;;  %p269_p1 = scmp.lt.u32.totalorder %s265_s16, %s364_s0 }
   0x4   :  { %p271_p2 = pnand %p269_p1, %p266_p0 }
   0x6   :  { %274 = shalt.err (!%p271_p2)
}
   0x7   :  { %s275_s21 = scalar_lea.vmem %s16_s13, 256  ;;  %p280_p4 = scmp.lt.s32.totalorder %s16_s13, %s16_s13 }
   0x8   :  { %p276_p3 = scmp.ne.s32.totalorder %s16_s13, %s275_s21  ;;  %p281_p5 = scmp.lt.s32.totalorder %s275_s21, %s275_s21 }
   0xa   :  { %p282_p6 = por %p281_p5, %p280_p4 }
   0xc   :  { %p283_p7 = pnand %p282_p6, %p276_p3 }
   0xe   :  { %286 = shalt.err (!%p283_p7)
}
   0xf   :  { %s290_s22 = smov 128   ;;  %s291_s23 = smov 8  }
  0x10   :  { %21 = dma.hbm_to_vmem [thread:$0]  %s364_s0, 256, %s16_s13, [#allocation3], %s290_s22, %s290_s22, %s291_s23  }
  0x11   :  { %287 = dma.done.wait [#allocation3], 256  }
  0x12   :  { %288 = vsyncadd [#allocation3], 4294967040  ;;  %vm31_vm0 = vcmask 130048   ;;  %v27_v0 = vld [vmem:[%s365_s1] sm:$0xff]  ;;  %v28_v1 = vld [vmem:[%s365_s1 + $0x8] sm:$0xff] }
  0x13   :  { %v224_v2 = vld [vmem:[%s365_s1 + $0x10] sm:$0xff]  ;;  %v254_v3 = vpack.c.bf16 %v28_v1, %v27_v0  ;;  %v225_v4 = vld [vmem:[%s365_s1 + $0x18] sm:$0xff]  ;;  %v29_v5 = vld [vmem:[#allocation2] sm:$0xff] }
  0x14   :  { %v258_v6 = vpack.c.bf16 %v225_v4, %v224_v2  ;;  %244 = vmatprep.mubr.msk.f32.mxu0 %vm31_vm0, %v29_v5  ;;  %251 = vmatprep.mubr.msk.f32.mxu1 %vm31_vm0, %v29_v5  ;;  %v30_v7 = vld [vmem:[#allocation2 + $0x8] sm:$0xff] }
  0x15   :  { %255 = vmatprep.subr.bf16.mxu0 %v254_v3 }
  0x16   :  { %259 = vmatprep.subr.bf16.mxu1 %v258_v6  ;;  %257 = vmatpush3.bf16.msra.mxu0 %v254_v3 }
  0x17   :  { %261 = vmatpush3.bf16.msra.mxu1 %v258_v6 }
  0x19   :  { %245 = vmatmul.mubr.msk.f32.vlgmr.msra.gmra.mrb[0].mxu0 %vm31_vm0, %v30_v7 }
  0x1a   :  { %252 = vmatmul.mubr.msk.f32.vlgmr.msra.gmra.mrb[0].mxu1 %vm31_vm0, %v30_v7 }
  0xec   :  { %v246_v8 = vpop.f32.mrb[0].mxu0 }
  0xed   :  { %114 = vst [vmem:[%s367_s3 + $0x8] sm:$0xff] %v246_v8  ;;  %v116_v9 = vsub.f32 %v28_v1, %v246_v8  ;;  %v253_v10 = vpop.f32.mrb[0].mxu1  ;;  %v104_v11 = vpop.f32.mrb[1].mxu0 }
  0xee   :  { %229 = vst [vmem:[%s367_s3 + $0x18] sm:$0xff] %v253_v10  ;;  %v209_v12 = vsub.f32 %v225_v4, %v253_v10  ;;  %113 = vst [vmem:[%s367_s3] sm:$0xff] %v104_v11  ;;  %v115_v13 = vsub.f32 %v27_v0, %v104_v11  ;;  %v196_v14 = vpop.f32.mrb[1].mxu1 }
  0xef   :  { %118 = vst [vmem:[%s366_s2 + $0x8] sm:$0xff] %v116_v9  ;;  %228 = vst [vmem:[%s367_s3 + $0x10] sm:$0xff] %v196_v14  ;;  %v208_v15 = vsub.f32 %v224_v2, %v196_v14 }
  0xf0   :  { %231 = vst [vmem:[%s366_s2 + $0x18] sm:$0xff] %v209_v12  ;;  %117 = vst [vmem:[%s366_s2] sm:$0xff] %v115_v13 }
  0xf1   :  { %230 = vst [vmem:[%s366_s2 + $0x10] sm:$0xff] %v208_v15 }
  0xf2   :  { %221 = vsyncpa [#allocation3], 1 }

// kernel: forward.27
= control target key start
LH: loop header
LB: loop body
LE: loop exit
PB: predicated region body
PF: predicated region fallthrough
CT: control target
= control target key end

     0   :  { %v342_v3 = vmov 0.0   ;;  %s618_s1 = inlined_call_operand.vmem [shape: f32[128,512], index: 1, kind: input, shape index: {}]   ;;  %s619_s0 = inlined_call_operand.vmem [shape: f32[32,128], index: 0, kind: input, shape index: {}]   ;;  %s620_s2 = inlined_call_operand.vmem [shape: f32[32,512], index: 2, kind: output, shape index: {}]  }
   0x1   :  { %v16_v0 = vld [vmem:[%s618_s1 + $0x8] sm:$0xff]  ;;  %v18_v2 = vld [vmem:[%s618_s1 + $0x18] sm:$0xff]  ;;  %143 = vmatprep.mubr.f32.mxu0 %v342_v3  ;;  %232 = vmatprep.mubr.f32.mxu1 %v342_v3  ;;  %v15_v6 = vld [vmem:[%s618_s1] sm:$0xff] }
   0x2   :  { %v20_v1 = vld [vmem:[%s618_s1 + $0x28] sm:$0xff]  ;;  %v22_v5 = vld [vmem:[%s618_s1 + $0x38] sm:$0xff]  ;;  %v19_v7 = vld [vmem:[%s618_s1 + $0x20] sm:$0xff] }
   0x3   :  { %v277_v4 = vpack.c.bf16 %v20_v1, %v16_v0  ;;  %v309_v8 = vpack.c.bf16 %v22_v5, %v18_v2  ;;  %v279_v9 = vpack.c.bf16 %v19_v7, %v15_v6  ;;  %v17_v10 = vld [vmem:[%s618_s1 + $0x10] sm:$0xff]  ;;  %v24_v12 = vld [vmem:[%s618_s1 + $0x48] sm:$0xff]  ;;  %v26_v15 = vld [vmem:[%s618_s1 + $0x58] sm:$0xff] }
   0x4   :  { %v21_v11 = vld [vmem:[%s618_s1 + $0x30] sm:$0xff]  ;;  %v28_v14 = vld [vmem:[%s618_s1 + $0x68] sm:$0xff]  ;;  %v30_v16 = vld [vmem:[%s618_s1 + $0x78] sm:$0xff] }
   0x5   :  { %278 = vmatprep.subr.bf16.mxu0 %v277_v4  ;;  %v311_v13 = vpack.c.bf16 %v21_v11, %v17_v10  ;;  %310 = vmatprep.subr.bf16.mxu1 %v309_v8  ;;  %v281_v17 = vpack.c.bf16 %v28_v14, %v24_v12  ;;  %v313_v18 = vpack.c.bf16 %v30_v16, %v26_v15  ;;  %v23_v19 = vld [vmem:[%s618_s1 + $0x40] sm:$0xff]  ;;  %v25_v21 = vld [vmem:[%s618_s1 + $0x50] sm:$0xff]  ;;  %v32_v24 = vld [vmem:[%s618_s1 + $0x88] sm:$0xff] }
   0x6   :  { %280 = vmatpush1.bf16.msra.mxu0 %v279_v9  ;;  %v27_v20 = vld [vmem:[%s618_s1 + $0x60] sm:$0xff]  ;;  %v29_v23 = vld [vmem:[%s618_s1 + $0x70] sm:$0xff]  ;;  %v36_v25 = vld [vmem:[%s618_s1 + $0xa8] sm:$0xff] }
   0x7   :  { %312 = vmatpush1.bf16.msra.mxu1 %v311_v13  ;;  %v283_v22 = vpack.c.bf16 %v27_v20, %v23_v19  ;;  %282 = vmatprep.subr.bf16.mxu0 %v281_v17  ;;  %v315_v26 = vpack.c.bf16 %v29_v23, %v25_v21  ;;  %v285_v27 = vpack.c.bf16 %v36_v25, %v32_v24  ;;  %v34_v28 = vld [vmem:[%s618_s1 + $0x98] sm:$0xff]  ;;  %v31_v30 = vld [vmem:[%s618_s1 + $0x80] sm:$0xff]  ;;  %v33_v33 = vld [vmem:[%s618_s1 + $0x90] sm:$0xff] }
   0x8   :  { %314 = vmatprep.subr.bf16.mxu1 %v313_v18  ;;  %v38_v29 = vld [vmem:[%s618_s1 + $0xb8] sm:$0xff]  ;;  %v35_v32 = vld [vmem:[%s618_s1 + $0xa0] sm:$0xff]  ;;  %v37_v34 = vld [vmem:[%s618_s1 + $0xb0] sm:$0xff] }
   0x9   :  { %v317_v31 = vpack.c.bf16 %v38_v29, %v34_v28  ;;  %v287_v35 = vpack.c.bf16 %v35_v32, %v31_v30  ;;  %v40_v36 = vld [vmem:[%s618_s1 + $0xc8] sm:$0xff]  ;;  %v42_v38 = vld [vmem:[%s618_s1 + $0xd8] sm:$0xff]  ;;  %v319_v39 = vpack.c.bf16 %v37_v34, %v33_v33  ;;  %v39_v42 = vld [vmem:[%s618_s1 + $0xc0] sm:$0xff] }
   0xa   :  { %284 = vmatpush1.bf16.msra.mxu0 %v283_v22  ;;  %v44_v37 = vld [vmem:[%s618_s1 + $0xe8] sm:$0xff]  ;;  %v46_v41 = vld [vmem:[%s618_s1 + $0xf8] sm:$0xff]  ;;  %v43_v43 = vld [vmem:[%s618_s1 + $0xe0] sm:$0xff] }
   0xb   :  { %316 = vmatpush1.bf16.msra.mxu1 %v315_v26  ;;  %286 = vmatprep.subr.bf16.mxu0 %v285_v27  ;;  %v289_v40 = vpack.c.bf16 %v44_v37, %v40_v36  ;;  %v321_v44 = vpack.c.bf16 %v46_v41, %v42_v38  ;;  %v41_v45 = vld [vmem:[%s618_s1 + $0xd0] sm:$0xff]  ;;  %v48_v47 = vld [vmem:[%s618_s1 + $0x108] sm:$0xff]  ;;  %v50_v49 = vld [vmem:[%s618_s1 + $0x118] sm:$0xff]  ;;  %v291_v51 = vpack.c.bf16 %v43_v43, %v39_v42 }
   0xc   :  { %318 = vmatprep.subr.bf16.mxu1 %v317_v31  ;;  %v45_v46 = vld [vmem:[%s618_s1 + $0xf0] sm:$0xff]  ;;  %v52_v48 = vld [vmem:[%s618_s1 + $0x128] sm:$0xff]  ;;  %v54_v50 = vld [vmem:[%s618_s1 + $0x138] sm:$0xff] }
   0xd   :  { %v323_v52 = vpack.c.bf16 %v45_v46, %v41_v45  ;;  %v293_v53 = vpack.c.bf16 %v52_v48, %v48_v47  ;;  %v47_v54 = vld [vmem:[%s618_s1 + $0x100] sm:$0xff]  ;;  %v49_v56 = vld [vmem:[%s618_s1 + $0x110] sm:$0xff]  ;;  %v325_v57 = vpack.c.bf16 %v54_v50, %v50_v49  ;;  %v56_v59 = vld [vmem:[%s618_s1 + $0x148] sm:$0xff] }
   0xe   :  { %288 = vmatpush1.bf16.msra.mxu0 %v287_v35  ;;  %v51_v55 = vld [vmem:[%s618_s1 + $0x120] sm:$0xff]  ;;  %v53_v58 = vld [vmem:[%s618_s1 + $0x130] sm:$0xff]  ;;  %v60_v60 = vld [vmem:[%s618_s1 + $0x168] sm:$0xff] }
   0xf   :  { %320 = vmatpush1.bf16.msra.mxu1 %v319_v39  ;;  %290 = vmatprep.subr.bf16.mxu0 %v289_v40  ;;  %v58_v61 = vld [vmem:[%s618_s1 + $0x158] sm:$0xff]  ;;  %v295_v63 = vpack.c.bf16 %v51_v55, %v47_v54  ;;  %v327_v0 = vpack.c.bf16 %v53_v58, %v49_v56  ;;  %v297_v1 = vpack.c.bf16 %v60_v60, %v56_v59  ;;  %v55_v2 = vld [vmem:[%s618_s1 + $0x140] sm:$0xff]  ;;  %v57_v5 = vld [vmem:[%s618_s1 + $0x150] sm:$0xff] }
  0x10   :  { %322 = vmatprep.subr.bf16.mxu1 %v321_v44  ;;  %v62_v62 = vld [vmem:[%s618_s1 + $0x178] sm:$0xff]  ;;  %v59_v4 = vld [vmem:[%s618_s1 + $0x160] sm:$0xff]  ;;  %v61_v7 = vld [vmem:[%s618_s1 + $0x170] sm:$0xff] }
  0x11   :  { %v329_v6 = vpack.c.bf16 %v62_v62, %v58_v61  ;;  %v64_v8 = vld [vmem:[%s618_s1 + $0x188] sm:$0xff]  ;;  %v66_v10 = vld [vmem:[%s618_s1 + $0x198] sm:$0xff]  ;;  %v299_v12 = vpack.c.bf16 %v59_v4, %v55_v2  ;;  %v331_v13 = vpack.c.bf16 %v61_v7, %v57_v5  ;;  %v63_v15 = vld [vmem:[%s618_s1 + $0x180] sm:$0xff] }
  0x12   :  { %292 = vmatpush1.bf16.msra.mxu0 %v291_v51  ;;  %v68_v9 = vld [vmem:[%s618_s1 + $0x1a8] sm:$0xff]  ;;  %v70_v11 = vld [vmem:[%s618_s1 + $0x1b8] sm:$0xff]  ;;  %v67_v16 = vld [vmem:[%s618_s1 + $0x1a0] sm:$0xff] }
  0x13   :  { %324 = vmatpush1.bf16.msra.mxu1 %v323_v52  ;;  %294 = vmatprep.subr.bf16.mxu0 %v293_v53  ;;  %v301_v14 = vpack.c.bf16 %v68_v9, %v64_v8  ;;  %v65_v17 = vld [vmem:[%s618_s1 + $0x190] sm:$0xff]  ;;  %v333_v18 = vpack.c.bf16 %v70_v11, %v66_v10  ;;  %v72_v20 = vld [vmem:[%s618_s1 + $0x1c8] sm:$0xff]  ;;  %v74_v22 = vld [vmem:[%s618_s1 + $0x1d8] sm:$0xff]  ;;  %v303_v24 = vpack.c.bf16 %v67_v16, %v63_v15 }
  0x14   :  { %326 = vmatprep.subr.bf16.mxu1 %v325_v57  ;;  %v69_v19 = vld [vmem:[%s618_s1 + $0x1b0] sm:$0xff]  ;;  %v76_v21 = vld [vmem:[%s618_s1 + $0x1e8] sm:$0xff]  ;;  %v78_v23 = vld [vmem:[%s618_s1 + $0x1f8] sm:$0xff] }
  0x15   :  { %v335_v25 = vpack.c.bf16 %v69_v19, %v65_v17  ;;  %v305_v26 = vpack.c.bf16 %v76_v21, %v72_v20  ;;  %v71_v27 = vld [vmem:[%s618_s1 + $0x1c0] sm:$0xff]  ;;  %v337_v29 = vpack.c.bf16 %v78_v23, %v74_v22  ;;  %v73_v30 = vld [vmem:[%s618_s1 + $0x1d0] sm:$0xff]  ;;  %v12_v35 = vld [vmem:[%s619_s0 + $0x8] sm:$0xff] }
  0x16   :  { %296 = vmatpush1.bf16.msra.mxu0 %v295_v63  ;;  %v75_v28 = vld [vmem:[%s618_s1 + $0x1e0] sm:$0xff]  ;;  %v77_v31 = vld [vmem:[%s618_s1 + $0x1f0] sm:$0xff]  ;;  %v14_v37 = vld [vmem:[%s619_s0 + $0x18] sm:$0xff] }
  0x17   :  { %328 = vmatpush1.bf16.msra.mxu1 %v327_v0  ;;  %298 = vmatprep.subr.bf16.mxu0 %v297_v1  ;;  %v307_v32 = vpack.c.bf16 %v75_v28, %v71_v27  ;;  %v339_v33 = vpack.c.bf16 %v77_v31, %v73_v30  ;;  %v11_v34 = vld [vmem:[%s619_s0] sm:$0xff]  ;;  %v13_v36 = vld [vmem:[%s619_s0 + $0x10] sm:$0xff] }
  0x18   :  { %330 = vmatprep.subr.bf16.mxu1 %v329_v6 }
  0x1a   :  { %300 = vmatpush1.bf16.msra.mxu0 %v299_v12 }
  0x1b   :  { %332 = vmatpush1.bf16.msra.mxu1 %v331_v13  ;;  %302 = vmatprep.subr.bf16.mxu0 %v301_v14 }
  0x1c   :  { %334 = vmatprep.subr.bf16.mxu1 %v333_v18 }
  0x1e   :  { %304 = vmatpush1.bf16.msra.mxu0 %v303_v24 }
  0x1f   :  { %336 = vmatpush1.bf16.msra.mxu1 %v335_v25  ;;  %306 = vmatprep.subr.bf16.mxu0 %v305_v26 }
  0x20   :  { %338 = vmatprep.subr.bf16.mxu1 %v337_v29 }
  0x22   :  { %308 = vmatpush1.bf16.msra.mxu0 %v307_v32 }
  0x23   :  { %340 = vmatpush1.bf16.msra.mxu1 %v339_v33 }
  0x25   :  { %144 = vmatmul.mubr.f32.vlgmr.msra.gmra.mrb[0].mxu0 %v11_v34 }
  0x26   :  { %233 = vmatmul.mubr.f32.vlgmr.msra.gmra.mrb[0].mxu1 %v11_v34  ;;  %149 = vmatprep.mubr.f32.mxu0 %v342_v3 }
  0x27   :  { %238 = vmatprep.mubr.f32.mxu1 %v342_v3 }
  0x29   :  { %150 = vmatmul.mubr.f32.gmra.mrb[2].mxu0 %v12_v35 }
  0x2a   :  { %239 = vmatmul.mubr.f32.gmra.mrb[2].mxu1 %v12_v35  ;;  %155 = vmatprep.mubr.f32.mxu0 %v342_v3 }
  0x2b   :  { %244 = vmatprep.mubr.f32.mxu1 %v342_v3 }
  0x2d   :  { %156 = vmatmul.mubr.f32.gmra.mrb[4].mxu0 %v13_v36 }
  0x2e   :  { %245 = vmatmul.mubr.f32.gmra.mrb[4].mxu1 %v13_v36  ;;  %161 = vmatprep.mubr.f32.mxu0 %v342_v3 }
  0x2f   :  { %250 = vmatprep.mubr.f32.mxu1 %v342_v3 }
  0x31   :  { %162 = vmatmul.mubr.f32.gmra.mrb[6].mxu0 %v14_v37 }
  0x32   :  { %251 = vmatmul.mubr.f32.gmra.mrb[6].mxu1 %v14_v37 }
  0xf8   :  { %v145_v38 = vpop.f32.mrb[0].mxu0 }
  0xf9   :  { %257 = vst [vmem:[%s620_s2] sm:$0xff] %v145_v38  ;;  %v234_v39 = vpop.f32.mrb[0].mxu1  ;;  %v147_v40 = vpop.f32.mrb[1].mxu0 }
  0xfa   :  { %259 = vst [vmem:[%s620_s2 + $0x10] sm:$0xff] %v234_v39  ;;  %258 = vst [vmem:[%s620_s2 + $0x8] sm:$0xff] %v147_v40  ;;  %v236_v41 = vpop.f32.mrb[1].mxu1 }
  0xfb   :  { %260 = vst [vmem:[%s620_s2 + $0x18] sm:$0xff] %v236_v41 }
  0xfc   :  { %v151_v3 = vpop.f32.mrb[2].mxu0 }
  0xfd   :  { %261 = vst [vmem:[%s620_s2 + $0x20] sm:$0xff] %v151_v3  ;;  %v240_v42 = vpop.f32.mrb[2].mxu1  ;;  %v153_v43 = vpop.f32.mrb[3].mxu0 }
  0xfe   :  { %263 = vst [vmem:[%s620_s2 + $0x30] sm:$0xff] %v240_v42  ;;  %262 = vst [vmem:[%s620_s2 + $0x28] sm:$0xff] %v153_v43  ;;  %v242_v44 = vpop.f32.mrb[3].mxu1 }
  0xff   :  { %264 = vst [vmem:[%s620_s2 + $0x38] sm:$0xff] %v242_v44 }
 0x100   :  { %v157_v45 = vpop.f32.mrb[4].mxu0 }
 0x101   :  { %265 = vst [vmem:[%s620_s2 + $0x40] sm:$0xff] %v157_v45  ;;  %v246_v46 = vpop.f32.mrb[4].mxu1  ;;  %v159_v47 = vpop.f32.mrb[5].mxu0 }
 0x102   :  { %267 = vst [vmem:[%s620_s2 + $0x50] sm:$0xff] %v246_v46  ;;  %266 = vst [vmem:[%s620_s2 + $0x48] sm:$0xff] %v159_v47  ;;  %v248_v48 = vpop.f32.mrb[5].mxu1 }
 0x103   :  { %268 = vst [vmem:[%s620_s2 + $0x58] sm:$0xff] %v248_v48 }
 0x104   :  { %v163_v49 = vpop.f32.mrb[6].mxu0 }
 0x105   :  { %269 = vst [vmem:[%s620_s2 + $0x60] sm:$0xff] %v163_v49  ;;  %v252_v50 = vpop.f32.mrb[6].mxu1  ;;  %v165_v51 = vpop.f32.mrb[7].mxu0 }
 0x106   :  { %271 = vst [vmem:[%s620_s2 + $0x70] sm:$0xff] %v252_v50  ;;  %270 = vst [vmem:[%s620_s2 + $0x68] sm:$0xff] %v165_v51  ;;  %v254_v52 = vpop.f32.mrb[7].mxu1 }
 0x107   :  { %272 = vst [vmem:[%s620_s2 + $0x78] sm:$0xff] %v254_v52 }

// kernel: forward.32
= control target key start
LH: loop header
LB: loop body
LE: loop exit
PB: predicated region body
PF: predicated region fallthrough
CT: control target
= control target key end

     0   :  { %s1859_s1 = inlined_call_operand.vmem [shape: f32[512,512], index: 1, kind: input, shape index: {}]   ;;  %s1860_s0 = inlined_call_operand.vmem [shape: f32[32,512], index: 0, kind: input, shape index: {}]   ;;  %s1861_s2 = inlined_call_operand.vmem [shape: f32[1,512], index: 2, kind: input, shape index: {}]   ;;  %s1862_s3 = inlined_call_operand.vmem [shape: f32[32,512], index: 3, kind: output, shape index: {}]  }
   0x1   :  { %v31_v0 = vld [vmem:[%s1859_s1 + $0x8] sm:$0xff]  ;;  %v33_v2 = vld [vmem:[%s1859_s1 + $0x18] sm:$0xff]  ;;  %v30_v5 = vld [vmem:[%s1859_s1] sm:$0xff] }
   0x2   :  { %v35_v1 = vld [vmem:[%s1859_s1 + $0x28] sm:$0xff]  ;;  %v37_v4 = vld [vmem:[%s1859_s1 + $0x38] sm:$0xff]  ;;  %v34_v6 = vld [vmem:[%s1859_s1 + $0x20] sm:$0xff] }
   0x3   :  { %v684_v3 = vpack.c.bf16 %v35_v1, %v31_v0  ;;  %v812_v7 = vpack.c.bf16 %v37_v4, %v33_v2  ;;  %v686_v8 = vpack.c.bf16 %v34_v6, %v30_v5  ;;  %v32_v9 = vld [vmem:[%s1859_s1 + $0x10] sm:$0xff]  ;;  %v39_v11 = vld [vmem:[%s1859_s1 + $0x48] sm:$0xff]  ;;  %v41_v14 = vld [vmem:[%s1859_s1 + $0x58] sm:$0xff] }
   0x4   :  { %v36_v10 = vld [vmem:[%s1859_s1 + $0x30] sm:$0xff]  ;;  %v43_v13 = vld [vmem:[%s1859_s1 + $0x68] sm:$0xff]  ;;  %v45_v15 = vld [vmem:[%s1859_s1 + $0x78] sm:$0xff] }
   0x5   :  { %685 = vmatprep.subr.bf16.mxu0 %v684_v3  ;;  %v814_v12 = vpack.c.bf16 %v36_v10, %v32_v9  ;;  %813 = vmatprep.subr.bf16.mxu1 %v812_v7  ;;  %v688_v16 = vpack.c.bf16 %v43_v13, %v39_v11  ;;  %v816_v17 = vpack.c.bf16 %v45_v15, %v41_v14  ;;  %v38_v18 = vld [vmem:[%s1859_s1 + $0x40] sm:$0xff]  ;;  %v40_v20 = vld [vmem:[%s1859_s1 + $0x50] sm:$0xff]  ;;  %v47_v23 = vld [vmem:[%s1859_s1 + $0x88] sm:$0xff] }
   0x6   :  { %687 = vmatpush1.bf16.msra.mxu0 %v686_v8  ;;  %v42_v19 = vld [vmem:[%s1859_s1 + $0x60] sm:$0xff]  ;;  %v44_v22 = vld [vmem:[%s1859_s1 + $0x70] sm:$0xff]  ;;  %v51_v24 = vld [vmem:[%s1859_s1 + $0xa8] sm:$0xff] }
   0x7   :  { %815 = vmatpush1.bf16.msra.mxu1 %v814_v12  ;;  %v690_v21 = vpack.c.bf16 %v42_v19, %v38_v18  ;;  %689 = vmatprep.subr.bf16.mxu0 %v688_v16  ;;  %v818_v25 = vpack.c.bf16 %v44_v22, %v40_v20  ;;  %v692_v26 = vpack.c.bf16 %v51_v24, %v47_v23  ;;  %v49_v27 = vld [vmem:[%s1859_s1 + $0x98] sm:$0xff]  ;;  %v46_v29 = vld [vmem:[%s1859_s1 + $0x80] sm:$0xff]  ;;  %v48_v32 = vld [vmem:[%s1859_s1 + $0x90] sm:$0xff] }
   0x8   :  { %817 = vmatprep.subr.bf16.mxu1 %v816_v17  ;;  %v53_v28 = vld [vmem:[%s1859_s1 + $0xb8] sm:$0xff]  ;;  %v50_v31 = vld [vmem:[%s1859_s1 + $0xa0] sm:$0xff]  ;;  %v52_v33 = vld [vmem:[%s1859_s1 + $0xb0] sm:$0xff] }
   0x9   :  { %v820_v30 = vpack.c.bf16 %v53_v28, %v49_v27  ;;  %v694_v34 = vpack.c.bf16 %v50_v31, %v46_v29  ;;  %v55_v35 = vld [vmem:[%s1859_s1 + $0xc8] sm:$0xff]  ;;  %v57_v37 = vld [vmem:[%s1859_s1 + $0xd8] sm:$0xff]  ;;  %v822_v38 = vpack.c.bf16 %v52_v33, %v48_v32  ;;  %v54_v41 = vld [vmem:[%s1859_s1 + $0xc0] sm:$0xff] }
   0xa   :  { %691 = vmatpush1.bf16.msra.mxu0 %v690_v21  ;;  %v59_v36 = vld [vmem:[%s1859_s1 + $0xe8] sm:$0xff]  ;;  %v61_v40 = vld [vmem:[%s1859_s1 + $0xf8] sm:$0xff]  ;;  %v58_v42 = vld [vmem:[%s1859_s1 + $0xe0] sm:$0xff] }
   0xb   :  { %819 = vmatpush1.bf16.msra.mxu1 %v818_v25  ;;  %693 = vmatprep.subr.bf16.mxu0 %v692_v26  ;;  %v696_v39 = vpack.c.bf16 %v59_v36, %v55_v35  ;;  %v824_v43 = vpack.c.bf16 %v61_v40, %v57_v37  ;;  %v56_v44 = vld [vmem:[%s1859_s1 + $0xd0] sm:$0xff]  ;;  %v63_v46 = vld [vmem:[%s1859_s1 + $0x108] sm:$0xff]  ;;  %v65_v48 = vld [vmem:[%s1859_s1 + $0x118] sm:$0xff]  ;;  %v698_v50 = vpack.c.bf16 %v58_v42, %v54_v41 }
   0xc   :  { %821 = vmatprep.subr.bf16.mxu1 %v820_v30  ;;  %v60_v45 = vld [vmem:[%s1859_s1 + $0xf0] sm:$0xff]  ;;  %v67_v47 = vld [vmem:[%s1859_s1 + $0x128] sm:$0xff]  ;;  %v69_v49 = vld [vmem:[%s1859_s1 + $0x138] sm:$0xff] }
   0xd   :  { %v826_v51 = vpack.c.bf16 %v60_v45, %v56_v44  ;;  %v700_v52 = vpack.c.bf16 %v67_v47, %v63_v46  ;;  %v62_v53 = vld [vmem:[%s1859_s1 + $0x100] sm:$0xff]  ;;  %v64_v55 = vld [vmem:[%s1859_s1 + $0x110] sm:$0xff]  ;;  %v828_v56 = vpack.c.bf16 %v69_v49, %v65_v48  ;;  %v71_v58 = vld [vmem:[%s1859_s1 + $0x148] sm:$0xff] }
   0xe   :  { %695 = vmatpush1.bf16.msra.mxu0 %v694_v34  ;;  %v66_v54 = vld [vmem:[%s1859_s1 + $0x120] sm:$0xff]  ;;  %v68_v57 = vld [vmem:[%s1859_s1 + $0x130] sm:$0xff]  ;;  %v75_v59 = vld [vmem:[%s1859_s1 + $0x168] sm:$0xff] }
   0xf   :  { %823 = vmatpush1.bf16.msra.mxu1 %v822_v38  ;;  %697 = vmatprep.subr.bf16.mxu0 %v696_v39  ;;  %v73_v60 = vld [vmem:[%s1859_s1 + $0x158] sm:$0xff]  ;;  %v702_v62 = vpack.c.bf16 %v66_v54, %v62_v53  ;;  %v830_v63 = vpack.c.bf16 %v68_v57, %v64_v55  ;;  %v704_v0 = vpack.c.bf16 %v75_v59, %v71_v58  ;;  %v70_v1 = vld [vmem:[%s1859_s1 + $0x140] sm:$0xff]  ;;  %v72_v3 = vld [vmem:[%s1859_s1 + $0x150] sm:$0xff] }
  0x10   :  { %825 = vmatprep.subr.bf16.mxu1 %v824_v43  ;;  %v77_v61 = vld [vmem:[%s1859_s1 + $0x178] sm:$0xff]  ;;  %v74_v2 = vld [vmem:[%s1859_s1 + $0x160] sm:$0xff]  ;;  %v76_v5 = vld [vmem:[%s1859_s1 + $0x170] sm:$0xff] }
  0x11   :  { %v832_v4 = vpack.c.bf16 %v77_v61, %v73_v60  ;;  %v79_v6 = vld [vmem:[%s1859_s1 + $0x188] sm:$0xff]  ;;  %v81_v8 = vld [vmem:[%s1859_s1 + $0x198] sm:$0xff]  ;;  %v706_v10 = vpack.c.bf16 %v74_v2, %v70_v1  ;;  %v834_v11 = vpack.c.bf16 %v76_v5, %v72_v3  ;;  %v78_v13 = vld [vmem:[%s1859_s1 + $0x180] sm:$0xff] }
  0x12   :  { %699 = vmatpush1.bf16.msra.mxu0 %v698_v50  ;;  %v83_v7 = vld [vmem:[%s1859_s1 + $0x1a8] sm:$0xff]  ;;  %v85_v9 = vld [vmem:[%s1859_s1 + $0x1b8] sm:$0xff]  ;;  %v82_v14 = vld [vmem:[%s1859_s1 + $0x1a0] sm:$0xff] }
  0x13   :  { %827 = vmatpush1.bf16.msra.mxu1 %v826_v51  ;;  %701 = vmatprep.subr.bf16.mxu0 %v700_v52  ;;  %v708_v12 = vpack.c.bf16 %v83_v7, %v79_v6  ;;  %v80_v15 = vld [vmem:[%s1859_s1 + $0x190] sm:$0xff]  ;;  %v836_v16 = vpack.c.bf16 %v85_v9, %v81_v8  ;;  %v87_v18 = vld [vmem:[%s1859_s1 + $0x1c8] sm:$0xff]  ;;  %v89_v20 = vld [vmem:[%s1859_s1 + $0x1d8] sm:$0xff]  ;;  %v710_v22 = vpack.c.bf16 %v82_v14, %v78_v13 }
  0x14   :  { %829 = vmatprep.subr.bf16.mxu1 %v828_v56  ;;  %v84_v17 = vld [vmem:[%s1859_s1 + $0x1b0] sm:$0xff]  ;;  %v91_v19 = vld [vmem:[%s1859_s1 + $0x1e8] sm:$0xff]  ;;  %v93_v21 = vld [vmem:[%s1859_s1 + $0x1f8] sm:$0xff] }
  0x15   :  { %v838_v23 = vpack.c.bf16 %v84_v17, %v80_v15  ;;  %v712_v24 = vpack.c.bf16 %v91_v19, %v87_v18  ;;  %v86_v25 = vld [vmem:[%s1859_s1 + $0x1c0] sm:$0xff]  ;;  %v88_v27 = vld [vmem:[%s1859_s1 + $0x1d0] sm:$0xff]  ;;  %v840_v28 = vpack.c.bf16 %v93_v21, %v89_v20  ;;  %v95_v30 = vld [vmem:[%s1859_s1 + $0x208] sm:$0xff] }
  0x16   :  { %703 = vmatpush1.bf16.msra.mxu0 %v702_v62  ;;  %v90_v26 = vld [vmem:[%s1859_s1 + $0x1e0] sm:$0xff]  ;;  %v92_v29 = vld [vmem:[%s1859_s1 + $0x1f0] sm:$0xff]  ;;  %v99_v31 = vld [vmem:[%s1859_s1 + $0x228] sm:$0xff] }
  0x17   :  { %831 = vmatpush1.bf16.msra.mxu1 %v830_v63  ;;  %705 = vmatprep.subr.bf16.mxu0 %v704_v0  ;;  %v97_v32 = vld [vmem:[%s1859_s1 + $0x218] sm:$0xff]  ;;  %v714_v34 = vpack.c.bf16 %v90_v26, %v86_v25  ;;  %v842_v35 = vpack.c.bf16 %v92_v29, %v88_v27  ;;  %v716_v36 = vpack.c.bf16 %v99_v31, %v95_v30  ;;  %v94_v37 = vld [vmem:[%s1859_s1 + $0x200] sm:$0xff]  ;;  %v96_v39 = vld [vmem:[%s1859_s1 + $0x210] sm:$0xff] }
  0x18   :  { %833 = vmatprep.subr.bf16.mxu1 %v832_v4  ;;  %v101_v33 = vld [vmem:[%s1859_s1 + $0x238] sm:$0xff]  ;;  %v98_v38 = vld [vmem:[%s1859_s1 + $0x220] sm:$0xff]  ;;  %v100_v41 = vld [vmem:[%s1859_s1 + $0x230] sm:$0xff] }
  0x19   :  { %v844_v40 = vpack.c.bf16 %v101_v33, %v97_v32  ;;  %v103_v42 = vld [vmem:[%s1859_s1 + $0x248] sm:$0xff]  ;;  %v105_v44 = vld [vmem:[%s1859_s1 + $0x258] sm:$0xff]  ;;  %v718_v46 = vpack.c.bf16 %v98_v38, %v94_v37  ;;  %v846_v47 = vpack.c.bf16 %v100_v41, %v96_v39  ;;  %v102_v49 = vld [vmem:[%s1859_s1 + $0x240] sm:$0xff] }
  0x1a   :  { %707 = vmatpush1.bf16.msra.mxu0 %v706_v10  ;;  %v107_v43 = vld [vmem:[%s1859_s1 + $0x268] sm:$0xff]  ;;  %v109_v45 = vld [vmem:[%s1859_s1 + $0x278] sm:$0xff]  ;;  %v106_v50 = vld [vmem:[%s1859_s1 + $0x260] sm:$0xff] }
  0x1b   :  { %835 = vmatpush1.bf16.msra.mxu1 %v834_v11  ;;  %709 = vmatprep.subr.bf16.mxu0 %v708_v12  ;;  %v720_v48 = vpack.c.bf16 %v107_v43, %v103_v42  ;;  %v104_v51 = vld [vmem:[%s1859_s1 + $0x250] sm:$0xff]  ;;  %v848_v52 = vpack.c.bf16 %v109_v45, %v105_v44  ;;  %v111_v54 = vld [vmem:[%s1859_s1 + $0x288] sm:$0xff]  ;;  %v113_v56 = vld [vmem:[%s1859_s1 + $0x298] sm:$0xff]  ;;  %v722_v58 = vpack.c.bf16 %v106_v50, %v102_v49 }
  0x1c   :  { %837 = vmatprep.subr.bf16.mxu1 %v836_v16  ;;  %v108_v53 = vld [vmem:[%s1859_s1 + $0x270] sm:$0xff]  ;;  %v115_v55 = vld [vmem:[%s1859_s1 + $0x2a8] sm:$0xff]  ;;  %v117_v57 = vld [vmem:[%s1859_s1 + $0x2b8] sm:$0xff] }
  0x1d   :  { %v850_v59 = vpack.c.bf16 %v108_v53, %v104_v51  ;;  %v724_v60 = vpack.c.bf16 %v115_v55, %v111_v54  ;;  %v110_v61 = vld [vmem:[%s1859_s1 + $0x280] sm:$0xff]  ;;  %v112_v63 = vld [vmem:[%s1859_s1 + $0x290] sm:$0xff]  ;;  %v852_v0 = vpack.c.bf16 %v117_v57, %v113_v56  ;;  %v119_v2 = vld [vmem:[%s1859_s1 + $0x2c8] sm:$0xff] }
  0x1e   :  { %711 = vmatpush1.bf16.msra.mxu0 %v710_v22  ;;  %v114_v62 = vld [vmem:[%s1859_s1 + $0x2a0] sm:$0xff]  ;;  %v116_v1 = vld [vmem:[%s1859_s1 + $0x2b0] sm:$0xff]  ;;  %v123_v3 = vld [vmem:[%s1859_s1 + $0x2e8] sm:$0xff] }
  0x1f   :  { %839 = vmatpush1.bf16.msra.mxu1 %v838_v23  ;;  %713 = vmatprep.subr.bf16.mxu0 %v712_v24  ;;  %v121_v4 = vld [vmem:[%s1859_s1 + $0x2d8] sm:$0xff]  ;;  %v726_v6 = vpack.c.bf16 %v114_v62, %v110_v61  ;;  %v118_v7 = vld [vmem:[%s1859_s1 + $0x2c0] sm:$0xff]  ;;  %v854_v8 = vpack.c.bf16 %v116_v1, %v112_v63  ;;  %v728_v9 = vpack.c.bf16 %v123_v3, %v119_v2  ;;  %v120_v11 = vld [vmem:[%s1859_s1 + $0x2d0] sm:$0xff] }
  0x20   :  { %841 = vmatprep.subr.bf16.mxu1 %v840_v28  ;;  %v125_v5 = vld [vmem:[%s1859_s1 + $0x2f8] sm:$0xff]  ;;  %v122_v10 = vld [vmem:[%s1859_s1 + $0x2e0] sm:$0xff]  ;;  %v124_v12 = vld [vmem:[%s1859_s1 + $0x2f0] sm:$0xff] }
  0x21   :  { %v856_v13 = vpack.c.bf16 %v125_v5, %v121_v4  ;;  %v127_v14 = vld [vmem:[%s1859_s1 + $0x308] sm:$0xff]  ;;  %v129_v17 = vld [vmem:[%s1859_s1 + $0x318] sm:$0xff]  ;;  %v730_v19 = vpack.c.bf16 %v122_v10, %v118_v7  ;;  %v858_v20 = vpack.c.bf16 %v124_v12, %v120_v11  ;;  %v126_v22 = vld [vmem:[%s1859_s1 + $0x300] sm:$0xff] }
  0x22   :  { %715 = vmatpush1.bf16.msra.mxu0 %v714_v34  ;;  %v131_v15 = vld [vmem:[%s1859_s1 + $0x328] sm:$0xff]  ;;  %v133_v18 = vld [vmem:[%s1859_s1 + $0x338] sm:$0xff]  ;;  %v130_v23 = vld [vmem:[%s1859_s1 + $0x320] sm:$0xff] }
  0x23   :  { %843 = vmatpush1.bf16.msra.mxu1 %v842_v35  ;;  %717 = vmatprep.subr.bf16.mxu0 %v716_v36  ;;  %v15_v16 = vld [vmem:[%s1860_s0 + $0x8] sm:$0xff]  ;;  %v732_v21 = vpack.c.bf16 %v131_v15, %v127_v14  ;;  %v128_v24 = vld [vmem:[%s1859_s1 + $0x310] sm:$0xff]  ;;  %v860_v25 = vpack.c.bf16 %v133_v18, %v129_v17  ;;  %v137_v29 = vld [vmem:[%s1859_s1 + $0x358] sm:$0xff]  ;;  %v734_v31 = vpack.c.bf16 %v130_v23, %v126_v22 }
  0x24   :  { %845 = vmatprep.subr.bf16.mxu1 %v844_v40  ;;  %372 = vmatprep.mubr.f32.mxu0 %v15_v16  ;;  %v132_v26 = vld [vmem:[%s1859_s1 + $0x330] sm:$0xff]  ;;  %v135_v27 = vld [vmem:[%s1859_s1 + $0x348] sm:$0xff]  ;;  %v141_v30 = vld [vmem:[%s1859_s1 + $0x378] sm:$0xff] }
  0x25   :  { %550 = vmatprep.mubr.f32.mxu1 %v15_v16  ;;  %v139_v28 = vld [vmem:[%s1859_s1 + $0x368] sm:$0xff]  ;;  %v862_v32 = vpack.c.bf16 %v132_v26, %v128_v24  ;;  %v134_v34 = vld [vmem:[%s1859_s1 + $0x340] sm:$0xff]  ;;  %v136_v36 = vld [vmem:[%s1859_s1 + $0x350] sm:$0xff]  ;;  %v864_v37 = vpack.c.bf16 %v141_v30, %v137_v29 }
  0x26   :  { %719 = vmatpush1.bf16.msra.mxu0 %v718_v46  ;;  %v736_v33 = vpack.c.bf16 %v139_v28, %v135_v27  ;;  %v138_v35 = vld [vmem:[%s1859_s1 + $0x360] sm:$0xff]  ;;  %v140_v38 = vld [vmem:[%s1859_s1 + $0x370] sm:$0xff]  ;;  %v143_v39 = vld [vmem:[%s1859_s1 + $0x388] sm:$0xff] }
  0x27   :  { %847 = vmatpush1.bf16.msra.mxu1 %v846_v47  ;;  %721 = vmatprep.subr.bf16.mxu0 %v720_v48  ;;  %v147_v40 = vld [vmem:[%s1859_s1 + $0x3a8] sm:$0xff]  ;;  %v145_v41 = vld [vmem:[%s1859_s1 + $0x398] sm:$0xff]  ;;  %v738_v43 = vpack.c.bf16 %v138_v35, %v134_v34  ;;  %v866_v44 = vpack.c.bf16 %v140_v38, %v136_v36  ;;  %v142_v46 = vld [vmem:[%s1859_s1 + $0x380] sm:$0xff] }
  0x28   :  { %849 = vmatprep.subr.bf16.mxu1 %v848_v52  ;;  %v149_v42 = vld [vmem:[%s1859_s1 + $0x3b8] sm:$0xff]  ;;  %v740_v45 = vpack.c.bf16 %v147_v40, %v143_v39  ;;  %v146_v47 = vld [vmem:[%s1859_s1 + $0x3a0] sm:$0xff]  ;;  %v144_v48 = vld [vmem:[%s1859_s1 + $0x390] sm:$0xff] }
  0x29   :  { %v868_v49 = vpack.c.bf16 %v149_v42, %v145_v41  ;;  %v148_v50 = vld [vmem:[%s1859_s1 + $0x3b0] sm:$0xff]  ;;  %v151_v51 = vld [vmem:[%s1859_s1 + $0x3c8] sm:$0xff]  ;;  %v153_v53 = vld [vmem:[%s1859_s1 + $0x3d8] sm:$0xff]  ;;  %v742_v55 = vpack.c.bf16 %v146_v47, %v142_v46 }
  0x2a   :  { %723 = vmatpush1.bf16.msra.mxu0 %v722_v58  ;;  %v155_v52 = vld [vmem:[%s1859_s1 + $0x3e8] sm:$0xff]  ;;  %v157_v54 = vld [vmem:[%s1859_s1 + $0x3f8] sm:$0xff]  ;;  %v870_v56 = vpack.c.bf16 %v148_v50, %v144_v48  ;;  %v150_v58 = vld [vmem:[%s1859_s1 + $0x3c0] sm:$0xff] }
  0x2b   :  { %851 = vmatpush1.bf16.msra.mxu1 %v850_v59  ;;  %725 = vmatprep.subr.bf16.mxu0 %v724_v60  ;;  %v744_v57 = vpack.c.bf16 %v155_v52, %v151_v51  ;;  %v154_v59 = vld [vmem:[%s1859_s1 + $0x3e0] sm:$0xff]  ;;  %v152_v60 = vld [vmem:[%s1859_s1 + $0x3d0] sm:$0xff]  ;;  %v872_v61 = vpack.c.bf16 %v157_v54, %v153_v53  ;;  %v159_v63 = vld [vmem:[%s1859_s1 + $0x408] sm:$0xff] }
  0x2c   :  { %853 = vmatprep.subr.bf16.mxu1 %v852_v0  ;;  %v156_v62 = vld [vmem:[%s1859_s1 + $0x3f0] sm:$0xff]  ;;  %v163_v0 = vld [vmem:[%s1859_s1 + $0x428] sm:$0xff]  ;;  %v161_v1 = vld [vmem:[%s1859_s1 + $0x418] sm:$0xff]  ;;  %v746_v3 = vpack.c.bf16 %v154_v59, %v150_v58 }
  0x2d   :  { %v165_v2 = vld [vmem:[%s1859_s1 + $0x438] sm:$0xff]  ;;  %v874_v4 = vpack.c.bf16 %v156_v62, %v152_v60  ;;  %v748_v5 = vpack.c.bf16 %v163_v0, %v159_v63  ;;  %v162_v7 = vld [vmem:[%s1859_s1 + $0x420] sm:$0xff]  ;;  %v164_v10 = vld [vmem:[%s1859_s1 + $0x430] sm:$0xff] }
  0x2e   :  { %727 = vmatpush1.bf16.msra.mxu0 %v726_v6  ;;  %v158_v6 = vld [vmem:[%s1859_s1 + $0x400] sm:$0xff]  ;;  %v167_v11 = vld [vmem:[%s1859_s1 + $0x448] sm:$0xff]  ;;  %v173_v14 = vld [vmem:[%s1859_s1 + $0x478] sm:$0xff] }
  0x2f   :  { %855 = vmatpush1.bf16.msra.mxu1 %v854_v8  ;;  %729 = vmatprep.subr.bf16.mxu0 %v728_v9  ;;  %v160_v8 = vld [vmem:[%s1859_s1 + $0x410] sm:$0xff]  ;;  %v876_v9 = vpack.c.bf16 %v165_v2, %v161_v1  ;;  %v171_v12 = vld [vmem:[%s1859_s1 + $0x468] sm:$0xff]  ;;  %v14_v15 = vld [vmem:[%s1860_s0] sm:$0xff]  ;;  %v750_v16 = vpack.c.bf16 %v162_v7, %v158_v6 }
  0x30   :  { %857 = vmatprep.subr.bf16.mxu1 %v856_v13  ;;  %v169_v13 = vld [vmem:[%s1859_s1 + $0x458] sm:$0xff]  ;;  %v878_v17 = vpack.c.bf16 %v164_v10, %v160_v8  ;;  %v752_v18 = vpack.c.bf16 %v171_v12, %v167_v11  ;;  %v172_v23 = vld [vmem:[%s1859_s1 + $0x470] sm:$0xff]  ;;  %v175_v24 = vld [vmem:[%s1859_s1 + $0x488] sm:$0xff] }
  0x31   :  { %v880_v22 = vpack.c.bf16 %v173_v14, %v169_v13  ;;  %v177_v26 = vld [vmem:[%s1859_s1 + $0x498] sm:$0xff]  ;;  %v180_v35 = vld [vmem:[%s1859_s1 + $0x4b0] sm:$0xff]  ;;  %v183_v36 = vld [vmem:[%s1859_s1 + $0x4c8] sm:$0xff] }
  0x32   :  { %731 = vmatpush1.bf16.msra.mxu0 %v730_v19  ;;  %v166_v19 = vld [vmem:[%s1859_s1 + $0x440] sm:$0xff]  ;;  %v181_v27 = vld [vmem:[%s1859_s1 + $0x4b8] sm:$0xff]  ;;  %v188_v47 = vld [vmem:[%s1859_s1 + $0x4f0] sm:$0xff] }
  0x33   :  { %859 = vmatpush1.bf16.msra.mxu1 %v858_v20  ;;  %733 = vmatprep.subr.bf16.mxu0 %v732_v21  ;;  %v170_v20 = vld [vmem:[%s1859_s1 + $0x460] sm:$0xff]  ;;  %v168_v21 = vld [vmem:[%s1859_s1 + $0x450] sm:$0xff]  ;;  %v884_v34 = vpack.c.bf16 %v181_v27, %v177_v26  ;;  %v185_v38 = vld [vmem:[%s1859_s1 + $0x4d8] sm:$0xff] }
  0x34   :  { %861 = vmatprep.subr.bf16.mxu1 %v860_v25  ;;  %v179_v25 = vld [vmem:[%s1859_s1 + $0x4a8] sm:$0xff]  ;;  %v754_v28 = vpack.c.bf16 %v170_v20, %v166_v19  ;;  %v882_v29 = vpack.c.bf16 %v172_v23, %v168_v21  ;;  %v189_v39 = vld [vmem:[%s1859_s1 + $0x4f8] sm:$0xff]  ;;  %v190_v53 = vld [vmem:[%s1859_s1 + $0x500] sm:$0xff] }
  0x35   :  { %v756_v30 = vpack.c.bf16 %v179_v25, %v175_v24  ;;  %v888_v46 = vpack.c.bf16 %v189_v39, %v185_v38  ;;  %v191_v48 = vld [vmem:[%s1859_s1 + $0x508] sm:$0xff]  ;;  %v193_v50 = vld [vmem:[%s1859_s1 + $0x518] sm:$0xff]  ;;  %v194_v54 = vld [vmem:[%s1859_s1 + $0x520] sm:$0xff] }
  0x36   :  { %735 = vmatpush1.bf16.msra.mxu0 %v734_v31  ;;  %v174_v31 = vld [vmem:[%s1859_s1 + $0x480] sm:$0xff]  ;;  %v197_v51 = vld [vmem:[%s1859_s1 + $0x538] sm:$0xff]  ;;  %v196_v58 = vld [vmem:[%s1859_s1 + $0x530] sm:$0xff]  ;;  %v766_v2 = vpack.c.bf16 %v194_v54, %v190_v53 }
  0x37   :  { %863 = vmatpush1.bf16.msra.mxu1 %v862_v32  ;;  %737 = vmatprep.subr.bf16.mxu0 %v736_v33  ;;  %v178_v32 = vld [vmem:[%s1859_s1 + $0x4a0] sm:$0xff]  ;;  %v176_v33 = vld [vmem:[%s1859_s1 + $0x490] sm:$0xff]  ;;  %v199_v59 = vld [vmem:[%s1859_s1 + $0x548] sm:$0xff]  ;;  %v892_v60 = vpack.c.bf16 %v197_v51, %v193_v50 }
  0x38   :  { %865 = vmatprep.subr.bf16.mxu1 %v864_v37  ;;  %v187_v37 = vld [vmem:[%s1859_s1 + $0x4e8] sm:$0xff]  ;;  %v758_v40 = vpack.c.bf16 %v178_v32, %v174_v31  ;;  %v886_v41 = vpack.c.bf16 %v180_v35, %v176_v33  ;;  %v18_v63 = vld [vmem:[%s1860_s0 + $0x20] sm:$0xff]  ;;  %v201_v0 = vld [vmem:[%s1859_s1 + $0x558] sm:$0xff] }
  0x39   :  { %v760_v42 = vpack.c.bf16 %v187_v37, %v183_v36  ;;  %v19_v62 = vld [vmem:[%s1860_s0 + $0x28] sm:$0xff]  ;;  %v205_v1 = vld [vmem:[%s1859_s1 + $0x578] sm:$0xff]  ;;  %v200_v7 = vld [vmem:[%s1859_s1 + $0x550] sm:$0xff] }
  0x3a   :  { %739 = vmatpush1.bf16.msra.mxu0 %v738_v43  ;;  %v182_v43 = vld [vmem:[%s1859_s1 + $0x4c0] sm:$0xff]  ;;  %v23_v8 = vld [vmem:[%s1860_s0 + $0x48] sm:$0xff]  ;;  %v896_v10 = vpack.c.bf16 %v205_v1, %v201_v0  ;;  %v204_v11 = vld [vmem:[%s1859_s1 + $0x570] sm:$0xff] }
  0x3b   :  { %867 = vmatpush1.bf16.msra.mxu1 %v866_v44  ;;  %741 = vmatprep.subr.bf16.mxu0 %v740_v45  ;;  %v186_v44 = vld [vmem:[%s1859_s1 + $0x4e0] sm:$0xff]  ;;  %v184_v45 = vld [vmem:[%s1859_s1 + $0x4d0] sm:$0xff]  ;;  %v207_v12 = vld [vmem:[%s1859_s1 + $0x588] sm:$0xff]  ;;  %v898_v19 = vpack.c.bf16 %v204_v11, %v200_v7 }
  0x3c   :  { %869 = vmatprep.subr.bf16.mxu1 %v868_v49  ;;  %v195_v49 = vld [vmem:[%s1859_s1 + $0x528] sm:$0xff]  ;;  %v762_v52 = vpack.c.bf16 %v186_v44, %v182_v43  ;;  %v209_v14 = vld [vmem:[%s1859_s1 + $0x598] sm:$0xff]  ;;  %v210_v21 = vld [vmem:[%s1859_s1 + $0x5a0] sm:$0xff] }
  0x3d   :  { %v211_v13 = vld [vmem:[%s1859_s1 + $0x5a8] sm:$0xff]  ;;  %v26_v23 = vld [vmem:[%s1860_s0 + $0x60] sm:$0xff]  ;;  %v212_v25 = vld [vmem:[%s1859_s1 + $0x5b0] sm:$0xff] }
  0x3e   :  { %743 = vmatpush1.bf16.msra.mxu0 %v742_v55  ;;  %v890_v55 = vpack.c.bf16 %v188_v47, %v184_v45  ;;  %v772_v20 = vpack.c.bf16 %v211_v13, %v207_v12  ;;  %v215_v26 = vld [vmem:[%s1859_s1 + $0x5c8] sm:$0xff]  ;;  %v17_v31 = vld [vmem:[%s1860_s0 + $0x18] sm:$0xff]  ;;  %v218_v35 = vld [vmem:[%s1859_s1 + $0x5e0] sm:$0xff] }
  0x3f   :  { %871 = vmatpush1.bf16.msra.mxu1 %v870_v56  ;;  %745 = vmatprep.subr.bf16.mxu0 %v744_v57  ;;  %v764_v56 = vpack.c.bf16 %v195_v49, %v191_v48  ;;  %v192_v57 = vld [vmem:[%s1859_s1 + $0x510] sm:$0xff]  ;;  %v219_v27 = vld [vmem:[%s1859_s1 + $0x5e8] sm:$0xff]  ;;  %v226_v47 = vld [vmem:[%s1859_s1 + $0x620] sm:$0xff] }
  0x40   :  { %873 = vmatprep.subr.bf16.mxu1 %v872_v61  ;;  %v203_v61 = vld [vmem:[%s1859_s1 + $0x568] sm:$0xff]  ;;  %v776_v33 = vpack.c.bf16 %v219_v27, %v215_v26  ;;  %v216_v36 = vld [vmem:[%s1859_s1 + $0x5d0] sm:$0xff]  ;;  %v233_v53 = vld [vmem:[%s1859_s1 + $0x658] sm:$0xff] }
  0x41   :  { %v768_v6 = vpack.c.bf16 %v203_v61, %v199_v59  ;;  %v220_v38 = vld [vmem:[%s1859_s1 + $0x5f0] sm:$0xff]  ;;  %v223_v39 = vld [vmem:[%s1859_s1 + $0x608] sm:$0xff]  ;;  %v237_v54 = vld [vmem:[%s1859_s1 + $0x678] sm:$0xff] }
  0x42   :  { %747 = vmatpush1.bf16.msra.mxu0 %v746_v3  ;;  %v198_v3 = vld [vmem:[%s1859_s1 + $0x540] sm:$0xff]  ;;  %v906_v44 = vpack.c.bf16 %v220_v38, %v216_v36  ;;  %v224_v48 = vld [vmem:[%s1859_s1 + $0x610] sm:$0xff]  ;;  %v231_v51 = vld [vmem:[%s1859_s1 + $0x648] sm:$0xff]  ;;  %v912_v61 = vpack.c.bf16 %v237_v54, %v233_v53 }
  0x43   :  { %875 = vmatpush1.bf16.msra.mxu1 %v874_v4  ;;  %749 = vmatprep.subr.bf16.mxu0 %v748_v5  ;;  %v202_v4 = vld [vmem:[%s1859_s1 + $0x560] sm:$0xff]  ;;  %v894_v5 = vpack.c.bf16 %v196_v58, %v192_v57  ;;  %v228_v50 = vld [vmem:[%s1859_s1 + $0x630] sm:$0xff]  ;;  %v243_v0 = vld [vmem:[%s1859_s1 + $0x6a8] sm:$0xff] }
  0x44   :  { %877 = vmatprep.subr.bf16.mxu1 %v876_v9  ;;  %v22_v9 = vld [vmem:[%s1860_s0 + $0x40] sm:$0xff]  ;;  %v241_v1 = vld [vmem:[%s1859_s1 + $0x698] sm:$0xff]  ;;  %v247_v11 = vld [vmem:[%s1859_s1 + $0x6c8] sm:$0xff] }
  0x45   :  { %373 = vmatmul.mubr.f32.vlgmr.msra.gmra.mrb[0].mxu0 %v14_v15  ;;  %v230_v58 = vld [vmem:[%s1859_s1 + $0x640] sm:$0xff]  ;;  %v251_v12 = vld [vmem:[%s1859_s1 + $0x6e8] sm:$0xff]  ;;  %v249_v13 = vld [vmem:[%s1859_s1 + $0x6d8] sm:$0xff] }
  0x46   :  { %751 = vmatpush1.bf16.msra.mxu0 %v750_v16  ;;  %551 = vmatmul.mubr.f32.vlgmr.msra.gmra.mrb[0].mxu1 %v14_v15  ;;  %v213_v15 = vld [vmem:[%s1859_s1 + $0x5b8] sm:$0xff]  ;;  %v770_v16 = vpack.c.bf16 %v202_v4, %v198_v3  ;;  %v234_v59 = vld [vmem:[%s1859_s1 + $0x660] sm:$0xff]  ;;  %v267_v36 = vld [vmem:[%s1859_s1 + $0x768] sm:$0xff] }
  0x47   :  { %879 = vmatpush1.bf16.msra.mxu1 %v878_v17  ;;  %753 = vmatprep.subr.bf16.mxu0 %v752_v18  ;;  %v206_v17 = vld [vmem:[%s1859_s1 + $0x580] sm:$0xff]  ;;  %v27_v18 = vld [vmem:[%s1860_s0 + $0x68] sm:$0xff]  ;;  %v900_v24 = vpack.c.bf16 %v213_v15, %v209_v14  ;;  %v786_v3 = vpack.c.bf16 %v234_v59, %v230_v58  ;;  %v253_v14 = vld [vmem:[%s1859_s1 + $0x6f8] sm:$0xff] }
  0x48   :  { %881 = vmatprep.subr.bf16.mxu1 %v880_v22  ;;  %378 = vmatprep.mubr.f32.mxu0 %v19_v62  ;;  %v208_v22 = vld [vmem:[%s1859_s1 + $0x590] sm:$0xff]  ;;  %v242_v7 = vld [vmem:[%s1859_s1 + $0x6a0] sm:$0xff]  ;;  %v261_v26 = vld [vmem:[%s1859_s1 + $0x738] sm:$0xff] }
  0x49   :  { %556 = vmatprep.mubr.f32.mxu1 %v19_v62  ;;  %379 = vmatmul.mubr.f32.gmra.mrb[2].mxu0 %v18_v63  ;;  %v902_v32 = vpack.c.bf16 %v212_v25, %v208_v22  ;;  %v236_v62 = vld [vmem:[%s1859_s1 + $0x670] sm:$0xff]  ;;  %v257_v25 = vld [vmem:[%s1859_s1 + $0x718] sm:$0xff]  ;;  %v270_v54 = vld [vmem:[%s1859_s1 + $0x780] sm:$0xff] }
  0x4a   :  { %755 = vmatpush1.bf16.msra.mxu0 %v754_v28  ;;  %557 = vmatmul.mubr.f32.gmra.mrb[2].mxu1 %v18_v63  ;;  %v217_v28 = vld [vmem:[%s1859_s1 + $0x5d8] sm:$0xff]  ;;  %v239_v63 = vld [vmem:[%s1859_s1 + $0x688] sm:$0xff]  ;;  %v252_v22 = vld [vmem:[%s1859_s1 + $0x6f0] sm:$0xff] }
  0x4b   :  { %883 = vmatpush1.bf16.msra.mxu1 %v882_v29  ;;  %757 = vmatprep.subr.bf16.mxu0 %v756_v30  ;;  %v221_v29 = vld [vmem:[%s1859_s1 + $0x5f8] sm:$0xff]  ;;  %v774_v30 = vpack.c.bf16 %v210_v21, %v206_v17  ;;  %v792_v17 = vpack.c.bf16 %v251_v12, %v247_v11  ;;  %v920_v21 = vpack.c.bf16 %v253_v14, %v249_v13  ;;  %v276_v58 = vld [vmem:[%s1859_s1 + $0x7b0] sm:$0xff]  ;;  %v279_v59 = vld [vmem:[%s1859_s1 + $0x7c8] sm:$0xff] }
  0x4c   :  { %885 = vmatprep.subr.bf16.mxu1 %v884_v34  ;;  %384 = vmatprep.mubr.f32.mxu0 %v23_v8  ;;  %v214_v34 = vld [vmem:[%s1859_s1 + $0x5c0] sm:$0xff]  ;;  %v904_v37 = vpack.c.bf16 %v221_v29, %v217_v28  ;;  %v269_v38 = vld [vmem:[%s1859_s1 + $0x778] sm:$0xff]  ;;  %v20_v11 = vld [vmem:[%s1860_s0 + $0x30] sm:$0xff] }
  0x4d   :  { %562 = vmatprep.mubr.f32.mxu1 %v23_v8  ;;  %385 = vmatmul.mubr.f32.gmra.mrb[4].mxu0 %v22_v9  ;;  %v778_v43 = vpack.c.bf16 %v218_v35, %v214_v34  ;;  %v240_v8 = vld [vmem:[%s1859_s1 + $0x690] sm:$0xff]  ;;  %v263_v35 = vld [vmem:[%s1859_s1 + $0x748] sm:$0xff]  ;;  %v25_v12 = vld [vmem:[%s1860_s0 + $0x58] sm:$0xff] }
  0x4e   :  { %759 = vmatpush1.bf16.msra.mxu0 %v758_v40  ;;  %563 = vmatmul.mubr.f32.gmra.mrb[4].mxu1 %v22_v9  ;;  %v227_v40 = vld [vmem:[%s1859_s1 + $0x628] sm:$0xff]  ;;  %v260_v34 = vld [vmem:[%s1859_s1 + $0x730] sm:$0xff]  ;;  %v29_v14 = vld [vmem:[%s1860_s0 + $0x78] sm:$0xff] }
  0x4f   :  { %887 = vmatpush1.bf16.msra.mxu1 %v886_v41  ;;  %761 = vmatprep.subr.bf16.mxu0 %v760_v42  ;;  %v225_v41 = vld [vmem:[%s1859_s1 + $0x618] sm:$0xff]  ;;  %v780_v45 = vpack.c.bf16 %v227_v40, %v223_v39  ;;  %v24_v13 = vld [vmem:[%s1860_s0 + $0x50] sm:$0xff] }
  0x50   :  { %889 = vmatprep.subr.bf16.mxu1 %v888_v46  ;;  %390 = vmatprep.mubr.f32.mxu0 %v27_v18  ;;  %v229_v42 = vld [vmem:[%s1859_s1 + $0x638] sm:$0xff]  ;;  %v222_v46 = vld [vmem:[%s1859_s1 + $0x600] sm:$0xff] }
  0x51   :  { %568 = vmatprep.mubr.f32.mxu1 %v27_v18  ;;  %391 = vmatmul.mubr.f32.gmra.mrb[6].mxu0 %v26_v23  ;;  %v908_v49 = vpack.c.bf16 %v229_v42, %v225_v41  ;;  %v246_v18 = vld [vmem:[%s1859_s1 + $0x6c0] sm:$0xff]  ;;  %v800_v41 = vpack.c.bf16 %v267_v36, %v263_v35 }
  0x52   :  { %763 = vmatpush1.bf16.msra.mxu0 %v762_v52  ;;  %569 = vmatmul.mubr.f32.gmra.mrb[6].mxu1 %v26_v23  ;;  %v235_v52 = vld [vmem:[%s1859_s1 + $0x668] sm:$0xff]  ;;  %v262_v42 = vld [vmem:[%s1859_s1 + $0x740] sm:$0xff] }
  0x53   :  { %891 = vmatpush1.bf16.msra.mxu1 %v890_v55  ;;  %765 = vmatprep.subr.bf16.mxu0 %v764_v56  ;;  %v782_v55 = vpack.c.bf16 %v226_v47, %v222_v46  ;;  %v910_v56 = vpack.c.bf16 %v228_v50, %v224_v48  ;;  %v784_v57 = vpack.c.bf16 %v235_v52, %v231_v51  ;;  %v255_v23 = vld [vmem:[%s1859_s1 + $0x708] sm:$0xff]  ;;  %v268_v46 = vld [vmem:[%s1859_s1 + $0x770] sm:$0xff]  ;;  %v277_v50 = vld [vmem:[%s1859_s1 + $0x7b8] sm:$0xff] }
  0x54   :  { %893 = vmatprep.subr.bf16.mxu1 %v892_v60  ;;  %461 = vmatprep.mubr.f32.mxu0 %v17_v31  ;;  %v232_v60 = vld [vmem:[%s1859_s1 + $0x650] sm:$0xff]  ;;  %v271_v47 = vld [vmem:[%s1859_s1 + $0x788] sm:$0xff] }
  0x55   :  { %639 = vmatprep.mubr.f32.mxu1 %v17_v31  ;;  %v914_v4 = vpack.c.bf16 %v236_v62, %v232_v60  ;;  %v258_v31 = vld [vmem:[%s1859_s1 + $0x720] sm:$0xff]  ;;  %v275_v48 = vld [vmem:[%s1859_s1 + $0x7a8] sm:$0xff]  ;;  %v285_v62 = vld [vmem:[%s1859_s1 + $0x7f8] sm:$0xff] }
  0x56   :  { %767 = vmatpush1.bf16.msra.mxu0 %v766_v2  ;;  %v245_v2 = vld [vmem:[%s1859_s1 + $0x6b8] sm:$0xff]  ;;  %v804_v53 = vpack.c.bf16 %v275_v48, %v271_v47  ;;  %v283_v60 = vld [vmem:[%s1859_s1 + $0x7e8] sm:$0xff] }
  0x57   :  { %895 = vmatpush1.bf16.msra.mxu1 %v894_v5  ;;  %769 = vmatprep.subr.bf16.mxu0 %v768_v6  ;;  %v788_v5 = vpack.c.bf16 %v243_v0, %v239_v63  ;;  %v238_v6 = vld [vmem:[%s1859_s1 + $0x680] sm:$0xff]  ;;  %v916_v9 = vpack.c.bf16 %v245_v2, %v241_v1  ;;  %v808_v1 = vpack.c.bf16 %v283_v60, %v279_v59 }
  0x58   :  { %897 = vmatprep.subr.bf16.mxu1 %v896_v10  ;;  %v244_v10 = vld [vmem:[%s1859_s1 + $0x6b0] sm:$0xff]  ;;  %v790_v15 = vpack.c.bf16 %v242_v7, %v238_v6  ;;  %v278_v2 = vld [vmem:[%s1859_s1 + $0x7c0] sm:$0xff] }
  0x59   :  { %v284_v6 = vld [vmem:[%s1859_s1 + $0x7f0] sm:$0xff] }
  0x5a   :  { %771 = vmatpush1.bf16.msra.mxu0 %v770_v16  ;;  %v918_v16 = vpack.c.bf16 %v244_v10, %v240_v8  ;;  %v21_v10 = vld [vmem:[%s1860_s0 + $0x38] sm:$0xff] }
  0x5b   :  { %899 = vmatpush1.bf16.msra.mxu1 %v898_v19  ;;  %773 = vmatprep.subr.bf16.mxu0 %v772_v20  ;;  %v250_v19 = vld [vmem:[%s1859_s1 + $0x6e0] sm:$0xff]  ;;  %v248_v20 = vld [vmem:[%s1859_s1 + $0x6d0] sm:$0xff] }
  0x5c   :  { %901 = vmatprep.subr.bf16.mxu1 %v900_v24  ;;  %v259_v24 = vld [vmem:[%s1859_s1 + $0x728] sm:$0xff]  ;;  %v794_v27 = vpack.c.bf16 %v250_v19, %v246_v18  ;;  %v922_v28 = vpack.c.bf16 %v252_v22, %v248_v20  ;;  %v286_v19 = vld [vmem:[%s1861_s2] sm:$0xf] }
  0x5d   :  { %v796_v29 = vpack.c.bf16 %v259_v24, %v255_v23 }
  0x5e   :  { %775 = vmatpush1.bf16.msra.mxu0 %v774_v30  ;;  %v254_v30 = vld [vmem:[%s1859_s1 + $0x700] sm:$0xff] }
  0x5f   :  { %903 = vmatpush1.bf16.msra.mxu1 %v902_v32  ;;  %777 = vmatprep.subr.bf16.mxu0 %v776_v33  ;;  %v256_v32 = vld [vmem:[%s1859_s1 + $0x710] sm:$0xff]  ;;  %v924_v33 = vpack.c.bf16 %v261_v26, %v257_v25  ;;  %v798_v39 = vpack.c.bf16 %v258_v31, %v254_v30 }
  0x60   :  { %905 = vmatprep.subr.bf16.mxu1 %v904_v37  ;;  %v265_v37 = vld [vmem:[%s1859_s1 + $0x758] sm:$0xff]  ;;  %v926_v40 = vpack.c.bf16 %v260_v34, %v256_v32 }
  0x62   :  { %779 = vmatpush1.bf16.msra.mxu0 %v778_v43  ;;  %v266_v43 = vld [vmem:[%s1859_s1 + $0x760] sm:$0xff] }
  0x63   :  { %907 = vmatpush1.bf16.msra.mxu1 %v906_v44  ;;  %781 = vmatprep.subr.bf16.mxu0 %v780_v45  ;;  %v264_v44 = vld [vmem:[%s1859_s1 + $0x750] sm:$0xff]  ;;  %v928_v45 = vpack.c.bf16 %v269_v38, %v265_v37  ;;  %v802_v51 = vpack.c.bf16 %v266_v43, %v262_v42 }
  0x64   :  { %909 = vmatprep.subr.bf16.mxu1 %v908_v49  ;;  %v273_v49 = vld [vmem:[%s1859_s1 + $0x798] sm:$0xff]  ;;  %v930_v52 = vpack.c.bf16 %v268_v46, %v264_v44 }
  0x66   :  { %783 = vmatpush1.bf16.msra.mxu0 %v782_v55  ;;  %v274_v55 = vld [vmem:[%s1859_s1 + $0x7a0] sm:$0xff] }
  0x67   :  { %911 = vmatpush1.bf16.msra.mxu1 %v910_v56  ;;  %785 = vmatprep.subr.bf16.mxu0 %v784_v57  ;;  %v272_v56 = vld [vmem:[%s1859_s1 + $0x790] sm:$0xff]  ;;  %v932_v57 = vpack.c.bf16 %v277_v50, %v273_v49  ;;  %v806_v63 = vpack.c.bf16 %v274_v55, %v270_v54 }
  0x68   :  { %913 = vmatprep.subr.bf16.mxu1 %v912_v61  ;;  %v281_v61 = vld [vmem:[%s1859_s1 + $0x7d8] sm:$0xff]  ;;  %v934_v0 = vpack.c.bf16 %v276_v58, %v272_v56 }
  0x6a   :  { %787 = vmatpush1.bf16.msra.mxu0 %v786_v3  ;;  %v282_v3 = vld [vmem:[%s1859_s1 + $0x7e0] sm:$0xff] }
  0x6b   :  { %915 = vmatpush1.bf16.msra.mxu1 %v914_v4  ;;  %789 = vmatprep.subr.bf16.mxu0 %v788_v5  ;;  %v936_v4 = vpack.c.bf16 %v285_v62, %v281_v61  ;;  %v280_v5 = vld [vmem:[%s1859_s1 + $0x7d0] sm:$0xff]  ;;  %v810_v7 = vpack.c.bf16 %v282_v3, %v278_v2 }
  0x6c   :  { %917 = vmatprep.subr.bf16.mxu1 %v916_v9  ;;  %v938_v8 = vpack.c.bf16 %v284_v6, %v280_v5  ;;  %v16_v9 = vld [vmem:[%s1860_s0 + $0x10] sm:$0xff] }
  0x6e   :  { %791 = vmatpush1.bf16.msra.mxu0 %v790_v15  ;;  %v28_v15 = vld [vmem:[%s1860_s0 + $0x70] sm:$0xff] }
  0x6f   :  { %919 = vmatpush1.bf16.msra.mxu1 %v918_v16  ;;  %793 = vmatprep.subr.bf16.mxu0 %v792_v17  ;;  %v288_v16 = vlaneseq }
  0x70   :  { %921 = vmatprep.subr.bf16.mxu1 %v920_v21 }
  0x71   :  { %v289_v17 = vshrl.u32 %v288_v16, 7 }
  0x72   :  { %795 = vmatpush1.bf16.msra.mxu0 %v794_v27 }
  0x73   :  { %923 = vmatpush1.bf16.msra.mxu1 %v922_v28  ;;  %797 = vmatprep.subr.bf16.mxu0 %v796_v29  ;;  %v290_v18 = vsub.s32 0, %v289_v17  ;;  %v298_v20 = vsub.s32 2, %v289_v17  ;;  %v294_v21 = vsub.s32 1, %v289_v17  ;;  %v302_v22 = vsub.s32 3, %v289_v17 }
  0x74   :  { %925 = vmatprep.subr.bf16.mxu1 %v924_v33 }
  0x75   :  { %v291_v23 = vrot.slane %v286_v19, %v290_v18  ;;  %v299_v24 = vrot.slane %v286_v19, %v298_v20  ;;  %v295_v25 = vrot.slane %v286_v19, %v294_v21  ;;  %v303_v26 = vrot.slane %v286_v19, %v302_v22 }
  0x76   :  { %799 = vmatpush1.bf16.msra.mxu0 %v798_v39 }
  0x77   :  { %927 = vmatpush1.bf16.msra.mxu1 %v926_v40  ;;  %801 = vmatprep.subr.bf16.mxu0 %v800_v41 }
  0x78   :  { %929 = vmatprep.subr.bf16.mxu1 %v928_v45 }
  0x7a   :  { %803 = vmatpush1.bf16.msra.mxu0 %v802_v51 }
  0x7b   :  { %931 = vmatpush1.bf16.msra.mxu1 %v930_v52  ;;  %805 = vmatprep.subr.bf16.mxu0 %v804_v53 }
  0x7c   :  { %933 = vmatprep.subr.bf16.mxu1 %v932_v57 }
  0x7e   :  { %807 = vmatpush1.bf16.msra.mxu0 %v806_v63 }
  0x7f   :  { %935 = vmatpush1.bf16.msra.mxu1 %v934_v0  ;;  %809 = vmatprep.subr.bf16.mxu0 %v808_v1 }
  0x80   :  { %937 = vmatprep.subr.bf16.mxu1 %v936_v4 }
  0x82   :  { %811 = vmatpush1.bf16.msra.mxu0 %v810_v7 }
  0x83   :  { %939 = vmatpush1.bf16.msra.mxu1 %v938_v8 }
  0x85   :  { %462 = vmatmul.mubr.f32.vlgmr.msra.gmra.mrb[0].mxu0 %v16_v9 }
  0x86   :  { %640 = vmatmul.mubr.f32.vlgmr.msra.gmra.mrb[0].mxu1 %v16_v9  ;;  %467 = vmatprep.mubr.f32.mxu0 %v21_v10 }
  0x87   :  { %645 = vmatprep.mubr.f32.mxu1 %v21_v10 }
  0x89   :  { %468 = vmatmul.mubr.f32.gmra.mrb[2].mxu0 %v20_v11 }
  0x8a   :  { %646 = vmatmul.mubr.f32.gmra.mrb[2].mxu1 %v20_v11  ;;  %473 = vmatprep.mubr.f32.mxu0 %v25_v12 }
  0x8b   :  { %651 = vmatprep.mubr.f32.mxu1 %v25_v12 }
  0x8d   :  { %474 = vmatmul.mubr.f32.gmra.mrb[4].mxu0 %v24_v13 }
  0x8e   :  { %652 = vmatmul.mubr.f32.gmra.mrb[4].mxu1 %v24_v13  ;;  %479 = vmatprep.mubr.f32.mxu0 %v29_v14 }
  0x8f   :  { %657 = vmatprep.mubr.f32.mxu1 %v29_v14 }
  0x91   :  { %480 = vmatmul.mubr.f32.gmra.mrb[6].mxu0 %v28_v15 }
  0x92   :  { %658 = vmatmul.mubr.f32.gmra.mrb[6].mxu1 %v28_v15 }
 0x158   :  { %v463_v27 = vpop.f32.mrb[0].mxu0 }
 0x159   :  { %v940_v28 = vadd.f32 %v463_v27, %v291_v23  ;;  %v641_v29 = vpop.f32.mrb[0].mxu1  ;;  %v465_v30 = vpop.f32.mrb[1].mxu0 }
 0x15a   :  { %v948_v31 = vadd.f32 %v641_v29, %v299_v24  ;;  %v941_v32 = vadd.f32 %v465_v30, %v295_v25  ;;  %v643_v33 = vpop.f32.mrb[1].mxu1 }
 0x15b   :  { %664 = vst [vmem:[%s1862_s3] sm:$0xff] %v940_v28  ;;  %v949_v34 = vadd.f32 %v643_v33, %v303_v26 }
 0x15c   :  { %666 = vst [vmem:[%s1862_s3 + $0x10] sm:$0xff] %v948_v31  ;;  %665 = vst [vmem:[%s1862_s3 + $0x8] sm:$0xff] %v941_v32  ;;  %v469_v35 = vpop.f32.mrb[2].mxu0 }
 0x15d   :  { %667 = vst [vmem:[%s1862_s3 + $0x18] sm:$0xff] %v949_v34  ;;  %v942_v36 = vadd.f32 %v469_v35, %v291_v23  ;;  %v647_v37 = vpop.f32.mrb[2].mxu1  ;;  %v471_v38 = vpop.f32.mrb[3].mxu0 }
 0x15e   :  { %v950_v39 = vadd.f32 %v647_v37, %v299_v24  ;;  %v943_v40 = vadd.f32 %v471_v38, %v295_v25  ;;  %v649_v41 = vpop.f32.mrb[3].mxu1 }
 0x15f   :  { %668 = vst [vmem:[%s1862_s3 + $0x20] sm:$0xff] %v942_v36  ;;  %v951_v42 = vadd.f32 %v649_v41, %v303_v26 }
 0x160   :  { %670 = vst [vmem:[%s1862_s3 + $0x30] sm:$0xff] %v950_v39  ;;  %669 = vst [vmem:[%s1862_s3 + $0x28] sm:$0xff] %v943_v40  ;;  %v475_v43 = vpop.f32.mrb[4].mxu0 }
 0x161   :  { %671 = vst [vmem:[%s1862_s3 + $0x38] sm:$0xff] %v951_v42  ;;  %v944_v44 = vadd.f32 %v475_v43, %v291_v23  ;;  %v653_v45 = vpop.f32.mrb[4].mxu1  ;;  %v477_v46 = vpop.f32.mrb[5].mxu0 }
 0x162   :  { %v952_v47 = vadd.f32 %v653_v45, %v299_v24  ;;  %v945_v48 = vadd.f32 %v477_v46, %v295_v25  ;;  %v655_v49 = vpop.f32.mrb[5].mxu1 }
 0x163   :  { %672 = vst [vmem:[%s1862_s3 + $0x40] sm:$0xff] %v944_v44  ;;  %v953_v50 = vadd.f32 %v655_v49, %v303_v26 }
 0x164   :  { %674 = vst [vmem:[%s1862_s3 + $0x50] sm:$0xff] %v952_v47  ;;  %673 = vst [vmem:[%s1862_s3 + $0x48] sm:$0xff] %v945_v48  ;;  %v481_v51 = vpop.f32.mrb[6].mxu0 }
 0x165   :  { %675 = vst [vmem:[%s1862_s3 + $0x58] sm:$0xff] %v953_v50  ;;  %v946_v52 = vadd.f32 %v481_v51, %v291_v23  ;;  %v659_v53 = vpop.f32.mrb[6].mxu1  ;;  %v483_v54 = vpop.f32.mrb[7].mxu0 }
 0x166   :  { %v954_v55 = vadd.f32 %v659_v53, %v299_v24  ;;  %v947_v56 = vadd.f32 %v483_v54, %v295_v25  ;;  %v661_v57 = vpop.f32.mrb[7].mxu1 }
 0x167   :  { %676 = vst [vmem:[%s1862_s3 + $0x60] sm:$0xff] %v946_v52  ;;  %v955_v58 = vadd.f32 %v661_v57, %v303_v26 }
 0x168   :  { %678 = vst [vmem:[%s1862_s3 + $0x70] sm:$0xff] %v954_v55  ;;  %677 = vst [vmem:[%s1862_s3 + $0x68] sm:$0xff] %v947_v56 }
 0x169   :  { %679 = vst [vmem:[%s1862_s3 + $0x78] sm:$0xff] %v955_v58 }

// kernel: reverse.10
= control target key start
LH: loop header
LB: loop body
LE: loop exit
PB: predicated region body
PF: predicated region fallthrough
CT: control target
= control target key end

     0   :  { %s680_s0 = inlined_call_operand.vmem [shape: f32[2,8,64,7], index: 0, kind: input, shape index: {}]   ;;  %s681_s1 = inlined_call_operand.vmem [shape: f32[2,8,64,7], index: 1, kind: output, shape index: {}]  }
   0x1   :  { %v224_v0 = vld [vmem:[%s680_s0 + $0xc] sm:$0x3]  ;;  %v225_v1 = vld [vmem:[%s680_s0 + $0x1a] sm:$0x3]  ;;  %v227_v2 = vld [vmem:[%s680_s0 + $0x28] sm:$0x3] }
   0x2   :  { %4 = vst [vmem:[%s681_s1] sm:$0x3] %v224_v0  ;;  %226 = vst [vmem:[%s681_s1 + $0xe] sm:$0x3] %v225_v1  ;;  %v229_v3 = vld [vmem:[%s680_s0 + $0x36] sm:$0x3] }
   0x3   :  { %228 = vst [vmem:[%s681_s1 + $0x1c] sm:$0x3] %v227_v2  ;;  %v231_v4 = vld [vmem:[%s680_s0 + $0x44] sm:$0x3]  ;;  %v233_v5 = vld [vmem:[%s680_s0 + $0x52] sm:$0x3] }
   0x4   :  { %230 = vst [vmem:[%s681_s1 + $0x2a] sm:$0x3] %v229_v3  ;;  %232 = vst [vmem:[%s681_s1 + $0x38] sm:$0x3] %v231_v4  ;;  %v235_v6 = vld [vmem:[%s680_s0 + $0x60] sm:$0x3] }
   0x5   :  { %234 = vst [vmem:[%s681_s1 + $0x46] sm:$0x3] %v233_v5  ;;  %v237_v7 = vld [vmem:[%s680_s0 + $0x6e] sm:$0x3]  ;;  %v239_v8 = vld [vmem:[%s680_s0 + $0xa] sm:$0x3] }
   0x6   :  { %236 = vst [vmem:[%s681_s1 + $0x54] sm:$0x3] %v235_v6  ;;  %238 = vst [vmem:[%s681_s1 + $0x62] sm:$0x3] %v237_v7  ;;  %v241_v9 = vld [vmem:[%s680_s0 + $0x18] sm:$0x3] }
   0x7   :  { %240 = vst [vmem:[%s681_s1 + $0x2] sm:$0x3] %v239_v8  ;;  %v243_v10 = vld [vmem:[%s680_s0 + $0x26] sm:$0x3]  ;;  %v245_v11 = vld [vmem:[%s680_s0 + $0x34] sm:$0x3] }
   0x8   :  { %242 = vst [vmem:[%s681_s1 + $0x10] sm:$0x3] %v241_v9  ;;  %244 = vst [vmem:[%s681_s1 + $0x1e] sm:$0x3] %v243_v10  ;;  %v247_v12 = vld [vmem:[%s680_s0 + $0x42] sm:$0x3] }
   0x9   :  { %246 = vst [vmem:[%s681_s1 + $0x2c] sm:$0x3] %v245_v11  ;;  %v249_v13 = vld [vmem:[%s680_s0 + $0x50] sm:$0x3]  ;;  %v251_v14 = vld [vmem:[%s680_s0 + $0x5e] sm:$0x3] }
   0xa   :  { %248 = vst [vmem:[%s681_s1 + $0x3a] sm:$0x3] %v247_v12  ;;  %250 = vst [vmem:[%s681_s1 + $0x48] sm:$0x3] %v249_v13  ;;  %v253_v15 = vld [vmem:[%s680_s0 + $0x6c] sm:$0x3] }
   0xb   :  { %252 = vst [vmem:[%s681_s1 + $0x56] sm:$0x3] %v251_v14  ;;  %v255_v16 = vld [vmem:[%s680_s0 + $0x8] sm:$0x3]  ;;  %v257_v17 = vld [vmem:[%s680_s0 + $0x16] sm:$0x3] }
   0xc   :  { %254 = vst [vmem:[%s681_s1 + $0x64] sm:$0x3] %v253_v15  ;;  %256 = vst [vmem:[%s681_s1 + $0x4] sm:$0x3] %v255_v16  ;;  %v259_v18 = vld [vmem:[%s680_s0 + $0x24] sm:$0x3] }
   0xd   :  { %258 = vst [vmem:[%s681_s1 + $0x12] sm:$0x3] %v257_v17  ;;  %v261_v19 = vld [vmem:[%s680_s0 + $0x32] sm:$0x3]  ;;  %v263_v20 = vld [vmem:[%s680_s0 + $0x40] sm:$0x3] }
   0xe   :  { %260 = vst [vmem:[%s681_s1 + $0x20] sm:$0x3] %v259_v18  ;;  %262 = vst [vmem:[%s681_s1 + $0x2e] sm:$0x3] %v261_v19  ;;  %v265_v21 = vld [vmem:[%s680_s0 + $0x4e] sm:$0x3] }
   0xf   :  { %264 = vst [vmem:[%s681_s1 + $0x3c] sm:$0x3] %v263_v20  ;;  %v267_v22 = vld [vmem:[%s680_s0 + $0x5c] sm:$0x3]  ;;  %v269_v23 = vld [vmem:[%s680_s0 + $0x6a] sm:$0x3] }
  0x10   :  { %266 = vst [vmem:[%s681_s1 + $0x4a] sm:$0x3] %v265_v21  ;;  %268 = vst [vmem:[%s681_s1 + $0x58] sm:$0x3] %v267_v22  ;;  %v271_v24 = vld [vmem:[%s680_s0 + $0x6] sm:$0x3] }
  0x11   :  { %270 = vst [vmem:[%s681_s1 + $0x66] sm:$0x3] %v269_v23  ;;  %v273_v25 = vld [vmem:[%s680_s0 + $0x14] sm:$0x3]  ;;  %v275_v26 = vld [vmem:[%s680_s0 + $0x22] sm:$0x3] }
  0x12   :  { %272 = vst [vmem:[%s681_s1 + $0x6] sm:$0x3] %v271_v24  ;;  %274 = vst [vmem:[%s681_s1 + $0x14] sm:$0x3] %v273_v25  ;;  %v277_v27 = vld [vmem:[%s680_s0 + $0x30] sm:$0x3] }
  0x13   :  { %276 = vst [vmem:[%s681_s1 + $0x22] sm:$0x3] %v275_v26  ;;  %v279_v28 = vld [vmem:[%s680_s0 + $0x3e] sm:$0x3]  ;;  %v281_v29 = vld [vmem:[%s680_s0 + $0x4c] sm:$0x3] }
  0x14   :  { %278 = vst [vmem:[%s681_s1 + $0x30] sm:$0x3] %v277_v27  ;;  %280 = vst [vmem:[%s681_s1 + $0x3e] sm:$0x3] %v279_v28  ;;  %v283_v30 = vld [vmem:[%s680_s0 + $0x5a] sm:$0x3] }
  0x15   :  { %282 = vst [vmem:[%s681_s1 + $0x4c] sm:$0x3] %v281_v29  ;;  %v285_v31 = vld [vmem:[%s680_s0 + $0x68] sm:$0x3]  ;;  %v287_v32 = vld [vmem:[%s680_s0 + $0x4] sm:$0x3] }
  0x16   :  { %284 = vst [vmem:[%s681_s1 + $0x5a] sm:$0x3] %v283_v30  ;;  %286 = vst [vmem:[%s681_s1 + $0x68] sm:$0x3] %v285_v31  ;;  %v289_v33 = vld [vmem:[%s680_s0 + $0x12] sm:$0x3] }
  0x17   :  { %288 = vst [vmem:[%s681_s1 + $0x8] sm:$0x3] %v287_v32  ;;  %v291_v34 = vld [vmem:[%s680_s0 + $0x20] sm:$0x3]  ;;  %v293_v35 = vld [vmem:[%s680_s0 + $0x2e] sm:$0x3] }
  0x18   :  { %290 = vst [vmem:[%s681_s1 + $0x16] sm:$0x3] %v289_v33  ;;  %292 = vst [vmem:[%s681_s1 + $0x24] sm:$0x3] %v291_v34  ;;  %v295_v36 = vld [vmem:[%s680_s0 + $0x3c] sm:$0x3] }
  0x19   :  { %294 = vst [vmem:[%s681_s1 + $0x32] sm:$0x3] %v293_v35  ;;  %v297_v37 = vld [vmem:[%s680_s0 + $0x4a] sm:$0x3]  ;;  %v299_v38 = vld [vmem:[%s680_s0 + $0x58] sm:$0x3] }
  0x1a   :  { %296 = vst [vmem:[%s681_s1 + $0x40] sm:$0x3] %v295_v36  ;;  %298 = vst [vmem:[%s681_s1 + $0x4e] sm:$0x3] %v297_v37  ;;  %v301_v39 = vld [vmem:[%s680_s0 + $0x66] sm:$0x3] }
  0x1b   :  { %300 = vst [vmem:[%s681_s1 + $0x5c] sm:$0x3] %v299_v38  ;;  %v303_v40 = vld [vmem:[%s680_s0 + $0x2] sm:$0x3]  ;;  %v305_v41 = vld [vmem:[%s680_s0 + $0x10] sm:$0x3] }
  0x1c   :  { %302 = vst [vmem:[%s681_s1 + $0x6a] sm:$0x3] %v301_v39  ;;  %304 = vst [vmem:[%s681_s1 + $0xa] sm:$0x3] %v303_v40  ;;  %v307_v42 = vld [vmem:[%s680_s0 + $0x1e] sm:$0x3] }
  0x1d   :  { %306 = vst [vmem:[%s681_s1 + $0x18] sm:$0x3] %v305_v41  ;;  %v309_v43 = vld [vmem:[%s680_s0 + $0x2c] sm:$0x3]  ;;  %v311_v44 = vld [vmem:[%s680_s0 + $0x3a] sm:$0x3] }
  0x1e   :  { %308 = vst [vmem:[%s681_s1 + $0x26] sm:$0x3] %v307_v42  ;;  %310 = vst [vmem:[%s681_s1 + $0x34] sm:$0x3] %v309_v43  ;;  %v313_v45 = vld [vmem:[%s680_s0 + $0x48] sm:$0x3] }
  0x1f   :  { %312 = vst [vmem:[%s681_s1 + $0x42] sm:$0x3] %v311_v44  ;;  %v315_v46 = vld [vmem:[%s680_s0 + $0x56] sm:$0x3]  ;;  %v317_v47 = vld [vmem:[%s680_s0 + $0x64] sm:$0x3] }
  0x20   :  { %314 = vst [vmem:[%s681_s1 + $0x50] sm:$0x3] %v313_v45  ;;  %316 = vst [vmem:[%s681_s1 + $0x5e] sm:$0x3] %v315_v46  ;;  %v193_v48 = vld [vmem:[%s680_s0] sm:$0x3] }
  0x21   :  { %318 = vst [vmem:[%s681_s1 + $0x6c] sm:$0x3] %v317_v47  ;;  %v320_v49 = vld [vmem:[%s680_s0 + $0xe] sm:$0x3]  ;;  %v322_v50 = vld [vmem:[%s680_s0 + $0x1c] sm:$0x3] }
  0x22   :  { %319 = vst [vmem:[%s681_s1 + $0xc] sm:$0x3] %v193_v48  ;;  %321 = vst [vmem:[%s681_s1 + $0x1a] sm:$0x3] %v320_v49  ;;  %v324_v51 = vld [vmem:[%s680_s0 + $0x2a] sm:$0x3] }
  0x23   :  { %323 = vst [vmem:[%s681_s1 + $0x28] sm:$0x3] %v322_v50  ;;  %v326_v52 = vld [vmem:[%s680_s0 + $0x38] sm:$0x3]  ;;  %v328_v53 = vld [vmem:[%s680_s0 + $0x46] sm:$0x3] }
  0x24   :  { %325 = vst [vmem:[%s681_s1 + $0x36] sm:$0x3] %v324_v51  ;;  %327 = vst [vmem:[%s681_s1 + $0x44] sm:$0x3] %v326_v52  ;;  %v330_v54 = vld [vmem:[%s680_s0 + $0x54] sm:$0x3] }
  0x25   :  { %329 = vst [vmem:[%s681_s1 + $0x52] sm:$0x3] %v328_v53  ;;  %v332_v55 = vld [vmem:[%s680_s0 + $0x62] sm:$0x3]  ;;  %331 = vst [vmem:[%s681_s1 + $0x60] sm:$0x3] %v330_v54 }
  0x26   :  { %333 = vst [vmem:[%s681_s1 + $0x6e] sm:$0x3] %v332_v55 }

// kernel: forward.34
= control target key start
LH: loop header
LB: loop body
LE: loop exit
PB: predicated region body
PF: predicated region fallthrough
CT: control target
= control target key end

     0   :  { %v538_v7 = vmov 0.0   ;;  %vm43_vm0 = vcmask 130048   ;;  %s816_s0 = inlined_call_operand.vmem [shape: f32[16,16], index: 0, kind: input, shape index: {}]   ;;  %s817_s1 = inlined_call_operand.vmem [shape: f32[2,16,512], index: 1, kind: input, shape index: {}]   ;;  %s818_s2 = inlined_call_operand.vmem [shape: f32[2,16,512], index: 2, kind: input, shape index: {}]   ;;  %s819_s3 = inlined_call_operand.vmem [shape: f32[2,16,512], index: 3, kind: output, shape index: {0}]   ;;  %s820_s4 = inlined_call_operand.hbm [shape: f32[2,16,512], index: 4, kind: output, shape index: {1}]  }
   0x1   :  { %v18_v0 = vld [vmem:[%s817_s1 + $0x8] sm:$0xff]  ;;  %v20_v5 = vld [vmem:[%s817_s1 + $0x18] sm:$0xff]  ;;  %114 = vmatprep.mubr.f32.mxu0 %v538_v7  ;;  %191 = vmatprep.mubr.f32.mxu1 %v538_v7  ;;  %v17_v11 = vld [vmem:[%s817_s1] sm:$0xff] }
   0x2   :  { %v22_v1 = vld [vmem:[%s817_s1 + $0x28] sm:$0xff]  ;;  %v24_v6 = vld [vmem:[%s817_s1 + $0x38] sm:$0xff]  ;;  %v21_v14 = vld [vmem:[%s817_s1 + $0x20] sm:$0xff] }
   0x3   :  { %v26_v2 = vld [vmem:[%s818_s2 + $0x8] sm:$0xff]  ;;  %v28_v9 = vld [vmem:[%s818_s2 + $0x18] sm:$0xff]  ;;  %v25_v15 = vld [vmem:[%s818_s2] sm:$0xff] }
   0x4   :  { %v30_v3 = vld [vmem:[%s818_s2 + $0x28] sm:$0xff]  ;;  %v579_v4 = vadd.f32 %v26_v2, %v18_v0  ;;  %v32_v10 = vld [vmem:[%s818_s2 + $0x38] sm:$0xff]  ;;  %v600_v12 = vadd.f32 %v28_v9, %v20_v5  ;;  %v29_v16 = vld [vmem:[%s818_s2 + $0x20] sm:$0xff]  ;;  %v615_v18 = vadd.f32 %v25_v15, %v17_v11 }
   0x5   :  { %v589_v8 = vadd.f32 %v30_v3, %v22_v1  ;;  %v602_v13 = vadd.f32 %v32_v10, %v24_v6  ;;  %v617_v19 = vadd.f32 %v29_v16, %v21_v14  ;;  %v19_v20 = vld [vmem:[%s817_s1 + $0x10] sm:$0xff]  ;;  %v467_v26 = vld [vmem:[%s817_s1 + $0x48] sm:$0xff]  ;;  %v41_v29 = vld [vmem:[%s816_s0] sm:$0xff] }
   0x6   :  { %v23_v21 = vld [vmem:[%s817_s1 + $0x30] sm:$0xff]  ;;  %v471_v30 = vld [vmem:[%s817_s1 + $0x68] sm:$0xff]  ;;  %v469_v35 = vld [vmem:[%s817_s1 + $0x58] sm:$0xff] }
   0x7   :  { %v494_v17 = vpack.c.bf16 %v589_v8, %v579_v4  ;;  %v27_v22 = vld [vmem:[%s818_s2 + $0x10] sm:$0xff]  ;;  %v498_v23 = vpack.c.bf16 %v602_v13, %v600_v12  ;;  %v496_v27 = vpack.c.bf16 %v617_v19, %v615_v18  ;;  %v475_v31 = vld [vmem:[%s818_s2 + $0x48] sm:$0xff]  ;;  %v473_v36 = vld [vmem:[%s817_s1 + $0x78] sm:$0xff] }
   0x8   :  { %v31_v24 = vld [vmem:[%s818_s2 + $0x30] sm:$0xff]  ;;  %v633_v25 = vadd.f32 %v27_v22, %v19_v20  ;;  %v479_v32 = vld [vmem:[%s818_s2 + $0x68] sm:$0xff]  ;;  %v654_v33 = vadd.f32 %v475_v31, %v467_v26  ;;  %v477_v37 = vld [vmem:[%s818_s2 + $0x58] sm:$0xff] }
   0x9   :  { %495 = vmatprep.subr.bf16.mxu0 %v494_v17  ;;  %v640_v28 = vadd.f32 %v31_v24, %v23_v21  ;;  %499 = vmatprep.subr.bf16.mxu1 %v498_v23  ;;  %v656_v34 = vadd.f32 %v479_v32, %v471_v30  ;;  %v481_v39 = vld [vmem:[%s818_s2 + $0x78] sm:$0xff]  ;;  %v672_v40 = vadd.f32 %v477_v37, %v469_v35  ;;  %v466_v41 = vld [vmem:[%s817_s1 + $0x40] sm:$0xff]  ;;  %v468_v47 = vld [vmem:[%s817_s1 + $0x50] sm:$0xff] }
   0xa   :  { %497 = vmatpush1.bf16.msra.mxu0 %v496_v27  ;;  %v470_v42 = vld [vmem:[%s817_s1 + $0x60] sm:$0xff]  ;;  %v682_v44 = vadd.f32 %v481_v39, %v473_v36  ;;  %v472_v50 = vld [vmem:[%s817_s1 + $0x70] sm:$0xff] }
   0xb   :  { %v500_v38 = vpack.c.bf16 %v640_v28, %v633_v25  ;;  %v502_v43 = vpack.c.bf16 %v656_v34, %v654_v33  ;;  %v474_v45 = vld [vmem:[%s818_s2 + $0x40] sm:$0xff]  ;;  %v476_v51 = vld [vmem:[%s818_s2 + $0x50] sm:$0xff] }
   0xc   :  { %v478_v46 = vld [vmem:[%s818_s2 + $0x60] sm:$0xff]  ;;  %v693_v48 = vadd.f32 %v474_v45, %v466_v41  ;;  %v480_v52 = vld [vmem:[%s818_s2 + $0x70] sm:$0xff]  ;;  %v506_v53 = vpack.c.bf16 %v682_v44, %v672_v40  ;;  %v709_v54 = vadd.f32 %v476_v51, %v468_v47 }
   0xd   :  { %501 = vmatpush1.bf16.msra.mxu1 %v500_v38  ;;  %v695_v49 = vadd.f32 %v478_v46, %v470_v42  ;;  %462 = vmatmul.mubr.msk.f32.vlgmr.msra.gmra.mrb[0].mxu0 %vm43_vm0, %v41_v29  ;;  %v711_v55 = vadd.f32 %v480_v52, %v472_v50 }
   0xe   :  { %503 = vmatprep.subr.bf16.mxu0 %v502_v43 }
   0xf   :  { %10 = vsyncpa [#allocation3], 0  ;;  %v504_v56 = vpack.c.bf16 %v695_v49, %v693_v48  ;;  %120 = vmatprep.mubr.f32.mxu0 %v538_v7  ;;  %v42_v57 = vld [vmem:[%s816_s0 + $0x8] sm:$0xff]  ;;  %507 = vmatprep.subr.bf16.mxu1 %v506_v53  ;;  %v508_v58 = vpack.c.bf16 %v711_v55, %v709_v54  ;;  %s539_s18 = smov [#allocation2]  }
  0x10   :  { %464 = vmatmul.mubr.msk.f32.vlgmr.msra.gmra.mrb[0].mxu1 %vm43_vm0, %v41_v29  ;;  %s449_s19 = sshll.u32 %s539_s18, 4  ;;  %s779_s19 = int_to_ptr.vmem [resolvable:$true] %s449_s19 }
  0x11   :  { %505 = vmatpush1.bf16.msra.mxu0 %v504_v56  ;;  %197 = vmatprep.mubr.f32.mxu1 %v538_v7  ;;  %s514_s5 = scalar_lea.vmem %s779_s19, 2048  ;;  %p519_p1 = scmp.lt.s32.totalorder %s779_s19, %s779_s19 }
  0x12   :  { %509 = vmatpush1.bf16.msra.mxu1 %v508_v58  ;;  %463 = vmatmul.mubr.msk.f32.gmra.mrb[2].mxu0 %vm43_vm0, %v42_v57  ;;  %p515_p0 = scmp.ne.s32.totalorder %s779_s19, %s514_s5  ;;  %p520_p2 = scmp.lt.s32.totalorder %s514_s5, %s514_s5 }
  0x13   :  { %326 = vmatprep.mubr.f32.mxu0 %v538_v7 }
  0x14   :  { %465 = vmatmul.mubr.msk.f32.gmra.mrb[2].mxu1 %vm43_vm0, %v42_v57  ;;  %p521_p3 = por %p520_p2, %p519_p1 }
  0x15   :  { %403 = vmatprep.mubr.f32.mxu1 %v538_v7 }
  0x16   :  { %482 = vmatmul.mubr.msk.f32.vlgmr.msra.gmra.mrb[4].mxu0 %vm43_vm0, %v41_v29  ;;  %p522_p4 = pnand %p521_p3, %p515_p0 }
  0x17   :  { %332 = vmatprep.mubr.f32.mxu0 %v538_v7 }
  0x18   :  { %484 = vmatmul.mubr.msk.f32.vlgmr.msra.gmra.mrb[4].mxu1 %vm43_vm0, %v41_v29 }
  0x19   :  { %409 = vmatprep.mubr.f32.mxu1 %v538_v7 }
  0x1a   :  { %483 = vmatmul.mubr.msk.f32.gmra.mrb[6].mxu0 %vm43_vm0, %v42_v57 }
  0x1c   :  { %485 = vmatmul.mubr.msk.f32.gmra.mrb[6].mxu1 %vm43_vm0, %v42_v57 }
  0xe0   :  { %v116_v59 = vpop.f32.mrb[0].mxu0 }
  0xe1   :  { %204 = vst [vmem:[#allocation2] sm:$0xff] %v116_v59  ;;  %v212_v60 = vsub.f32 %v615_v18, %v116_v59  ;;  %v118_v61 = vpop.f32.mrb[1].mxu0 }
  0xe2   :  { %205 = vst [vmem:[#allocation2 + $0x8] sm:$0xff] %v118_v61  ;;  %v213_v63 = vsub.f32 %v579_v4, %v118_v61 }
  0xe3   :  { %v193_v62 = vpop.f32.mrb[0].mxu1  ;;  %220 = vst [vmem:[%s819_s3] sm:$0xff] %v212_v60 }
  0xe4   :  { %206 = vst [vmem:[#allocation2 + $0x10] sm:$0xff] %v193_v62  ;;  %v214_v0 = vsub.f32 %v633_v25, %v193_v62  ;;  %v195_v1 = vpop.f32.mrb[1].mxu1  ;;  %221 = vst [vmem:[%s819_s3 + $0x8] sm:$0xff] %v213_v63 }
  0xe5   :  { %207 = vst [vmem:[#allocation2 + $0x18] sm:$0xff] %v195_v1  ;;  %v215_v2 = vsub.f32 %v600_v12, %v195_v1  ;;  %v122_v3 = vpop.f32.mrb[2].mxu0 }
  0xe6   :  { %222 = vst [vmem:[%s819_s3 + $0x10] sm:$0xff] %v214_v0  ;;  %208 = vst [vmem:[#allocation2 + $0x20] sm:$0xff] %v122_v3  ;;  %v216_v4 = vsub.f32 %v617_v19, %v122_v3  ;;  %v124_v5 = vpop.f32.mrb[3].mxu0 }
  0xe7   :  { %223 = vst [vmem:[%s819_s3 + $0x18] sm:$0xff] %v215_v2  ;;  %v199_v6 = vpop.f32.mrb[2].mxu1  ;;  %209 = vst [vmem:[#allocation2 + $0x28] sm:$0xff] %v124_v5  ;;  %v217_v7 = vsub.f32 %v589_v8, %v124_v5 }
  0xe8   :  { %224 = vst [vmem:[%s819_s3 + $0x20] sm:$0xff] %v216_v4  ;;  %210 = vst [vmem:[#allocation2 + $0x30] sm:$0xff] %v199_v6  ;;  %v218_v9 = vsub.f32 %v640_v28, %v199_v6  ;;  %v201_v10 = vpop.f32.mrb[3].mxu1 }
  0xe9   :  { %225 = vst [vmem:[%s819_s3 + $0x28] sm:$0xff] %v217_v7  ;;  %211 = vst [vmem:[#allocation2 + $0x38] sm:$0xff] %v201_v10  ;;  %v219_v11 = vsub.f32 %v602_v13, %v201_v10  ;;  %v328_v12 = vpop.f32.mrb[4].mxu0 }
  0xea   :  { %226 = vst [vmem:[%s819_s3 + $0x30] sm:$0xff] %v218_v9  ;;  %417 = vst [vmem:[#allocation2 + $0x40] sm:$0xff] %v328_v12  ;;  %v425_v8 = vsub.f32 %v693_v48, %v328_v12  ;;  %v330_v14 = vpop.f32.mrb[5].mxu0 }
  0xeb   :  { %227 = vst [vmem:[%s819_s3 + $0x38] sm:$0xff] %v219_v11  ;;  %v405_v15 = vpop.f32.mrb[4].mxu1  ;;  %418 = vst [vmem:[#allocation2 + $0x48] sm:$0xff] %v330_v14  ;;  %v426_v16 = vsub.f32 %v654_v33, %v330_v14 }
  0xec   :  { %486 = vst [vmem:[%s819_s3 + $0x40] sm:$0xff] %v425_v8  ;;  %419 = vst [vmem:[#allocation2 + $0x50] sm:$0xff] %v405_v15  ;;  %v427_v13 = vsub.f32 %v709_v54, %v405_v15  ;;  %v407_v17 = vpop.f32.mrb[5].mxu1 }
  0xed   :  { %487 = vst [vmem:[%s819_s3 + $0x48] sm:$0xff] %v426_v16  ;;  %420 = vst [vmem:[#allocation2 + $0x58] sm:$0xff] %v407_v17  ;;  %v428_v18 = vsub.f32 %v672_v40, %v407_v17  ;;  %v334_v19 = vpop.f32.mrb[6].mxu0 }
  0xee   :  { %488 = vst [vmem:[%s819_s3 + $0x50] sm:$0xff] %v427_v13  ;;  %421 = vst [vmem:[#allocation2 + $0x60] sm:$0xff] %v334_v19  ;;  %v429_v20 = vsub.f32 %v695_v49, %v334_v19  ;;  %v336_v21 = vpop.f32.mrb[7].mxu0 }
  0xef   :  { %489 = vst [vmem:[%s819_s3 + $0x58] sm:$0xff] %v428_v18  ;;  %v411_v22 = vpop.f32.mrb[6].mxu1  ;;  %422 = vst [vmem:[#allocation2 + $0x68] sm:$0xff] %v336_v21  ;;  %v430_v23 = vsub.f32 %v656_v34, %v336_v21 }
  0xf0   :  { %490 = vst [vmem:[%s819_s3 + $0x60] sm:$0xff] %v429_v20  ;;  %423 = vst [vmem:[#allocation2 + $0x70] sm:$0xff] %v411_v22  ;;  %v431_v24 = vsub.f32 %v711_v55, %v411_v22  ;;  %v413_v25 = vpop.f32.mrb[7].mxu1 }
  0xf1   :  { %491 = vst [vmem:[%s819_s3 + $0x68] sm:$0xff] %v430_v23  ;;  %424 = vst [vmem:[#allocation2 + $0x78] sm:$0xff] %v413_v25  ;;  %v432_v26 = vsub.f32 %v682_v44, %v413_v25 }
  0xf2   :  { %492 = vst [vmem:[%s819_s3 + $0x70] sm:$0xff] %v431_v24 }
  0xf3   :  { %525 = shalt.err (!%p522_p4)
}
  0xf4   :  { %s526_s8 = scalar_lea.hbm %s820_s4, 2048 }
  0xf5   :  { %p527_p5 = scmp.ne.s32.totalorder %s820_s4, %s526_s8  ;;  %p530_p6 = scmp.lt.u32.totalorder %s526_s8, %s820_s4 }
  0xf7   :  { %p532_p7 = pnand %p530_p6, %p527_p5 }
  0xf9   :  { %535 = shalt.err (!%p532_p7)
}
  0xfa   :  { %s540_s13 = smov 512   ;;  %s541_s14 = smov 32   ;;  %493 = vst [vmem:[%s819_s3 + $0x78] sm:$0xff] %v432_v26 }
  0xfb   :  { %455 = dma.vmem_to_hbm [thread:$0]  %s779_s19, 2048, %s820_s4, [#allocation3], %s540_s13, %s540_s13, %s541_s14  }
  0xfc   :  { %536 = dma.done.wait [#allocation3], 2048  }
  0xfd   :  { %537 = vsyncadd [#allocation3], 4294965248 }
  0xfe   :  { %461 = vsyncpa [#allocation3], 1 }

// kernel: forward.35
= control target key start
LH: loop header
LB: loop body
LE: loop exit
PB: predicated region body
PF: predicated region fallthrough
CT: control target
= control target key end

     0   :  { %s2845_s12 = smov 0   ;;  %s2847_s13 = smov 0   ;;  %s4076_s0 = inlined_call_operand.vmem [shape: f32[32,512], index: 0, kind: input, shape index: {}]   ;;  %s4077_s1 = inlined_call_operand.vmem [shape: f32[512,2048], index: 1, kind: input, shape index: {}]   ;;  %s4078_s2 = inlined_call_operand.vmem [shape: f32[2048,512], index: 2, kind: input, shape index: {}]   ;;  %s4079_s3 = inlined_call_operand.vmem [shape: f32[32,512], index: 3, kind: output, shape index: {}]  }
   0x1   :  { %s2849_s14 = smov 0  }
   0x2 LB: > { %s2861_s15 = sadd.s32 4294967295, %s2822_s14   ;;  %s2864_s16 = sadd.s32 1, %s2822_s14   ;;  %s2822_s14 = sphi %s2849_s14, %s4082_s14   ;;  %s2818_s13 = sphi %s2847_s13, %s4081_s13   ;;  %s2814_s12 = sphi %s2845_s12, %s4080_s12  }
   0x3   : > { %s38_s17 = ssub.s32 %s2822_s14, %s2864_s16  ;;  %s41_s18 = sadd.s32 1, %s2818_s13 }
   0x4   : > { %p39_p0 = scmp.eq.s32.totalorder %s38_s17, 0  ;;  %p48_p1 = scmp.ne.s32.totalorder %s2818_s13, %s2814_s12 }
   0x5   : > { %p49_p2 = scmp.eq.s32.totalorder %s2822_s14, 0  ;;  %p2184_p4 = scmp.ge.s32.totalorder %s2822_s14, 4 }
   0x6   : > { %s2873_s19 = scalar_select %p39_p0, %s2818_s13, %s41_s18  }
   0x7   : > { %p50_p3 = por %p49_p2, %p48_p1  ;;  %124 = sbr.rel (%p2184_p4) target bundleno = 146 (0x92), region = 20 }
   0xe   : > { %127 = sbr.rel (!%p50_p3) target bundleno = 146 (0x92), region = 24  ;;  %s129_s20 = sand.u32 (%p50_p3), 1, %s2818_s13  }
   0xf   : > { %s2197_s21 = sshll.u32 (%p50_p3), %s2822_s14, 5  ;;  %s2185_s22 = sshll.u32 (%p50_p3), %s129_s20, 11 }
  0x10   : > { %s2881_s25 = scalar_lea.vmem (%p50_p3), %s4077_s1, %s2197_s21  ;;  %s2886_s26 = scalar_lea.vmem (%p50_p3), [#allocation3], %s2185_s22 }
  0x11   : > { %v147_v0 = vld [vmem:[%s2881_s25] sm:$0xff] (%p50_p3)  ;;  %v149_v1 = vld [vmem:[%s2881_s25 + $0x8] sm:$0xff] (%p50_p3)  ;;  %v151_v2 = vld [vmem:[%s2881_s25 + $0x10] sm:$0xff] (%p50_p3) }
  0x12   : > { %148 = vst [vmem:[%s2886_s26] sm:$0xff] (%p50_p3), %v147_v0  ;;  %150 = vst [vmem:[%s2886_s26 + $0x8] sm:$0xff] (%p50_p3), %v149_v1  ;;  %v153_v3 = vld [vmem:[%s2881_s25 + $0x18] sm:$0xff] (%p50_p3)  ;;  %v155_v4 = vld [vmem:[%s2881_s25 + $0x80] sm:$0xff] (%p50_p3) }
  0x13   : > { %152 = vst [vmem:[%s2886_s26 + $0x10] sm:$0xff] (%p50_p3), %v151_v2  ;;  %v157_v5 = vld [vmem:[%s2881_s25 + $0x88] sm:$0xff] (%p50_p3)  ;;  %154 = vst [vmem:[%s2886_s26 + $0x18] sm:$0xff] (%p50_p3), %v153_v3  ;;  %v159_v6 = vld [vmem:[%s2881_s25 + $0x90] sm:$0xff] (%p50_p3) }
  0x14   : > { %156 = vst [vmem:[%s2886_s26 + $0x20] sm:$0xff] (%p50_p3), %v155_v4  ;;  %158 = vst [vmem:[%s2886_s26 + $0x28] sm:$0xff] (%p50_p3), %v157_v5  ;;  %v161_v7 = vld [vmem:[%s2881_s25 + $0x98] sm:$0xff] (%p50_p3)  ;;  %v163_v8 = vld [vmem:[%s2881_s25 + $0x100] sm:$0xff] (%p50_p3) }
  0x15   : > { %160 = vst [vmem:[%s2886_s26 + $0x30] sm:$0xff] %v159_v6  ;;  %162 = vst [vmem:[%s2886_s26 + $0x38] sm:$0xff] %v161_v7  ;;  %v165_v9 = vld [vmem:[%s2881_s25 + $0x108] sm:$0xff]  ;;  %v167_v10 = vld [vmem:[%s2881_s25 + $0x110] sm:$0xff] }
  0x16   : > { %164 = vst [vmem:[%s2886_s26 + $0x40] sm:$0xff] %v163_v8  ;;  %v169_v11 = vld [vmem:[%s2881_s25 + $0x118] sm:$0xff]  ;;  %166 = vst [vmem:[%s2886_s26 + $0x48] sm:$0xff] %v165_v9  ;;  %v171_v12 = vld [vmem:[%s2881_s25 + $0x180] sm:$0xff] }
  0x17   : > { %168 = vst [vmem:[%s2886_s26 + $0x50] sm:$0xff] %v167_v10  ;;  %170 = vst [vmem:[%s2886_s26 + $0x58] sm:$0xff] %v169_v11  ;;  %v173_v13 = vld [vmem:[%s2881_s25 + $0x188] sm:$0xff]  ;;  %v175_v14 = vld [vmem:[%s2881_s25 + $0x190] sm:$0xff] }
  0x18   : > { %172 = vst [vmem:[%s2886_s26 + $0x60] sm:$0xff] %v171_v12  ;;  %174 = vst [vmem:[%s2886_s26 + $0x68] sm:$0xff] %v173_v13  ;;  %v177_v15 = vld [vmem:[%s2881_s25 + $0x198] sm:$0xff]  ;;  %v179_v16 = vld [vmem:[%s2881_s25 + $0x200] sm:$0xff] }
  0x19   : > { %176 = vst [vmem:[%s2886_s26 + $0x70] sm:$0xff] %v175_v14  ;;  %v181_v17 = vld [vmem:[%s2881_s25 + $0x208] sm:$0xff]  ;;  %178 = vst [vmem:[%s2886_s26 + $0x78] sm:$0xff] %v177_v15  ;;  %v183_v18 = vld [vmem:[%s2881_s25 + $0x210] sm:$0xff] }
  0x1a   : > { %180 = vst [vmem:[%s2886_s26 + $0x80] sm:$0xff] %v179_v16  ;;  %182 = vst [vmem:[%s2886_s26 + $0x88] sm:$0xff] %v181_v17  ;;  %v185_v19 = vld [vmem:[%s2881_s25 + $0x218] sm:$0xff]  ;;  %v187_v20 = vld [vmem:[%s2881_s25 + $0x280] sm:$0xff] }
  0x1b   : > { %184 = vst [vmem:[%s2886_s26 + $0x90] sm:$0xff] %v183_v18  ;;  %186 = vst [vmem:[%s2886_s26 + $0x98] sm:$0xff] %v185_v19  ;;  %v189_v21 = vld [vmem:[%s2881_s25 + $0x288] sm:$0xff]  ;;  %v191_v22 = vld [vmem:[%s2881_s25 + $0x290] sm:$0xff] }
  0x1c   : > { %188 = vst [vmem:[%s2886_s26 + $0xa0] sm:$0xff] %v187_v20  ;;  %v193_v23 = vld [vmem:[%s2881_s25 + $0x298] sm:$0xff]  ;;  %190 = vst [vmem:[%s2886_s26 + $0xa8] sm:$0xff] %v189_v21  ;;  %v195_v24 = vld [vmem:[%s2881_s25 + $0x300] sm:$0xff] }
  0x1d   : > { %192 = vst [vmem:[%s2886_s26 + $0xb0] sm:$0xff] %v191_v22  ;;  %194 = vst [vmem:[%s2886_s26 + $0xb8] sm:$0xff] %v193_v23  ;;  %v197_v25 = vld [vmem:[%s2881_s25 + $0x308] sm:$0xff]  ;;  %v199_v26 = vld [vmem:[%s2881_s25 + $0x310] sm:$0xff] }
  0x1e   : > { %196 = vst [vmem:[%s2886_s26 + $0xc0] sm:$0xff] %v195_v24  ;;  %198 = vst [vmem:[%s2886_s26 + $0xc8] sm:$0xff] %v197_v25  ;;  %v201_v27 = vld [vmem:[%s2881_s25 + $0x318] sm:$0xff]  ;;  %v203_v28 = vld [vmem:[%s2881_s25 + $0x380] sm:$0xff] }
  0x1f   : > { %200 = vst [vmem:[%s2886_s26 + $0xd0] sm:$0xff] %v199_v26  ;;  %v205_v29 = vld [vmem:[%s2881_s25 + $0x388] sm:$0xff]  ;;  %202 = vst [vmem:[%s2886_s26 + $0xd8] sm:$0xff] %v201_v27  ;;  %v207_v30 = vld [vmem:[%s2881_s25 + $0x390] sm:$0xff] }
  0x20   : > { %204 = vst [vmem:[%s2886_s26 + $0xe0] sm:$0xff] %v203_v28  ;;  %206 = vst [vmem:[%s2886_s26 + $0xe8] sm:$0xff] %v205_v29  ;;  %v209_v31 = vld [vmem:[%s2881_s25 + $0x398] sm:$0xff]  ;;  %v211_v32 = vld [vmem:[%s2881_s25 + $0x400] sm:$0xff] }
  0x21   : > { %208 = vst [vmem:[%s2886_s26 + $0xf0] sm:$0xff] %v207_v30  ;;  %210 = vst [vmem:[%s2886_s26 + $0xf8] sm:$0xff] %v209_v31  ;;  %v213_v33 = vld [vmem:[%s2881_s25 + $0x408] sm:$0xff]  ;;  %v215_v34 = vld [vmem:[%s2881_s25 + $0x410] sm:$0xff] }
  0x22   : > { %212 = vst [vmem:[%s2886_s26 + $0x100] sm:$0xff] %v211_v32  ;;  %v217_v35 = vld [vmem:[%s2881_s25 + $0x418] sm:$0xff]  ;;  %214 = vst [vmem:[%s2886_s26 + $0x108] sm:$0xff] %v213_v33  ;;  %v219_v36 = vld [vmem:[%s2881_s25 + $0x480] sm:$0xff] }
  0x23   : > { %216 = vst [vmem:[%s2886_s26 + $0x110] sm:$0xff] %v215_v34  ;;  %218 = vst [vmem:[%s2886_s26 + $0x118] sm:$0xff] %v217_v35  ;;  %v221_v37 = vld [vmem:[%s2881_s25 + $0x488] sm:$0xff]  ;;  %v223_v38 = vld [vmem:[%s2881_s25 + $0x490] sm:$0xff] }
  0x24   : > { %220 = vst [vmem:[%s2886_s26 + $0x120] sm:$0xff] %v219_v36  ;;  %222 = vst [vmem:[%s2886_s26 + $0x128] sm:$0xff] %v221_v37  ;;  %v225_v39 = vld [vmem:[%s2881_s25 + $0x498] sm:$0xff]  ;;  %v227_v40 = vld [vmem:[%s2881_s25 + $0x500] sm:$0xff] }
  0x25   : > { %224 = vst [vmem:[%s2886_s26 + $0x130] sm:$0xff] %v223_v38  ;;  %v229_v41 = vld [vmem:[%s2881_s25 + $0x508] sm:$0xff]  ;;  %226 = vst [vmem:[%s2886_s26 + $0x138] sm:$0xff] %v225_v39  ;;  %v231_v42 = vld [vmem:[%s2881_s25 + $0x510] sm:$0xff] }
  0x26   : > { %228 = vst [vmem:[%s2886_s26 + $0x140] sm:$0xff] %v227_v40  ;;  %230 = vst [vmem:[%s2886_s26 + $0x148] sm:$0xff] %v229_v41  ;;  %v233_v43 = vld [vmem:[%s2881_s25 + $0x518] sm:$0xff]  ;;  %v235_v44 = vld [vmem:[%s2881_s25 + $0x580] sm:$0xff] }
  0x27   : > { %232 = vst [vmem:[%s2886_s26 + $0x150] sm:$0xff] %v231_v42  ;;  %234 = vst [vmem:[%s2886_s26 + $0x158] sm:$0xff] %v233_v43  ;;  %v237_v45 = vld [vmem:[%s2881_s25 + $0x588] sm:$0xff]  ;;  %v239_v46 = vld [vmem:[%s2881_s25 + $0x590] sm:$0xff] }
  0x28   : > { %236 = vst [vmem:[%s2886_s26 + $0x160] sm:$0xff] %v235_v44  ;;  %v241_v47 = vld [vmem:[%s2881_s25 + $0x598] sm:$0xff]  ;;  %238 = vst [vmem:[%s2886_s26 + $0x168] sm:$0xff] %v237_v45  ;;  %v243_v48 = vld [vmem:[%s2881_s25 + $0x600] sm:$0xff] }
  0x29   : > { %240 = vst [vmem:[%s2886_s26 + $0x170] sm:$0xff] %v239_v46  ;;  %242 = vst [vmem:[%s2886_s26 + $0x178] sm:$0xff] %v241_v47  ;;  %v245_v49 = vld [vmem:[%s2881_s25 + $0x608] sm:$0xff]  ;;  %v247_v50 = vld [vmem:[%s2881_s25 + $0x610] sm:$0xff] }
  0x2a   : > { %244 = vst [vmem:[%s2886_s26 + $0x180] sm:$0xff] %v243_v48  ;;  %246 = vst [vmem:[%s2886_s26 + $0x188] sm:$0xff] %v245_v49  ;;  %v249_v51 = vld [vmem:[%s2881_s25 + $0x618] sm:$0xff]  ;;  %v251_v52 = vld [vmem:[%s2881_s25 + $0x680] sm:$0xff] }
  0x2b   : > { %248 = vst [vmem:[%s2886_s26 + $0x190] sm:$0xff] %v247_v50  ;;  %v253_v53 = vld [vmem:[%s2881_s25 + $0x688] sm:$0xff]  ;;  %250 = vst [vmem:[%s2886_s26 + $0x198] sm:$0xff] %v249_v51  ;;  %v255_v54 = vld [vmem:[%s2881_s25 + $0x690] sm:$0xff] }
  0x2c   : > { %252 = vst [vmem:[%s2886_s26 + $0x1a0] sm:$0xff] %v251_v52  ;;  %254 = vst [vmem:[%s2886_s26 + $0x1a8] sm:$0xff] %v253_v53  ;;  %v257_v55 = vld [vmem:[%s2881_s25 + $0x698] sm:$0xff]  ;;  %v259_v56 = vld [vmem:[%s2881_s25 + $0x700] sm:$0xff] }
  0x2d   : > { %256 = vst [vmem:[%s2886_s26 + $0x1b0] sm:$0xff] %v255_v54  ;;  %258 = vst [vmem:[%s2886_s26 + $0x1b8] sm:$0xff] %v257_v55  ;;  %v261_v57 = vld [vmem:[%s2881_s25 + $0x708] sm:$0xff]  ;;  %v263_v58 = vld [vmem:[%s2881_s25 + $0x710] sm:$0xff] }
  0x2e   : > { %260 = vst [vmem:[%s2886_s26 + $0x1c0] sm:$0xff] %v259_v56  ;;  %v265_v59 = vld [vmem:[%s2881_s25 + $0x718] sm:$0xff]  ;;  %262 = vst [vmem:[%s2886_s26 + $0x1c8] sm:$0xff] %v261_v57  ;;  %v267_v60 = vld [vmem:[%s2881_s25 + $0x780] sm:$0xff] }
  0x2f   : > { %264 = vst [vmem:[%s2886_s26 + $0x1d0] sm:$0xff] %v263_v58  ;;  %266 = vst [vmem:[%s2886_s26 + $0x1d8] sm:$0xff] %v265_v59  ;;  %v269_v61 = vld [vmem:[%s2881_s25 + $0x788] sm:$0xff]  ;;  %v271_v62 = vld [vmem:[%s2881_s25 + $0x790] sm:$0xff] }
  0x30   : > { %268 = vst [vmem:[%s2886_s26 + $0x1e0] sm:$0xff] %v267_v60  ;;  %270 = vst [vmem:[%s2886_s26 + $0x1e8] sm:$0xff] %v269_v61  ;;  %v273_v63 = vld [vmem:[%s2881_s25 + $0x798] sm:$0xff]  ;;  %v275_v0 = vld [vmem:[%s2881_s25 + $0x800] sm:$0xff] }
  0x31   : > { %272 = vst [vmem:[%s2886_s26 + $0x1f0] sm:$0xff] %v271_v62  ;;  %v277_v1 = vld [vmem:[%s2881_s25 + $0x808] sm:$0xff]  ;;  %274 = vst [vmem:[%s2886_s26 + $0x1f8] sm:$0xff] %v273_v63  ;;  %v279_v2 = vld [vmem:[%s2881_s25 + $0x810] sm:$0xff] }
  0x32   : > { %276 = vst [vmem:[%s2886_s26 + $0x200] sm:$0xff] %v275_v0  ;;  %278 = vst [vmem:[%s2886_s26 + $0x208] sm:$0xff] %v277_v1  ;;  %v281_v3 = vld [vmem:[%s2881_s25 + $0x818] sm:$0xff]  ;;  %v283_v4 = vld [vmem:[%s2881_s25 + $0x880] sm:$0xff] }
  0x33   : > { %280 = vst [vmem:[%s2886_s26 + $0x210] sm:$0xff] %v279_v2  ;;  %282 = vst [vmem:[%s2886_s26 + $0x218] sm:$0xff] %v281_v3  ;;  %v285_v5 = vld [vmem:[%s2881_s25 + $0x888] sm:$0xff]  ;;  %v287_v6 = vld [vmem:[%s2881_s25 + $0x890] sm:$0xff] }
  0x34   : > { %284 = vst [vmem:[%s2886_s26 + $0x220] sm:$0xff] %v283_v4  ;;  %v289_v7 = vld [vmem:[%s2881_s25 + $0x898] sm:$0xff]  ;;  %286 = vst [vmem:[%s2886_s26 + $0x228] sm:$0xff] %v285_v5  ;;  %v291_v8 = vld [vmem:[%s2881_s25 + $0x900] sm:$0xff] }
  0x35   : > { %288 = vst [vmem:[%s2886_s26 + $0x230] sm:$0xff] %v287_v6  ;;  %290 = vst [vmem:[%s2886_s26 + $0x238] sm:$0xff] %v289_v7  ;;  %v293_v9 = vld [vmem:[%s2881_s25 + $0x908] sm:$0xff]  ;;  %v295_v10 = vld [vmem:[%s2881_s25 + $0x910] sm:$0xff] }
  0x36   : > { %292 = vst [vmem:[%s2886_s26 + $0x240] sm:$0xff] %v291_v8  ;;  %294 = vst [vmem:[%s2886_s26 + $0x248] sm:$0xff] %v293_v9  ;;  %v297_v11 = vld [vmem:[%s2881_s25 + $0x918] sm:$0xff]  ;;  %v299_v12 = vld [vmem:[%s2881_s25 + $0x980] sm:$0xff] }
  0x37   : > { %296 = vst [vmem:[%s2886_s26 + $0x250] sm:$0xff] %v295_v10  ;;  %v301_v13 = vld [vmem:[%s2881_s25 + $0x988] sm:$0xff]  ;;  %298 = vst [vmem:[%s2886_s26 + $0x258] sm:$0xff] %v297_v11  ;;  %v303_v14 = vld [vmem:[%s2881_s25 + $0x990] sm:$0xff] }
  0x38   : > { %300 = vst [vmem:[%s2886_s26 + $0x260] sm:$0xff] %v299_v12  ;;  %302 = vst [vmem:[%s2886_s26 + $0x268] sm:$0xff] %v301_v13  ;;  %v305_v15 = vld [vmem:[%s2881_s25 + $0x998] sm:$0xff]  ;;  %v307_v16 = vld [vmem:[%s2881_s25 + $0xa00] sm:$0xff] }
  0x39   : > { %304 = vst [vmem:[%s2886_s26 + $0x270] sm:$0xff] %v303_v14  ;;  %306 = vst [vmem:[%s2886_s26 + $0x278] sm:$0xff] %v305_v15  ;;  %v309_v17 = vld [vmem:[%s2881_s25 + $0xa08] sm:$0xff]  ;;  %v311_v18 = vld [vmem:[%s2881_s25 + $0xa10] sm:$0xff] }
  0x3a   : > { %308 = vst [vmem:[%s2886_s26 + $0x280] sm:$0xff] %v307_v16  ;;  %v313_v19 = vld [vmem:[%s2881_s25 + $0xa18] sm:$0xff]  ;;  %310 = vst [vmem:[%s2886_s26 + $0x288] sm:$0xff] %v309_v17  ;;  %v315_v20 = vld [vmem:[%s2881_s25 + $0xa80] sm:$0xff] }
  0x3b   : > { %312 = vst [vmem:[%s2886_s26 + $0x290] sm:$0xff] %v311_v18  ;;  %314 = vst [vmem:[%s2886_s26 + $0x298] sm:$0xff] %v313_v19  ;;  %v317_v21 = vld [vmem:[%s2881_s25 + $0xa88] sm:$0xff]  ;;  %v319_v22 = vld [vmem:[%s2881_s25 + $0xa90] sm:$0xff] }
  0x3c   : > { %316 = vst [vmem:[%s2886_s26 + $0x2a0] sm:$0xff] %v315_v20  ;;  %318 = vst [vmem:[%s2886_s26 + $0x2a8] sm:$0xff] %v317_v21  ;;  %v321_v23 = vld [vmem:[%s2881_s25 + $0xa98] sm:$0xff]  ;;  %v323_v24 = vld [vmem:[%s2881_s25 + $0xb00] sm:$0xff] }
  0x3d   : > { %320 = vst [vmem:[%s2886_s26 + $0x2b0] sm:$0xff] %v319_v22  ;;  %v325_v25 = vld [vmem:[%s2881_s25 + $0xb08] sm:$0xff]  ;;  %322 = vst [vmem:[%s2886_s26 + $0x2b8] sm:$0xff] %v321_v23  ;;  %v327_v26 = vld [vmem:[%s2881_s25 + $0xb10] sm:$0xff] }
  0x3e   : > { %324 = vst [vmem:[%s2886_s26 + $0x2c0] sm:$0xff] %v323_v24  ;;  %326 = vst [vmem:[%s2886_s26 + $0x2c8] sm:$0xff] %v325_v25  ;;  %v329_v27 = vld [vmem:[%s2881_s25 + $0xb18] sm:$0xff]  ;;  %v331_v28 = vld [vmem:[%s2881_s25 + $0xb80] sm:$0xff] }
  0x3f   : > { %328 = vst [vmem:[%s2886_s26 + $0x2d0] sm:$0xff] %v327_v26  ;;  %330 = vst [vmem:[%s2886_s26 + $0x2d8] sm:$0xff] %v329_v27  ;;  %v333_v29 = vld [vmem:[%s2881_s25 + $0xb88] sm:$0xff]  ;;  %v335_v30 = vld [vmem:[%s2881_s25 + $0xb90] sm:$0xff] }
  0x40   : > { %332 = vst [vmem:[%s2886_s26 + $0x2e0] sm:$0xff] %v331_v28  ;;  %v337_v31 = vld [vmem:[%s2881_s25 + $0xb98] sm:$0xff]  ;;  %334 = vst [vmem:[%s2886_s26 + $0x2e8] sm:$0xff] %v333_v29  ;;  %v339_v32 = vld [vmem:[%s2881_s25 + $0xc00] sm:$0xff] }
  0x41   : > { %336 = vst [vmem:[%s2886_s26 + $0x2f0] sm:$0xff] %v335_v30  ;;  %338 = vst [vmem:[%s2886_s26 + $0x2f8] sm:$0xff] %v337_v31  ;;  %v341_v33 = vld [vmem:[%s2881_s25 + $0xc08] sm:$0xff]  ;;  %v343_v34 = vld [vmem:[%s2881_s25 + $0xc10] sm:$0xff] }
  0x42   : > { %340 = vst [vmem:[%s2886_s26 + $0x300] sm:$0xff] %v339_v32  ;;  %342 = vst [vmem:[%s2886_s26 + $0x308] sm:$0xff] %v341_v33  ;;  %v345_v35 = vld [vmem:[%s2881_s25 + $0xc18] sm:$0xff]  ;;  %v347_v36 = vld [vmem:[%s2881_s25 + $0xc80] sm:$0xff] }
  0x43   : > { %344 = vst [vmem:[%s2886_s26 + $0x310] sm:$0xff] %v343_v34  ;;  %v349_v37 = vld [vmem:[%s2881_s25 + $0xc88] sm:$0xff]  ;;  %346 = vst [vmem:[%s2886_s26 + $0x318] sm:$0xff] %v345_v35  ;;  %v351_v38 = vld [vmem:[%s2881_s25 + $0xc90] sm:$0xff] }
  0x44   : > { %348 = vst [vmem:[%s2886_s26 + $0x320] sm:$0xff] %v347_v36  ;;  %350 = vst [vmem:[%s2886_s26 + $0x328] sm:$0xff] %v349_v37  ;;  %v353_v39 = vld [vmem:[%s2881_s25 + $0xc98] sm:$0xff]  ;;  %v355_v40 = vld [vmem:[%s2881_s25 + $0xd00] sm:$0xff] }
  0x45   : > { %352 = vst [vmem:[%s2886_s26 + $0x330] sm:$0xff] %v351_v38  ;;  %354 = vst [vmem:[%s2886_s26 + $0x338] sm:$0xff] %v353_v39  ;;  %v357_v41 = vld [vmem:[%s2881_s25 + $0xd08] sm:$0xff]  ;;  %v359_v42 = vld [vmem:[%s2881_s25 + $0xd10] sm:$0xff] }
  0x46   : > { %356 = vst [vmem:[%s2886_s26 + $0x340] sm:$0xff] %v355_v40  ;;  %v361_v43 = vld [vmem:[%s2881_s25 + $0xd18] sm:$0xff]  ;;  %358 = vst [vmem:[%s2886_s26 + $0x348] sm:$0xff] %v357_v41  ;;  %v363_v44 = vld [vmem:[%s2881_s25 + $0xd80] sm:$0xff] }
  0x47   : > { %360 = vst [vmem:[%s2886_s26 + $0x350] sm:$0xff] %v359_v42  ;;  %362 = vst [vmem:[%s2886_s26 + $0x358] sm:$0xff] %v361_v43  ;;  %v365_v45 = vld [vmem:[%s2881_s25 + $0xd88] sm:$0xff]  ;;  %v367_v46 = vld [vmem:[%s2881_s25 + $0xd90] sm:$0xff] }
  0x48   : > { %364 = vst [vmem:[%s2886_s26 + $0x360] sm:$0xff] %v363_v44  ;;  %366 = vst [vmem:[%s2886_s26 + $0x368] sm:$0xff] %v365_v45  ;;  %v369_v47 = vld [vmem:[%s2881_s25 + $0xd98] sm:$0xff]  ;;  %v371_v48 = vld [vmem:[%s2881_s25 + $0xe00] sm:$0xff] }
  0x49   : > { %368 = vst [vmem:[%s2886_s26 + $0x370] sm:$0xff] %v367_v46  ;;  %v373_v49 = vld [vmem:[%s2881_s25 + $0xe08] sm:$0xff]  ;;  %370 = vst [vmem:[%s2886_s26 + $0x378] sm:$0xff] %v369_v47  ;;  %v375_v50 = vld [vmem:[%s2881_s25 + $0xe10] sm:$0xff] }
  0x4a   : > { %372 = vst [vmem:[%s2886_s26 + $0x380] sm:$0xff] %v371_v48  ;;  %374 = vst [vmem:[%s2886_s26 + $0x388] sm:$0xff] %v373_v49  ;;  %v377_v51 = vld [vmem:[%s2881_s25 + $0xe18] sm:$0xff]  ;;  %v379_v52 = vld [vmem:[%s2881_s25 + $0xe80] sm:$0xff] }
  0x4b   : > { %376 = vst [vmem:[%s2886_s26 + $0x390] sm:$0xff] %v375_v50  ;;  %378 = vst [vmem:[%s2886_s26 + $0x398] sm:$0xff] %v377_v51  ;;  %v381_v53 = vld [vmem:[%s2881_s25 + $0xe88] sm:$0xff]  ;;  %v383_v54 = vld [vmem:[%s2881_s25 + $0xe90] sm:$0xff] }
  0x4c   : > { %380 = vst [vmem:[%s2886_s26 + $0x3a0] sm:$0xff] %v379_v52  ;;  %v385_v55 = vld [vmem:[%s2881_s25 + $0xe98] sm:$0xff]  ;;  %382 = vst [vmem:[%s2886_s26 + $0x3a8] sm:$0xff] %v381_v53  ;;  %v387_v56 = vld [vmem:[%s2881_s25 + $0xf00] sm:$0xff] }
  0x4d   : > { %384 = vst [vmem:[%s2886_s26 + $0x3b0] sm:$0xff] %v383_v54  ;;  %386 = vst [vmem:[%s2886_s26 + $0x3b8] sm:$0xff] %v385_v55  ;;  %v389_v57 = vld [vmem:[%s2881_s25 + $0xf08] sm:$0xff]  ;;  %v391_v58 = vld [vmem:[%s2881_s25 + $0xf10] sm:$0xff] }
  0x4e   : > { %388 = vst [vmem:[%s2886_s26 + $0x3c0] sm:$0xff] %v387_v56  ;;  %390 = vst [vmem:[%s2886_s26 + $0x3c8] sm:$0xff] %v389_v57  ;;  %v393_v59 = vld [vmem:[%s2881_s25 + $0xf18] sm:$0xff]  ;;  %v395_v60 = vld [vmem:[%s2881_s25 + $0xf80] sm:$0xff] }
  0x4f   : > { %392 = vst [vmem:[%s2886_s26 + $0x3d0] sm:$0xff] %v391_v58  ;;  %v397_v61 = vld [vmem:[%s2881_s25 + $0xf88] sm:$0xff]  ;;  %394 = vst [vmem:[%s2886_s26 + $0x3d8] sm:$0xff] %v393_v59  ;;  %v399_v62 = vld [vmem:[%s2881_s25 + $0xf90] sm:$0xff] }
  0x50   : > { %396 = vst [vmem:[%s2886_s26 + $0x3e0] sm:$0xff] %v395_v60  ;;  %398 = vst [vmem:[%s2886_s26 + $0x3e8] sm:$0xff] %v397_v61  ;;  %v401_v63 = vld [vmem:[%s2881_s25 + $0xf98] sm:$0xff]  ;;  %v403_v0 = vld [vmem:[%s2881_s25 + $0x1000] sm:$0xff] }
  0x51   : > { %400 = vst [vmem:[%s2886_s26 + $0x3f0] sm:$0xff] %v399_v62  ;;  %402 = vst [vmem:[%s2886_s26 + $0x3f8] sm:$0xff] %v401_v63  ;;  %v405_v1 = vld [vmem:[%s2881_s25 + $0x1008] sm:$0xff]  ;;  %v407_v2 = vld [vmem:[%s2881_s25 + $0x1010] sm:$0xff] }
  0x52   : > { %404 = vst [vmem:[%s2886_s26 + $0x400] sm:$0xff] %v403_v0  ;;  %v409_v3 = vld [vmem:[%s2881_s25 + $0x1018] sm:$0xff]  ;;  %406 = vst [vmem:[%s2886_s26 + $0x408] sm:$0xff] %v405_v1  ;;  %v411_v4 = vld [vmem:[%s2881_s25 + $0x1080] sm:$0xff] }
  0x53   : > { %408 = vst [vmem:[%s2886_s26 + $0x410] sm:$0xff] %v407_v2  ;;  %410 = vst [vmem:[%s2886_s26 + $0x418] sm:$0xff] %v409_v3  ;;  %v413_v5 = vld [vmem:[%s2881_s25 + $0x1088] sm:$0xff]  ;;  %v415_v6 = vld [vmem:[%s2881_s25 + $0x1090] sm:$0xff] }
  0x54   : > { %412 = vst [vmem:[%s2886_s26 + $0x420] sm:$0xff] %v411_v4  ;;  %414 = vst [vmem:[%s2886_s26 + $0x428] sm:$0xff] %v413_v5  ;;  %v417_v7 = vld [vmem:[%s2881_s25 + $0x1098] sm:$0xff]  ;;  %v419_v8 = vld [vmem:[%s2881_s25 + $0x1100] sm:$0xff] }
  0x55   : > { %416 = vst [vmem:[%s2886_s26 + $0x430] sm:$0xff] %v415_v6  ;;  %v421_v9 = vld [vmem:[%s2881_s25 + $0x1108] sm:$0xff]  ;;  %418 = vst [vmem:[%s2886_s26 + $0x438] sm:$0xff] %v417_v7  ;;  %v423_v10 = vld [vmem:[%s2881_s25 + $0x1110] sm:$0xff] }
  0x56   : > { %420 = vst [vmem:[%s2886_s26 + $0x440] sm:$0xff] %v419_v8  ;;  %422 = vst [vmem:[%s2886_s26 + $0x448] sm:$0xff] %v421_v9  ;;  %v425_v11 = vld [vmem:[%s2881_s25 + $0x1118] sm:$0xff]  ;;  %v427_v12 = vld [vmem:[%s2881_s25 + $0x1180] sm:$0xff] }
  0x57   : > { %424 = vst [vmem:[%s2886_s26 + $0x450] sm:$0xff] %v423_v10  ;;  %426 = vst [vmem:[%s2886_s26 + $0x458] sm:$0xff] %v425_v11  ;;  %v429_v13 = vld [vmem:[%s2881_s25 + $0x1188] sm:$0xff]  ;;  %v431_v14 = vld [vmem:[%s2881_s25 + $0x1190] sm:$0xff] }
  0x58   : > { %428 = vst [vmem:[%s2886_s26 + $0x460] sm:$0xff] %v427_v12  ;;  %v433_v15 = vld [vmem:[%s2881_s25 + $0x1198] sm:$0xff]  ;;  %430 = vst [vmem:[%s2886_s26 + $0x468] sm:$0xff] %v429_v13  ;;  %v435_v16 = vld [vmem:[%s2881_s25 + $0x1200] sm:$0xff] }
  0x59   : > { %432 = vst [vmem:[%s2886_s26 + $0x470] sm:$0xff] %v431_v14  ;;  %434 = vst [vmem:[%s2886_s26 + $0x478] sm:$0xff] %v433_v15  ;;  %v437_v17 = vld [vmem:[%s2881_s25 + $0x1208] sm:$0xff]  ;;  %v439_v18 = vld [vmem:[%s2881_s25 + $0x1210] sm:$0xff] }
  0x5a   : > { %436 = vst [vmem:[%s2886_s26 + $0x480] sm:$0xff] %v435_v16  ;;  %438 = vst [vmem:[%s2886_s26 + $0x488] sm:$0xff] %v437_v17  ;;  %v441_v19 = vld [vmem:[%s2881_s25 + $0x1218] sm:$0xff]  ;;  %v443_v20 = vld [vmem:[%s2881_s25 + $0x1280] sm:$0xff] }
  0x5b   : > { %440 = vst [vmem:[%s2886_s26 + $0x490] sm:$0xff] %v439_v18  ;;  %v445_v21 = vld [vmem:[%s2881_s25 + $0x1288] sm:$0xff]  ;;  %442 = vst [vmem:[%s2886_s26 + $0x498] sm:$0xff] %v441_v19  ;;  %v447_v22 = vld [vmem:[%s2881_s25 + $0x1290] sm:$0xff] }
  0x5c   : > { %444 = vst [vmem:[%s2886_s26 + $0x4a0] sm:$0xff] %v443_v20  ;;  %446 = vst [vmem:[%s2886_s26 + $0x4a8] sm:$0xff] %v445_v21  ;;  %v449_v23 = vld [vmem:[%s2881_s25 + $0x1298] sm:$0xff]  ;;  %v451_v24 = vld [vmem:[%s2881_s25 + $0x1300] sm:$0xff] }
  0x5d   : > { %448 = vst [vmem:[%s2886_s26 + $0x4b0] sm:$0xff] %v447_v22  ;;  %450 = vst [vmem:[%s2886_s26 + $0x4b8] sm:$0xff] %v449_v23  ;;  %v453_v25 = vld [vmem:[%s2881_s25 + $0x1308] sm:$0xff]  ;;  %v455_v26 = vld [vmem:[%s2881_s25 + $0x1310] sm:$0xff] }
  0x5e   : > { %452 = vst [vmem:[%s2886_s26 + $0x4c0] sm:$0xff] %v451_v24  ;;  %v457_v27 = vld [vmem:[%s2881_s25 + $0x1318] sm:$0xff]  ;;  %454 = vst [vmem:[%s2886_s26 + $0x4c8] sm:$0xff] %v453_v25  ;;  %v459_v28 = vld [vmem:[%s2881_s25 + $0x1380] sm:$0xff] }
  0x5f   : > { %456 = vst [vmem:[%s2886_s26 + $0x4d0] sm:$0xff] %v455_v26  ;;  %458 = vst [vmem:[%s2886_s26 + $0x4d8] sm:$0xff] %v457_v27  ;;  %v461_v29 = vld [vmem:[%s2881_s25 + $0x1388] sm:$0xff]  ;;  %v463_v30 = vld [vmem:[%s2881_s25 + $0x1390] sm:$0xff] }
  0x60   : > { %460 = vst [vmem:[%s2886_s26 + $0x4e0] sm:$0xff] %v459_v28  ;;  %462 = vst [vmem:[%s2886_s26 + $0x4e8] sm:$0xff] %v461_v29  ;;  %v465_v31 = vld [vmem:[%s2881_s25 + $0x1398] sm:$0xff]  ;;  %v467_v32 = vld [vmem:[%s2881_s25 + $0x1400] sm:$0xff] }
  0x61   : > { %464 = vst [vmem:[%s2886_s26 + $0x4f0] sm:$0xff] %v463_v30  ;;  %v469_v33 = vld [vmem:[%s2881_s25 + $0x1408] sm:$0xff]  ;;  %466 = vst [vmem:[%s2886_s26 + $0x4f8] sm:$0xff] %v465_v31  ;;  %v471_v34 = vld [vmem:[%s2881_s25 + $0x1410] sm:$0xff] }
  0x62   : > { %468 = vst [vmem:[%s2886_s26 + $0x500] sm:$0xff] %v467_v32  ;;  %470 = vst [vmem:[%s2886_s26 + $0x508] sm:$0xff] %v469_v33  ;;  %v473_v35 = vld [vmem:[%s2881_s25 + $0x1418] sm:$0xff]  ;;  %v475_v36 = vld [vmem:[%s2881_s25 + $0x1480] sm:$0xff] }
  0x63   : > { %472 = vst [vmem:[%s2886_s26 + $0x510] sm:$0xff] %v471_v34  ;;  %474 = vst [vmem:[%s2886_s26 + $0x518] sm:$0xff] %v473_v35  ;;  %v477_v37 = vld [vmem:[%s2881_s25 + $0x1488] sm:$0xff]  ;;  %v479_v38 = vld [vmem:[%s2881_s25 + $0x1490] sm:$0xff] }
  0x64   : > { %476 = vst [vmem:[%s2886_s26 + $0x520] sm:$0xff] %v475_v36  ;;  %v481_v39 = vld [vmem:[%s2881_s25 + $0x1498] sm:$0xff]  ;;  %478 = vst [vmem:[%s2886_s26 + $0x528] sm:$0xff] %v477_v37  ;;  %v483_v40 = vld [vmem:[%s2881_s25 + $0x1500] sm:$0xff] }
  0x65   : > { %480 = vst [vmem:[%s2886_s26 + $0x530] sm:$0xff] %v479_v38  ;;  %482 = vst [vmem:[%s2886_s26 + $0x538] sm:$0xff] %v481_v39  ;;  %v485_v41 = vld [vmem:[%s2881_s25 + $0x1508] sm:$0xff]  ;;  %v487_v42 = vld [vmem:[%s2881_s25 + $0x1510] sm:$0xff] }
  0x66   : > { %484 = vst [vmem:[%s2886_s26 + $0x540] sm:$0xff] %v483_v40  ;;  %486 = vst [vmem:[%s2886_s26 + $0x548] sm:$0xff] %v485_v41  ;;  %v489_v43 = vld [vmem:[%s2881_s25 + $0x1518] sm:$0xff]  ;;  %v491_v44 = vld [vmem:[%s2881_s25 + $0x1580] sm:$0xff] }
  0x67   : > { %488 = vst [vmem:[%s2886_s26 + $0x550] sm:$0xff] %v487_v42  ;;  %v493_v45 = vld [vmem:[%s2881_s25 + $0x1588] sm:$0xff]  ;;  %490 = vst [vmem:[%s2886_s26 + $0x558] sm:$0xff] %v489_v43  ;;  %v495_v46 = vld [vmem:[%s2881_s25 + $0x1590] sm:$0xff] }
  0x68   : > { %492 = vst [vmem:[%s2886_s26 + $0x560] sm:$0xff] %v491_v44  ;;  %494 = vst [vmem:[%s2886_s26 + $0x568] sm:$0xff] %v493_v45  ;;  %v497_v47 = vld [vmem:[%s2881_s25 + $0x1598] sm:$0xff]  ;;  %v499_v48 = vld [vmem:[%s2881_s25 + $0x1600] sm:$0xff] }
  0x69   : > { %496 = vst [vmem:[%s2886_s26 + $0x570] sm:$0xff] %v495_v46  ;;  %498 = vst [vmem:[%s2886_s26 + $0x578] sm:$0xff] %v497_v47  ;;  %v501_v49 = vld [vmem:[%s2881_s25 + $0x1608] sm:$0xff]  ;;  %v503_v50 = vld [vmem:[%s2881_s25 + $0x1610] sm:$0xff] }
  0x6a   : > { %500 = vst [vmem:[%s2886_s26 + $0x580] sm:$0xff] %v499_v48  ;;  %v505_v51 = vld [vmem:[%s2881_s25 + $0x1618] sm:$0xff]  ;;  %502 = vst [vmem:[%s2886_s26 + $0x588] sm:$0xff] %v501_v49  ;;  %v507_v52 = vld [vmem:[%s2881_s25 + $0x1680] sm:$0xff] }
  0x6b   : > { %504 = vst [vmem:[%s2886_s26 + $0x590] sm:$0xff] %v503_v50  ;;  %506 = vst [vmem:[%s2886_s26 + $0x598] sm:$0xff] %v505_v51  ;;  %v509_v53 = vld [vmem:[%s2881_s25 + $0x1688] sm:$0xff]  ;;  %v511_v54 = vld [vmem:[%s2881_s25 + $0x1690] sm:$0xff] }
  0x6c   : > { %508 = vst [vmem:[%s2886_s26 + $0x5a0] sm:$0xff] %v507_v52  ;;  %510 = vst [vmem:[%s2886_s26 + $0x5a8] sm:$0xff] %v509_v53  ;;  %v513_v55 = vld [vmem:[%s2881_s25 + $0x1698] sm:$0xff]  ;;  %v515_v56 = vld [vmem:[%s2881_s25 + $0x1700] sm:$0xff] }
  0x6d   : > { %512 = vst [vmem:[%s2886_s26 + $0x5b0] sm:$0xff] %v511_v54  ;;  %v517_v57 = vld [vmem:[%s2881_s25 + $0x1708] sm:$0xff]  ;;  %514 = vst [vmem:[%s2886_s26 + $0x5b8] sm:$0xff] %v513_v55  ;;  %v519_v58 = vld [vmem:[%s2881_s25 + $0x1710] sm:$0xff] }
  0x6e   : > { %516 = vst [vmem:[%s2886_s26 + $0x5c0] sm:$0xff] %v515_v56  ;;  %518 = vst [vmem:[%s2886_s26 + $0x5c8] sm:$0xff] %v517_v57  ;;  %v521_v59 = vld [vmem:[%s2881_s25 + $0x1718] sm:$0xff]  ;;  %v523_v60 = vld [vmem:[%s2881_s25 + $0x1780] sm:$0xff] }
  0x6f   : > { %520 = vst [vmem:[%s2886_s26 + $0x5d0] sm:$0xff] %v519_v58  ;;  %522 = vst [vmem:[%s2886_s26 + $0x5d8] sm:$0xff] %v521_v59  ;;  %v525_v61 = vld [vmem:[%s2881_s25 + $0x1788] sm:$0xff]  ;;  %v527_v62 = vld [vmem:[%s2881_s25 + $0x1790] sm:$0xff] }
  0x70   : > { %524 = vst [vmem:[%s2886_s26 + $0x5e0] sm:$0xff] %v523_v60  ;;  %v529_v63 = vld [vmem:[%s2881_s25 + $0x1798] sm:$0xff]  ;;  %526 = vst [vmem:[%s2886_s26 + $0x5e8] sm:$0xff] %v525_v61  ;;  %v531_v0 = vld [vmem:[%s2881_s25 + $0x1800] sm:$0xff] }
  0x71   : > { %528 = vst [vmem:[%s2886_s26 + $0x5f0] sm:$0xff] %v527_v62  ;;  %530 = vst [vmem:[%s2886_s26 + $0x5f8] sm:$0xff] %v529_v63  ;;  %v533_v1 = vld [vmem:[%s2881_s25 + $0x1808] sm:$0xff]  ;;  %v535_v2 = vld [vmem:[%s2881_s25 + $0x1810] sm:$0xff] }
  0x72   : > { %532 = vst [vmem:[%s2886_s26 + $0x600] sm:$0xff] %v531_v0  ;;  %534 = vst [vmem:[%s2886_s26 + $0x608] sm:$0xff] %v533_v1  ;;  %v537_v3 = vld [vmem:[%s2881_s25 + $0x1818] sm:$0xff]  ;;  %v539_v4 = vld [vmem:[%s2881_s25 + $0x1880] sm:$0xff] }
  0x73   : > { %536 = vst [vmem:[%s2886_s26 + $0x610] sm:$0xff] %v535_v2  ;;  %v541_v5 = vld [vmem:[%s2881_s25 + $0x1888] sm:$0xff]  ;;  %538 = vst [vmem:[%s2886_s26 + $0x618] sm:$0xff] %v537_v3  ;;  %v543_v6 = vld [vmem:[%s2881_s25 + $0x1890] sm:$0xff] }
  0x74   : > { %540 = vst [vmem:[%s2886_s26 + $0x620] sm:$0xff] %v539_v4  ;;  %542 = vst [vmem:[%s2886_s26 + $0x628] sm:$0xff] %v541_v5  ;;  %v545_v7 = vld [vmem:[%s2881_s25 + $0x1898] sm:$0xff]  ;;  %v547_v8 = vld [vmem:[%s2881_s25 + $0x1900] sm:$0xff] }
  0x75   : > { %544 = vst [vmem:[%s2886_s26 + $0x630] sm:$0xff] %v543_v6  ;;  %546 = vst [vmem:[%s2886_s26 + $0x638] sm:$0xff] %v545_v7  ;;  %v549_v9 = vld [vmem:[%s2881_s25 + $0x1908] sm:$0xff]  ;;  %v551_v10 = vld [vmem:[%s2881_s25 + $0x1910] sm:$0xff] }
  0x76   : > { %548 = vst [vmem:[%s2886_s26 + $0x640] sm:$0xff] %v547_v8  ;;  %v553_v11 = vld [vmem:[%s2881_s25 + $0x1918] sm:$0xff]  ;;  %550 = vst [vmem:[%s2886_s26 + $0x648] sm:$0xff] %v549_v9  ;;  %v555_v12 = vld [vmem:[%s2881_s25 + $0x1980] sm:$0xff] }
  0x77   : > { %552 = vst [vmem:[%s2886_s26 + $0x650] sm:$0xff] %v551_v10  ;;  %554 = vst [vmem:[%s2886_s26 + $0x658] sm:$0xff] %v553_v11  ;;  %v557_v13 = vld [vmem:[%s2881_s25 + $0x1988] sm:$0xff]  ;;  %v559_v14 = vld [vmem:[%s2881_s25 + $0x1990] sm:$0xff] }
  0x78   : > { %556 = vst [vmem:[%s2886_s26 + $0x660] sm:$0xff] %v555_v12  ;;  %558 = vst [vmem:[%s2886_s26 + $0x668] sm:$0xff] %v557_v13  ;;  %v561_v15 = vld [vmem:[%s2881_s25 + $0x1998] sm:$0xff]  ;;  %v563_v16 = vld [vmem:[%s2881_s25 + $0x1a00] sm:$0xff] }
  0x79   : > { %560 = vst [vmem:[%s2886_s26 + $0x670] sm:$0xff] %v559_v14  ;;  %v565_v17 = vld [vmem:[%s2881_s25 + $0x1a08] sm:$0xff]  ;;  %562 = vst [vmem:[%s2886_s26 + $0x678] sm:$0xff] %v561_v15  ;;  %v567_v18 = vld [vmem:[%s2881_s25 + $0x1a10] sm:$0xff] }
  0x7a   : > { %564 = vst [vmem:[%s2886_s26 + $0x680] sm:$0xff] %v563_v16  ;;  %566 = vst [vmem:[%s2886_s26 + $0x688] sm:$0xff] %v565_v17  ;;  %v569_v19 = vld [vmem:[%s2881_s25 + $0x1a18] sm:$0xff]  ;;  %v571_v20 = vld [vmem:[%s2881_s25 + $0x1a80] sm:$0xff] }
  0x7b   : > { %568 = vst [vmem:[%s2886_s26 + $0x690] sm:$0xff] %v567_v18  ;;  %570 = vst [vmem:[%s2886_s26 + $0x698] sm:$0xff] %v569_v19  ;;  %v573_v21 = vld [vmem:[%s2881_s25 + $0x1a88] sm:$0xff]  ;;  %v575_v22 = vld [vmem:[%s2881_s25 + $0x1a90] sm:$0xff] }
  0x7c   : > { %572 = vst [vmem:[%s2886_s26 + $0x6a0] sm:$0xff] %v571_v20  ;;  %v577_v23 = vld [vmem:[%s2881_s25 + $0x1a98] sm:$0xff]  ;;  %574 = vst [vmem:[%s2886_s26 + $0x6a8] sm:$0xff] %v573_v21  ;;  %v579_v24 = vld [vmem:[%s2881_s25 + $0x1b00] sm:$0xff] }
  0x7d   : > { %576 = vst [vmem:[%s2886_s26 + $0x6b0] sm:$0xff] %v575_v22  ;;  %578 = vst [vmem:[%s2886_s26 + $0x6b8] sm:$0xff] %v577_v23  ;;  %v581_v25 = vld [vmem:[%s2881_s25 + $0x1b08] sm:$0xff]  ;;  %v583_v26 = vld [vmem:[%s2881_s25 + $0x1b10] sm:$0xff] }
  0x7e   : > { %580 = vst [vmem:[%s2886_s26 + $0x6c0] sm:$0xff] %v579_v24  ;;  %582 = vst [vmem:[%s2886_s26 + $0x6c8] sm:$0xff] %v581_v25  ;;  %v585_v27 = vld [vmem:[%s2881_s25 + $0x1b18] sm:$0xff]  ;;  %v587_v28 = vld [vmem:[%s2881_s25 + $0x1b80] sm:$0xff] }
  0x7f   : > { %584 = vst [vmem:[%s2886_s26 + $0x6d0] sm:$0xff] %v583_v26  ;;  %v589_v29 = vld [vmem:[%s2881_s25 + $0x1b88] sm:$0xff]  ;;  %586 = vst [vmem:[%s2886_s26 + $0x6d8] sm:$0xff] %v585_v27  ;;  %v591_v30 = vld [vmem:[%s2881_s25 + $0x1b90] sm:$0xff] }
  0x80   : > { %588 = vst [vmem:[%s2886_s26 + $0x6e0] sm:$0xff] %v587_v28  ;;  %590 = vst [vmem:[%s2886_s26 + $0x6e8] sm:$0xff] %v589_v29  ;;  %v593_v31 = vld [vmem:[%s2881_s25 + $0x1b98] sm:$0xff]  ;;  %v595_v32 = vld [vmem:[%s2881_s25 + $0x1c00] sm:$0xff] }
  0x81   : > { %592 = vst [vmem:[%s2886_s26 + $0x6f0] sm:$0xff] %v591_v30  ;;  %594 = vst [vmem:[%s2886_s26 + $0x6f8] sm:$0xff] %v593_v31  ;;  %v597_v33 = vld [vmem:[%s2881_s25 + $0x1c08] sm:$0xff]  ;;  %v599_v34 = vld [vmem:[%s2881_s25 + $0x1c10] sm:$0xff] }
  0x82   : > { %596 = vst [vmem:[%s2886_s26 + $0x700] sm:$0xff] %v595_v32  ;;  %v601_v35 = vld [vmem:[%s2881_s25 + $0x1c18] sm:$0xff]  ;;  %598 = vst [vmem:[%s2886_s26 + $0x708] sm:$0xff] %v597_v33  ;;  %v603_v36 = vld [vmem:[%s2881_s25 + $0x1c80] sm:$0xff] }
  0x83   : > { %600 = vst [vmem:[%s2886_s26 + $0x710] sm:$0xff] %v599_v34  ;;  %602 = vst [vmem:[%s2886_s26 + $0x718] sm:$0xff] %v601_v35  ;;  %v605_v37 = vld [vmem:[%s2881_s25 + $0x1c88] sm:$0xff]  ;;  %v607_v38 = vld [vmem:[%s2881_s25 + $0x1c90] sm:$0xff] }
  0x84   : > { %604 = vst [vmem:[%s2886_s26 + $0x720] sm:$0xff] %v603_v36  ;;  %606 = vst [vmem:[%s2886_s26 + $0x728] sm:$0xff] %v605_v37  ;;  %v609_v39 = vld [vmem:[%s2881_s25 + $0x1c98] sm:$0xff]  ;;  %v611_v40 = vld [vmem:[%s2881_s25 + $0x1d00] sm:$0xff] }
  0x85   : > { %608 = vst [vmem:[%s2886_s26 + $0x730] sm:$0xff] %v607_v38  ;;  %v613_v41 = vld [vmem:[%s2881_s25 + $0x1d08] sm:$0xff]  ;;  %610 = vst [vmem:[%s2886_s26 + $0x738] sm:$0xff] %v609_v39  ;;  %v615_v42 = vld [vmem:[%s2881_s25 + $0x1d10] sm:$0xff] }
  0x86   : > { %612 = vst [vmem:[%s2886_s26 + $0x740] sm:$0xff] %v611_v40  ;;  %614 = vst [vmem:[%s2886_s26 + $0x748] sm:$0xff] %v613_v41  ;;  %v617_v43 = vld [vmem:[%s2881_s25 + $0x1d18] sm:$0xff]  ;;  %v619_v44 = vld [vmem:[%s2881_s25 + $0x1d80] sm:$0xff] }
  0x87   : > { %616 = vst [vmem:[%s2886_s26 + $0x750] sm:$0xff] %v615_v42  ;;  %618 = vst [vmem:[%s2886_s26 + $0x758] sm:$0xff] %v617_v43  ;;  %v621_v45 = vld [vmem:[%s2881_s25 + $0x1d88] sm:$0xff]  ;;  %v623_v46 = vld [vmem:[%s2881_s25 + $0x1d90] sm:$0xff] }
  0x88   : > { %620 = vst [vmem:[%s2886_s26 + $0x760] sm:$0xff] %v619_v44  ;;  %v625_v47 = vld [vmem:[%s2881_s25 + $0x1d98] sm:$0xff]  ;;  %622 = vst [vmem:[%s2886_s26 + $0x768] sm:$0xff] %v621_v45  ;;  %v627_v48 = vld [vmem:[%s2881_s25 + $0x1e00] sm:$0xff] }
  0x89   : > { %624 = vst [vmem:[%s2886_s26 + $0x770] sm:$0xff] %v623_v46  ;;  %626 = vst [vmem:[%s2886_s26 + $0x778] sm:$0xff] %v625_v47  ;;  %v629_v49 = vld [vmem:[%s2881_s25 + $0x1e08] sm:$0xff]  ;;  %v631_v50 = vld [vmem:[%s2881_s25 + $0x1e10] sm:$0xff] }
  0x8a   : > { %628 = vst [vmem:[%s2886_s26 + $0x780] sm:$0xff] %v627_v48  ;;  %630 = vst [vmem:[%s2886_s26 + $0x788] sm:$0xff] %v629_v49  ;;  %v633_v51 = vld [vmem:[%s2881_s25 + $0x1e18] sm:$0xff]  ;;  %v635_v52 = vld [vmem:[%s2881_s25 + $0x1e80] sm:$0xff] }
  0x8b   : > { %632 = vst [vmem:[%s2886_s26 + $0x790] sm:$0xff] %v631_v50  ;;  %v637_v53 = vld [vmem:[%s2881_s25 + $0x1e88] sm:$0xff]  ;;  %634 = vst [vmem:[%s2886_s26 + $0x798] sm:$0xff] %v633_v51  ;;  %v639_v54 = vld [vmem:[%s2881_s25 + $0x1e90] sm:$0xff] }
  0x8c   : > { %636 = vst [vmem:[%s2886_s26 + $0x7a0] sm:$0xff] %v635_v52  ;;  %638 = vst [vmem:[%s2886_s26 + $0x7a8] sm:$0xff] %v637_v53  ;;  %v641_v55 = vld [vmem:[%s2881_s25 + $0x1e98] sm:$0xff]  ;;  %v643_v56 = vld [vmem:[%s2881_s25 + $0x1f00] sm:$0xff] }
  0x8d   : > { %640 = vst [vmem:[%s2886_s26 + $0x7b0] sm:$0xff] %v639_v54  ;;  %642 = vst [vmem:[%s2886_s26 + $0x7b8] sm:$0xff] %v641_v55  ;;  %v645_v57 = vld [vmem:[%s2881_s25 + $0x1f08] sm:$0xff]  ;;  %v647_v58 = vld [vmem:[%s2881_s25 + $0x1f10] sm:$0xff] }
  0x8e   : > { %644 = vst [vmem:[%s2886_s26 + $0x7c0] sm:$0xff] %v643_v56  ;;  %v649_v59 = vld [vmem:[%s2881_s25 + $0x1f18] sm:$0xff]  ;;  %646 = vst [vmem:[%s2886_s26 + $0x7c8] sm:$0xff] %v645_v57  ;;  %v651_v60 = vld [vmem:[%s2881_s25 + $0x1f80] sm:$0xff] }
  0x8f   : > { %648 = vst [vmem:[%s2886_s26 + $0x7d0] sm:$0xff] %v647_v58  ;;  %650 = vst [vmem:[%s2886_s26 + $0x7d8] sm:$0xff] %v649_v59  ;;  %v653_v61 = vld [vmem:[%s2881_s25 + $0x1f88] sm:$0xff]  ;;  %v655_v62 = vld [vmem:[%s2881_s25 + $0x1f90] sm:$0xff] }
  0x90   : > { %652 = vst [vmem:[%s2886_s26 + $0x7e0] sm:$0xff] %v651_v60  ;;  %654 = vst [vmem:[%s2886_s26 + $0x7e8] sm:$0xff] %v653_v61  ;;  %v657_v63 = vld [vmem:[%s2881_s25 + $0x1f98] sm:$0xff] }
  0x91   : > { %656 = vst [vmem:[%s2886_s26 + $0x7f0] sm:$0xff] %v655_v62  ;;  %658 = vst [vmem:[%s2886_s26 + $0x7f8] sm:$0xff] %v657_v63 }
  0x92 PF: > { %p2188_p5 = scmp.ge.s32.totalorder %s2822_s14, 1  ;;  %p673_p6 = scmp.lt.s32.totalorder %s2822_s14, 5 }
  0x94   : > { %p674_p7 = pnand %p2188_p5, %p673_p6 }
  0x95   : > { %s680_s27 = sand.u32 (!%p674_p7), 1, %s2814_s12   ;;  %s2190_s28 = sshll.u32 (!%p674_p7), %s2861_s15, 6 }
  0x96   : > { %677 = sbr.rel (%p674_p7) target bundleno = 830 (0x33e), region = 51  ;;  %s2189_s29 = sshll.u32 (!%p674_p7), %s680_s27, 11 }
  0x97   : > { %p706_p8 = scmp.lt.s32.totalorder (!%p674_p7), %s2190_s28, 255  ;;  %s3406_s7 = scalar_lea.vmem (!%p674_p7), [#allocation3], %s2189_s29 }
  0x98   : > { %p2193_p9 = scmp.ne.s32.totalorder (!%p674_p7), %s2861_s15, 0 }
  0x9d   : > { %s4084_s28 = smov (!%p706_p8, %s2190_s28), 255  ;;  %715 = sbr.rel (%p2193_p9) target bundleno = 167 (0xa7), region = 59 }
  0x9e   : > { %s2198_s30 = sshll.u32 %s4084_s28, 5  ;;  %v2824_v0 = vmov (!%p2193_p9), 0.0  }
  0x9f   : > { %s3404_s6 = scalar_lea.vmem %s4078_s2, %s2198_s30  ;;  %716 = vst [vmem:[#allocation2] sm:$0xff] (!%p2193_p9), %v2824_v0  ;;  %717 = vst [vmem:[#allocation2 + $0x8] sm:$0xff] (!%p2193_p9), %v2824_v0 }
  0xa0   : > { %718 = vst [vmem:[#allocation2 + $0x10] sm:$0xff] (!%p2193_p9), %v2824_v0  ;;  %719 = vst [vmem:[#allocation2 + $0x18] sm:$0xff] (!%p2193_p9), %v2824_v0 }
  0xa1   : > { %720 = vst [vmem:[#allocation2 + $0x20] sm:$0xff] (!%p2193_p9), %v2824_v0  ;;  %721 = vst [vmem:[#allocation2 + $0x28] sm:$0xff] (!%p2193_p9), %v2824_v0 }
  0xa2   : > { %722 = vst [vmem:[#allocation2 + $0x30] sm:$0xff] (!%p2193_p9), %v2824_v0  ;;  %723 = vst [vmem:[#allocation2 + $0x38] sm:$0xff] (!%p2193_p9), %v2824_v0 }
  0xa3   : > { %724 = vst [vmem:[#allocation2 + $0x40] sm:$0xff] (!%p2193_p9), %v2824_v0  ;;  %725 = vst [vmem:[#allocation2 + $0x48] sm:$0xff] (!%p2193_p9), %v2824_v0 }
  0xa4   : > { %726 = vst [vmem:[#allocation2 + $0x50] sm:$0xff] %v2824_v0  ;;  %727 = vst [vmem:[#allocation2 + $0x58] sm:$0xff] %v2824_v0 }
  0xa5   : > { %728 = vst [vmem:[#allocation2 + $0x60] sm:$0xff] %v2824_v0  ;;  %729 = vst [vmem:[#allocation2 + $0x68] sm:$0xff] %v2824_v0 }
  0xa6   : > { %730 = vst [vmem:[#allocation2 + $0x70] sm:$0xff] %v2824_v0  ;;  %731 = vst [vmem:[#allocation2 + $0x78] sm:$0xff] %v2824_v0 }
  0xa7 PF: > { %v749_v1 = vld [vmem:[%s3406_s7 + $0x8] sm:$0xff]  ;;  %v751_v3 = vld [vmem:[%s3406_s7 + $0x18] sm:$0xff]  ;;  %v748_v6 = vld [vmem:[%s3406_s7] sm:$0xff]  ;;  %p2194_p10 = scmp.ne.s32.totalorder %s2861_s15, 3 }
  0xa8   : > { %v753_v2 = vld [vmem:[%s3406_s7 + $0x28] sm:$0xff]  ;;  %v755_v5 = vld [vmem:[%s3406_s7 + $0x38] sm:$0xff]  ;;  %v752_v7 = vld [vmem:[%s3406_s7 + $0x20] sm:$0xff] }
  0xa9   : > { %v2199_v4 = vpack.c.bf16 %v753_v2, %v749_v1  ;;  %v2327_v8 = vpack.c.bf16 %v755_v5, %v751_v3  ;;  %v2201_v9 = vpack.c.bf16 %v752_v7, %v748_v6  ;;  %v750_v10 = vld [vmem:[%s3406_s7 + $0x10] sm:$0xff]  ;;  %v757_v12 = vld [vmem:[%s3406_s7 + $0x48] sm:$0xff]  ;;  %v759_v15 = vld [vmem:[%s3406_s7 + $0x58] sm:$0xff] }
  0xaa   : > { %v754_v11 = vld [vmem:[%s3406_s7 + $0x30] sm:$0xff]  ;;  %v761_v14 = vld [vmem:[%s3406_s7 + $0x68] sm:$0xff]  ;;  %v763_v16 = vld [vmem:[%s3406_s7 + $0x78] sm:$0xff] }
  0xab   : > { %2200 = vmatprep.subr.bf16.mxu0 %v2199_v4  ;;  %v2329_v13 = vpack.c.bf16 %v754_v11, %v750_v10  ;;  %2328 = vmatprep.subr.bf16.mxu1 %v2327_v8  ;;  %v2203_v17 = vpack.c.bf16 %v761_v14, %v757_v12  ;;  %v2331_v18 = vpack.c.bf16 %v763_v16, %v759_v15  ;;  %v756_v19 = vld [vmem:[%s3406_s7 + $0x40] sm:$0xff]  ;;  %v758_v21 = vld [vmem:[%s3406_s7 + $0x50] sm:$0xff]  ;;  %v765_v24 = vld [vmem:[%s3406_s7 + $0x88] sm:$0xff] }
  0xac   : > { %2202 = vmatpush1.bf16.msra.mxu0 %v2201_v9  ;;  %v760_v20 = vld [vmem:[%s3406_s7 + $0x60] sm:$0xff]  ;;  %v762_v23 = vld [vmem:[%s3406_s7 + $0x70] sm:$0xff]  ;;  %v769_v25 = vld [vmem:[%s3406_s7 + $0xa8] sm:$0xff] }
  0xad   : > { %2330 = vmatpush1.bf16.msra.mxu1 %v2329_v13  ;;  %v2205_v22 = vpack.c.bf16 %v760_v20, %v756_v19  ;;  %2204 = vmatprep.subr.bf16.mxu0 %v2203_v17  ;;  %v2333_v26 = vpack.c.bf16 %v762_v23, %v758_v21  ;;  %v2207_v27 = vpack.c.bf16 %v769_v25, %v765_v24  ;;  %v767_v28 = vld [vmem:[%s3406_s7 + $0x98] sm:$0xff]  ;;  %v764_v30 = vld [vmem:[%s3406_s7 + $0x80] sm:$0xff]  ;;  %v766_v33 = vld [vmem:[%s3406_s7 + $0x90] sm:$0xff] }
  0xae   : > { %2332 = vmatprep.subr.bf16.mxu1 %v2331_v18  ;;  %v771_v29 = vld [vmem:[%s3406_s7 + $0xb8] sm:$0xff]  ;;  %v768_v32 = vld [vmem:[%s3406_s7 + $0xa0] sm:$0xff]  ;;  %v770_v34 = vld [vmem:[%s3406_s7 + $0xb0] sm:$0xff] }
  0xaf   : > { %v2335_v31 = vpack.c.bf16 %v771_v29, %v767_v28  ;;  %v2209_v35 = vpack.c.bf16 %v768_v32, %v764_v30  ;;  %v773_v36 = vld [vmem:[%s3406_s7 + $0xc8] sm:$0xff]  ;;  %v775_v38 = vld [vmem:[%s3406_s7 + $0xd8] sm:$0xff]  ;;  %v2337_v39 = vpack.c.bf16 %v770_v34, %v766_v33  ;;  %v772_v42 = vld [vmem:[%s3406_s7 + $0xc0] sm:$0xff] }
  0xb0   : > { %2206 = vmatpush1.bf16.msra.mxu0 %v2205_v22  ;;  %v777_v37 = vld [vmem:[%s3406_s7 + $0xe8] sm:$0xff]  ;;  %v779_v41 = vld [vmem:[%s3406_s7 + $0xf8] sm:$0xff]  ;;  %v776_v43 = vld [vmem:[%s3406_s7 + $0xe0] sm:$0xff] }
  0xb1   : > { %2334 = vmatpush1.bf16.msra.mxu1 %v2333_v26  ;;  %2208 = vmatprep.subr.bf16.mxu0 %v2207_v27  ;;  %v2211_v40 = vpack.c.bf16 %v777_v37, %v773_v36  ;;  %v2339_v44 = vpack.c.bf16 %v779_v41, %v775_v38  ;;  %v774_v45 = vld [vmem:[%s3406_s7 + $0xd0] sm:$0xff]  ;;  %v781_v47 = vld [vmem:[%s3406_s7 + $0x108] sm:$0xff]  ;;  %v783_v49 = vld [vmem:[%s3406_s7 + $0x118] sm:$0xff]  ;;  %v2213_v51 = vpack.c.bf16 %v776_v43, %v772_v42 }
  0xb2   : > { %2336 = vmatprep.subr.bf16.mxu1 %v2335_v31  ;;  %v778_v46 = vld [vmem:[%s3406_s7 + $0xf0] sm:$0xff]  ;;  %v785_v48 = vld [vmem:[%s3406_s7 + $0x128] sm:$0xff]  ;;  %v787_v50 = vld [vmem:[%s3406_s7 + $0x138] sm:$0xff] }
  0xb3   : > { %v2341_v52 = vpack.c.bf16 %v778_v46, %v774_v45  ;;  %v2215_v53 = vpack.c.bf16 %v785_v48, %v781_v47  ;;  %v780_v54 = vld [vmem:[%s3406_s7 + $0x100] sm:$0xff]  ;;  %v782_v56 = vld [vmem:[%s3406_s7 + $0x110] sm:$0xff]  ;;  %v2343_v57 = vpack.c.bf16 %v787_v50, %v783_v49  ;;  %v789_v59 = vld [vmem:[%s3406_s7 + $0x148] sm:$0xff] }
  0xb4   : > { %2210 = vmatpush1.bf16.msra.mxu0 %v2209_v35  ;;  %v784_v55 = vld [vmem:[%s3406_s7 + $0x120] sm:$0xff]  ;;  %v786_v58 = vld [vmem:[%s3406_s7 + $0x130] sm:$0xff]  ;;  %v793_v60 = vld [vmem:[%s3406_s7 + $0x168] sm:$0xff] }
  0xb5   : > { %2338 = vmatpush1.bf16.msra.mxu1 %v2337_v39  ;;  %2212 = vmatprep.subr.bf16.mxu0 %v2211_v40  ;;  %v791_v61 = vld [vmem:[%s3406_s7 + $0x158] sm:$0xff]  ;;  %v2217_v63 = vpack.c.bf16 %v784_v55, %v780_v54  ;;  %v2345_v0 = vpack.c.bf16 %v786_v58, %v782_v56  ;;  %v2219_v1 = vpack.c.bf16 %v793_v60, %v789_v59  ;;  %v788_v2 = vld [vmem:[%s3406_s7 + $0x140] sm:$0xff]  ;;  %v790_v4 = vld [vmem:[%s3406_s7 + $0x150] sm:$0xff] }
  0xb6   : > { %2340 = vmatprep.subr.bf16.mxu1 %v2339_v44  ;;  %v795_v62 = vld [vmem:[%s3406_s7 + $0x178] sm:$0xff]  ;;  %v792_v3 = vld [vmem:[%s3406_s7 + $0x160] sm:$0xff]  ;;  %v794_v6 = vld [vmem:[%s3406_s7 + $0x170] sm:$0xff] }
  0xb7   : > { %v2347_v5 = vpack.c.bf16 %v795_v62, %v791_v61  ;;  %v797_v7 = vld [vmem:[%s3406_s7 + $0x188] sm:$0xff]  ;;  %v799_v9 = vld [vmem:[%s3406_s7 + $0x198] sm:$0xff]  ;;  %v2221_v11 = vpack.c.bf16 %v792_v3, %v788_v2  ;;  %v2349_v12 = vpack.c.bf16 %v794_v6, %v790_v4  ;;  %v796_v14 = vld [vmem:[%s3406_s7 + $0x180] sm:$0xff] }
  0xb8   : > { %2214 = vmatpush1.bf16.msra.mxu0 %v2213_v51  ;;  %v801_v8 = vld [vmem:[%s3406_s7 + $0x1a8] sm:$0xff]  ;;  %v803_v10 = vld [vmem:[%s3406_s7 + $0x1b8] sm:$0xff]  ;;  %v800_v15 = vld [vmem:[%s3406_s7 + $0x1a0] sm:$0xff] }
  0xb9   : > { %2342 = vmatpush1.bf16.msra.mxu1 %v2341_v52  ;;  %2216 = vmatprep.subr.bf16.mxu0 %v2215_v53  ;;  %v2223_v13 = vpack.c.bf16 %v801_v8, %v797_v7  ;;  %v798_v16 = vld [vmem:[%s3406_s7 + $0x190] sm:$0xff]  ;;  %v2351_v17 = vpack.c.bf16 %v803_v10, %v799_v9  ;;  %v805_v19 = vld [vmem:[%s3406_s7 + $0x1c8] sm:$0xff]  ;;  %v807_v21 = vld [vmem:[%s3406_s7 + $0x1d8] sm:$0xff]  ;;  %v2225_v23 = vpack.c.bf16 %v800_v15, %v796_v14 }
  0xba   : > { %2344 = vmatprep.subr.bf16.mxu1 %v2343_v57  ;;  %v802_v18 = vld [vmem:[%s3406_s7 + $0x1b0] sm:$0xff]  ;;  %v809_v20 = vld [vmem:[%s3406_s7 + $0x1e8] sm:$0xff]  ;;  %v811_v22 = vld [vmem:[%s3406_s7 + $0x1f8] sm:$0xff] }
  0xbb   : > { %v2353_v24 = vpack.c.bf16 %v802_v18, %v798_v16  ;;  %v2227_v25 = vpack.c.bf16 %v809_v20, %v805_v19  ;;  %v804_v26 = vld [vmem:[%s3406_s7 + $0x1c0] sm:$0xff]  ;;  %v806_v28 = vld [vmem:[%s3406_s7 + $0x1d0] sm:$0xff]  ;;  %v2355_v29 = vpack.c.bf16 %v811_v22, %v807_v21  ;;  %v813_v31 = vld [vmem:[%s3406_s7 + $0x208] sm:$0xff] }
  0xbc   : > { %2218 = vmatpush1.bf16.msra.mxu0 %v2217_v63  ;;  %v808_v27 = vld [vmem:[%s3406_s7 + $0x1e0] sm:$0xff]  ;;  %v810_v30 = vld [vmem:[%s3406_s7 + $0x1f0] sm:$0xff]  ;;  %v817_v32 = vld [vmem:[%s3406_s7 + $0x228] sm:$0xff] }
  0xbd   : > { %2346 = vmatpush1.bf16.msra.mxu1 %v2345_v0  ;;  %2220 = vmatprep.subr.bf16.mxu0 %v2219_v1  ;;  %v815_v33 = vld [vmem:[%s3406_s7 + $0x218] sm:$0xff]  ;;  %v2229_v35 = vpack.c.bf16 %v808_v27, %v804_v26  ;;  %v2357_v36 = vpack.c.bf16 %v810_v30, %v806_v28  ;;  %v2231_v37 = vpack.c.bf16 %v817_v32, %v813_v31  ;;  %v812_v38 = vld [vmem:[%s3406_s7 + $0x200] sm:$0xff]  ;;  %v814_v40 = vld [vmem:[%s3406_s7 + $0x210] sm:$0xff] }
  0xbe   : > { %2348 = vmatprep.subr.bf16.mxu1 %v2347_v5  ;;  %v819_v34 = vld [vmem:[%s3406_s7 + $0x238] sm:$0xff]  ;;  %v816_v39 = vld [vmem:[%s3406_s7 + $0x220] sm:$0xff]  ;;  %v818_v42 = vld [vmem:[%s3406_s7 + $0x230] sm:$0xff] }
  0xbf   : > { %v2359_v41 = vpack.c.bf16 %v819_v34, %v815_v33  ;;  %v821_v43 = vld [vmem:[%s3406_s7 + $0x248] sm:$0xff]  ;;  %v823_v45 = vld [vmem:[%s3406_s7 + $0x258] sm:$0xff]  ;;  %v2233_v47 = vpack.c.bf16 %v816_v39, %v812_v38  ;;  %v2361_v48 = vpack.c.bf16 %v818_v42, %v814_v40  ;;  %v820_v50 = vld [vmem:[%s3406_s7 + $0x240] sm:$0xff] }
  0xc0   : > { %2222 = vmatpush1.bf16.msra.mxu0 %v2221_v11  ;;  %v825_v44 = vld [vmem:[%s3406_s7 + $0x268] sm:$0xff]  ;;  %v827_v46 = vld [vmem:[%s3406_s7 + $0x278] sm:$0xff]  ;;  %v824_v51 = vld [vmem:[%s3406_s7 + $0x260] sm:$0xff] }
  0xc1   : > { %2350 = vmatpush1.bf16.msra.mxu1 %v2349_v12  ;;  %2224 = vmatprep.subr.bf16.mxu0 %v2223_v13  ;;  %v2235_v49 = vpack.c.bf16 %v825_v44, %v821_v43  ;;  %v822_v52 = vld [vmem:[%s3406_s7 + $0x250] sm:$0xff]  ;;  %v2363_v53 = vpack.c.bf16 %v827_v46, %v823_v45  ;;  %v829_v55 = vld [vmem:[%s3406_s7 + $0x288] sm:$0xff]  ;;  %v831_v57 = vld [vmem:[%s3406_s7 + $0x298] sm:$0xff]  ;;  %v2237_v59 = vpack.c.bf16 %v824_v51, %v820_v50 }
  0xc2   : > { %2352 = vmatprep.subr.bf16.mxu1 %v2351_v17  ;;  %v826_v54 = vld [vmem:[%s3406_s7 + $0x270] sm:$0xff]  ;;  %v833_v56 = vld [vmem:[%s3406_s7 + $0x2a8] sm:$0xff]  ;;  %v835_v58 = vld [vmem:[%s3406_s7 + $0x2b8] sm:$0xff] }
  0xc3   : > { %v2365_v60 = vpack.c.bf16 %v826_v54, %v822_v52  ;;  %v2239_v61 = vpack.c.bf16 %v833_v56, %v829_v55  ;;  %v828_v62 = vld [vmem:[%s3406_s7 + $0x280] sm:$0xff]  ;;  %v830_v0 = vld [vmem:[%s3406_s7 + $0x290] sm:$0xff]  ;;  %v2367_v1 = vpack.c.bf16 %v835_v58, %v831_v57  ;;  %v837_v3 = vld [vmem:[%s3406_s7 + $0x2c8] sm:$0xff] }
  0xc4   : > { %2226 = vmatpush1.bf16.msra.mxu0 %v2225_v23  ;;  %v832_v63 = vld [vmem:[%s3406_s7 + $0x2a0] sm:$0xff]  ;;  %v834_v2 = vld [vmem:[%s3406_s7 + $0x2b0] sm:$0xff]  ;;  %v841_v4 = vld [vmem:[%s3406_s7 + $0x2e8] sm:$0xff] }
  0xc5   : > { %2354 = vmatpush1.bf16.msra.mxu1 %v2353_v24  ;;  %2228 = vmatprep.subr.bf16.mxu0 %v2227_v25  ;;  %v839_v5 = vld [vmem:[%s3406_s7 + $0x2d8] sm:$0xff]  ;;  %v2241_v7 = vpack.c.bf16 %v832_v63, %v828_v62  ;;  %v836_v8 = vld [vmem:[%s3406_s7 + $0x2c0] sm:$0xff]  ;;  %v2369_v9 = vpack.c.bf16 %v834_v2, %v830_v0  ;;  %v2243_v10 = vpack.c.bf16 %v841_v4, %v837_v3  ;;  %v838_v12 = vld [vmem:[%s3406_s7 + $0x2d0] sm:$0xff] }
  0xc6   : > { %2356 = vmatprep.subr.bf16.mxu1 %v2355_v29  ;;  %v843_v6 = vld [vmem:[%s3406_s7 + $0x2f8] sm:$0xff]  ;;  %v840_v11 = vld [vmem:[%s3406_s7 + $0x2e0] sm:$0xff]  ;;  %v842_v13 = vld [vmem:[%s3406_s7 + $0x2f0] sm:$0xff] }
  0xc7   : > { %v2371_v14 = vpack.c.bf16 %v843_v6, %v839_v5  ;;  %v845_v15 = vld [vmem:[%s3406_s7 + $0x308] sm:$0xff]  ;;  %v847_v18 = vld [vmem:[%s3406_s7 + $0x318] sm:$0xff]  ;;  %v2245_v20 = vpack.c.bf16 %v840_v11, %v836_v8  ;;  %v2373_v21 = vpack.c.bf16 %v842_v13, %v838_v12  ;;  %v844_v23 = vld [vmem:[%s3406_s7 + $0x300] sm:$0xff] }
  0xc8   : > { %2230 = vmatpush1.bf16.msra.mxu0 %v2229_v35  ;;  %v849_v16 = vld [vmem:[%s3406_s7 + $0x328] sm:$0xff]  ;;  %v851_v19 = vld [vmem:[%s3406_s7 + $0x338] sm:$0xff]  ;;  %v848_v24 = vld [vmem:[%s3406_s7 + $0x320] sm:$0xff] }
  0xc9   : > { %2358 = vmatpush1.bf16.msra.mxu1 %v2357_v36  ;;  %2232 = vmatprep.subr.bf16.mxu0 %v2231_v37  ;;  %v733_v17 = vld [vmem:[%s4076_s0 + $0x8] sm:$0xff]  ;;  %v2247_v22 = vpack.c.bf16 %v849_v16, %v845_v15  ;;  %v846_v25 = vld [vmem:[%s3406_s7 + $0x310] sm:$0xff]  ;;  %v2375_v26 = vpack.c.bf16 %v851_v19, %v847_v18  ;;  %v855_v30 = vld [vmem:[%s3406_s7 + $0x358] sm:$0xff]  ;;  %v2249_v32 = vpack.c.bf16 %v848_v24, %v844_v23 }
  0xca   : > { %2360 = vmatprep.subr.bf16.mxu1 %v2359_v41  ;;  %1068 = vmatprep.mubr.f32.mxu0 %v733_v17  ;;  %v850_v27 = vld [vmem:[%s3406_s7 + $0x330] sm:$0xff]  ;;  %v853_v28 = vld [vmem:[%s3406_s7 + $0x348] sm:$0xff]  ;;  %v859_v31 = vld [vmem:[%s3406_s7 + $0x378] sm:$0xff] }
  0xcb   : > { %1246 = vmatprep.mubr.f32.mxu1 %v733_v17  ;;  %v857_v29 = vld [vmem:[%s3406_s7 + $0x368] sm:$0xff]  ;;  %v2377_v33 = vpack.c.bf16 %v850_v27, %v846_v25  ;;  %v852_v35 = vld [vmem:[%s3406_s7 + $0x340] sm:$0xff]  ;;  %v854_v37 = vld [vmem:[%s3406_s7 + $0x350] sm:$0xff]  ;;  %v2379_v38 = vpack.c.bf16 %v859_v31, %v855_v30 }
  0xcc   : > { %2234 = vmatpush1.bf16.msra.mxu0 %v2233_v47  ;;  %v2251_v34 = vpack.c.bf16 %v857_v29, %v853_v28  ;;  %v856_v36 = vld [vmem:[%s3406_s7 + $0x360] sm:$0xff]  ;;  %v858_v39 = vld [vmem:[%s3406_s7 + $0x370] sm:$0xff]  ;;  %v861_v40 = vld [vmem:[%s3406_s7 + $0x388] sm:$0xff] }
  0xcd   : > { %2362 = vmatpush1.bf16.msra.mxu1 %v2361_v48  ;;  %2236 = vmatprep.subr.bf16.mxu0 %v2235_v49  ;;  %v865_v41 = vld [vmem:[%s3406_s7 + $0x3a8] sm:$0xff]  ;;  %v863_v42 = vld [vmem:[%s3406_s7 + $0x398] sm:$0xff]  ;;  %v2253_v44 = vpack.c.bf16 %v856_v36, %v852_v35  ;;  %v2381_v45 = vpack.c.bf16 %v858_v39, %v854_v37  ;;  %v860_v47 = vld [vmem:[%s3406_s7 + $0x380] sm:$0xff] }
  0xce   : > { %2364 = vmatprep.subr.bf16.mxu1 %v2363_v53  ;;  %v867_v43 = vld [vmem:[%s3406_s7 + $0x3b8] sm:$0xff]  ;;  %v2255_v46 = vpack.c.bf16 %v865_v41, %v861_v40  ;;  %v864_v48 = vld [vmem:[%s3406_s7 + $0x3a0] sm:$0xff]  ;;  %v862_v49 = vld [vmem:[%s3406_s7 + $0x390] sm:$0xff] }
  0xcf   : > { %v2383_v50 = vpack.c.bf16 %v867_v43, %v863_v42  ;;  %v866_v51 = vld [vmem:[%s3406_s7 + $0x3b0] sm:$0xff]  ;;  %v869_v52 = vld [vmem:[%s3406_s7 + $0x3c8] sm:$0xff]  ;;  %v871_v54 = vld [vmem:[%s3406_s7 + $0x3d8] sm:$0xff]  ;;  %v2257_v56 = vpack.c.bf16 %v864_v48, %v860_v47 }
  0xd0   : > { %2238 = vmatpush1.bf16.msra.mxu0 %v2237_v59  ;;  %v873_v53 = vld [vmem:[%s3406_s7 + $0x3e8] sm:$0xff]  ;;  %v875_v55 = vld [vmem:[%s3406_s7 + $0x3f8] sm:$0xff]  ;;  %v2385_v57 = vpack.c.bf16 %v866_v51, %v862_v49  ;;  %v868_v59 = vld [vmem:[%s3406_s7 + $0x3c0] sm:$0xff] }
  0xd1   : > { %2366 = vmatpush1.bf16.msra.mxu1 %v2365_v60  ;;  %2240 = vmatprep.subr.bf16.mxu0 %v2239_v61  ;;  %v2259_v58 = vpack.c.bf16 %v873_v53, %v869_v52  ;;  %v872_v60 = vld [vmem:[%s3406_s7 + $0x3e0] sm:$0xff]  ;;  %v870_v61 = vld [vmem:[%s3406_s7 + $0x3d0] sm:$0xff]  ;;  %v2387_v62 = vpack.c.bf16 %v875_v55, %v871_v54  ;;  %v877_v0 = vld [vmem:[%s3406_s7 + $0x408] sm:$0xff] }
  0xd2   : > { %2368 = vmatprep.subr.bf16.mxu1 %v2367_v1  ;;  %v874_v63 = vld [vmem:[%s3406_s7 + $0x3f0] sm:$0xff]  ;;  %v881_v1 = vld [vmem:[%s3406_s7 + $0x428] sm:$0xff]  ;;  %v879_v2 = vld [vmem:[%s3406_s7 + $0x418] sm:$0xff]  ;;  %v2261_v4 = vpack.c.bf16 %v872_v60, %v868_v59 }
  0xd3   : > { %v883_v3 = vld [vmem:[%s3406_s7 + $0x438] sm:$0xff]  ;;  %v2389_v5 = vpack.c.bf16 %v874_v63, %v870_v61  ;;  %v2263_v6 = vpack.c.bf16 %v881_v1, %v877_v0  ;;  %v880_v8 = vld [vmem:[%s3406_s7 + $0x420] sm:$0xff]  ;;  %v882_v11 = vld [vmem:[%s3406_s7 + $0x430] sm:$0xff] }
  0xd4   : > { %2242 = vmatpush1.bf16.msra.mxu0 %v2241_v7  ;;  %v876_v7 = vld [vmem:[%s3406_s7 + $0x400] sm:$0xff]  ;;  %v885_v12 = vld [vmem:[%s3406_s7 + $0x448] sm:$0xff]  ;;  %v891_v15 = vld [vmem:[%s3406_s7 + $0x478] sm:$0xff] }
  0xd5   : > { %2370 = vmatpush1.bf16.msra.mxu1 %v2369_v9  ;;  %2244 = vmatprep.subr.bf16.mxu0 %v2243_v10  ;;  %v878_v9 = vld [vmem:[%s3406_s7 + $0x410] sm:$0xff]  ;;  %v2391_v10 = vpack.c.bf16 %v883_v3, %v879_v2  ;;  %v889_v13 = vld [vmem:[%s3406_s7 + $0x468] sm:$0xff]  ;;  %v732_v16 = vld [vmem:[%s4076_s0] sm:$0xff]  ;;  %v2265_v17 = vpack.c.bf16 %v880_v8, %v876_v7 }
  0xd6   : > { %2372 = vmatprep.subr.bf16.mxu1 %v2371_v14  ;;  %v887_v14 = vld [vmem:[%s3406_s7 + $0x458] sm:$0xff]  ;;  %v2393_v18 = vpack.c.bf16 %v882_v11, %v878_v9  ;;  %v2267_v19 = vpack.c.bf16 %v889_v13, %v885_v12  ;;  %v890_v24 = vld [vmem:[%s3406_s7 + $0x470] sm:$0xff]  ;;  %v893_v25 = vld [vmem:[%s3406_s7 + $0x488] sm:$0xff] }
  0xd7   : > { %v2395_v23 = vpack.c.bf16 %v891_v15, %v887_v14  ;;  %v895_v27 = vld [vmem:[%s3406_s7 + $0x498] sm:$0xff]  ;;  %v898_v36 = vld [vmem:[%s3406_s7 + $0x4b0] sm:$0xff]  ;;  %v901_v37 = vld [vmem:[%s3406_s7 + $0x4c8] sm:$0xff] }
  0xd8   : > { %2246 = vmatpush1.bf16.msra.mxu0 %v2245_v20  ;;  %v884_v20 = vld [vmem:[%s3406_s7 + $0x440] sm:$0xff]  ;;  %v899_v28 = vld [vmem:[%s3406_s7 + $0x4b8] sm:$0xff]  ;;  %v906_v48 = vld [vmem:[%s3406_s7 + $0x4f0] sm:$0xff] }
  0xd9   : > { %2374 = vmatpush1.bf16.msra.mxu1 %v2373_v21  ;;  %2248 = vmatprep.subr.bf16.mxu0 %v2247_v22  ;;  %v888_v21 = vld [vmem:[%s3406_s7 + $0x460] sm:$0xff]  ;;  %v886_v22 = vld [vmem:[%s3406_s7 + $0x450] sm:$0xff]  ;;  %v2399_v35 = vpack.c.bf16 %v899_v28, %v895_v27  ;;  %v903_v39 = vld [vmem:[%s3406_s7 + $0x4d8] sm:$0xff] }
  0xda   : > { %2376 = vmatprep.subr.bf16.mxu1 %v2375_v26  ;;  %v897_v26 = vld [vmem:[%s3406_s7 + $0x4a8] sm:$0xff]  ;;  %v2269_v29 = vpack.c.bf16 %v888_v21, %v884_v20  ;;  %v2397_v30 = vpack.c.bf16 %v890_v24, %v886_v22  ;;  %v907_v40 = vld [vmem:[%s3406_s7 + $0x4f8] sm:$0xff]  ;;  %v908_v54 = vld [vmem:[%s3406_s7 + $0x500] sm:$0xff] }
  0xdb   : > { %v2271_v31 = vpack.c.bf16 %v897_v26, %v893_v25  ;;  %v2403_v47 = vpack.c.bf16 %v907_v40, %v903_v39  ;;  %v909_v49 = vld [vmem:[%s3406_s7 + $0x508] sm:$0xff]  ;;  %v911_v51 = vld [vmem:[%s3406_s7 + $0x518] sm:$0xff]  ;;  %v912_v55 = vld [vmem:[%s3406_s7 + $0x520] sm:$0xff] }
  0xdc   : > { %2250 = vmatpush1.bf16.msra.mxu0 %v2249_v32  ;;  %v892_v32 = vld [vmem:[%s3406_s7 + $0x480] sm:$0xff]  ;;  %v915_v52 = vld [vmem:[%s3406_s7 + $0x538] sm:$0xff]  ;;  %v914_v59 = vld [vmem:[%s3406_s7 + $0x530] sm:$0xff]  ;;  %v2281_v3 = vpack.c.bf16 %v912_v55, %v908_v54 }
  0xdd   : > { %2378 = vmatpush1.bf16.msra.mxu1 %v2377_v33  ;;  %2252 = vmatprep.subr.bf16.mxu0 %v2251_v34  ;;  %v896_v33 = vld [vmem:[%s3406_s7 + $0x4a0] sm:$0xff]  ;;  %v894_v34 = vld [vmem:[%s3406_s7 + $0x490] sm:$0xff]  ;;  %v917_v60 = vld [vmem:[%s3406_s7 + $0x548] sm:$0xff]  ;;  %v2407_v61 = vpack.c.bf16 %v915_v52, %v911_v51 }
  0xde   : > { %2380 = vmatprep.subr.bf16.mxu1 %v2379_v38  ;;  %v905_v38 = vld [vmem:[%s3406_s7 + $0x4e8] sm:$0xff]  ;;  %v2273_v41 = vpack.c.bf16 %v896_v33, %v892_v32  ;;  %v2401_v42 = vpack.c.bf16 %v898_v36, %v894_v34  ;;  %v736_v0 = vld [vmem:[%s4076_s0 + $0x20] sm:$0xff]  ;;  %v919_v1 = vld [vmem:[%s3406_s7 + $0x558] sm:$0xff] }
  0xdf   : > { %v2275_v43 = vpack.c.bf16 %v905_v38, %v901_v37  ;;  %v737_v63 = vld [vmem:[%s4076_s0 + $0x28] sm:$0xff]  ;;  %v923_v2 = vld [vmem:[%s3406_s7 + $0x578] sm:$0xff]  ;;  %v918_v8 = vld [vmem:[%s3406_s7 + $0x550] sm:$0xff] }
  0xe0   : > { %2254 = vmatpush1.bf16.msra.mxu0 %v2253_v44  ;;  %v900_v44 = vld [vmem:[%s3406_s7 + $0x4c0] sm:$0xff]  ;;  %v741_v9 = vld [vmem:[%s4076_s0 + $0x48] sm:$0xff]  ;;  %v2411_v11 = vpack.c.bf16 %v923_v2, %v919_v1  ;;  %v922_v12 = vld [vmem:[%s3406_s7 + $0x570] sm:$0xff] }
  0xe1   : > { %2382 = vmatpush1.bf16.msra.mxu1 %v2381_v45  ;;  %2256 = vmatprep.subr.bf16.mxu0 %v2255_v46  ;;  %v904_v45 = vld [vmem:[%s3406_s7 + $0x4e0] sm:$0xff]  ;;  %v902_v46 = vld [vmem:[%s3406_s7 + $0x4d0] sm:$0xff]  ;;  %v925_v13 = vld [vmem:[%s3406_s7 + $0x588] sm:$0xff]  ;;  %v2413_v20 = vpack.c.bf16 %v922_v12, %v918_v8 }
  0xe2   : > { %2384 = vmatprep.subr.bf16.mxu1 %v2383_v50  ;;  %v913_v50 = vld [vmem:[%s3406_s7 + $0x528] sm:$0xff]  ;;  %v2277_v53 = vpack.c.bf16 %v904_v45, %v900_v44  ;;  %v927_v15 = vld [vmem:[%s3406_s7 + $0x598] sm:$0xff]  ;;  %v928_v22 = vld [vmem:[%s3406_s7 + $0x5a0] sm:$0xff] }
  0xe3   : > { %v929_v14 = vld [vmem:[%s3406_s7 + $0x5a8] sm:$0xff]  ;;  %v744_v24 = vld [vmem:[%s4076_s0 + $0x60] sm:$0xff]  ;;  %v930_v26 = vld [vmem:[%s3406_s7 + $0x5b0] sm:$0xff] }
  0xe4   : > { %2258 = vmatpush1.bf16.msra.mxu0 %v2257_v56  ;;  %v2405_v56 = vpack.c.bf16 %v906_v48, %v902_v46  ;;  %v2287_v21 = vpack.c.bf16 %v929_v14, %v925_v13  ;;  %v933_v27 = vld [vmem:[%s3406_s7 + $0x5c8] sm:$0xff]  ;;  %v735_v32 = vld [vmem:[%s4076_s0 + $0x18] sm:$0xff]  ;;  %v936_v36 = vld [vmem:[%s3406_s7 + $0x5e0] sm:$0xff] }
  0xe5   : > { %2386 = vmatpush1.bf16.msra.mxu1 %v2385_v57  ;;  %2260 = vmatprep.subr.bf16.mxu0 %v2259_v58  ;;  %v2279_v57 = vpack.c.bf16 %v913_v50, %v909_v49  ;;  %v910_v58 = vld [vmem:[%s3406_s7 + $0x510] sm:$0xff]  ;;  %v937_v28 = vld [vmem:[%s3406_s7 + $0x5e8] sm:$0xff]  ;;  %v944_v48 = vld [vmem:[%s3406_s7 + $0x620] sm:$0xff] }
  0xe6   : > { %2388 = vmatprep.subr.bf16.mxu1 %v2387_v62  ;;  %v921_v62 = vld [vmem:[%s3406_s7 + $0x568] sm:$0xff]  ;;  %v2291_v34 = vpack.c.bf16 %v937_v28, %v933_v27  ;;  %v934_v37 = vld [vmem:[%s3406_s7 + $0x5d0] sm:$0xff]  ;;  %v951_v54 = vld [vmem:[%s3406_s7 + $0x658] sm:$0xff] }
  0xe7   : > { %v2283_v7 = vpack.c.bf16 %v921_v62, %v917_v60  ;;  %v938_v39 = vld [vmem:[%s3406_s7 + $0x5f0] sm:$0xff]  ;;  %v941_v40 = vld [vmem:[%s3406_s7 + $0x608] sm:$0xff]  ;;  %v955_v55 = vld [vmem:[%s3406_s7 + $0x678] sm:$0xff] }
  0xe8   : > { %2262 = vmatpush1.bf16.msra.mxu0 %v2261_v4  ;;  %v916_v4 = vld [vmem:[%s3406_s7 + $0x540] sm:$0xff]  ;;  %v2421_v45 = vpack.c.bf16 %v938_v39, %v934_v37  ;;  %v942_v49 = vld [vmem:[%s3406_s7 + $0x610] sm:$0xff]  ;;  %v949_v52 = vld [vmem:[%s3406_s7 + $0x648] sm:$0xff]  ;;  %v2427_v62 = vpack.c.bf16 %v955_v55, %v951_v54 }
  0xe9   : > { %2390 = vmatpush1.bf16.msra.mxu1 %v2389_v5  ;;  %2264 = vmatprep.subr.bf16.mxu0 %v2263_v6  ;;  %v920_v5 = vld [vmem:[%s3406_s7 + $0x560] sm:$0xff]  ;;  %v2409_v6 = vpack.c.bf16 %v914_v59, %v910_v58  ;;  %v946_v51 = vld [vmem:[%s3406_s7 + $0x630] sm:$0xff]  ;;  %v961_v1 = vld [vmem:[%s3406_s7 + $0x6a8] sm:$0xff] }
  0xea   : > { %2392 = vmatprep.subr.bf16.mxu1 %v2391_v10  ;;  %v740_v10 = vld [vmem:[%s4076_s0 + $0x40] sm:$0xff]  ;;  %v959_v2 = vld [vmem:[%s3406_s7 + $0x698] sm:$0xff]  ;;  %v965_v12 = vld [vmem:[%s3406_s7 + $0x6c8] sm:$0xff] }
  0xeb   : > { %1069 = vmatmul.mubr.f32.vlgmr.msra.gmra.mrb[0].mxu0 %v732_v16  ;;  %v948_v59 = vld [vmem:[%s3406_s7 + $0x640] sm:$0xff]  ;;  %v969_v13 = vld [vmem:[%s3406_s7 + $0x6e8] sm:$0xff]  ;;  %v967_v14 = vld [vmem:[%s3406_s7 + $0x6d8] sm:$0xff] }
  0xec   : > { %2266 = vmatpush1.bf16.msra.mxu0 %v2265_v17  ;;  %1247 = vmatmul.mubr.f32.vlgmr.msra.gmra.mrb[0].mxu1 %v732_v16  ;;  %v931_v16 = vld [vmem:[%s3406_s7 + $0x5b8] sm:$0xff]  ;;  %v2285_v17 = vpack.c.bf16 %v920_v5, %v916_v4  ;;  %v952_v60 = vld [vmem:[%s3406_s7 + $0x660] sm:$0xff]  ;;  %v985_v37 = vld [vmem:[%s3406_s7 + $0x768] sm:$0xff] }
  0xed   : > { %2394 = vmatpush1.bf16.msra.mxu1 %v2393_v18  ;;  %2268 = vmatprep.subr.bf16.mxu0 %v2267_v19  ;;  %v924_v18 = vld [vmem:[%s3406_s7 + $0x580] sm:$0xff]  ;;  %v745_v19 = vld [vmem:[%s4076_s0 + $0x68] sm:$0xff]  ;;  %v2415_v25 = vpack.c.bf16 %v931_v16, %v927_v15  ;;  %v2301_v4 = vpack.c.bf16 %v952_v60, %v948_v59  ;;  %v971_v15 = vld [vmem:[%s3406_s7 + $0x6f8] sm:$0xff] }
  0xee   : > { %2396 = vmatprep.subr.bf16.mxu1 %v2395_v23  ;;  %1074 = vmatprep.mubr.f32.mxu0 %v737_v63  ;;  %v926_v23 = vld [vmem:[%s3406_s7 + $0x590] sm:$0xff]  ;;  %v960_v8 = vld [vmem:[%s3406_s7 + $0x6a0] sm:$0xff]  ;;  %v979_v27 = vld [vmem:[%s3406_s7 + $0x738] sm:$0xff] }
  0xef   : > { %1252 = vmatprep.mubr.f32.mxu1 %v737_v63  ;;  %1075 = vmatmul.mubr.f32.gmra.mrb[2].mxu0 %v736_v0  ;;  %v2417_v33 = vpack.c.bf16 %v930_v26, %v926_v23  ;;  %v954_v63 = vld [vmem:[%s3406_s7 + $0x670] sm:$0xff]  ;;  %v975_v26 = vld [vmem:[%s3406_s7 + $0x718] sm:$0xff]  ;;  %v988_v55 = vld [vmem:[%s3406_s7 + $0x780] sm:$0xff] }
  0xf0   : > { %2270 = vmatpush1.bf16.msra.mxu0 %v2269_v29  ;;  %1253 = vmatmul.mubr.f32.gmra.mrb[2].mxu1 %v736_v0  ;;  %v935_v29 = vld [vmem:[%s3406_s7 + $0x5d8] sm:$0xff]  ;;  %v957_v0 = vld [vmem:[%s3406_s7 + $0x688] sm:$0xff]  ;;  %v970_v23 = vld [vmem:[%s3406_s7 + $0x6f0] sm:$0xff] }
  0xf1   : > { %2398 = vmatpush1.bf16.msra.mxu1 %v2397_v30  ;;  %2272 = vmatprep.subr.bf16.mxu0 %v2271_v31  ;;  %v939_v30 = vld [vmem:[%s3406_s7 + $0x5f8] sm:$0xff]  ;;  %v2289_v31 = vpack.c.bf16 %v928_v22, %v924_v18  ;;  %v2307_v18 = vpack.c.bf16 %v969_v13, %v965_v12  ;;  %v2435_v22 = vpack.c.bf16 %v971_v15, %v967_v14  ;;  %v994_v59 = vld [vmem:[%s3406_s7 + $0x7b0] sm:$0xff]  ;;  %v997_v60 = vld [vmem:[%s3406_s7 + $0x7c8] sm:$0xff] }
  0xf2   : > { %2400 = vmatprep.subr.bf16.mxu1 %v2399_v35  ;;  %1080 = vmatprep.mubr.f32.mxu0 %v741_v9  ;;  %v932_v35 = vld [vmem:[%s3406_s7 + $0x5c0] sm:$0xff]  ;;  %v2419_v38 = vpack.c.bf16 %v939_v30, %v935_v29  ;;  %v987_v39 = vld [vmem:[%s3406_s7 + $0x778] sm:$0xff] }
  0xf3   : > { %1258 = vmatprep.mubr.f32.mxu1 %v741_v9  ;;  %1081 = vmatmul.mubr.f32.gmra.mrb[4].mxu0 %v740_v10  ;;  %v2293_v44 = vpack.c.bf16 %v936_v36, %v932_v35  ;;  %v958_v9 = vld [vmem:[%s3406_s7 + $0x690] sm:$0xff]  ;;  %v981_v36 = vld [vmem:[%s3406_s7 + $0x748] sm:$0xff] }
  0xf4   : > { %2274 = vmatpush1.bf16.msra.mxu0 %v2273_v41  ;;  %1259 = vmatmul.mubr.f32.gmra.mrb[4].mxu1 %v740_v10  ;;  %v945_v41 = vld [vmem:[%s3406_s7 + $0x628] sm:$0xff]  ;;  %v978_v35 = vld [vmem:[%s3406_s7 + $0x730] sm:$0xff] }
  0xf5   : > { %2402 = vmatpush1.bf16.msra.mxu1 %v2401_v42  ;;  %2276 = vmatprep.subr.bf16.mxu0 %v2275_v43  ;;  %v943_v42 = vld [vmem:[%s3406_s7 + $0x618] sm:$0xff]  ;;  %v2295_v46 = vpack.c.bf16 %v945_v41, %v941_v40 }
  0xf6   : > { %2404 = vmatprep.subr.bf16.mxu1 %v2403_v47  ;;  %1086 = vmatprep.mubr.f32.mxu0 %v745_v19  ;;  %v947_v43 = vld [vmem:[%s3406_s7 + $0x638] sm:$0xff]  ;;  %v940_v47 = vld [vmem:[%s3406_s7 + $0x600] sm:$0xff] }
  0xf7   : > { %1264 = vmatprep.mubr.f32.mxu1 %v745_v19  ;;  %1087 = vmatmul.mubr.f32.gmra.mrb[6].mxu0 %v744_v24  ;;  %v2423_v50 = vpack.c.bf16 %v947_v43, %v943_v42  ;;  %v964_v19 = vld [vmem:[%s3406_s7 + $0x6c0] sm:$0xff]  ;;  %v2315_v42 = vpack.c.bf16 %v985_v37, %v981_v36  ;;  %v738_v36 = vld [vmem:[%s4076_s0 + $0x30] sm:$0xff]  ;;  %v1475_v37 = vld [vmem:[%s3404_s6 + $0x98] sm:$0xff] }
  0xf8   : > { %2278 = vmatpush1.bf16.msra.mxu0 %v2277_v53  ;;  %1265 = vmatmul.mubr.f32.gmra.mrb[6].mxu1 %v744_v24  ;;  %v953_v53 = vld [vmem:[%s3406_s7 + $0x668] sm:$0xff]  ;;  %v980_v43 = vld [vmem:[%s3406_s7 + $0x740] sm:$0xff] }
  0xf9   : > { %2406 = vmatpush1.bf16.msra.mxu1 %v2405_v56  ;;  %2280 = vmatprep.subr.bf16.mxu0 %v2279_v57  ;;  %v2297_v56 = vpack.c.bf16 %v944_v48, %v940_v47  ;;  %v2425_v57 = vpack.c.bf16 %v946_v51, %v942_v49  ;;  %v2299_v58 = vpack.c.bf16 %v953_v53, %v949_v52  ;;  %v973_v24 = vld [vmem:[%s3406_s7 + $0x708] sm:$0xff]  ;;  %v986_v47 = vld [vmem:[%s3406_s7 + $0x770] sm:$0xff]  ;;  %v995_v51 = vld [vmem:[%s3406_s7 + $0x7b8] sm:$0xff] }
  0xfa   : > { %2408 = vmatprep.subr.bf16.mxu1 %v2407_v61  ;;  %1157 = vmatprep.mubr.f32.mxu0 %v735_v32  ;;  %v950_v61 = vld [vmem:[%s3406_s7 + $0x650] sm:$0xff]  ;;  %v989_v48 = vld [vmem:[%s3406_s7 + $0x788] sm:$0xff] }
  0xfb   : > { %1335 = vmatprep.mubr.f32.mxu1 %v735_v32  ;;  %v2429_v5 = vpack.c.bf16 %v954_v63, %v950_v61  ;;  %v976_v32 = vld [vmem:[%s3406_s7 + $0x720] sm:$0xff]  ;;  %v993_v49 = vld [vmem:[%s3406_s7 + $0x7a8] sm:$0xff]  ;;  %v1003_v63 = vld [vmem:[%s3406_s7 + $0x7f8] sm:$0xff] }
  0xfc   : > { %2282 = vmatpush1.bf16.msra.mxu0 %v2281_v3  ;;  %v963_v3 = vld [vmem:[%s3406_s7 + $0x6b8] sm:$0xff]  ;;  %v2319_v54 = vpack.c.bf16 %v993_v49, %v989_v48  ;;  %v1001_v61 = vld [vmem:[%s3406_s7 + $0x7e8] sm:$0xff] }
  0xfd   : > { %2410 = vmatpush1.bf16.msra.mxu1 %v2409_v6  ;;  %2284 = vmatprep.subr.bf16.mxu0 %v2283_v7  ;;  %v2303_v6 = vpack.c.bf16 %v961_v1, %v957_v0  ;;  %v956_v7 = vld [vmem:[%s3406_s7 + $0x680] sm:$0xff]  ;;  %v2431_v10 = vpack.c.bf16 %v963_v3, %v959_v2  ;;  %v2323_v2 = vpack.c.bf16 %v1001_v61, %v997_v60  ;;  %v1481_v48 = vld [vmem:[%s3404_s6 + $0xc8] sm:$0xff]  ;;  %v1486_v61 = vld [vmem:[%s3404_s6 + $0xf0] sm:$0xff] }
  0xfe   : > { %2412 = vmatprep.subr.bf16.mxu1 %v2411_v11  ;;  %v962_v11 = vld [vmem:[%s3406_s7 + $0x6b0] sm:$0xff]  ;;  %v2305_v16 = vpack.c.bf16 %v960_v8, %v956_v7  ;;  %v996_v3 = vld [vmem:[%s3406_s7 + $0x7c0] sm:$0xff]  ;;  %v1457_v8 = vld [vmem:[%s3404_s6 + $0x8] sm:$0xff] }
  0xff   : > { %v1002_v7 = vld [vmem:[%s3406_s7 + $0x7f0] sm:$0xff]  ;;  %v1485_v49 = vld [vmem:[%s3404_s6 + $0xe8] sm:$0xff] }
 0x100   : > { %2286 = vmatpush1.bf16.msra.mxu0 %v2285_v17  ;;  %v2433_v17 = vpack.c.bf16 %v962_v11, %v958_v9  ;;  %v1461_v9 = vld [vmem:[%s3404_s6 + $0x28] sm:$0xff]  ;;  %v1463_v11 = vld [vmem:[%s3404_s6 + $0x38] sm:$0xff] }
 0x101   : > { %2414 = vmatpush1.bf16.msra.mxu1 %v2413_v20  ;;  %2288 = vmatprep.subr.bf16.mxu0 %v2287_v21  ;;  %v968_v20 = vld [vmem:[%s3406_s7 + $0x6e0] sm:$0xff]  ;;  %v966_v21 = vld [vmem:[%s3406_s7 + $0x6d0] sm:$0xff]  ;;  %v2455_v14 = vpack.c.bf16 %v1461_v9, %v1457_v8 }
 0x102   : > { %2416 = vmatprep.subr.bf16.mxu1 %v2415_v25  ;;  %v977_v25 = vld [vmem:[%s3406_s7 + $0x728] sm:$0xff]  ;;  %v2309_v28 = vpack.c.bf16 %v968_v20, %v964_v19  ;;  %v2437_v29 = vpack.c.bf16 %v970_v23, %v966_v21  ;;  %v1462_v19 = vld [vmem:[%s3404_s6 + $0x30] sm:$0xff]  ;;  %v1467_v23 = vld [vmem:[%s3404_s6 + $0x58] sm:$0xff] }
 0x103   : > { %v2311_v30 = vpack.c.bf16 %v977_v25, %v973_v24  ;;  %v1465_v20 = vld [vmem:[%s3404_s6 + $0x48] sm:$0xff]  ;;  %v1471_v24 = vld [vmem:[%s3404_s6 + $0x78] sm:$0xff]  ;;  %v1490_v8 = vld [vmem:[%s3404_s6 + $0x110] sm:$0xff] }
 0x104   : > { %2290 = vmatpush1.bf16.msra.mxu0 %v2289_v31  ;;  %v972_v31 = vld [vmem:[%s3406_s7 + $0x700] sm:$0xff]  ;;  %v1469_v21 = vld [vmem:[%s3404_s6 + $0x68] sm:$0xff]  ;;  %v739_v25 = vld [vmem:[%s4076_s0 + $0x38] sm:$0xff] }
 0x105   : > { %2418 = vmatpush1.bf16.msra.mxu1 %v2417_v33  ;;  %2292 = vmatprep.subr.bf16.mxu0 %v2291_v34  ;;  %v974_v33 = vld [vmem:[%s3406_s7 + $0x710] sm:$0xff]  ;;  %v2439_v34 = vpack.c.bf16 %v979_v27, %v975_v26  ;;  %v2313_v40 = vpack.c.bf16 %v976_v32, %v972_v31  ;;  %v2587_v32 = vpack.c.bf16 %v1471_v24, %v1467_v23  ;;  %v1505_v23 = vld [vmem:[%s3404_s6 + $0x188] sm:$0xff] }
 0x106   : > { %2420 = vmatprep.subr.bf16.mxu1 %v2419_v38  ;;  %v983_v38 = vld [vmem:[%s3406_s7 + $0x758] sm:$0xff]  ;;  %v2441_v41 = vpack.c.bf16 %v978_v35, %v974_v33  ;;  %v1466_v31 = vld [vmem:[%s3404_s6 + $0x50] sm:$0xff]  ;;  %v1477_v35 = vld [vmem:[%s3404_s6 + $0xa8] sm:$0xff] }
 0x107   : > { %v1470_v33 = vld [vmem:[%s3404_s6 + $0x70] sm:$0xff]  ;;  %v1509_v24 = vld [vmem:[%s3404_s6 + $0x1a8] sm:$0xff] }
 0x108   : > { %2294 = vmatpush1.bf16.msra.mxu0 %v2293_v44  ;;  %v984_v44 = vld [vmem:[%s3406_s7 + $0x760] sm:$0xff] }
 0x109   : > { %2422 = vmatpush1.bf16.msra.mxu1 %v2421_v45  ;;  %2296 = vmatprep.subr.bf16.mxu0 %v2295_v46  ;;  %v982_v45 = vld [vmem:[%s3406_s7 + $0x750] sm:$0xff]  ;;  %v2443_v46 = vpack.c.bf16 %v987_v39, %v983_v38  ;;  %v2317_v52 = vpack.c.bf16 %v984_v44, %v980_v43  ;;  %v1479_v38 = vld [vmem:[%s3404_s6 + $0xb8] sm:$0xff]  ;;  %v1472_v43 = vld [vmem:[%s3404_s6 + $0x80] sm:$0xff] }
 0x10a   : > { %2424 = vmatprep.subr.bf16.mxu1 %v2423_v50  ;;  %v991_v50 = vld [vmem:[%s3406_s7 + $0x798] sm:$0xff]  ;;  %v2445_v53 = vpack.c.bf16 %v986_v47, %v982_v45  ;;  %v1476_v44 = vld [vmem:[%s3404_s6 + $0xa0] sm:$0xff]  ;;  %v1474_v45 = vld [vmem:[%s3404_s6 + $0x90] sm:$0xff] }
 0x10b   : > { %v743_v39 = vld [vmem:[%s4076_s0 + $0x58] sm:$0xff]  ;;  %v1478_v47 = vld [vmem:[%s3404_s6 + $0xb0] sm:$0xff] }
 0x10c   : > { %2298 = vmatpush1.bf16.msra.mxu0 %v2297_v56  ;;  %v992_v56 = vld [vmem:[%s3406_s7 + $0x7a0] sm:$0xff] }
 0x10d   : > { %2426 = vmatpush1.bf16.msra.mxu1 %v2425_v57  ;;  %2300 = vmatprep.subr.bf16.mxu0 %v2299_v58  ;;  %v990_v57 = vld [vmem:[%s3406_s7 + $0x790] sm:$0xff]  ;;  %v2447_v58 = vpack.c.bf16 %v995_v51, %v991_v50  ;;  %v2321_v0 = vpack.c.bf16 %v992_v56, %v988_v55  ;;  %v1483_v51 = vld [vmem:[%s3404_s6 + $0xd8] sm:$0xff]  ;;  %v2593_v55 = vpack.c.bf16 %v1478_v47, %v1474_v45  ;;  %v1521_v47 = vld [vmem:[%s3404_s6 + $0x208] sm:$0xff] }
 0x10e   : > { %2428 = vmatprep.subr.bf16.mxu1 %v2427_v62  ;;  %v999_v62 = vld [vmem:[%s3406_s7 + $0x7d8] sm:$0xff]  ;;  %v2449_v1 = vpack.c.bf16 %v994_v59, %v990_v57  ;;  %v742_v50 = vld [vmem:[%s4076_s0 + $0x50] sm:$0xff]  ;;  %v2467_v56 = vpack.c.bf16 %v1485_v49, %v1481_v48  ;;  %v1480_v57 = vld [vmem:[%s3404_s6 + $0xc0] sm:$0xff] }
 0x10f   : > { %v1482_v59 = vld [vmem:[%s3404_s6 + $0xd0] sm:$0xff]  ;;  %v1525_v48 = vld [vmem:[%s3404_s6 + $0x228] sm:$0xff]  ;;  %v1523_v49 = vld [vmem:[%s3404_s6 + $0x218] sm:$0xff] }
 0x110   : > { %2302 = vmatpush1.bf16.msra.mxu0 %v2301_v4  ;;  %v1000_v4 = vld [vmem:[%s3406_s7 + $0x7e0] sm:$0xff] }
 0x111   : > { %2430 = vmatpush1.bf16.msra.mxu1 %v2429_v5  ;;  %2304 = vmatprep.subr.bf16.mxu0 %v2303_v6  ;;  %v998_v5 = vld [vmem:[%s3406_s7 + $0x7d0] sm:$0xff]  ;;  %v2451_v6 = vpack.c.bf16 %v1003_v63, %v999_v62  ;;  %v2325_v12 = vpack.c.bf16 %v1000_v4, %v996_v3  ;;  %v1489_v62 = vld [vmem:[%s3404_s6 + $0x108] sm:$0xff]  ;;  %v2597_v4 = vpack.c.bf16 %v1486_v61, %v1482_v59  ;;  %v1531_v61 = vld [vmem:[%s3404_s6 + $0x258] sm:$0xff] }
 0x112   : > { %2432 = vmatprep.subr.bf16.mxu1 %v2431_v10  ;;  %v1459_v10 = vld [vmem:[%s3404_s6 + $0x18] sm:$0xff]  ;;  %v2453_v13 = vpack.c.bf16 %v1002_v7, %v998_v5  ;;  %v1493_v63 = vld [vmem:[%s3404_s6 + $0x128] sm:$0xff]  ;;  %v1492_v7 = vld [vmem:[%s3404_s6 + $0x120] sm:$0xff] }
 0x113   : > { %v2583_v15 = vpack.c.bf16 %v1463_v11, %v1459_v10  ;;  %v2471_v5 = vpack.c.bf16 %v1493_v63, %v1489_v62  ;;  %v1494_v10 = vld [vmem:[%s3404_s6 + $0x130] sm:$0xff]  ;;  %v1497_v11 = vld [vmem:[%s3404_s6 + $0x148] sm:$0xff]  ;;  %v1535_v62 = vld [vmem:[%s3404_s6 + $0x278] sm:$0xff] }
 0x114   : > { %2306 = vmatpush1.bf16.msra.mxu0 %v2305_v16  ;;  %v1456_v16 = vld [vmem:[%s3404_s6] sm:$0xff]  ;;  %v1529_v59 = vld [vmem:[%s3404_s6 + $0x248] sm:$0xff] }
 0x115   : > { %2434 = vmatpush1.bf16.msra.mxu1 %v2433_v17  ;;  %2308 = vmatprep.subr.bf16.mxu0 %v2307_v18  ;;  %v1460_v17 = vld [vmem:[%s3404_s6 + $0x20] sm:$0xff]  ;;  %v1458_v18 = vld [vmem:[%s3404_s6 + $0x10] sm:$0xff] }
 0x116   : > { %2436 = vmatprep.subr.bf16.mxu1 %v2435_v22  ;;  %v734_v22 = vld [vmem:[%s4076_s0 + $0x10] sm:$0xff]  ;;  %v2457_v26 = vpack.c.bf16 %v1460_v17, %v1456_v16  ;;  %v2585_v27 = vpack.c.bf16 %v1462_v19, %v1458_v18  ;;  %v2601_v16 = vpack.c.bf16 %v1494_v10, %v1490_v8  ;;  %v1496_v18 = vld [vmem:[%s3404_s6 + $0x140] sm:$0xff]  ;;  %v1541_v8 = vld [vmem:[%s3404_s6 + $0x2a8] sm:$0xff] }
 0x117   : > { %v1500_v19 = vld [vmem:[%s3404_s6 + $0x160] sm:$0xff]  ;;  %v1543_v10 = vld [vmem:[%s3404_s6 + $0x2b8] sm:$0xff] }
 0x118   : > { %2310 = vmatpush1.bf16.msra.mxu0 %v2309_v28  ;;  %v2459_v28 = vpack.c.bf16 %v1469_v21, %v1465_v20  ;;  %v1498_v20 = vld [vmem:[%s3404_s6 + $0x150] sm:$0xff] }
 0x119   : > { %2438 = vmatpush1.bf16.msra.mxu1 %v2437_v29  ;;  %2312 = vmatprep.subr.bf16.mxu0 %v2311_v30  ;;  %v1464_v29 = vld [vmem:[%s3404_s6 + $0x40] sm:$0xff] }
 0x11a   : > { %2440 = vmatprep.subr.bf16.mxu1 %v2439_v34  ;;  %v1468_v30 = vld [vmem:[%s3404_s6 + $0x60] sm:$0xff]  ;;  %v1473_v34 = vld [vmem:[%s3404_s6 + $0x88] sm:$0xff] }
 0x11c   : > { %2314 = vmatpush1.bf16.msra.mxu0 %v2313_v40  ;;  %v2461_v40 = vpack.c.bf16 %v1468_v30, %v1464_v29  ;;  %v2479_v29 = vpack.c.bf16 %v1509_v24, %v1505_v23  ;;  %v1504_v30 = vld [vmem:[%s3404_s6 + $0x180] sm:$0xff] }
 0x11d   : > { %2442 = vmatpush1.bf16.msra.mxu1 %v2441_v41  ;;  %2316 = vmatprep.subr.bf16.mxu0 %v2315_v42  ;;  %v2589_v41 = vpack.c.bf16 %v1470_v33, %v1466_v31  ;;  %v2463_v42 = vpack.c.bf16 %v1477_v35, %v1473_v34  ;;  %v1508_v31 = vld [vmem:[%s3404_s6 + $0x1a0] sm:$0xff]  ;;  %v1510_v34 = vld [vmem:[%s3404_s6 + $0x1b0] sm:$0xff]  ;;  %v1513_v35 = vld [vmem:[%s3404_s6 + $0x1c8] sm:$0xff] }
 0x11e   : > { %2444 = vmatprep.subr.bf16.mxu1 %v2443_v46  ;;  %v2591_v46 = vpack.c.bf16 %v1479_v38, %v1475_v37  ;;  %v1515_v37 = vld [vmem:[%s3404_s6 + $0x1d8] sm:$0xff] }
 0x11f   : > { %v1519_v38 = vld [vmem:[%s3404_s6 + $0x1f8] sm:$0xff] }
 0x120   : > { %2318 = vmatpush1.bf16.msra.mxu0 %v2317_v52  ;;  %v1487_v52 = vld [vmem:[%s3404_s6 + $0xf8] sm:$0xff]  ;;  %v2611_v45 = vpack.c.bf16 %v1519_v38, %v1515_v37  ;;  %v1552_v38 = vld [vmem:[%s3404_s6 + $0x300] sm:$0xff] }
 0x121   : > { %2446 = vmatpush1.bf16.msra.mxu1 %v2445_v53  ;;  %2320 = vmatprep.subr.bf16.mxu0 %v2319_v54  ;;  %v747_v53 = vld [vmem:[%s4076_s0 + $0x78] sm:$0xff]  ;;  %v2465_v54 = vpack.c.bf16 %v1476_v44, %v1472_v43  ;;  %v2595_v60 = vpack.c.bf16 %v1487_v52, %v1483_v51  ;;  %v1516_v43 = vld [vmem:[%s3404_s6 + $0x1e0] sm:$0xff]  ;;  %v1514_v44 = vld [vmem:[%s3404_s6 + $0x1d0] sm:$0xff] }
 0x122   : > { %2448 = vmatprep.subr.bf16.mxu1 %v2447_v58  ;;  %v1484_v58 = vld [vmem:[%s3404_s6 + $0xe0] sm:$0xff]  ;;  %v1559_v37 = vld [vmem:[%s3404_s6 + $0x338] sm:$0xff] }
 0x123   : > { %v2469_v3 = vpack.c.bf16 %v1484_v58, %v1480_v57  ;;  %v1526_v58 = vld [vmem:[%s3404_s6 + $0x230] sm:$0xff] }
 0x124   : > { %2322 = vmatpush1.bf16.msra.mxu0 %v2321_v0  ;;  %v746_v0 = vld [vmem:[%s4076_s0 + $0x70] sm:$0xff] }
 0x125   : > { %2450 = vmatpush1.bf16.msra.mxu1 %v2449_v1  ;;  %2324 = vmatprep.subr.bf16.mxu0 %v2323_v2  ;;  %v1491_v1 = vld [vmem:[%s3404_s6 + $0x118] sm:$0xff] }
 0x126   : > { %2452 = vmatprep.subr.bf16.mxu1 %v2451_v6  ;;  %v1495_v2 = vld [vmem:[%s3404_s6 + $0x138] sm:$0xff]  ;;  %v1488_v6 = vld [vmem:[%s3404_s6 + $0x100] sm:$0xff] }
 0x127   : > { %v2599_v9 = vpack.c.bf16 %v1495_v2, %v1491_v1  ;;  %v1528_v2 = vld [vmem:[%s3404_s6 + $0x240] sm:$0xff] }
 0x128   : > { %2326 = vmatpush1.bf16.msra.mxu0 %v2325_v12  ;;  %v1501_v12 = vld [vmem:[%s3404_s6 + $0x168] sm:$0xff] }
 0x129   : > { %2454 = vmatpush1.bf16.msra.mxu1 %v2453_v13  ;;  %2456 = vmatprep.subr.bf16.mxu0 %v2455_v14  ;;  %v1499_v13 = vld [vmem:[%s3404_s6 + $0x158] sm:$0xff]  ;;  %v2475_v17 = vpack.c.bf16 %v1501_v12, %v1497_v11 }
 0x12a   : > { %2584 = vmatprep.subr.bf16.mxu1 %v2583_v15  ;;  %v1503_v14 = vld [vmem:[%s3404_s6 + $0x178] sm:$0xff]  ;;  %v2473_v15 = vpack.c.bf16 %v1492_v7, %v1488_v6  ;;  %v1534_v6 = vld [vmem:[%s3404_s6 + $0x270] sm:$0xff]  ;;  %v1537_v7 = vld [vmem:[%s3404_s6 + $0x288] sm:$0xff] }
 0x12b   : > { %1158 = vmatmul.mubr.f32.vlgmr.msra.gmra.mrb[0].mxu0 %v734_v22  ;;  %v2603_v21 = vpack.c.bf16 %v1503_v14, %v1499_v13  ;;  %v2495_v13 = vpack.c.bf16 %v1541_v8, %v1537_v7  ;;  %v1536_v14 = vld [vmem:[%s3404_s6 + $0x280] sm:$0xff]  ;;  %v1579_v7 = vld [vmem:[%s3404_s6 + $0x3d8] sm:$0xff] }
 0x12c   : > { %1336 = vmatmul.mubr.f32.vlgmr.msra.gmra.mrb[0].mxu1 %v734_v22  ;;  %1163 = vmatprep.mubr.f32.mxu0 %v739_v25  ;;  %v1502_v22 = vld [vmem:[%s3404_s6 + $0x170] sm:$0xff] }
 0x12d   : > { %1341 = vmatprep.mubr.f32.mxu1 %v739_v25  ;;  %2458 = vmatpush1.bf16.msra.mxu0 %v2457_v26  ;;  %v1507_v25 = vld [vmem:[%s3404_s6 + $0x198] sm:$0xff] }
 0x12e   : > { %2586 = vmatpush1.bf16.msra.mxu1 %v2585_v27  ;;  %2460 = vmatprep.subr.bf16.mxu0 %v2459_v28  ;;  %v1511_v26 = vld [vmem:[%s3404_s6 + $0x1b8] sm:$0xff]  ;;  %v2477_v27 = vpack.c.bf16 %v1500_v19, %v1496_v18  ;;  %v2605_v28 = vpack.c.bf16 %v1502_v22, %v1498_v20  ;;  %v1542_v18 = vld [vmem:[%s3404_s6 + $0x2b0] sm:$0xff]  ;;  %v1545_v19 = vld [vmem:[%s3404_s6 + $0x2c8] sm:$0xff] }
 0x12f   : > { %1164 = vmatmul.mubr.f32.gmra.mrb[2].mxu0 %v738_v36  ;;  %2588 = vmatprep.subr.bf16.mxu1 %v2587_v32  ;;  %v1506_v32 = vld [vmem:[%s3404_s6 + $0x190] sm:$0xff]  ;;  %v2607_v33 = vpack.c.bf16 %v1511_v26, %v1507_v25  ;;  %v1549_v20 = vld [vmem:[%s3404_s6 + $0x2e8] sm:$0xff]  ;;  %v1551_v22 = vld [vmem:[%s3404_s6 + $0x2f8] sm:$0xff] }
 0x130   : > { %1169 = vmatprep.mubr.f32.mxu0 %v743_v39  ;;  %1342 = vmatmul.mubr.f32.gmra.mrb[2].mxu1 %v738_v36  ;;  %v1517_v36 = vld [vmem:[%s3404_s6 + $0x1e8] sm:$0xff]  ;;  %v2499_v25 = vpack.c.bf16 %v1549_v20, %v1545_v19  ;;  %v1587_v19 = vld [vmem:[%s3404_s6 + $0x418] sm:$0xff] }
 0x131   : > { %1347 = vmatprep.mubr.f32.mxu1 %v743_v39  ;;  %2462 = vmatpush1.bf16.msra.mxu0 %v2461_v40  ;;  %v2481_v39 = vpack.c.bf16 %v1508_v31, %v1504_v30  ;;  %v2609_v40 = vpack.c.bf16 %v1510_v34, %v1506_v32  ;;  %v1550_v31 = vld [vmem:[%s3404_s6 + $0x2f0] sm:$0xff]  ;;  %v1557_v34 = vld [vmem:[%s3404_s6 + $0x328] sm:$0xff] }
 0x132   : > { %2590 = vmatpush1.bf16.msra.mxu1 %v2589_v41  ;;  %2464 = vmatprep.subr.bf16.mxu0 %v2463_v42  ;;  %v2483_v41 = vpack.c.bf16 %v1517_v36, %v1513_v35  ;;  %v1512_v42 = vld [vmem:[%s3404_s6 + $0x1c0] sm:$0xff]  ;;  %v1555_v35 = vld [vmem:[%s3404_s6 + $0x318] sm:$0xff] }
 0x133   : > { %1170 = vmatmul.mubr.f32.gmra.mrb[4].mxu0 %v742_v50  ;;  %2592 = vmatprep.subr.bf16.mxu1 %v2591_v46  ;;  %v1518_v46 = vld [vmem:[%s3404_s6 + $0x1f0] sm:$0xff]  ;;  %v2485_v51 = vpack.c.bf16 %v1516_v43, %v1512_v42 }
 0x134   : > { %1175 = vmatprep.mubr.f32.mxu0 %v747_v53  ;;  %1348 = vmatmul.mubr.f32.gmra.mrb[4].mxu1 %v742_v50  ;;  %v1527_v50 = vld [vmem:[%s3404_s6 + $0x238] sm:$0xff]  ;;  %v2613_v52 = vpack.c.bf16 %v1518_v46, %v1514_v44  ;;  %v1554_v42 = vld [vmem:[%s3404_s6 + $0x310] sm:$0xff]  ;;  %v1565_v46 = vld [vmem:[%s3404_s6 + $0x368] sm:$0xff] }
 0x135   : > { %1353 = vmatprep.mubr.f32.mxu1 %v747_v53  ;;  %2466 = vmatpush1.bf16.msra.mxu0 %v2465_v54  ;;  %v2487_v53 = vpack.c.bf16 %v1525_v48, %v1521_v47  ;;  %v1520_v54 = vld [vmem:[%s3404_s6 + $0x200] sm:$0xff]  ;;  %v2615_v57 = vpack.c.bf16 %v1527_v50, %v1523_v49  ;;  %v1558_v43 = vld [vmem:[%s3404_s6 + $0x330] sm:$0xff]  ;;  %v1563_v47 = vld [vmem:[%s3404_s6 + $0x358] sm:$0xff] }
 0x136   : > { %2594 = vmatpush1.bf16.msra.mxu1 %v2593_v55  ;;  %2468 = vmatprep.subr.bf16.mxu0 %v2467_v56  ;;  %v1524_v55 = vld [vmem:[%s3404_s6 + $0x220] sm:$0xff]  ;;  %v1522_v56 = vld [vmem:[%s3404_s6 + $0x210] sm:$0xff]  ;;  %v2633_v44 = vpack.c.bf16 %v1558_v43, %v1554_v42  ;;  %v1567_v49 = vld [vmem:[%s3404_s6 + $0x378] sm:$0xff] }
 0x137   : > { %1176 = vmatmul.mubr.f32.gmra.mrb[6].mxu0 %v746_v0  ;;  %2596 = vmatprep.subr.bf16.mxu1 %v2595_v60  ;;  %v1533_v60 = vld [vmem:[%s3404_s6 + $0x268] sm:$0xff]  ;;  %v2489_v63 = vpack.c.bf16 %v1524_v55, %v1520_v54  ;;  %v1560_v50 = vld [vmem:[%s3404_s6 + $0x340] sm:$0xff]  ;;  %v1562_v54 = vld [vmem:[%s3404_s6 + $0x350] sm:$0xff] }
 0x138   : > { %1354 = vmatmul.mubr.f32.gmra.mrb[6].mxu1 %v746_v0  ;;  %v2617_v0 = vpack.c.bf16 %v1526_v58, %v1522_v56  ;;  %v2491_v1 = vpack.c.bf16 %v1533_v60, %v1529_v59  ;;  %v1566_v55 = vld [vmem:[%s3404_s6 + $0x370] sm:$0xff]  ;;  %v1573_v58 = vld [vmem:[%s3404_s6 + $0x3a8] sm:$0xff]  ;;  %v1571_v59 = vld [vmem:[%s3404_s6 + $0x398] sm:$0xff] }
 0x139   : > { %2470 = vmatpush1.bf16.msra.mxu0 %v2469_v3  ;;  %v1532_v3 = vld [vmem:[%s3404_s6 + $0x260] sm:$0xff]  ;;  %v2637_v56 = vpack.c.bf16 %v1566_v55, %v1562_v54  ;;  %v1590_v54 = vld [vmem:[%s3404_s6 + $0x430] sm:$0xff]  ;;  %v1593_v55 = vld [vmem:[%s3404_s6 + $0x448] sm:$0xff] }
 0x13a   : > { %2598 = vmatpush1.bf16.msra.mxu1 %v2597_v4  ;;  %2472 = vmatprep.subr.bf16.mxu0 %v2471_v5  ;;  %v1530_v4 = vld [vmem:[%s3404_s6 + $0x250] sm:$0xff]  ;;  %v2619_v5 = vpack.c.bf16 %v1535_v62, %v1531_v61  ;;  %v2493_v11 = vpack.c.bf16 %v1532_v3, %v1528_v2  ;;  %v1575_v61 = vld [vmem:[%s3404_s6 + $0x3b8] sm:$0xff]  ;;  %v1568_v62 = vld [vmem:[%s3404_s6 + $0x380] sm:$0xff] }
 0x13b   : > { %2600 = vmatprep.subr.bf16.mxu1 %v2599_v9  ;;  %v1539_v9 = vld [vmem:[%s3404_s6 + $0x298] sm:$0xff]  ;;  %v2621_v12 = vpack.c.bf16 %v1534_v6, %v1530_v4  ;;  %v1570_v2 = vld [vmem:[%s3404_s6 + $0x390] sm:$0xff]  ;;  %v1581_v6 = vld [vmem:[%s3404_s6 + $0x3e8] sm:$0xff] }
 0x13c   : > { %v1574_v3 = vld [vmem:[%s3404_s6 + $0x3b0] sm:$0xff] }
 0x13d   : > { %2474 = vmatpush1.bf16.msra.mxu0 %v2473_v15  ;;  %v1540_v15 = vld [vmem:[%s3404_s6 + $0x2a0] sm:$0xff]  ;;  %v2641_v4 = vpack.c.bf16 %v1574_v3, %v1570_v2 }
 0x13e   : > { %2602 = vmatpush1.bf16.msra.mxu1 %v2601_v16  ;;  %2476 = vmatprep.subr.bf16.mxu0 %v2475_v17  ;;  %v1538_v16 = vld [vmem:[%s3404_s6 + $0x290] sm:$0xff]  ;;  %v2623_v17 = vpack.c.bf16 %v1543_v10, %v1539_v9  ;;  %v2497_v23 = vpack.c.bf16 %v1540_v15, %v1536_v14  ;;  %v1583_v9 = vld [vmem:[%s3404_s6 + $0x3f8] sm:$0xff]  ;;  %v1576_v10 = vld [vmem:[%s3404_s6 + $0x3c0] sm:$0xff] }
 0x13f   : > { %2604 = vmatprep.subr.bf16.mxu1 %v2603_v21  ;;  %v1547_v21 = vld [vmem:[%s3404_s6 + $0x2d8] sm:$0xff]  ;;  %v2625_v24 = vpack.c.bf16 %v1542_v18, %v1538_v16  ;;  %v1578_v14 = vld [vmem:[%s3404_s6 + $0x3d0] sm:$0xff]  ;;  %v1589_v18 = vld [vmem:[%s3404_s6 + $0x428] sm:$0xff] }
 0x140   : > { %v2627_v26 = vpack.c.bf16 %v1551_v22, %v1547_v21  ;;  %v1582_v15 = vld [vmem:[%s3404_s6 + $0x3f0] sm:$0xff]  ;;  %v1591_v21 = vld [vmem:[%s3404_s6 + $0x438] sm:$0xff] }
 0x141   : > { %2478 = vmatpush1.bf16.msra.mxu0 %v2477_v27  ;;  %v1544_v27 = vld [vmem:[%s3404_s6 + $0x2c0] sm:$0xff]  ;;  %v2645_v16 = vpack.c.bf16 %v1582_v15, %v1578_v14  ;;  %v2647_v22 = vpack.c.bf16 %v1591_v21, %v1587_v19  ;;  %v1607_v19 = vld [vmem:[%s3404_s6 + $0x4b8] sm:$0xff] }
 0x142   : > { %2606 = vmatpush1.bf16.msra.mxu1 %v2605_v28  ;;  %2480 = vmatprep.subr.bf16.mxu0 %v2479_v29  ;;  %v1548_v28 = vld [vmem:[%s3404_s6 + $0x2e0] sm:$0xff]  ;;  %v1546_v29 = vld [vmem:[%s3404_s6 + $0x2d0] sm:$0xff] }
 0x143   : > { %2608 = vmatprep.subr.bf16.mxu1 %v2607_v33  ;;  %v2501_v30 = vpack.c.bf16 %v1548_v28, %v1544_v27  ;;  %v2629_v32 = vpack.c.bf16 %v1550_v31, %v1546_v29  ;;  %v1553_v33 = vld [vmem:[%s3404_s6 + $0x308] sm:$0xff] }
 0x144   : > { %v2503_v36 = vpack.c.bf16 %v1557_v34, %v1553_v33 }
 0x145   : > { %2482 = vmatpush1.bf16.msra.mxu0 %v2481_v39  ;;  %v1556_v39 = vld [vmem:[%s3404_s6 + $0x320] sm:$0xff] }
 0x146   : > { %2610 = vmatpush1.bf16.msra.mxu1 %v2609_v40  ;;  %2484 = vmatprep.subr.bf16.mxu0 %v2483_v41  ;;  %v2631_v40 = vpack.c.bf16 %v1559_v37, %v1555_v35  ;;  %v2505_v41 = vpack.c.bf16 %v1556_v39, %v1552_v38 }
 0x147   : > { %2612 = vmatprep.subr.bf16.mxu1 %v2611_v45  ;;  %v1561_v45 = vld [vmem:[%s3404_s6 + $0x348] sm:$0xff] }
 0x148   : > { %v2507_v48 = vpack.c.bf16 %v1565_v46, %v1561_v45 }
 0x149   : > { %2486 = vmatpush1.bf16.msra.mxu0 %v2485_v51  ;;  %v1564_v51 = vld [vmem:[%s3404_s6 + $0x360] sm:$0xff] }
 0x14a   : > { %2614 = vmatpush1.bf16.msra.mxu1 %v2613_v52  ;;  %2488 = vmatprep.subr.bf16.mxu0 %v2487_v53  ;;  %v2635_v52 = vpack.c.bf16 %v1567_v49, %v1563_v47  ;;  %v2509_v53 = vpack.c.bf16 %v1564_v51, %v1560_v50  ;;  %v1588_v49 = vld [vmem:[%s3404_s6 + $0x420] sm:$0xff]  ;;  %v1586_v50 = vld [vmem:[%s3404_s6 + $0x410] sm:$0xff] }
 0x14b   : > { %2616 = vmatprep.subr.bf16.mxu1 %v2615_v57  ;;  %v1569_v57 = vld [vmem:[%s3404_s6 + $0x388] sm:$0xff]  ;;  %v2649_v2 = vpack.c.bf16 %v1590_v54, %v1586_v50  ;;  %v1615_v50 = vld [vmem:[%s3404_s6 + $0x4f8] sm:$0xff] }
 0x14c   : > { %v2511_v60 = vpack.c.bf16 %v1573_v58, %v1569_v57 }
 0x14d   : > { %2490 = vmatpush1.bf16.msra.mxu0 %v2489_v63  ;;  %v1572_v63 = vld [vmem:[%s3404_s6 + $0x3a0] sm:$0xff] }
 0x14e   : > { %2618 = vmatpush1.bf16.msra.mxu1 %v2617_v0  ;;  %2492 = vmatprep.subr.bf16.mxu0 %v2491_v1  ;;  %v2639_v0 = vpack.c.bf16 %v1575_v61, %v1571_v59  ;;  %v2513_v1 = vpack.c.bf16 %v1572_v63, %v1568_v62  ;;  %v1595_v61 = vld [vmem:[%s3404_s6 + $0x458] sm:$0xff] }
 0x14f   : > { %2620 = vmatprep.subr.bf16.mxu1 %v2619_v5  ;;  %v1577_v5 = vld [vmem:[%s3404_s6 + $0x3c8] sm:$0xff]  ;;  %v1599_v62 = vld [vmem:[%s3404_s6 + $0x478] sm:$0xff] }
 0x150   : > { %v2515_v8 = vpack.c.bf16 %v1581_v6, %v1577_v5  ;;  %v1596_v5 = vld [vmem:[%s3404_s6 + $0x460] sm:$0xff]  ;;  %v1594_v6 = vld [vmem:[%s3404_s6 + $0x450] sm:$0xff]  ;;  %v2651_v14 = vpack.c.bf16 %v1599_v62, %v1595_v61 }
 0x151   : > { %2494 = vmatpush1.bf16.msra.mxu0 %v2493_v11  ;;  %v1580_v11 = vld [vmem:[%s3404_s6 + $0x3e0] sm:$0xff]  ;;  %v1610_v61 = vld [vmem:[%s3404_s6 + $0x4d0] sm:$0xff] }
 0x152   : > { %2622 = vmatpush1.bf16.msra.mxu1 %v2621_v12  ;;  %2496 = vmatprep.subr.bf16.mxu0 %v2495_v13  ;;  %v2643_v12 = vpack.c.bf16 %v1583_v9, %v1579_v7  ;;  %v2517_v13 = vpack.c.bf16 %v1580_v11, %v1576_v10  ;;  %v1598_v11 = vld [vmem:[%s3404_s6 + $0x470] sm:$0xff] }
 0x153   : > { %2624 = vmatprep.subr.bf16.mxu1 %v2623_v17  ;;  %v1585_v17 = vld [vmem:[%s3404_s6 + $0x408] sm:$0xff]  ;;  %v1614_v62 = vld [vmem:[%s3404_s6 + $0x4f0] sm:$0xff] }
 0x154   : > { %v2519_v20 = vpack.c.bf16 %v1589_v18, %v1585_v17  ;;  %v1603_v18 = vld [vmem:[%s3404_s6 + $0x498] sm:$0xff] }
 0x155   : > { %2498 = vmatpush1.bf16.msra.mxu0 %v2497_v23 }
 0x156   : > { %2626 = vmatpush1.bf16.msra.mxu1 %v2625_v24  ;;  %2500 = vmatprep.subr.bf16.mxu0 %v2499_v25 }
 0x157   : > { %2628 = vmatprep.subr.bf16.mxu1 %v2627_v26 }
 0x159   : > { %2502 = vmatpush1.bf16.msra.mxu0 %v2501_v30 }
 0x15a   : > { %2630 = vmatpush1.bf16.msra.mxu1 %v2629_v32  ;;  %2504 = vmatprep.subr.bf16.mxu0 %v2503_v36 }
 0x15b   : > { %2632 = vmatprep.subr.bf16.mxu1 %v2631_v40 }
 0x15d   : > { %2506 = vmatpush1.bf16.msra.mxu0 %v2505_v41 }
 0x15e   : > { %2634 = vmatpush1.bf16.msra.mxu1 %v2633_v44  ;;  %2508 = vmatprep.subr.bf16.mxu0 %v2507_v48  ;;  %v1584_v48 = vld [vmem:[%s3404_s6 + $0x400] sm:$0xff] }
 0x15f   : > { %2636 = vmatprep.subr.bf16.mxu1 %v2635_v52 }
 0x161   : > { %2510 = vmatpush1.bf16.msra.mxu0 %v2509_v53 }
 0x162   : > { %2638 = vmatpush1.bf16.msra.mxu1 %v2637_v56  ;;  %2512 = vmatprep.subr.bf16.mxu0 %v2511_v60  ;;  %v1597_v56 = vld [vmem:[%s3404_s6 + $0x468] sm:$0xff] }
 0x163   : > { %2640 = vmatprep.subr.bf16.mxu1 %v2639_v0  ;;  %v2523_v3 = vpack.c.bf16 %v1597_v56, %v1593_v55  ;;  %v1608_v56 = vld [vmem:[%s3404_s6 + $0x4c0] sm:$0xff] }
 0x165   : > { %2514 = vmatpush1.bf16.msra.mxu0 %v2513_v1  ;;  %v2521_v1 = vpack.c.bf16 %v1588_v49, %v1584_v48 }
 0x166   : > { %2642 = vmatpush1.bf16.msra.mxu1 %v2641_v4  ;;  %2516 = vmatprep.subr.bf16.mxu0 %v2515_v8  ;;  %v1592_v4 = vld [vmem:[%s3404_s6 + $0x440] sm:$0xff] }
 0x167   : > { %2644 = vmatprep.subr.bf16.mxu1 %v2643_v12  ;;  %v1601_v12 = vld [vmem:[%s3404_s6 + $0x488] sm:$0xff]  ;;  %v2525_v21 = vpack.c.bf16 %v1596_v5, %v1592_v4  ;;  %v1619_v4 = vld [vmem:[%s3404_s6 + $0x518] sm:$0xff] }
 0x168   : > { %v1623_v5 = vld [vmem:[%s3404_s6 + $0x538] sm:$0xff] }
 0x169   : > { %2518 = vmatpush1.bf16.msra.mxu0 %v2517_v13  ;;  %v1605_v13 = vld [vmem:[%s3404_s6 + $0x4a8] sm:$0xff] }
 0x16a   : > { %2646 = vmatpush1.bf16.msra.mxu1 %v2645_v16  ;;  %2520 = vmatprep.subr.bf16.mxu0 %v2519_v20 }
 0x16b   : > { %2648 = vmatprep.subr.bf16.mxu1 %v2647_v22  ;;  %v2653_v22 = vpack.c.bf16 %v1598_v11, %v1594_v6  ;;  %v1618_v11 = vld [vmem:[%s3404_s6 + $0x510] sm:$0xff] }
 0x1fe   : > { %v1159_v23 = vpop.f32.mrb[0].mxu0 }
 0x1ff   : > { %v1376_v24 = vmul.f32 0.70710677, %v1159_v23  ;;  %v3845_v25 = vpop.f32.mrb[0].mxu1  ;;  %v1161_v26 = vpop.f32.mrb[1].mxu0  ;;  %v1360_v60 = vmul.f32 0.5, %v1159_v23  ;;  %v2527_v23 = vpack.c.bf16 %v1605_v13, %v1601_v12  ;;  %v1622_v12 = vld [vmem:[%s3404_s6 + $0x530] sm:$0xff] }
 0x200   : > { %v1377_v27 = vmul.f32 0.70710677, %v1161_v26  ;;  %v3847_v28 = vpop.f32.mrb[1].mxu1  ;;  %v1361_v57 = vmul.f32 0.5, %v1161_v26  ;;  %v1604_v26 = vld [vmem:[%s3404_s6 + $0x4a0] sm:$0xff]  ;;  %v1625_v13 = vld [vmem:[%s3404_s6 + $0x548] sm:$0xff] }
 0x201   : > { %2768 = verf.f32 %v1376_v24  ;;  %v1379_v39 = vmul.f32 0.70710677, %v3847_v28  ;;  %v1600_v24 = vld [vmem:[%s3404_s6 + $0x480] sm:$0xff] }
 0x202   : > { %v1165_v29 = vpop.f32.mrb[2].mxu0  ;;  %2770 = verf.f32 %v1377_v27  ;;  %v1602_v27 = vld [vmem:[%s3404_s6 + $0x490] sm:$0xff] }
 0x203   : > { %v1380_v30 = vmul.f32 0.70710677, %v1165_v29  ;;  %v1167_v31 = vpop.f32.mrb[3].mxu0  ;;  %v3849_v32 = vpop.f32.mrb[2].mxu1  ;;  %v1364_v16 = vmul.f32 0.5, %v1165_v29 }
 0x204   : > { %v1381_v33 = vmul.f32 0.70710677, %v1167_v31  ;;  %v3851_v34 = vpop.f32.mrb[3].mxu1  ;;  %v1365_v9 = vmul.f32 0.5, %v1167_v31 }
 0x205   : > { %2772 = verf.f32 %v1380_v30 }
 0x206   : > { %2774 = verf.f32 %v1381_v33  ;;  %v3853_v35 = vpop.f32.mrb[4].mxu0 }
 0x207   : > { %v1384_v36 = vmul.f32 0.70710677, %v3853_v35  ;;  %v3856_v37 = vpop.f32.mrb[5].mxu0  ;;  %v3858_v38 = vpop.f32.mrb[4].mxu1  ;;  %v1368_v48 = vmul.f32 0.5, %v3853_v35 }
 0x208   : > { %v1385_v40 = vmul.f32 0.70710677, %v3856_v37  ;;  %v3862_v41 = vpop.f32.mrb[5].mxu1  ;;  %v1369_v29 = vmul.f32 0.5, %v3856_v37  ;;  %v1611_v37 = vld [vmem:[%s3404_s6 + $0x4d8] sm:$0xff] }
 0x209   : > { %2776 = verf.f32 %v1384_v36  ;;  %v1606_v36 = vld [vmem:[%s3404_s6 + $0x4b0] sm:$0xff] }
 0x20a   : > { %2778 = verf.f32 %v1385_v40  ;;  %v3864_v42 = vpop.f32.mrb[6].mxu0  ;;  %v1613_v40 = vld [vmem:[%s3404_s6 + $0x4e8] sm:$0xff]  ;;  %v2657_v54 = vpack.c.bf16 %v1606_v36, %v1602_v27  ;;  %v1630_v27 = vld [vmem:[%s3404_s6 + $0x570] sm:$0xff] }
 0x20b   : > { %v2769_v43 = vpop.eup %2768  ;;  %v1388_v44 = vmul.f32 0.70710677, %v3864_v42  ;;  %v3867_v45 = vpop.f32.mrb[7].mxu0  ;;  %2780 = verf.f32 %v1379_v39  ;;  %v1609_v39 = vld [vmem:[%s3404_s6 + $0x4c8] sm:$0xff] }
 0x20c   : > { %v3869_v46 = vpop.f32.mrb[6].mxu1  ;;  %v1389_v47 = vmul.f32 0.70710677, %v3867_v45  ;;  %v2771_v52 = vpop.eup %2770  ;;  %v1408_v53 = vadd.f32 1.0, %v2769_v43  ;;  %v2531_v55 = vpack.c.bf16 %v1613_v40, %v1609_v39  ;;  %v1373_v35 = vmul.f32 0.5, %v3867_v45  ;;  %v1621_v45 = vld [vmem:[%s3404_s6 + $0x528] sm:$0xff] }
 0x20d   : > { %v3875_v51 = vpop.f32.mrb[7].mxu1  ;;  %2782 = verf.f32 %v1388_v44  ;;  %v1409_v58 = vadd.f32 1.0, %v2771_v52  ;;  %v2655_v44 = vpack.c.bf16 %v1607_v19, %v1603_v18  ;;  %v1631_v18 = vld [vmem:[%s3404_s6 + $0x578] sm:$0xff]  ;;  %v1632_v40 = vld [vmem:[%s3404_s6 + $0x580] sm:$0xff] }
 0x20e   : > { %2784 = verf.f32 %v1389_v47  ;;  %v1424_v7 = vmul.f32 %v1408_v53, %v1360_v60  ;;  %v2529_v53 = vpack.c.bf16 %v1604_v26, %v1600_v24  ;;  %v1612_v60 = vld [vmem:[%s3404_s6 + $0x4e0] sm:$0xff]  ;;  %v1626_v26 = vld [vmem:[%s3404_s6 + $0x550] sm:$0xff] }
 0x20f   : > { %v2773_v59 = vpop.eup %2772  ;;  %v1425_v0 = vmul.f32 %v1409_v58, %v1361_v57  ;;  %v2533_v6 = vpack.c.bf16 %v1612_v60, %v1608_v56  ;;  %v2669_v39 = vpack.c.bf16 %v1630_v27, %v1626_v26  ;;  %v1640_v56 = vld [vmem:[%s3404_s6 + $0x5c0] sm:$0xff]  ;;  %v1646_v60 = vld [vmem:[%s3404_s6 + $0x5f0] sm:$0xff] }
 0x210   : > { %v2775_v63 = vpop.eup %2774  ;;  %v1412_v8 = vadd.f32 1.0, %v2773_v59  ;;  %v1668_v26 = vld [vmem:[%s3404_s6 + $0x6a0] sm:$0xff] }
 0x211   : > { %v1413_v10 = vadd.f32 1.0, %v2775_v63  ;;  %1776 = vmatprep.mubr.f32.mxu0 %v1425_v0  ;;  %1954 = vmatprep.mubr.f32.mxu1 %v1425_v0  ;;  %v2659_v63 = vpack.c.bf16 %v1615_v50, %v1611_v37  ;;  %v1617_v0 = vld [vmem:[%s3404_s6 + $0x508] sm:$0xff] }
 0x212   : > { %1777 = vmatmul.mubr.f32.vlgmr.msra.gmra.mrb[8].mxu0 %v1424_v7  ;;  %1955 = vmatmul.mubr.f32.vlgmr.msra.gmra.mrb[8].mxu1 %v1424_v7  ;;  %v1428_v30 = vmul.f32 %v1412_v8, %v1364_v16  ;;  %v2661_v7 = vpack.c.bf16 %v1614_v62, %v1610_v61  ;;  %v1616_v8 = vld [vmem:[%s3404_s6 + $0x500] sm:$0xff]  ;;  %v1629_v16 = vld [vmem:[%s3404_s6 + $0x568] sm:$0xff] }
 0x213   : > { %v2777_v15 = vpop.eup %2776  ;;  %v1429_v17 = vmul.f32 %v1413_v10, %v1365_v9  ;;  %2522 = vmatpush1.bf16.msra.mxu0 %v2521_v1  ;;  %2650 = vmatpush1.bf16.msra.mxu1 %v2649_v2  ;;  %v1372_v2 = vmul.f32 0.5, %v3864_v42  ;;  %v1620_v9 = vld [vmem:[%s3404_s6 + $0x520] sm:$0xff]  ;;  %v1363_v42 = vmul.f32 0.5, %v3847_v28  ;;  %v1641_v37 = vld [vmem:[%s3404_s6 + $0x5c8] sm:$0xff] }
 0x214   : > { %v2779_v20 = vpop.eup %2778  ;;  %v1416_v31 = vadd.f32 1.0, %v2777_v15  ;;  %2524 = vmatprep.subr.bf16.mxu0 %v2523_v3  ;;  %2652 = vmatprep.subr.bf16.mxu1 %v2651_v14  ;;  %v2535_v14 = vpack.c.bf16 %v1621_v45, %v1617_v0  ;;  %v2663_v15 = vpack.c.bf16 %v1623_v5, %v1619_v4  ;;  %v2537_v28 = vpack.c.bf16 %v1620_v9, %v1616_v8  ;;  %v1645_v50 = vld [vmem:[%s3404_s6 + $0x5e8] sm:$0xff]  ;;  %v1655_v0 = vld [vmem:[%s3404_s6 + $0x638] sm:$0xff]  ;;  %v1652_v45 = vld [vmem:[%s3404_s6 + $0x620] sm:$0xff] }
 0x215   : > { %v1417_v33 = vadd.f32 1.0, %v2779_v20  ;;  %1782 = vmatprep.mubr.f32.mxu0 %v1429_v17  ;;  %v2781_v43 = vpop.eup %2780  ;;  %1960 = vmatprep.mubr.f32.mxu1 %v1429_v17  ;;  %v1627_v17 = vld [vmem:[%s3404_s6 + $0x558] sm:$0xff]  ;;  %v2665_v20 = vpack.c.bf16 %v1622_v12, %v1618_v11  ;;  %v1649_v61 = vld [vmem:[%s3404_s6 + $0x608] sm:$0xff] }
 0x216   : > { %1783 = vmatmul.mubr.f32.gmra.mrb[10].mxu0 %v1428_v30  ;;  %1961 = vmatmul.mubr.f32.gmra.mrb[10].mxu1 %v1428_v30  ;;  %v1432_v57 = vmul.f32 %v1416_v31, %v1368_v48  ;;  %v1411_v1 = vadd.f32 1.0, %v2781_v43  ;;  %v2667_v24 = vpack.c.bf16 %v1631_v18, %v1627_v17  ;;  %v1633_v30 = vld [vmem:[%s3404_s6 + $0x588] sm:$0xff]  ;;  %v1636_v43 = vld [vmem:[%s3404_s6 + $0x5a0] sm:$0xff]  ;;  %v1634_v48 = vld [vmem:[%s3404_s6 + $0x590] sm:$0xff] }
 0x217   : > { %v2783_v47 = vpop.eup %2782  ;;  %v1433_v49 = vmul.f32 %v1417_v33, %v1369_v29  ;;  %2526 = vmatpush1.bf16.msra.mxu0 %v2525_v21  ;;  %2654 = vmatpush1.bf16.msra.mxu1 %v2653_v22  ;;  %v1624_v21 = vld [vmem:[%s3404_s6 + $0x540] sm:$0xff]  ;;  %v1637_v31 = vld [vmem:[%s3404_s6 + $0x5a8] sm:$0xff]  ;;  %v1635_v29 = vld [vmem:[%s3404_s6 + $0x598] sm:$0xff] }
 0x218   : > { %v2785_v52 = vpop.eup %2784  ;;  %v1420_v58 = vadd.f32 1.0, %v2783_v47  ;;  %2528 = vmatprep.subr.bf16.mxu0 %v2527_v23  ;;  %2656 = vmatprep.subr.bf16.mxu1 %v2655_v44  ;;  %v1427_v19 = vmul.f32 %v1411_v1, %v1363_v42  ;;  %v1628_v22 = vld [vmem:[%s3404_s6 + $0x560] sm:$0xff]  ;;  %v2539_v23 = vpack.c.bf16 %v1629_v16, %v1625_v13  ;;  %v1639_v33 = vld [vmem:[%s3404_s6 + $0x5b8] sm:$0xff]  ;;  %v2543_v44 = vpack.c.bf16 %v1637_v31, %v1633_v30  ;;  %v1653_v62 = vld [vmem:[%s3404_s6 + $0x628] sm:$0xff] }
 0x219   : > { %v1421_v59 = vadd.f32 1.0, %v2785_v52  ;;  %1788 = vmatprep.mubr.f32.mxu0 %v1433_v49  ;;  %1966 = vmatprep.mubr.f32.mxu1 %v1433_v49  ;;  %v2541_v36 = vpack.c.bf16 %v1628_v22, %v1624_v21  ;;  %v2671_v47 = vpack.c.bf16 %v1639_v33, %v1635_v29  ;;  %v1638_v49 = vld [vmem:[%s3404_s6 + $0x5b0] sm:$0xff]  ;;  %v1643_v52 = vld [vmem:[%s3404_s6 + $0x5d8] sm:$0xff]  ;;  %v2551_v4 = vpack.c.bf16 %v1653_v62, %v1649_v61  ;;  %v1657_v8 = vld [vmem:[%s3404_s6 + $0x648] sm:$0xff] }
 0x21a   : > { %1789 = vmatmul.mubr.f32.gmra.mrb[12].mxu0 %v1432_v57  ;;  %1967 = vmatmul.mubr.f32.gmra.mrb[12].mxu1 %v1432_v57  ;;  %v1436_v10 = vmul.f32 %v1420_v58, %v1372_v2  ;;  %v1644_v57 = vld [vmem:[%s3404_s6 + $0x5e0] sm:$0xff]  ;;  %v2547_v58 = vpack.c.bf16 %v1645_v50, %v1641_v37  ;;  %v1661_v9 = vld [vmem:[%s3404_s6 + $0x668] sm:$0xff]  ;;  %v1659_v42 = vld [vmem:[%s3404_s6 + $0x658] sm:$0xff]  ;;  %v1383_v61 = vmul.f32 0.70710677, %v3851_v34 }
 0x21b   : > { %v1437_v3 = vmul.f32 %v1421_v59, %v1373_v35  ;;  %2530 = vmatpush1.bf16.msra.mxu0 %v2529_v53  ;;  %2658 = vmatpush1.bf16.msra.mxu1 %v2657_v54  ;;  %v1647_v53 = vld [vmem:[%s3404_s6 + $0x5f8] sm:$0xff]  ;;  %v2545_v54 = vpack.c.bf16 %v1636_v43, %v1632_v40  ;;  %v1642_v59 = vld [vmem:[%s3404_s6 + $0x5d0] sm:$0xff]  ;;  %v2549_v1 = vpack.c.bf16 %v1644_v57, %v1640_v56  ;;  %v1656_v13 = vld [vmem:[%s3404_s6 + $0x640] sm:$0xff]  ;;  %v1378_v57 = vmul.f32 0.70710677, %v3845_v25 }
 0x21c   : > { %2532 = vmatprep.subr.bf16.mxu0 %v2531_v55  ;;  %2660 = vmatprep.subr.bf16.mxu1 %v2659_v63  ;;  %v2673_v55 = vpack.c.bf16 %v1638_v49, %v1634_v48  ;;  %v2675_v35 = vpack.c.bf16 %v1647_v53, %v1643_v52  ;;  %v1651_v63 = vld [vmem:[%s3404_s6 + $0x618] sm:$0xff]  ;;  %v2677_v2 = vpack.c.bf16 %v1646_v60, %v1642_v59  ;;  %v1658_v17 = vld [vmem:[%s3404_s6 + $0x650] sm:$0xff]  ;;  %v1673_v33 = vld [vmem:[%s3404_s6 + $0x6c8] sm:$0xff] }
 0x21d   : > { %1794 = vmatprep.mubr.f32.mxu0 %v1437_v3  ;;  %1972 = vmatprep.mubr.f32.mxu1 %v1437_v3  ;;  %v1648_v3 = vld [vmem:[%s3404_s6 + $0x600] sm:$0xff]  ;;  %v2679_v5 = vpack.c.bf16 %v1655_v0, %v1651_v63  ;;  %v1662_v18 = vld [vmem:[%s3404_s6 + $0x670] sm:$0xff]  ;;  %v1671_v21 = vld [vmem:[%s3404_s6 + $0x6b8] sm:$0xff]  ;;  %2786 = verf.f32 %v1378_v57  ;;  %v1367_v57 = vmul.f32 0.5, %v3851_v34 }
 0x21e   : > { %1795 = vmatmul.mubr.f32.gmra.mrb[14].mxu0 %v1436_v10  ;;  %1973 = vmatmul.mubr.f32.gmra.mrb[14].mxu1 %v1436_v10  ;;  %v1663_v10 = vld [vmem:[%s3404_s6 + $0x678] sm:$0xff]  ;;  %v2553_v11 = vpack.c.bf16 %v1652_v45, %v1648_v3  ;;  %v1666_v31 = vld [vmem:[%s3404_s6 + $0x690] sm:$0xff]  ;;  %v1676_v48 = vld [vmem:[%s3404_s6 + $0x6e0] sm:$0xff]  ;;  %2788 = verf.f32 %v1383_v61  ;;  %v1366_v61 = vmul.f32 0.5, %v3849_v32 }
 0x21f   : > { %2534 = vmatpush1.bf16.msra.mxu0 %v2533_v6  ;;  %2662 = vmatpush1.bf16.msra.mxu1 %v2661_v7  ;;  %v1650_v6 = vld [vmem:[%s3404_s6 + $0x610] sm:$0xff]  ;;  %v2683_v16 = vpack.c.bf16 %v1663_v10, %v1659_v42  ;;  %v1679_v40 = vld [vmem:[%s3404_s6 + $0x6f8] sm:$0xff]  ;;  %v1681_v53 = vld [vmem:[%s3404_s6 + $0x708] sm:$0xff]  ;;  %v1387_v42 = vmul.f32 0.70710677, %v3862_v41 }
 0x220   : > { %1865 = vmatprep.mubr.f32.mxu0 %v1427_v19  ;;  %2043 = vmatprep.mubr.f32.mxu1 %v1427_v19  ;;  %v1654_v7 = vld [vmem:[%s3404_s6 + $0x630] sm:$0xff]  ;;  %v1665_v19 = vld [vmem:[%s3404_s6 + $0x688] sm:$0xff]  ;;  %v1687_v56 = vld [vmem:[%s3404_s6 + $0x738] sm:$0xff] }
 0x221   : > { %2536 = vmatprep.subr.bf16.mxu0 %v2535_v14  ;;  %2664 = vmatprep.subr.bf16.mxu1 %v2663_v15  ;;  %v2681_v12 = vpack.c.bf16 %v1654_v7, %v1650_v6  ;;  %v1660_v14 = vld [vmem:[%s3404_s6 + $0x660] sm:$0xff]  ;;  %v2555_v15 = vpack.c.bf16 %v1661_v9, %v1657_v8  ;;  %v1670_v29 = vld [vmem:[%s3404_s6 + $0x6b0] sm:$0xff]  ;;  %v1693_v3 = vld [vmem:[%s3404_s6 + $0x768] sm:$0xff] }
 0x222   : > { %v2557_v22 = vpack.c.bf16 %v1660_v14, %v1656_v13  ;;  %v1674_v50 = vld [vmem:[%s3404_s6 + $0x6d0] sm:$0xff]  ;;  %v1680_v59 = vld [vmem:[%s3404_s6 + $0x700] sm:$0xff]  ;;  %v1691_v45 = vld [vmem:[%s3404_s6 + $0x758] sm:$0xff] }
 0x223   : > { %2538 = vmatpush1.bf16.msra.mxu0 %v2537_v28  ;;  %2666 = vmatpush1.bf16.msra.mxu1 %v2665_v20  ;;  %v1669_v28 = vld [vmem:[%s3404_s6 + $0x6a8] sm:$0xff]  ;;  %v1667_v20 = vld [vmem:[%s3404_s6 + $0x698] sm:$0xff]  ;;  %v1678_v52 = vld [vmem:[%s3404_s6 + $0x6f0] sm:$0xff] }
 0x224   : > { %2540 = vmatprep.subr.bf16.mxu0 %v2539_v23  ;;  %2668 = vmatprep.subr.bf16.mxu1 %v2667_v24  ;;  %v2685_v23 = vpack.c.bf16 %v1662_v18, %v1658_v17  ;;  %v1664_v24 = vld [vmem:[%s3404_s6 + $0x680] sm:$0xff]  ;;  %v2559_v27 = vpack.c.bf16 %v1669_v28, %v1665_v19  ;;  %v2687_v30 = vpack.c.bf16 %v1671_v21, %v1667_v20  ;;  %v1682_v0 = vld [vmem:[%s3404_s6 + $0x710] sm:$0xff]  ;;  %v1697_v14 = vld [vmem:[%s3404_s6 + $0x788] sm:$0xff]  ;;  %v1386_v18 = vmul.f32 0.70710677, %v3858_v38 }
 0x225   : > { %v2561_v43 = vpack.c.bf16 %v1668_v26, %v1664_v24  ;;  %v1684_v60 = vld [vmem:[%s3404_s6 + $0x720] sm:$0xff]  ;;  %v1694_v13 = vld [vmem:[%s3404_s6 + $0x770] sm:$0xff]  ;;  %v1703_v17 = vld [vmem:[%s3404_s6 + $0x7b8] sm:$0xff] }
 0x226   : > { %v2569_v6 = vpack.c.bf16 %v1684_v60, %v1680_v59  ;;  %v1688_v8 = vld [vmem:[%s3404_s6 + $0x740] sm:$0xff]  ;;  %v1698_v26 = vld [vmem:[%s3404_s6 + $0x790] sm:$0xff]  ;;  %v1362_v59 = vmul.f32 0.5, %v3845_v25 }
 0x227   : > { %2542 = vmatpush1.bf16.msra.mxu0 %v2541_v36  ;;  %2670 = vmatpush1.bf16.msra.mxu1 %v2669_v39  ;;  %v1677_v36 = vld [vmem:[%s3404_s6 + $0x6e8] sm:$0xff]  ;;  %v1675_v39 = vld [vmem:[%s3404_s6 + $0x6d8] sm:$0xff]  ;;  %v1692_v9 = vld [vmem:[%s3404_s6 + $0x760] sm:$0xff] }
 0x228   : > { %2544 = vmatprep.subr.bf16.mxu0 %v2543_v44  ;;  %2672 = vmatprep.subr.bf16.mxu1 %v2671_v47  ;;  %v2689_v44 = vpack.c.bf16 %v1670_v29, %v1666_v31  ;;  %v1672_v47 = vld [vmem:[%s3404_s6 + $0x6c0] sm:$0xff]  ;;  %v2563_v49 = vpack.c.bf16 %v1677_v36, %v1673_v33  ;;  %v2691_v37 = vpack.c.bf16 %v1679_v40, %v1675_v39  ;;  %v1709_v31 = vld [vmem:[%s3404_s6 + $0x7e8] sm:$0xff]  ;;  %v1707_v29 = vld [vmem:[%s3404_s6 + $0x7d8] sm:$0xff]  ;;  %v1390_v36 = vmul.f32 0.70710677, %v3869_v46 }
 0x229   : > { %v2573_v19 = vpack.c.bf16 %v1692_v9, %v1688_v8  ;;  %v1696_v20 = vld [vmem:[%s3404_s6 + $0x780] sm:$0xff]  ;;  %v1711_v33 = vld [vmem:[%s3404_s6 + $0x7f8] sm:$0xff] }
 0x22a   : > { %v1700_v21 = vld [vmem:[%s3404_s6 + $0x7a0] sm:$0xff] }
 0x22b   : > { %2546 = vmatpush1.bf16.msra.mxu0 %v2545_v54  ;;  %2674 = vmatpush1.bf16.msra.mxu1 %v2673_v55  ;;  %v1685_v54 = vld [vmem:[%s3404_s6 + $0x728] sm:$0xff]  ;;  %v1683_v55 = vld [vmem:[%s3404_s6 + $0x718] sm:$0xff]  ;;  %v2577_v39 = vpack.c.bf16 %v1700_v21, %v1696_v20 }
 0x22c   : > { %2548 = vmatprep.subr.bf16.mxu0 %v2547_v58  ;;  %2676 = vmatprep.subr.bf16.mxu1 %v2675_v35  ;;  %v2565_v58 = vpack.c.bf16 %v1676_v48, %v1672_v47  ;;  %v2693_v35 = vpack.c.bf16 %v1678_v52, %v1674_v50  ;;  %v2567_v62 = vpack.c.bf16 %v1685_v54, %v1681_v53  ;;  %v1708_v48 = vld [vmem:[%s3404_s6 + $0x7e0] sm:$0xff]  ;;  %v2787_v50 = vpop.eup %2786  ;;  %v1445_v20 = vld [vmem:[#allocation2 + $0x28] sm:$0xff]  ;;  %v1447_v21 = vld [vmem:[#allocation2 + $0x38] sm:$0xff] }
 0x22d   : > { %v2695_v63 = vpack.c.bf16 %v1687_v56, %v1683_v55  ;;  %v2707_v47 = vpack.c.bf16 %v1711_v33, %v1707_v29  ;;  %v2789_v52 = vpop.eup %2788  ;;  %v1410_v55 = vadd.f32 1.0, %v2787_v50  ;;  %v1448_v33 = vld [vmem:[#allocation2 + $0x40] sm:$0xff] }
 0x22f   : > { %2550 = vmatpush1.bf16.msra.mxu0 %v2549_v1  ;;  %2678 = vmatpush1.bf16.msra.mxu1 %v2677_v2  ;;  %v1686_v1 = vld [vmem:[%s3404_s6 + $0x730] sm:$0xff]  ;;  %v1689_v2 = vld [vmem:[%s3404_s6 + $0x748] sm:$0xff]  ;;  %v1426_v60 = vmul.f32 %v1410_v55, %v1362_v59 }
 0x230   : > { %2552 = vmatprep.subr.bf16.mxu0 %v2551_v4  ;;  %2680 = vmatprep.subr.bf16.mxu1 %v2679_v5  ;;  %v1695_v4 = vld [vmem:[%s3404_s6 + $0x778] sm:$0xff]  ;;  %v1382_v5 = vmul.f32 0.70710677, %v3849_v32  ;;  %v2697_v7 = vpack.c.bf16 %v1686_v1, %v1682_v0  ;;  %v2571_v10 = vpack.c.bf16 %v1693_v3, %v1689_v2  ;;  %v1371_v1 = vmul.f32 0.5, %v3862_v41  ;;  %v1453_v55 = vld [vmem:[#allocation2 + $0x68] sm:$0xff] }
 0x232   : > { %2790 = verf.f32 %v1382_v5 }
 0x233   : > { %2554 = vmatpush1.bf16.msra.mxu0 %v2553_v11  ;;  %2682 = vmatpush1.bf16.msra.mxu1 %v2681_v12  ;;  %v2699_v11 = vpack.c.bf16 %v1695_v4, %v1691_v45  ;;  %v1690_v12 = vld [vmem:[%s3404_s6 + $0x750] sm:$0xff]  ;;  %2792 = verf.f32 %v1387_v42  ;;  %v1370_v45 = vmul.f32 0.5, %v3858_v38  ;;  %v1440_v42 = vld [vmem:[#allocation2] sm:$0xff] }
 0x234   : > { %2556 = vmatprep.subr.bf16.mxu0 %v2555_v15  ;;  %2684 = vmatprep.subr.bf16.mxu1 %v2683_v16  ;;  %v1701_v15 = vld [vmem:[%s3404_s6 + $0x7a8] sm:$0xff]  ;;  %v1699_v16 = vld [vmem:[%s3404_s6 + $0x798] sm:$0xff]  ;;  %v2701_v28 = vpack.c.bf16 %v1694_v13, %v1690_v12  ;;  %2794 = verf.f32 %v1386_v18 }
 0x235   : > { %v2703_v24 = vpack.c.bf16 %v1703_v17, %v1699_v16 }
 0x237   : > { %2558 = vmatpush1.bf16.msra.mxu0 %v2557_v22  ;;  %2686 = vmatpush1.bf16.msra.mxu1 %v2685_v23  ;;  %v1391_v22 = vmul.f32 0.70710677, %v3875_v51  ;;  %v2575_v23 = vpack.c.bf16 %v1701_v15, %v1697_v14 }
 0x238   : > { %2560 = vmatprep.subr.bf16.mxu0 %v2559_v27  ;;  %2688 = vmatprep.subr.bf16.mxu1 %v2687_v30  ;;  %v1702_v27 = vld [vmem:[%s3404_s6 + $0x7b0] sm:$0xff]  ;;  %v1705_v30 = vld [vmem:[%s3404_s6 + $0x7c8] sm:$0xff] }
 0x239   : > { %v2705_v40 = vpack.c.bf16 %v1702_v27, %v1698_v26  ;;  %2796 = verf.f32 %v1391_v22 }
 0x23a   : > { %2798 = verf.f32 %v1390_v36  ;;  %v1450_v36 = vld [vmem:[#allocation2 + $0x50] sm:$0xff] }
 0x23b   : > { %2562 = vmatpush1.bf16.msra.mxu0 %v2561_v43  ;;  %2690 = vmatpush1.bf16.msra.mxu1 %v2689_v44  ;;  %v1704_v43 = vld [vmem:[%s3404_s6 + $0x7c0] sm:$0xff]  ;;  %v2579_v44 = vpack.c.bf16 %v1709_v31, %v1705_v30 }
 0x23c   : > { %2564 = vmatprep.subr.bf16.mxu0 %v2563_v49  ;;  %2692 = vmatprep.subr.bf16.mxu1 %v2691_v37  ;;  %v1706_v49 = vld [vmem:[%s3404_s6 + $0x7d0] sm:$0xff]  ;;  %v2581_v53 = vpack.c.bf16 %v1708_v48, %v1704_v43  ;;  %v2791_v56 = vpop.eup %2790 }
 0x23d   : > { %v1710_v37 = vld [vmem:[%s3404_s6 + $0x7f0] sm:$0xff] }
 0x23e   : > { %v2709_v54 = vpack.c.bf16 %v1710_v37, %v1706_v49 }
 0x23f   : > { %2566 = vmatpush1.bf16.msra.mxu0 %v2565_v58  ;;  %2694 = vmatpush1.bf16.msra.mxu1 %v2693_v35  ;;  %v1415_v58 = vadd.f32 1.0, %v2789_v52  ;;  %v2793_v35 = vpop.eup %2792 }
 0x240   : > { %2568 = vmatprep.subr.bf16.mxu0 %v2567_v62  ;;  %2696 = vmatprep.subr.bf16.mxu1 %v2695_v63  ;;  %v1414_v62 = vadd.f32 1.0, %v2791_v56  ;;  %v2795_v63 = vpop.eup %2794  ;;  %v1419_v2 = vadd.f32 1.0, %v2793_v35  ;;  %v1455_v56 = vld [vmem:[#allocation2 + $0x78] sm:$0xff] }
 0x241   : > { %v1431_v0 = vmul.f32 %v1415_v58, %v1367_v57  ;;  %v1418_v25 = vadd.f32 1.0, %v2795_v63 }
 0x242   : > { %v1430_v34 = vmul.f32 %v1414_v62, %v1366_v61  ;;  %v1435_v5 = vmul.f32 %v1419_v2, %v1371_v1 }
 0x243   : > { %2570 = vmatpush1.bf16.msra.mxu0 %v2569_v6  ;;  %2698 = vmatpush1.bf16.msra.mxu1 %v2697_v7  ;;  %v2797_v3 = vpop.eup %2796  ;;  %v1375_v6 = vmul.f32 0.5, %v3875_v51  ;;  %v1434_v41 = vmul.f32 %v1418_v25, %v1370_v45  ;;  %v1374_v7 = vmul.f32 0.5, %v3869_v46  ;;  %v1441_v51 = vld [vmem:[#allocation2 + $0x8] sm:$0xff] }
 0x244   : > { %2572 = vmatprep.subr.bf16.mxu0 %v2571_v10  ;;  %2700 = vmatprep.subr.bf16.mxu1 %v2699_v11  ;;  %v2799_v4 = vpop.eup %2798  ;;  %v1423_v32 = vadd.f32 1.0, %v2797_v3  ;;  %v1442_v10 = vld [vmem:[#allocation2 + $0x10] sm:$0xff]  ;;  %v1443_v11 = vld [vmem:[#allocation2 + $0x18] sm:$0xff] }
 0x245   : > { %v1422_v8 = vadd.f32 1.0, %v2799_v4 }
 0x246   : > { %v1439_v9 = vmul.f32 %v1423_v32, %v1375_v6 }
 0x247   : > { %2574 = vmatpush1.bf16.msra.mxu0 %v2573_v19  ;;  %2702 = vmatpush1.bf16.msra.mxu1 %v2701_v28  ;;  %v1438_v38 = vmul.f32 %v1422_v8, %v1374_v7  ;;  %v1444_v19 = vld [vmem:[#allocation2 + $0x20] sm:$0xff]  ;;  %v1446_v28 = vld [vmem:[#allocation2 + $0x30] sm:$0xff] }
 0x248   : > { %2576 = vmatprep.subr.bf16.mxu0 %v2575_v23  ;;  %2704 = vmatprep.subr.bf16.mxu1 %v2703_v24 }
 0x24b   : > { %2578 = vmatpush1.bf16.msra.mxu0 %v2577_v39  ;;  %2706 = vmatpush1.bf16.msra.mxu1 %v2705_v40  ;;  %v1449_v39 = vld [vmem:[#allocation2 + $0x48] sm:$0xff]  ;;  %v1451_v40 = vld [vmem:[#allocation2 + $0x58] sm:$0xff] }
 0x24c   : > { %2580 = vmatprep.subr.bf16.mxu0 %v2579_v44  ;;  %2708 = vmatprep.subr.bf16.mxu1 %v2707_v47 }
 0x24f   : > { %2582 = vmatpush1.bf16.msra.mxu0 %v2581_v53  ;;  %2710 = vmatpush1.bf16.msra.mxu1 %v2709_v54  ;;  %v1452_v53 = vld [vmem:[#allocation2 + $0x60] sm:$0xff]  ;;  %v1454_v54 = vld [vmem:[#allocation2 + $0x70] sm:$0xff] }
 0x252   : > { %1866 = vmatmul.mubr.f32.vlgmr.msra.gmra.mrb[8].mxu0 %v1426_v60  ;;  %2044 = vmatmul.mubr.f32.vlgmr.msra.gmra.mrb[8].mxu1 %v1426_v60 }
 0x253   : > { %1871 = vmatprep.mubr.f32.mxu0 %v1431_v0  ;;  %2049 = vmatprep.mubr.f32.mxu1 %v1431_v0 }
 0x256   : > { %1872 = vmatmul.mubr.f32.gmra.mrb[10].mxu0 %v1430_v34  ;;  %2050 = vmatmul.mubr.f32.gmra.mrb[10].mxu1 %v1430_v34 }
 0x257   : > { %1877 = vmatprep.mubr.f32.mxu0 %v1435_v5  ;;  %2055 = vmatprep.mubr.f32.mxu1 %v1435_v5 }
 0x25a   : > { %1878 = vmatmul.mubr.f32.gmra.mrb[12].mxu0 %v1434_v41  ;;  %2056 = vmatmul.mubr.f32.gmra.mrb[12].mxu1 %v1434_v41 }
 0x25b   : > { %1883 = vmatprep.mubr.f32.mxu0 %v1439_v9  ;;  %2061 = vmatprep.mubr.f32.mxu1 %v1439_v9 }
 0x25e   : > { %1884 = vmatmul.mubr.f32.gmra.mrb[14].mxu0 %v1438_v38  ;;  %2062 = vmatmul.mubr.f32.gmra.mrb[14].mxu1 %v1438_v38 }
 0x325   : > { %v1867_v12 = vpop.f32.mrb[8].mxu0  ;;  %v2045_v13 = vpop.f32.mrb[8].mxu1 }
 0x326   : > { %v2068_v14 = vadd.f32 %v1867_v12, %v1440_v42  ;;  %v2070_v15 = vadd.f32 %v2045_v13, %v1442_v10  ;;  %v1869_v16 = vpop.f32.mrb[9].mxu0  ;;  %v2047_v17 = vpop.f32.mrb[9].mxu1 }
 0x327   : > { %v2069_v46 = vadd.f32 %v1869_v16, %v1441_v51  ;;  %v2071_v18 = vadd.f32 %v2047_v17, %v1443_v11 }
 0x328   : > { %2084 = vst [vmem:[#allocation2] sm:$0xff] %v2068_v14  ;;  %2086 = vst [vmem:[#allocation2 + $0x10] sm:$0xff] %v2070_v15 }
 0x329   : > { %2085 = vst [vmem:[#allocation2 + $0x8] sm:$0xff] %v2069_v46  ;;  %2087 = vst [vmem:[#allocation2 + $0x18] sm:$0xff] %v2071_v18  ;;  %v1873_v22 = vpop.f32.mrb[10].mxu0  ;;  %v2051_v23 = vpop.f32.mrb[10].mxu1 }
 0x32a   : > { %v2072_v24 = vadd.f32 %v1873_v22, %v1444_v19  ;;  %v2074_v26 = vadd.f32 %v2051_v23, %v1446_v28  ;;  %v1875_v27 = vpop.f32.mrb[11].mxu0  ;;  %v2053_v30 = vpop.f32.mrb[11].mxu1 }
 0x32b   : > { %v2073_v31 = vadd.f32 %v1875_v27, %v1445_v20  ;;  %v2075_v29 = vadd.f32 %v2053_v30, %v1447_v21 }
 0x32c   : > { %2088 = vst [vmem:[#allocation2 + $0x20] sm:$0xff] %v2072_v24  ;;  %2090 = vst [vmem:[#allocation2 + $0x30] sm:$0xff] %v2074_v26 }
 0x32d   : > { %2089 = vst [vmem:[#allocation2 + $0x28] sm:$0xff] %v2073_v31  ;;  %2091 = vst [vmem:[#allocation2 + $0x38] sm:$0xff] %v2075_v29  ;;  %v1879_v43 = vpop.f32.mrb[12].mxu0  ;;  %v2057_v44 = vpop.f32.mrb[12].mxu1 }
 0x32e   : > { %v2076_v47 = vadd.f32 %v1879_v43, %v1448_v33  ;;  %v2078_v48 = vadd.f32 %v2057_v44, %v1450_v36  ;;  %v1881_v49 = vpop.f32.mrb[13].mxu0  ;;  %v2059_v37 = vpop.f32.mrb[13].mxu1 }
 0x32f   : > { %v2077_v50 = vadd.f32 %v1881_v49, %v1449_v39  ;;  %v2079_v52 = vadd.f32 %v2059_v37, %v1451_v40  ;;  %2103 = sbr.rel (%p2194_p10) target bundleno = 830 (0x33e), region = 63  ;;  %v2104_v0 = vld [vmem:[#allocation2] sm:$0xff] (!%p2194_p10)  ;;  %v2106_v2 = vld [vmem:[#allocation2 + $0x10] sm:$0xff] (!%p2194_p10) }
 0x330   : > { %2092 = vst [vmem:[#allocation2 + $0x40] sm:$0xff] %v2076_v47  ;;  %2094 = vst [vmem:[#allocation2 + $0x50] sm:$0xff] %v2078_v48  ;;  %v2105_v1 = vld [vmem:[#allocation2 + $0x8] sm:$0xff] (!%p2194_p10)  ;;  %v2107_v3 = vld [vmem:[#allocation2 + $0x18] sm:$0xff] (!%p2194_p10) }
 0x331   : > { %2093 = vst [vmem:[#allocation2 + $0x48] sm:$0xff] %v2077_v50  ;;  %2095 = vst [vmem:[#allocation2 + $0x58] sm:$0xff] %v2079_v52  ;;  %v1885_v57 = vpop.f32.mrb[14].mxu0  ;;  %v2063_v58 = vpop.f32.mrb[14].mxu1 }
 0x332   : > { %v2080_v35 = vadd.f32 %v1885_v57, %v1452_v53  ;;  %v2082_v59 = vadd.f32 %v2063_v58, %v1454_v54  ;;  %v1887_v60 = vpop.f32.mrb[15].mxu0  ;;  %v2065_v61 = vpop.f32.mrb[15].mxu1  ;;  %2120 = vst [vmem:[%s4079_s3] sm:$0xff] (!%p2194_p10), %v2104_v0  ;;  %2121 = vst [vmem:[%s4079_s3 + $0x8] sm:$0xff] (!%p2194_p10), %v2105_v1 }
 0x333   : > { %v2081_v62 = vadd.f32 %v1887_v60, %v1453_v55  ;;  %v2083_v63 = vadd.f32 %v2065_v61, %v1455_v56  ;;  %2122 = vst [vmem:[%s4079_s3 + $0x10] sm:$0xff] (!%p2194_p10), %v2106_v2  ;;  %v2108_v34 = vld [vmem:[#allocation2 + $0x20] sm:$0xff] (!%p2194_p10)  ;;  %2123 = vst [vmem:[%s4079_s3 + $0x18] sm:$0xff] (!%p2194_p10), %v2107_v3  ;;  %v2110_v25 = vld [vmem:[#allocation2 + $0x30] sm:$0xff] (!%p2194_p10) }
 0x334   : > { %2096 = vst [vmem:[#allocation2 + $0x60] sm:$0xff] %v2080_v35  ;;  %2098 = vst [vmem:[#allocation2 + $0x70] sm:$0xff] %v2082_v59  ;;  %v2109_v45 = vld [vmem:[#allocation2 + $0x28] sm:$0xff] (!%p2194_p10)  ;;  %v2111_v4 = vld [vmem:[#allocation2 + $0x38] sm:$0xff] (!%p2194_p10) }
 0x335   : > { %2097 = vst [vmem:[#allocation2 + $0x68] sm:$0xff] %v2081_v62  ;;  %2099 = vst [vmem:[#allocation2 + $0x78] sm:$0xff] %v2083_v63 }
 0x336   : > { %2124 = vst [vmem:[%s4079_s3 + $0x20] sm:$0xff] %v2108_v34  ;;  %2125 = vst [vmem:[%s4079_s3 + $0x28] sm:$0xff] %v2109_v45 }
 0x337   : > { %v2112_v5 = vld [vmem:[#allocation2 + $0x40] sm:$0xff]  ;;  %2126 = vst [vmem:[%s4079_s3 + $0x30] sm:$0xff] %v2110_v25  ;;  %2127 = vst [vmem:[%s4079_s3 + $0x38] sm:$0xff] %v2111_v4  ;;  %v2114_v32 = vld [vmem:[#allocation2 + $0x50] sm:$0xff] }
 0x338   : > { %2128 = vst [vmem:[%s4079_s3 + $0x40] sm:$0xff] %v2112_v5  ;;  %v2113_v6 = vld [vmem:[#allocation2 + $0x48] sm:$0xff]  ;;  %v2115_v41 = vld [vmem:[#allocation2 + $0x58] sm:$0xff]  ;;  %2130 = vst [vmem:[%s4079_s3 + $0x50] sm:$0xff] %v2114_v32 }
 0x339   : > { %2129 = vst [vmem:[%s4079_s3 + $0x48] sm:$0xff] %v2113_v6  ;;  %2131 = vst [vmem:[%s4079_s3 + $0x58] sm:$0xff] %v2115_v41 }
 0x33b   : > { %v2116_v7 = vld [vmem:[#allocation2 + $0x60] sm:$0xff]  ;;  %v2118_v9 = vld [vmem:[#allocation2 + $0x70] sm:$0xff] }
 0x33c   : > { %v2117_v8 = vld [vmem:[#allocation2 + $0x68] sm:$0xff]  ;;  %2132 = vst [vmem:[%s4079_s3 + $0x60] sm:$0xff] %v2116_v7  ;;  %2134 = vst [vmem:[%s4079_s3 + $0x70] sm:$0xff] %v2118_v9  ;;  %v2119_v38 = vld [vmem:[#allocation2 + $0x78] sm:$0xff] }
 0x33d   : > { %2133 = vst [vmem:[%s4079_s3 + $0x68] sm:$0xff] %v2117_v8  ;;  %2135 = vst [vmem:[%s4079_s3 + $0x78] sm:$0xff] %v2119_v38 }
 0x33e PF: > { %p10_p11 = scmp.ge.s32.totalorder %s2864_s16, 6   ;;  %s4080_s12 = smov %s2818_s13 }
 0x33f   : > { %s4081_s13 = smov %s2873_s19  ;;  %s4082_s14 = smov %s2864_s16 }
 0x340   :  { %12 = sbr.rel (!%p10_p11) target bundleno = 2 (0x2), region = 97 }

// kernel: forward.42
= control target key start
LH: loop header
LB: loop body
LE: loop exit
PB: predicated region body
PF: predicated region fallthrough
CT: control target
= control target key end

     0   :  { %s610_s0 = inlined_call_operand.vmem [shape: f32[2,16,512], index: 0, kind: input, shape index: {}]   ;;  %s611_s1 = inlined_call_operand.vmem [shape: f32[1,512], index: 1, kind: input, shape index: {}]   ;;  %s612_s2 = inlined_call_operand.vmem [shape: f32[1,512], index: 2, kind: input, shape index: {}]   ;;  %s613_s3 = inlined_call_operand.vmem [shape: f32[2,16,512], index: 3, kind: output, shape index: {}]  }
   0x1   :  { %v22_v0 = vld [vmem:[%s610_s0 + $0x40] sm:$0xff]  ;;  %v23_v1 = vld [vmem:[%s610_s0 + $0x48] sm:$0xff]  ;;  %v24_v2 = vld [vmem:[%s610_s0 + $0x50] sm:$0xff] }
   0x2   :  { %v40_v3 = vadd.f32 %v23_v1, %v22_v0  ;;  %v14_v4 = vld [vmem:[%s610_s0] sm:$0xff]  ;;  %v15_v5 = vld [vmem:[%s610_s0 + $0x8] sm:$0xff]  ;;  %v25_v6 = vld [vmem:[%s610_s0 + $0x58] sm:$0xff] }
   0x3   :  { %v16_v7 = vld [vmem:[%s610_s0 + $0x10] sm:$0xff]  ;;  %v30_v8 = vadd.f32 %v15_v5, %v14_v4  ;;  %v26_v9 = vld [vmem:[%s610_s0 + $0x60] sm:$0xff]  ;;  %v17_v11 = vld [vmem:[%s610_s0 + $0x18] sm:$0xff] }
   0x4   :  { %v41_v10 = vadd.f32 %v40_v3, %v24_v2  ;;  %v27_v12 = vld [vmem:[%s610_s0 + $0x68] sm:$0xff]  ;;  %v28_v13 = vld [vmem:[%s610_s0 + $0x70] sm:$0xff]  ;;  %v18_v16 = vld [vmem:[%s610_s0 + $0x20] sm:$0xff] }
   0x5   :  { %v31_v14 = vadd.f32 %v30_v8, %v16_v7  ;;  %v45_v15 = vadd.f32 %v27_v12, %v26_v9  ;;  %v19_v17 = vld [vmem:[%s610_s0 + $0x28] sm:$0xff]  ;;  %v20_v18 = vld [vmem:[%s610_s0 + $0x30] sm:$0xff]  ;;  %v29_v20 = vld [vmem:[%s610_s0 + $0x78] sm:$0xff] }
   0x6   :  { %v42_v19 = vadd.f32 %v41_v10, %v25_v6  ;;  %v35_v21 = vadd.f32 %v19_v17, %v18_v16  ;;  %v21_v24 = vld [vmem:[%s610_s0 + $0x38] sm:$0xff] }
   0x7   :  { %v32_v22 = vadd.f32 %v31_v14, %v17_v11  ;;  %v46_v23 = vadd.f32 %v45_v15, %v28_v13 }
   0x8   :  { %43 = vadd.xlane.f32.xlu1 %v42_v19  ;;  %v36_v25 = vadd.f32 %v35_v21, %v20_v18 }
   0x9   :  { %33 = vadd.xlane.f32.xlu0 %v32_v22  ;;  %v47_v26 = vadd.f32 %v46_v23, %v29_v20 }
   0xa   :  { %v37_v27 = vadd.f32 %v36_v25, %v21_v24 }
   0xc   :  { %48 = vadd.xlane.f32.xlu1 %v47_v26 }
   0xd   :  { %38 = vadd.xlane.f32.xlu0 %v37_v27 }
  0x95   :  { %v44_v28 = vpop.xlane.xlu1 %43 }
  0x96   :  { %v53_v29 = vmul.f32 0.001953125, %v44_v28  ;;  %v34_v30 = vpop.xlane.xlu0 %33 }
  0x97   :  { %v51_v31 = vmul.f32 0.001953125, %v34_v30  ;;  %v135_v30 = vld [vmem:[%s611_s1] sm:$0xf] }
  0x98   :  { %v388_v32 = vsub.f32 %v22_v0, %v53_v29  ;;  %v390_v33 = vsub.f32 %v23_v1, %v53_v29  ;;  %v392_v34 = vsub.f32 %v24_v2, %v53_v29  ;;  %v400_v39 = vsub.f32 %v25_v6, %v53_v29 }
  0x99   :  { %v394_v35 = vsub.f32 %v14_v4, %v51_v31  ;;  %v396_v36 = vsub.f32 %v15_v5, %v51_v31  ;;  %v49_v37 = vpop.xlane.xlu1 %48  ;;  %v398_v38 = vsub.f32 %v16_v7, %v51_v31  ;;  %v402_v42 = vsub.f32 %v17_v11, %v51_v31 }
  0x9a   :  { %v54_v40 = vmul.f32 0.001953125, %v49_v37  ;;  %v39_v41 = vpop.xlane.xlu0 %38  ;;  %v79_v43 = vmul.f32 %v388_v32, %v388_v32  ;;  %v80_v44 = vmul.f32 %v390_v33, %v390_v33  ;;  %v81_v51 = vmul.f32 %v392_v34, %v392_v34 }
  0x9b   :  { %v52_v45 = vmul.f32 0.001953125, %v39_v41  ;;  %v71_v46 = vmul.f32 %v394_v35, %v394_v35  ;;  %v72_v47 = vmul.f32 %v396_v36, %v396_v36  ;;  %v73_v50 = vmul.f32 %v398_v38, %v398_v38  ;;  %v173_v41 = vld [vmem:[%s612_s2] sm:$0xf] }
  0x9c   :  { %v412_v48 = vsub.f32 %v26_v9, %v54_v40  ;;  %v414_v49 = vsub.f32 %v27_v12, %v54_v40  ;;  %v97_v55 = vadd.f32 %v80_v44, %v79_v43  ;;  %v74_v56 = vmul.f32 %v402_v42, %v402_v42 }
  0x9d   :  { %v420_v52 = vsub.f32 %v18_v16, %v52_v45  ;;  %v422_v53 = vsub.f32 %v19_v17, %v52_v45  ;;  %v87_v54 = vadd.f32 %v72_v47, %v71_v46  ;;  %v82_v57 = vmul.f32 %v400_v39, %v400_v39 }
  0x9e   :  { %v428_v58 = vsub.f32 %v20_v18, %v52_v45  ;;  %v430_v59 = vsub.f32 %v28_v13, %v54_v40  ;;  %v432_v61 = vsub.f32 %v21_v24, %v52_v45  ;;  %v98_v0 = vadd.f32 %v97_v55, %v81_v51 }
  0x9f   :  { %v88_v60 = vadd.f32 %v87_v54, %v73_v50  ;;  %v75_v62 = vmul.f32 %v420_v52, %v420_v52  ;;  %v76_v63 = vmul.f32 %v422_v53, %v422_v53  ;;  %v438_v1 = vsub.f32 %v29_v20, %v54_v40 }
  0xa0   :  { %v83_v2 = vmul.f32 %v412_v48, %v412_v48  ;;  %v84_v3 = vmul.f32 %v414_v49, %v414_v49  ;;  %v77_v5 = vmul.f32 %v428_v58, %v428_v58  ;;  %v85_v7 = vmul.f32 %v430_v59, %v430_v59 }
  0xa1   :  { %v89_v4 = vadd.f32 %v88_v60, %v74_v56  ;;  %v92_v6 = vadd.f32 %v76_v63, %v75_v62  ;;  %v78_v9 = vmul.f32 %v432_v61, %v432_v61  ;;  %v99_v11 = vadd.f32 %v98_v0, %v82_v57 }
  0xa2   :  { %v102_v8 = vadd.f32 %v84_v3, %v83_v2  ;;  %v86_v13 = vmul.f32 %v438_v1, %v438_v1  ;;  %v137_v17 = vlaneseq }
  0xa3   :  { %90 = vadd.xlane.f32.xlu0 %v89_v4  ;;  %v93_v10 = vadd.f32 %v92_v6, %v77_v5 }
  0xa4   :  { %v103_v14 = vadd.f32 %v102_v8, %v85_v7  ;;  %v138_v22 = vshrl.u32 %v137_v17, 7 }
  0xa5   :  { %v94_v12 = vadd.f32 %v93_v10, %v78_v9 }
  0xa6   :  { %v104_v15 = vadd.f32 %v103_v14, %v86_v13  ;;  %v139_v28 = vsub.s32 0, %v138_v22  ;;  %v143_v31 = vsub.s32 1, %v138_v22  ;;  %v147_v37 = vsub.s32 2, %v138_v22 }
  0xa7   :  { %100 = vadd.xlane.f32.xlu0 %v99_v11  ;;  %95 = vadd.xlane.f32.xlu1 %v94_v12  ;;  %v151_v40 = vsub.s32 3, %v138_v22 }
  0xa8   :  { %v140_v44 = vrot.slane %v135_v30, %v139_v28  ;;  %v144_v45 = vrot.slane %v135_v30, %v143_v31  ;;  %v148_v46 = vrot.slane %v135_v30, %v147_v37  ;;  %v458_v50 = vrot.slane %v173_v41, %v139_v28 }
  0xa9   :  { %v152_v47 = vrot.slane %v135_v30, %v151_v40  ;;  %v460_v54 = vrot.slane %v173_v41, %v143_v31  ;;  %v462_v55 = vrot.slane %v173_v41, %v147_v37  ;;  %v464_v56 = vrot.slane %v173_v41, %v151_v40 }
  0xab   :  { %105 = vadd.xlane.f32.xlu1 %v104_v15 }
 0x130   :  { %v91_v16 = vpop.xlane.xlu0 %90 }
 0x131   :  { %v107_v18 = vmul.f32 0.001953125, %v91_v16 }
 0x133   :  { %v111_v19 = vadd.f32 1e-05, %v107_v18 }
 0x134   :  { %v96_v20 = vpop.xlane.xlu1 %95  ;;  %v101_v21 = vpop.xlane.xlu0 %100 }
 0x135   :  { %312 = vrsqrt.f32 %v111_v19  ;;  %v108_v23 = vmul.f32 0.001953125, %v96_v20  ;;  %v109_v24 = vmul.f32 0.001953125, %v101_v21 }
 0x137   :  { %v112_v25 = vadd.f32 1e-05, %v108_v23  ;;  %v113_v26 = vadd.f32 1e-05, %v109_v24 }
 0x138   :  { %v106_v27 = vpop.xlane.xlu1 %105 }
 0x139   :  { %314 = vrsqrt.f32 %v112_v25  ;;  %v110_v29 = vmul.f32 0.001953125, %v106_v27 }
 0x13a   :  { %316 = vrsqrt.f32 %v113_v26 }
 0x13b   :  { %v114_v43 = vadd.f32 1e-05, %v110_v29 }
 0x13d   :  { %318 = vrsqrt.f32 %v114_v43 }
 0x13f   :  { %v313_v51 = vpop.eup %312 }
 0x140   :  { %v119_v57 = vmul.f32 %v313_v51, %v394_v35  ;;  %v120_v60 = vmul.f32 %v313_v51, %v396_v36  ;;  %v121_v62 = vmul.f32 %v313_v51, %v398_v38  ;;  %v122_v63 = vmul.f32 %v313_v51, %v402_v42 }
 0x142   :  { %v157_v0 = vmul.f32 %v140_v44, %v119_v57  ;;  %v158_v2 = vmul.f32 %v144_v45, %v120_v60  ;;  %v159_v3 = vmul.f32 %v148_v46, %v121_v62  ;;  %v160_v4 = vmul.f32 %v152_v47, %v122_v63 }
 0x143   :  { %v315_v5 = vpop.eup %314 }
 0x144   :  { %v317_v6 = vpop.eup %316  ;;  %v471_v7 = vadd.f32 %v458_v50, %v157_v0  ;;  %v474_v8 = vadd.f32 %v460_v54, %v158_v2  ;;  %v477_v35 = vadd.f32 %v462_v55, %v159_v3  ;;  %v480_v36 = vadd.f32 %v464_v56, %v160_v4 }
 0x145   :  { %v123_v38 = vmul.f32 %v315_v5, %v420_v52  ;;  %v124_v42 = vmul.f32 %v315_v5, %v422_v53  ;;  %v125_v9 = vmul.f32 %v315_v5, %v428_v58  ;;  %v126_v10 = vmul.f32 %v315_v5, %v432_v61 }
 0x146   :  { %v127_v11 = vmul.f32 %v317_v6, %v388_v32  ;;  %v128_v12 = vmul.f32 %v317_v6, %v390_v33  ;;  %v129_v13 = vmul.f32 %v317_v6, %v392_v34  ;;  %v130_v14 = vmul.f32 %v317_v6, %v400_v39 }
 0x147   :  { %v161_v15 = vmul.f32 %v140_v44, %v123_v38  ;;  %v162_v16 = vmul.f32 %v144_v45, %v124_v42  ;;  %v163_v17 = vmul.f32 %v148_v46, %v125_v9  ;;  %v164_v18 = vmul.f32 %v152_v47, %v126_v10  ;;  %v319_v21 = vpop.eup %318 }
 0x148   :  { %v165_v19 = vmul.f32 %v140_v44, %v127_v11  ;;  %v166_v52 = vmul.f32 %v144_v45, %v128_v12  ;;  %v167_v20 = vmul.f32 %v148_v46, %v129_v13  ;;  %v168_v53 = vmul.f32 %v152_v47, %v130_v14 }
 0x149   :  { %v491_v58 = vadd.f32 %v458_v50, %v161_v15  ;;  %v494_v32 = vadd.f32 %v460_v54, %v162_v16  ;;  %v497_v33 = vadd.f32 %v462_v55, %v163_v17  ;;  %v500_v34 = vadd.f32 %v464_v56, %v164_v18 }
 0x14a   :  { %v503_v39 = vadd.f32 %v458_v50, %v165_v19  ;;  %v506_v61 = vadd.f32 %v460_v54, %v166_v52  ;;  %v509_v22 = vadd.f32 %v462_v55, %v167_v20  ;;  %v512_v23 = vadd.f32 %v464_v56, %v168_v53 }
 0x14b   :  { %v211_v24 = vadd.f32 %v491_v58, %v471_v7  ;;  %v218_v25 = vadd.f32 %v494_v32, %v474_v8  ;;  %v225_v26 = vadd.f32 %v497_v33, %v477_v35  ;;  %v232_v27 = vadd.f32 %v500_v34, %v480_v36 }
 0x14c   :  { %v131_v28 = vmul.f32 %v319_v21, %v412_v48  ;;  %v132_v29 = vmul.f32 %v319_v21, %v414_v49  ;;  %v133_v30 = vmul.f32 %v319_v21, %v430_v59  ;;  %v134_v31 = vmul.f32 %v319_v21, %v438_v1 }
 0x14d   :  { %v212_v37 = vrot.slane %v211_v24, 4  ;;  %v219_v40 = vrot.slane %v218_v25, 4  ;;  %v226_v41 = vrot.slane %v225_v26, 4  ;;  %v233_v43 = vrot.slane %v232_v27, 4 }
 0x14e   :  { %v169_v51 = vmul.f32 %v140_v44, %v131_v28  ;;  %v170_v57 = vmul.f32 %v144_v45, %v132_v29  ;;  %v171_v60 = vmul.f32 %v148_v46, %v133_v30  ;;  %v172_v62 = vmul.f32 %v152_v47, %v134_v31 }
 0x14f   :  { %v213_v63 = vadd.f32 %v212_v37, %v211_v24  ;;  %v220_v0 = vadd.f32 %v219_v40, %v218_v25  ;;  %v227_v2 = vadd.f32 %v226_v41, %v225_v26  ;;  %v234_v3 = vadd.f32 %v233_v43, %v232_v27 }
 0x150   :  { %v527_v48 = vadd.f32 %v458_v50, %v169_v51  ;;  %v530_v49 = vadd.f32 %v460_v54, %v170_v57  ;;  %v533_v59 = vadd.f32 %v462_v55, %v171_v60  ;;  %v536_v1 = vadd.f32 %v464_v56, %v172_v62 }
 0x151   :  { %v214_v44 = vrot.slane %v213_v63, 2  ;;  %v221_v45 = vrot.slane %v220_v0, 2  ;;  %v228_v46 = vrot.slane %v227_v2, 2  ;;  %v235_v47 = vrot.slane %v234_v3, 2 }
 0x152   :  { %v239_v4 = vadd.f32 %v527_v48, %v503_v39  ;;  %v246_v50 = vadd.f32 %v530_v49, %v506_v61  ;;  %v253_v54 = vadd.f32 %v533_v59, %v509_v22  ;;  %v260_v55 = vadd.f32 %v536_v1, %v512_v23 }
 0x153   :  { %v215_v5 = vadd.f32 %v214_v44, %v213_v63  ;;  %v222_v6 = vadd.f32 %v221_v45, %v220_v0  ;;  %v229_v56 = vadd.f32 %v228_v46, %v227_v2  ;;  %v236_v38 = vadd.f32 %v235_v47, %v234_v3 }
 0x154   :  { %v240_v42 = vrot.slane %v239_v4, 4  ;;  %v247_v9 = vrot.slane %v246_v50, 4  ;;  %v254_v10 = vrot.slane %v253_v54, 4  ;;  %v261_v11 = vrot.slane %v260_v55, 4 }
 0x155   :  { %v216_v12 = vrot.slane %v215_v5, 1  ;;  %v223_v13 = vrot.slane %v222_v6, 1  ;;  %v230_v14 = vrot.slane %v229_v56, 1  ;;  %v237_v15 = vrot.slane %v236_v38, 1 }
 0x156   :  { %v241_v16 = vadd.f32 %v240_v42, %v239_v4  ;;  %v248_v17 = vadd.f32 %v247_v9, %v246_v50  ;;  %v255_v18 = vadd.f32 %v254_v10, %v253_v54  ;;  %v262_v19 = vadd.f32 %v261_v11, %v260_v55 }
 0x157   :  { %v217_v52 = vadd.f32 %v216_v12, %v215_v5  ;;  %v224_v20 = vadd.f32 %v223_v13, %v222_v6  ;;  %v231_v53 = vadd.f32 %v230_v14, %v229_v56  ;;  %v238_v21 = vadd.f32 %v237_v15, %v236_v38 }
 0x158   :  { %v242_v24 = vrot.slane %v241_v16, 2  ;;  %v249_v25 = vrot.slane %v248_v17, 2  ;;  %v256_v26 = vrot.slane %v255_v18, 2  ;;  %v263_v27 = vrot.slane %v262_v19, 2 }
 0x159   :  { %v268_v28 = vmul.f32 0.0625, %v217_v52  ;;  %v269_v29 = vmul.f32 0.0625, %v224_v20  ;;  %v270_v30 = vmul.f32 0.0625, %v231_v53  ;;  %v271_v31 = vmul.f32 0.0625, %v238_v21 }
 0x15a   :  { %v243_v37 = vadd.f32 %v242_v24, %v241_v16  ;;  %v250_v40 = vadd.f32 %v249_v25, %v248_v17  ;;  %v257_v41 = vadd.f32 %v256_v26, %v255_v18  ;;  %v264_v43 = vadd.f32 %v263_v27, %v262_v19 }
 0x15b   :  { %v276_v51 = vsub.f32 %v471_v7, %v268_v28  ;;  %v277_v57 = vsub.f32 %v474_v8, %v269_v29  ;;  %v278_v60 = vsub.f32 %v477_v35, %v270_v30  ;;  %v279_v62 = vsub.f32 %v480_v36, %v271_v31 }
 0x15c   :  { %v280_v63 = vsub.f32 %v491_v58, %v268_v28  ;;  %v281_v0 = vsub.f32 %v494_v32, %v269_v29  ;;  %v282_v2 = vsub.f32 %v497_v33, %v270_v30  ;;  %v283_v3 = vsub.f32 %v500_v34, %v271_v31 }
 0x15d   :  { %292 = vst [vmem:[%s613_s3] sm:$0xff] %v276_v51  ;;  %293 = vst [vmem:[%s613_s3 + $0x8] sm:$0xff] %v277_v57  ;;  %v244_v7 = vrot.slane %v243_v37, 1  ;;  %v251_v8 = vrot.slane %v250_v40, 1  ;;  %v258_v35 = vrot.slane %v257_v41, 1  ;;  %v265_v36 = vrot.slane %v264_v43, 1 }
 0x15e   :  { %294 = vst [vmem:[%s613_s3 + $0x10] sm:$0xff] %v278_v60  ;;  %295 = vst [vmem:[%s613_s3 + $0x18] sm:$0xff] %v279_v62 }
 0x15f   :  { %296 = vst [vmem:[%s613_s3 + $0x20] sm:$0xff] %v280_v63  ;;  %297 = vst [vmem:[%s613_s3 + $0x28] sm:$0xff] %v281_v0  ;;  %v245_v58 = vadd.f32 %v244_v7, %v243_v37  ;;  %v252_v32 = vadd.f32 %v251_v8, %v250_v40  ;;  %v259_v33 = vadd.f32 %v258_v35, %v257_v41 }
 0x160   :  { %298 = vst [vmem:[%s613_s3 + $0x30] sm:$0xff] %v282_v2  ;;  %299 = vst [vmem:[%s613_s3 + $0x38] sm:$0xff] %v283_v3  ;;  %v266_v34 = vadd.f32 %v265_v36, %v264_v43 }
 0x161   :  { %v272_v44 = vmul.f32 0.0625, %v245_v58  ;;  %v273_v45 = vmul.f32 0.0625, %v252_v32  ;;  %v274_v46 = vmul.f32 0.0625, %v259_v33 }
 0x162   :  { %v275_v47 = vmul.f32 0.0625, %v266_v34 }
 0x163   :  { %v284_v4 = vsub.f32 %v503_v39, %v272_v44  ;;  %v285_v50 = vsub.f32 %v506_v61, %v273_v45  ;;  %v286_v54 = vsub.f32 %v509_v22, %v274_v46  ;;  %v288_v5 = vsub.f32 %v527_v48, %v272_v44 }
 0x164   :  { %v287_v55 = vsub.f32 %v512_v23, %v275_v47  ;;  %v289_v6 = vsub.f32 %v530_v49, %v273_v45  ;;  %v290_v56 = vsub.f32 %v533_v59, %v274_v46  ;;  %v291_v38 = vsub.f32 %v536_v1, %v275_v47 }
 0x165   :  { %300 = vst [vmem:[%s613_s3 + $0x40] sm:$0xff] %v284_v4  ;;  %301 = vst [vmem:[%s613_s3 + $0x48] sm:$0xff] %v285_v50 }
 0x166   :  { %302 = vst [vmem:[%s613_s3 + $0x50] sm:$0xff] %v286_v54  ;;  %303 = vst [vmem:[%s613_s3 + $0x58] sm:$0xff] %v287_v55 }
 0x167   :  { %304 = vst [vmem:[%s613_s3 + $0x60] sm:$0xff] %v288_v5  ;;  %305 = vst [vmem:[%s613_s3 + $0x68] sm:$0xff] %v289_v6 }
 0x168   :  { %306 = vst [vmem:[%s613_s3 + $0x70] sm:$0xff] %v290_v56  ;;  %307 = vst [vmem:[%s613_s3 + $0x78] sm:$0xff] %v291_v38 }

// kernel: forward.30
= control target key start
LH: loop header
LB: loop body
LE: loop exit
PB: predicated region body
PF: predicated region fallthrough
CT: control target
= control target key end

     0   :  { %v506_v3 = vmov 0.0   ;;  %vm42_vm0 = vcmask 130048   ;;  %s810_s1 = inlined_call_operand.vmem [shape: f32[2,16,512], index: 1, kind: input, shape index: {}]   ;;  %s811_s2 = inlined_call_operand.vmem [shape: f32[2,16,512], index: 2, kind: input, shape index: {}]   ;;  %s812_s0 = inlined_call_operand.vmem [shape: f32[16,16], index: 0, kind: input, shape index: {}]   ;;  %s813_s4 = inlined_call_operand.vmem [shape: f32[2,16,512], index: 4, kind: output, shape index: {1}]   ;;  %s814_s3 = inlined_call_operand.vmem [shape: f32[2,16,512], index: 3, kind: output, shape index: {0}]  }
   0x1   :  { %v17_v0 = vld [vmem:[%s810_s1 + $0x8] sm:$0xff]  ;;  %113 = vmatprep.mubr.f32.mxu0 %v506_v3  ;;  %190 = vmatprep.mubr.f32.mxu1 %v506_v3  ;;  %v19_v6 = vld [vmem:[%s810_s1 + $0x18] sm:$0xff]  ;;  %v16_v11 = vld [vmem:[%s810_s1] sm:$0xff] }
   0x2   :  { %v21_v1 = vld [vmem:[%s810_s1 + $0x28] sm:$0xff]  ;;  %v23_v7 = vld [vmem:[%s810_s1 + $0x38] sm:$0xff]  ;;  %v20_v14 = vld [vmem:[%s810_s1 + $0x20] sm:$0xff] }
   0x3   :  { %v25_v2 = vld [vmem:[%s811_s2 + $0x8] sm:$0xff]  ;;  %v27_v9 = vld [vmem:[%s811_s2 + $0x18] sm:$0xff]  ;;  %v24_v15 = vld [vmem:[%s811_s2] sm:$0xff] }
   0x4   :  { %v29_v4 = vld [vmem:[%s811_s2 + $0x28] sm:$0xff]  ;;  %v546_v5 = vadd.f32 %v25_v2, %v17_v0  ;;  %v31_v10 = vld [vmem:[%s811_s2 + $0x38] sm:$0xff]  ;;  %v565_v12 = vadd.f32 %v27_v9, %v19_v6  ;;  %v28_v16 = vld [vmem:[%s811_s2 + $0x20] sm:$0xff]  ;;  %v580_v18 = vadd.f32 %v24_v15, %v16_v11 }
   0x5   :  { %v554_v8 = vadd.f32 %v29_v4, %v21_v1  ;;  %v567_v13 = vadd.f32 %v31_v10, %v23_v7  ;;  %v582_v19 = vadd.f32 %v28_v16, %v20_v14  ;;  %v18_v20 = vld [vmem:[%s810_s1 + $0x10] sm:$0xff]  ;;  %v454_v26 = vld [vmem:[%s810_s1 + $0x48] sm:$0xff]  ;;  %v40_v29 = vld [vmem:[%s812_s0] sm:$0xff] }
   0x6   :  { %v22_v21 = vld [vmem:[%s810_s1 + $0x30] sm:$0xff]  ;;  %v458_v30 = vld [vmem:[%s810_s1 + $0x68] sm:$0xff]  ;;  %v456_v35 = vld [vmem:[%s810_s1 + $0x58] sm:$0xff] }
   0x7   :  { %v489_v17 = vpack.c.bf16 %v554_v8, %v546_v5  ;;  %v26_v22 = vld [vmem:[%s811_s2 + $0x10] sm:$0xff]  ;;  %v493_v23 = vpack.c.bf16 %v567_v13, %v565_v12  ;;  %v491_v27 = vpack.c.bf16 %v582_v19, %v580_v18  ;;  %v462_v31 = vld [vmem:[%s811_s2 + $0x48] sm:$0xff]  ;;  %v460_v36 = vld [vmem:[%s810_s1 + $0x78] sm:$0xff] }
   0x8   :  { %v30_v24 = vld [vmem:[%s811_s2 + $0x30] sm:$0xff]  ;;  %v598_v25 = vadd.f32 %v26_v22, %v18_v20  ;;  %v466_v32 = vld [vmem:[%s811_s2 + $0x68] sm:$0xff]  ;;  %v619_v33 = vadd.f32 %v462_v31, %v454_v26  ;;  %v464_v37 = vld [vmem:[%s811_s2 + $0x58] sm:$0xff] }
   0x9   :  { %490 = vmatprep.subr.bf16.mxu0 %v489_v17  ;;  %v605_v28 = vadd.f32 %v30_v24, %v22_v21  ;;  %494 = vmatprep.subr.bf16.mxu1 %v493_v23  ;;  %v621_v34 = vadd.f32 %v466_v32, %v458_v30  ;;  %v468_v39 = vld [vmem:[%s811_s2 + $0x78] sm:$0xff]  ;;  %v637_v40 = vadd.f32 %v464_v37, %v456_v35  ;;  %v453_v41 = vld [vmem:[%s810_s1 + $0x40] sm:$0xff]  ;;  %v455_v47 = vld [vmem:[%s810_s1 + $0x50] sm:$0xff] }
   0xa   :  { %492 = vmatpush1.bf16.msra.mxu0 %v491_v27  ;;  %v457_v42 = vld [vmem:[%s810_s1 + $0x60] sm:$0xff]  ;;  %v647_v44 = vadd.f32 %v468_v39, %v460_v36  ;;  %v459_v50 = vld [vmem:[%s810_s1 + $0x70] sm:$0xff]  ;;  %v41_v57 = vld [vmem:[%s812_s0 + $0x8] sm:$0xff] }
   0xb   :  { %v495_v38 = vpack.c.bf16 %v605_v28, %v598_v25  ;;  %v497_v43 = vpack.c.bf16 %v621_v34, %v619_v33  ;;  %v461_v45 = vld [vmem:[%s811_s2 + $0x40] sm:$0xff]  ;;  %v463_v51 = vld [vmem:[%s811_s2 + $0x50] sm:$0xff] }
   0xc   :  { %v465_v46 = vld [vmem:[%s811_s2 + $0x60] sm:$0xff]  ;;  %v658_v48 = vadd.f32 %v461_v45, %v453_v41  ;;  %v467_v52 = vld [vmem:[%s811_s2 + $0x70] sm:$0xff]  ;;  %v501_v53 = vpack.c.bf16 %v647_v44, %v637_v40  ;;  %v674_v54 = vadd.f32 %v463_v51, %v455_v47 }
   0xd   :  { %496 = vmatpush1.bf16.msra.mxu1 %v495_v38  ;;  %v660_v49 = vadd.f32 %v465_v46, %v457_v42  ;;  %449 = vmatmul.mubr.msk.f32.vlgmr.msra.gmra.mrb[0].mxu0 %vm42_vm0, %v40_v29  ;;  %v676_v55 = vadd.f32 %v467_v52, %v459_v50 }
   0xe   :  { %498 = vmatprep.subr.bf16.mxu0 %v497_v43  ;;  %119 = vmatprep.mubr.f32.mxu0 %v506_v3 }
   0xf   :  { %v499_v56 = vpack.c.bf16 %v660_v49, %v658_v48  ;;  %502 = vmatprep.subr.bf16.mxu1 %v501_v53  ;;  %v503_v58 = vpack.c.bf16 %v676_v55, %v674_v54 }
  0x10   :  { %451 = vmatmul.mubr.msk.f32.vlgmr.msra.gmra.mrb[0].mxu1 %vm42_vm0, %v40_v29 }
  0x11   :  { %500 = vmatpush1.bf16.msra.mxu0 %v499_v56  ;;  %196 = vmatprep.mubr.f32.mxu1 %v506_v3 }
  0x12   :  { %504 = vmatpush1.bf16.msra.mxu1 %v503_v58  ;;  %450 = vmatmul.mubr.msk.f32.gmra.mrb[2].mxu0 %vm42_vm0, %v41_v57 }
  0x13   :  { %325 = vmatprep.mubr.f32.mxu0 %v506_v3 }
  0x14   :  { %452 = vmatmul.mubr.msk.f32.gmra.mrb[2].mxu1 %vm42_vm0, %v41_v57 }
  0x15   :  { %402 = vmatprep.mubr.f32.mxu1 %v506_v3 }
  0x16   :  { %469 = vmatmul.mubr.msk.f32.vlgmr.msra.gmra.mrb[4].mxu0 %vm42_vm0, %v40_v29 }
  0x17   :  { %331 = vmatprep.mubr.f32.mxu0 %v506_v3 }
  0x18   :  { %471 = vmatmul.mubr.msk.f32.vlgmr.msra.gmra.mrb[4].mxu1 %vm42_vm0, %v40_v29 }
  0x19   :  { %408 = vmatprep.mubr.f32.mxu1 %v506_v3 }
  0x1a   :  { %470 = vmatmul.mubr.msk.f32.gmra.mrb[6].mxu0 %vm42_vm0, %v41_v57 }
  0x1c   :  { %472 = vmatmul.mubr.msk.f32.gmra.mrb[6].mxu1 %vm42_vm0, %v41_v57 }
  0xe0   :  { %v115_v59 = vpop.f32.mrb[0].mxu0 }
  0xe1   :  { %203 = vst [vmem:[%s813_s4] sm:$0xff] %v115_v59  ;;  %v211_v60 = vsub.f32 %v580_v18, %v115_v59  ;;  %v117_v61 = vpop.f32.mrb[1].mxu0 }
  0xe2   :  { %204 = vst [vmem:[%s813_s4 + $0x8] sm:$0xff] %v117_v61  ;;  %v212_v63 = vsub.f32 %v546_v5, %v117_v61 }
  0xe3   :  { %v192_v62 = vpop.f32.mrb[0].mxu1  ;;  %219 = vst [vmem:[%s814_s3] sm:$0xff] %v211_v60 }
  0xe4   :  { %205 = vst [vmem:[%s813_s4 + $0x10] sm:$0xff] %v192_v62  ;;  %v213_v0 = vsub.f32 %v598_v25, %v192_v62  ;;  %v194_v1 = vpop.f32.mrb[1].mxu1  ;;  %220 = vst [vmem:[%s814_s3 + $0x8] sm:$0xff] %v212_v63 }
  0xe5   :  { %206 = vst [vmem:[%s813_s4 + $0x18] sm:$0xff] %v194_v1  ;;  %v214_v2 = vsub.f32 %v565_v12, %v194_v1  ;;  %v121_v3 = vpop.f32.mrb[2].mxu0 }
  0xe6   :  { %221 = vst [vmem:[%s814_s3 + $0x10] sm:$0xff] %v213_v0  ;;  %207 = vst [vmem:[%s813_s4 + $0x20] sm:$0xff] %v121_v3  ;;  %v215_v4 = vsub.f32 %v582_v19, %v121_v3  ;;  %v123_v5 = vpop.f32.mrb[3].mxu0 }
  0xe7   :  { %222 = vst [vmem:[%s814_s3 + $0x18] sm:$0xff] %v214_v2  ;;  %v198_v6 = vpop.f32.mrb[2].mxu1  ;;  %208 = vst [vmem:[%s813_s4 + $0x28] sm:$0xff] %v123_v5  ;;  %v216_v7 = vsub.f32 %v554_v8, %v123_v5 }
  0xe8   :  { %223 = vst [vmem:[%s814_s3 + $0x20] sm:$0xff] %v215_v4  ;;  %209 = vst [vmem:[%s813_s4 + $0x30] sm:$0xff] %v198_v6  ;;  %v217_v9 = vsub.f32 %v605_v28, %v198_v6  ;;  %v200_v10 = vpop.f32.mrb[3].mxu1 }
  0xe9   :  { %224 = vst [vmem:[%s814_s3 + $0x28] sm:$0xff] %v216_v7  ;;  %210 = vst [vmem:[%s813_s4 + $0x38] sm:$0xff] %v200_v10  ;;  %v218_v8 = vsub.f32 %v567_v13, %v200_v10  ;;  %v327_v11 = vpop.f32.mrb[4].mxu0 }
  0xea   :  { %225 = vst [vmem:[%s814_s3 + $0x30] sm:$0xff] %v217_v9  ;;  %473 = vst [vmem:[%s813_s4 + $0x40] sm:$0xff] %v327_v11  ;;  %v424_v12 = vsub.f32 %v658_v48, %v327_v11  ;;  %v329_v14 = vpop.f32.mrb[5].mxu0 }
  0xeb   :  { %226 = vst [vmem:[%s814_s3 + $0x38] sm:$0xff] %v218_v8  ;;  %v404_v15 = vpop.f32.mrb[4].mxu1  ;;  %474 = vst [vmem:[%s813_s4 + $0x48] sm:$0xff] %v329_v14  ;;  %v425_v13 = vsub.f32 %v619_v33, %v329_v14 }
  0xec   :  { %481 = vst [vmem:[%s814_s3 + $0x40] sm:$0xff] %v424_v12  ;;  %475 = vst [vmem:[%s813_s4 + $0x50] sm:$0xff] %v404_v15  ;;  %v426_v16 = vsub.f32 %v674_v54, %v404_v15  ;;  %v406_v17 = vpop.f32.mrb[5].mxu1 }
  0xed   :  { %482 = vst [vmem:[%s814_s3 + $0x48] sm:$0xff] %v425_v13  ;;  %476 = vst [vmem:[%s813_s4 + $0x58] sm:$0xff] %v406_v17  ;;  %v427_v18 = vsub.f32 %v637_v40, %v406_v17  ;;  %v333_v19 = vpop.f32.mrb[6].mxu0 }
  0xee   :  { %483 = vst [vmem:[%s814_s3 + $0x50] sm:$0xff] %v426_v16  ;;  %477 = vst [vmem:[%s813_s4 + $0x60] sm:$0xff] %v333_v19  ;;  %v428_v20 = vsub.f32 %v660_v49, %v333_v19  ;;  %v335_v21 = vpop.f32.mrb[7].mxu0 }
  0xef   :  { %484 = vst [vmem:[%s814_s3 + $0x58] sm:$0xff] %v427_v18  ;;  %v410_v22 = vpop.f32.mrb[6].mxu1  ;;  %478 = vst [vmem:[%s813_s4 + $0x68] sm:$0xff] %v335_v21  ;;  %v429_v23 = vsub.f32 %v621_v34, %v335_v21 }
  0xf0   :  { %485 = vst [vmem:[%s814_s3 + $0x60] sm:$0xff] %v428_v20  ;;  %479 = vst [vmem:[%s813_s4 + $0x70] sm:$0xff] %v410_v22  ;;  %v430_v24 = vsub.f32 %v676_v55, %v410_v22  ;;  %v412_v25 = vpop.f32.mrb[7].mxu1 }
  0xf1   :  { %486 = vst [vmem:[%s814_s3 + $0x68] sm:$0xff] %v429_v23  ;;  %480 = vst [vmem:[%s813_s4 + $0x78] sm:$0xff] %v412_v25  ;;  %v431_v26 = vsub.f32 %v647_v44, %v412_v25 }
  0xf2   :  { %487 = vst [vmem:[%s814_s3 + $0x70] sm:$0xff] %v430_v24 }
  0xf3   :  { %488 = vst [vmem:[%s814_s3 + $0x78] sm:$0xff] %v431_v26 }

// kernel: forward.49
= control target key start
LH: loop header
LB: loop body
LE: loop exit
PB: predicated region body
PF: predicated region fallthrough
CT: control target
= control target key end

     0   :  { %s1972_s1 = inlined_call_operand.vmem [shape: f32[1536,128], index: 1, kind: input, shape index: {}]   ;;  %s1973_s0 = inlined_call_operand.vmem [shape: f32[32,1536], index: 0, kind: input, shape index: {}]   ;;  %s1974_s2 = inlined_call_operand.vmem [shape: f32[32,128], index: 2, kind: output, shape index: {}]  }
   0x1   :  { %v75_v0 = vld [vmem:[%s1972_s1 + $0x80] sm:$0xff]  ;;  %v76_v1 = vld [vmem:[%s1972_s1 + $0x88] sm:$0xff]  ;;  %v77_v11 = vld [vmem:[%s1972_s1 + $0x90] sm:$0xff] }
   0x2   :  { %v107_v2 = vld [vmem:[%s1972_s1 + $0x180] sm:$0xff]  ;;  %v1033_v3 = vpack.c.bf16 %v76_v1, %v75_v0  ;;  %v108_v4 = vld [vmem:[%s1972_s1 + $0x188] sm:$0xff]  ;;  %v78_v13 = vld [vmem:[%s1972_s1 + $0x98] sm:$0xff] }
   0x3   :  { %v59_v5 = vld [vmem:[%s1972_s1] sm:$0xff]  ;;  %v60_v6 = vld [vmem:[%s1972_s1 + $0x8] sm:$0xff]  ;;  %v1065_v7 = vpack.c.bf16 %v108_v4, %v107_v2  ;;  %v109_v14 = vld [vmem:[%s1972_s1 + $0x190] sm:$0xff]  ;;  %v1037_v16 = vpack.c.bf16 %v78_v13, %v77_v11 }
   0x4   :  { %v1035_v8 = vpack.c.bf16 %v60_v6, %v59_v5  ;;  %v91_v9 = vld [vmem:[%s1972_s1 + $0x100] sm:$0xff]  ;;  %v92_v10 = vld [vmem:[%s1972_s1 + $0x108] sm:$0xff]  ;;  %1034 = vmatprep.subr.bf16.mxu0 %v1033_v3  ;;  %v110_v15 = vld [vmem:[%s1972_s1 + $0x198] sm:$0xff] }
   0x5   :  { %v1067_v12 = vpack.c.bf16 %v92_v10, %v91_v9  ;;  %1066 = vmatprep.subr.bf16.mxu1 %v1065_v7  ;;  %v1069_v17 = vpack.c.bf16 %v110_v15, %v109_v14  ;;  %v61_v18 = vld [vmem:[%s1972_s1 + $0x10] sm:$0xff]  ;;  %v62_v19 = vld [vmem:[%s1972_s1 + $0x18] sm:$0xff]  ;;  %v79_v23 = vld [vmem:[%s1972_s1 + $0xa0] sm:$0xff] }
   0x6   :  { %1036 = vmatpush3.bf16.msra.mxu0 %v1035_v8  ;;  %v93_v20 = vld [vmem:[%s1972_s1 + $0x110] sm:$0xff]  ;;  %v1039_v21 = vpack.c.bf16 %v62_v19, %v61_v18  ;;  %v94_v22 = vld [vmem:[%s1972_s1 + $0x118] sm:$0xff]  ;;  %v80_v24 = vld [vmem:[%s1972_s1 + $0xa8] sm:$0xff] }
   0x7   :  { %1068 = vmatpush3.bf16.msra.mxu1 %v1067_v12  ;;  %1038 = vmatprep.subr.bf16.mxu0 %v1037_v16  ;;  %v1071_v25 = vpack.c.bf16 %v94_v22, %v93_v20  ;;  %v1041_v26 = vpack.c.bf16 %v80_v24, %v79_v23  ;;  %v111_v27 = vld [vmem:[%s1972_s1 + $0x1a0] sm:$0xff]  ;;  %v112_v28 = vld [vmem:[%s1972_s1 + $0x1a8] sm:$0xff]  ;;  %v81_v35 = vld [vmem:[%s1972_s1 + $0xb0] sm:$0xff] }
   0x8   :  { %1070 = vmatprep.subr.bf16.mxu1 %v1069_v17  ;;  %v63_v29 = vld [vmem:[%s1972_s1 + $0x20] sm:$0xff]  ;;  %v1073_v30 = vpack.c.bf16 %v112_v28, %v111_v27  ;;  %v64_v31 = vld [vmem:[%s1972_s1 + $0x28] sm:$0xff]  ;;  %v82_v36 = vld [vmem:[%s1972_s1 + $0xb8] sm:$0xff] }
   0x9   :  { %v95_v32 = vld [vmem:[%s1972_s1 + $0x120] sm:$0xff]  ;;  %v96_v33 = vld [vmem:[%s1972_s1 + $0x128] sm:$0xff]  ;;  %v1043_v34 = vpack.c.bf16 %v64_v31, %v63_v29  ;;  %v113_v37 = vld [vmem:[%s1972_s1 + $0x1b0] sm:$0xff]  ;;  %v1045_v39 = vpack.c.bf16 %v82_v36, %v81_v35 }
   0xa   :  { %1040 = vmatpush3.bf16.msra.mxu0 %v1039_v21  ;;  %v1075_v38 = vpack.c.bf16 %v96_v33, %v95_v32  ;;  %v114_v40 = vld [vmem:[%s1972_s1 + $0x1b8] sm:$0xff]  ;;  %v65_v41 = vld [vmem:[%s1972_s1 + $0x30] sm:$0xff]  ;;  %v83_v46 = vld [vmem:[%s1972_s1 + $0xc0] sm:$0xff] }
   0xb   :  { %1072 = vmatpush3.bf16.msra.mxu1 %v1071_v25  ;;  %1042 = vmatprep.subr.bf16.mxu0 %v1041_v26  ;;  %v66_v42 = vld [vmem:[%s1972_s1 + $0x38] sm:$0xff]  ;;  %v1077_v43 = vpack.c.bf16 %v114_v40, %v113_v37  ;;  %v97_v44 = vld [vmem:[%s1972_s1 + $0x130] sm:$0xff]  ;;  %v84_v47 = vld [vmem:[%s1972_s1 + $0xc8] sm:$0xff] }
   0xc   :  { %1074 = vmatprep.subr.bf16.mxu1 %v1073_v30  ;;  %v98_v45 = vld [vmem:[%s1972_s1 + $0x138] sm:$0xff]  ;;  %v115_v48 = vld [vmem:[%s1972_s1 + $0x1c0] sm:$0xff]  ;;  %v116_v49 = vld [vmem:[%s1972_s1 + $0x1c8] sm:$0xff]  ;;  %v1047_v50 = vpack.c.bf16 %v66_v42, %v65_v41  ;;  %v1049_v52 = vpack.c.bf16 %v84_v47, %v83_v46 }
   0xd   :  { %v1079_v51 = vpack.c.bf16 %v98_v45, %v97_v44  ;;  %v67_v53 = vld [vmem:[%s1972_s1 + $0x40] sm:$0xff]  ;;  %v68_v54 = vld [vmem:[%s1972_s1 + $0x48] sm:$0xff]  ;;  %v1081_v56 = vpack.c.bf16 %v116_v49, %v115_v48  ;;  %v85_v58 = vld [vmem:[%s1972_s1 + $0xd0] sm:$0xff] }
   0xe   :  { %1044 = vmatpush3.bf16.msra.mxu0 %v1043_v34  ;;  %v99_v55 = vld [vmem:[%s1972_s1 + $0x140] sm:$0xff]  ;;  %v100_v57 = vld [vmem:[%s1972_s1 + $0x148] sm:$0xff]  ;;  %v86_v59 = vld [vmem:[%s1972_s1 + $0xd8] sm:$0xff]  ;;  %v1051_v62 = vpack.c.bf16 %v68_v54, %v67_v53 }
   0xf   :  { %1076 = vmatpush3.bf16.msra.mxu1 %v1075_v38  ;;  %1046 = vmatprep.subr.bf16.mxu0 %v1045_v39  ;;  %v117_v60 = vld [vmem:[%s1972_s1 + $0x1d0] sm:$0xff]  ;;  %v118_v61 = vld [vmem:[%s1972_s1 + $0x1d8] sm:$0xff]  ;;  %v1083_v63 = vpack.c.bf16 %v100_v57, %v99_v55  ;;  %v1053_v0 = vpack.c.bf16 %v86_v59, %v85_v58  ;;  %v87_v6 = vld [vmem:[%s1972_s1 + $0xe0] sm:$0xff] }
  0x10   :  { %1078 = vmatprep.subr.bf16.mxu1 %v1077_v43  ;;  %v69_v1 = vld [vmem:[%s1972_s1 + $0x50] sm:$0xff]  ;;  %v70_v2 = vld [vmem:[%s1972_s1 + $0x58] sm:$0xff]  ;;  %v1085_v4 = vpack.c.bf16 %v118_v61, %v117_v60  ;;  %v88_v7 = vld [vmem:[%s1972_s1 + $0xe8] sm:$0xff] }
  0x11   :  { %v101_v3 = vld [vmem:[%s1972_s1 + $0x150] sm:$0xff]  ;;  %v102_v5 = vld [vmem:[%s1972_s1 + $0x158] sm:$0xff]  ;;  %v119_v8 = vld [vmem:[%s1972_s1 + $0x1e0] sm:$0xff]  ;;  %v1055_v10 = vpack.c.bf16 %v70_v2, %v69_v1  ;;  %v1057_v14 = vpack.c.bf16 %v88_v7, %v87_v6 }
  0x12   :  { %1048 = vmatpush3.bf16.msra.mxu0 %v1047_v50  ;;  %v120_v9 = vld [vmem:[%s1972_s1 + $0x1e8] sm:$0xff]  ;;  %v71_v11 = vld [vmem:[%s1972_s1 + $0x60] sm:$0xff]  ;;  %v1087_v13 = vpack.c.bf16 %v102_v5, %v101_v3  ;;  %v14_v17 = vld [vmem:[%s1973_s0 + $0x18] sm:$0xff] }
  0x13   :  { %1080 = vmatpush3.bf16.msra.mxu1 %v1079_v51  ;;  %1050 = vmatprep.subr.bf16.mxu0 %v1049_v52  ;;  %v72_v12 = vld [vmem:[%s1972_s1 + $0x68] sm:$0xff]  ;;  %v103_v15 = vld [vmem:[%s1972_s1 + $0x160] sm:$0xff]  ;;  %v1089_v18 = vpack.c.bf16 %v120_v9, %v119_v8  ;;  %v89_v20 = vld [vmem:[%s1972_s1 + $0xf0] sm:$0xff] }
  0x14   :  { %1082 = vmatprep.subr.bf16.mxu1 %v1081_v56  ;;  %v12_v16 = vld [vmem:[%s1973_s0 + $0x8] sm:$0xff]  ;;  %v90_v21 = vld [vmem:[%s1972_s1 + $0xf8] sm:$0xff]  ;;  %v121_v22 = vld [vmem:[%s1972_s1 + $0x1f0] sm:$0xff]  ;;  %400 = vmatprep.mubr.f32.mxu1 %v14_v17  ;;  %v1059_v24 = vpack.c.bf16 %v72_v12, %v71_v11 }
  0x15   :  { %v104_v19 = vld [vmem:[%s1972_s1 + $0x168] sm:$0xff]  ;;  %315 = vmatprep.mubr.f32.mxu0 %v12_v16  ;;  %v122_v23 = vld [vmem:[%s1972_s1 + $0x1f8] sm:$0xff]  ;;  %v1061_v26 = vpack.c.bf16 %v90_v21, %v89_v20  ;;  %v73_v27 = vld [vmem:[%s1972_s1 + $0x70] sm:$0xff] }
  0x16   :  { %1052 = vmatpush3.bf16.msra.mxu0 %v1051_v62  ;;  %v1091_v25 = vpack.c.bf16 %v104_v19, %v103_v15  ;;  %v74_v28 = vld [vmem:[%s1972_s1 + $0x78] sm:$0xff]  ;;  %v105_v29 = vld [vmem:[%s1972_s1 + $0x170] sm:$0xff]  ;;  %v1093_v30 = vpack.c.bf16 %v122_v23, %v121_v22  ;;  %v139_v32 = vld [vmem:[%s1972_s1 + $0x280] sm:$0xff] }
  0x17   :  { %1084 = vmatpush3.bf16.msra.mxu1 %v1083_v63  ;;  %1054 = vmatprep.subr.bf16.mxu0 %v1053_v0  ;;  %v106_v31 = vld [vmem:[%s1972_s1 + $0x178] sm:$0xff]  ;;  %v140_v33 = vld [vmem:[%s1972_s1 + $0x288] sm:$0xff]  ;;  %v171_v34 = vld [vmem:[%s1972_s1 + $0x380] sm:$0xff]  ;;  %v1063_v36 = vpack.c.bf16 %v74_v28, %v73_v27 }
  0x18   :  { %1086 = vmatprep.subr.bf16.mxu1 %v1085_v4  ;;  %v172_v35 = vld [vmem:[%s1972_s1 + $0x388] sm:$0xff]  ;;  %v1095_v37 = vpack.c.bf16 %v106_v31, %v105_v29  ;;  %v1097_v38 = vpack.c.bf16 %v140_v33, %v139_v32  ;;  %v123_v39 = vld [vmem:[%s1972_s1 + $0x200] sm:$0xff]  ;;  %v141_v44 = vld [vmem:[%s1972_s1 + $0x290] sm:$0xff] }
  0x19   :  { %v124_v40 = vld [vmem:[%s1972_s1 + $0x208] sm:$0xff]  ;;  %v155_v41 = vld [vmem:[%s1972_s1 + $0x300] sm:$0xff]  ;;  %v1129_v42 = vpack.c.bf16 %v172_v35, %v171_v34  ;;  %v142_v45 = vld [vmem:[%s1972_s1 + $0x298] sm:$0xff] }
  0x1a   :  { %1056 = vmatpush3.bf16.msra.mxu0 %v1055_v10  ;;  %v156_v43 = vld [vmem:[%s1972_s1 + $0x308] sm:$0xff]  ;;  %v173_v46 = vld [vmem:[%s1972_s1 + $0x390] sm:$0xff]  ;;  %v174_v47 = vld [vmem:[%s1972_s1 + $0x398] sm:$0xff]  ;;  %v1099_v50 = vpack.c.bf16 %v124_v40, %v123_v39  ;;  %v1101_v52 = vpack.c.bf16 %v142_v45, %v141_v44 }
  0x1b   :  { %1088 = vmatpush3.bf16.msra.mxu1 %v1087_v13  ;;  %1058 = vmatprep.subr.bf16.mxu0 %v1057_v14  ;;  %v11_v48 = vld [vmem:[%s1973_s0] sm:$0xff]  ;;  %v13_v49 = vld [vmem:[%s1973_s0 + $0x10] sm:$0xff]  ;;  %v1131_v51 = vpack.c.bf16 %v156_v43, %v155_v41  ;;  %v126_v54 = vld [vmem:[%s1972_s1 + $0x218] sm:$0xff]  ;;  %v1133_v56 = vpack.c.bf16 %v174_v47, %v173_v46 }
  0x1c   :  { %1090 = vmatprep.subr.bf16.mxu1 %v1089_v18  ;;  %v125_v53 = vld [vmem:[%s1972_s1 + $0x210] sm:$0xff]  ;;  %v158_v57 = vld [vmem:[%s1972_s1 + $0x318] sm:$0xff]  ;;  %v143_v58 = vld [vmem:[%s1972_s1 + $0x2a0] sm:$0xff] }
  0x1d   :  { %v157_v55 = vld [vmem:[%s1972_s1 + $0x310] sm:$0xff]  ;;  %v144_v59 = vld [vmem:[%s1972_s1 + $0x2a8] sm:$0xff]  ;;  %v127_v60 = vld [vmem:[%s1972_s1 + $0x220] sm:$0xff]  ;;  %v1103_v63 = vpack.c.bf16 %v126_v54, %v125_v53 }
  0x1e   :  { %1060 = vmatpush3.bf16.msra.mxu0 %v1059_v24  ;;  %v175_v61 = vld [vmem:[%s1972_s1 + $0x3a0] sm:$0xff]  ;;  %v176_v62 = vld [vmem:[%s1972_s1 + $0x3a8] sm:$0xff]  ;;  %v26_v1 = vld [vmem:[%s1973_s0 + $0x78] sm:$0xff]  ;;  %v1135_v3 = vpack.c.bf16 %v158_v57, %v157_v55  ;;  %v1105_v4 = vpack.c.bf16 %v144_v59, %v143_v58 }
  0x1f   :  { %1092 = vmatpush3.bf16.msra.mxu1 %v1091_v25  ;;  %1062 = vmatprep.subr.bf16.mxu0 %v1061_v26  ;;  %v24_v0 = vld [vmem:[%s1973_s0 + $0x68] sm:$0xff]  ;;  %v23_v2 = vld [vmem:[%s1973_s0 + $0x60] sm:$0xff]  ;;  %v25_v7 = vld [vmem:[%s1973_s0 + $0x70] sm:$0xff]  ;;  %v1137_v8 = vpack.c.bf16 %v176_v62, %v175_v61 }
  0x20   :  { %1094 = vmatprep.subr.bf16.mxu1 %v1093_v30  ;;  %v128_v5 = vld [vmem:[%s1972_s1 + $0x228] sm:$0xff]  ;;  %v159_v6 = vld [vmem:[%s1972_s1 + $0x320] sm:$0xff]  ;;  %v145_v10 = vld [vmem:[%s1972_s1 + $0x2b0] sm:$0xff] }
  0x21   :  { %v160_v9 = vld [vmem:[%s1972_s1 + $0x328] sm:$0xff]  ;;  %v146_v11 = vld [vmem:[%s1972_s1 + $0x2b8] sm:$0xff]  ;;  %v129_v12 = vld [vmem:[%s1972_s1 + $0x230] sm:$0xff]  ;;  %v1107_v15 = vpack.c.bf16 %v128_v5, %v127_v60 }
  0x22   :  { %1064 = vmatpush3.bf16.msra.mxu0 %v1063_v36  ;;  %v177_v13 = vld [vmem:[%s1972_s1 + $0x3b0] sm:$0xff]  ;;  %v178_v14 = vld [vmem:[%s1972_s1 + $0x3b8] sm:$0xff]  ;;  %v36_v16 = vld [vmem:[%s1973_s0 + $0xc8] sm:$0xff]  ;;  %v1139_v19 = vpack.c.bf16 %v160_v9, %v159_v6  ;;  %v1109_v20 = vpack.c.bf16 %v146_v11, %v145_v10 }
  0x23   :  { %1096 = vmatpush3.bf16.msra.mxu1 %v1095_v37  ;;  %1098 = vmatprep.subr.bf16.mxu0 %v1097_v38  ;;  %v38_v17 = vld [vmem:[%s1973_s0 + $0xd8] sm:$0xff]  ;;  %v35_v18 = vld [vmem:[%s1973_s0 + $0xc0] sm:$0xff]  ;;  %v161_v22 = vld [vmem:[%s1972_s1 + $0x330] sm:$0xff]  ;;  %v1141_v24 = vpack.c.bf16 %v178_v14, %v177_v13 }
  0x24   :  { %1130 = vmatprep.subr.bf16.mxu1 %v1129_v42  ;;  %v130_v21 = vld [vmem:[%s1972_s1 + $0x238] sm:$0xff]  ;;  %v37_v23 = vld [vmem:[%s1973_s0 + $0xd0] sm:$0xff]  ;;  %v147_v26 = vld [vmem:[%s1972_s1 + $0x2c0] sm:$0xff] }
  0x25   :  { %316 = vmatmul.mubr.f32.vlgmr.msra.gmra.mrb[0].mxu0 %v11_v48  ;;  %v162_v25 = vld [vmem:[%s1972_s1 + $0x338] sm:$0xff]  ;;  %v148_v27 = vld [vmem:[%s1972_s1 + $0x2c8] sm:$0xff]  ;;  %v131_v28 = vld [vmem:[%s1972_s1 + $0x240] sm:$0xff]  ;;  %v1111_v31 = vpack.c.bf16 %v130_v21, %v129_v12 }
  0x26   :  { %401 = vmatmul.mubr.f32.vlgmr.msra.gmra.mrb[0].mxu1 %v13_v49  ;;  %1100 = vmatpush3.bf16.msra.mxu0 %v1099_v50  ;;  %v179_v29 = vld [vmem:[%s1972_s1 + $0x3c0] sm:$0xff]  ;;  %v180_v30 = vld [vmem:[%s1972_s1 + $0x3c8] sm:$0xff]  ;;  %v50_v33 = vld [vmem:[%s1973_s0 + $0x138] sm:$0xff]  ;;  %v1143_v35 = vpack.c.bf16 %v162_v25, %v161_v22  ;;  %v1113_v36 = vpack.c.bf16 %v148_v27, %v147_v26 }
  0x27   :  { %1132 = vmatpush3.bf16.msra.mxu1 %v1131_v51  ;;  %1102 = vmatprep.subr.bf16.mxu0 %v1101_v52  ;;  %v48_v32 = vld [vmem:[%s1973_s0 + $0x128] sm:$0xff]  ;;  %v47_v34 = vld [vmem:[%s1973_s0 + $0x120] sm:$0xff]  ;;  %v49_v39 = vld [vmem:[%s1973_s0 + $0x130] sm:$0xff]  ;;  %v1145_v40 = vpack.c.bf16 %v180_v30, %v179_v29 }
  0x28   :  { %1134 = vmatprep.subr.bf16.mxu1 %v1133_v56  ;;  %320 = vmatprep.mubr.f32.mxu0 %v24_v0  ;;  %v132_v37 = vld [vmem:[%s1972_s1 + $0x248] sm:$0xff]  ;;  %v163_v38 = vld [vmem:[%s1972_s1 + $0x340] sm:$0xff]  ;;  %v149_v42 = vld [vmem:[%s1972_s1 + $0x2d0] sm:$0xff] }
  0x29   :  { %405 = vmatprep.mubr.f32.mxu1 %v26_v1  ;;  %321 = vmatmul.mubr.f32.gmra.mrb[2].mxu0 %v23_v2  ;;  %v164_v41 = vld [vmem:[%s1972_s1 + $0x348] sm:$0xff]  ;;  %v150_v43 = vld [vmem:[%s1972_s1 + $0x2d8] sm:$0xff]  ;;  %v181_v44 = vld [vmem:[%s1972_s1 + $0x3d0] sm:$0xff]  ;;  %v1115_v46 = vpack.c.bf16 %v132_v37, %v131_v28 }
  0x2a   :  { %1104 = vmatpush3.bf16.msra.mxu0 %v1103_v63  ;;  %406 = vmatmul.mubr.f32.gmra.mrb[2].mxu1 %v25_v7  ;;  %v182_v45 = vld [vmem:[%s1972_s1 + $0x3d8] sm:$0xff]  ;;  %v133_v47 = vld [vmem:[%s1972_s1 + $0x250] sm:$0xff]  ;;  %v16_v48 = vld [vmem:[%s1973_s0 + $0x28] sm:$0xff]  ;;  %v1147_v49 = vpack.c.bf16 %v164_v41, %v163_v38  ;;  %v1117_v50 = vpack.c.bf16 %v150_v43, %v149_v42 }
  0x2b   :  { %1136 = vmatpush3.bf16.msra.mxu1 %v1135_v3  ;;  %1106 = vmatprep.subr.bf16.mxu0 %v1105_v4  ;;  %v134_v51 = vld [vmem:[%s1972_s1 + $0x258] sm:$0xff]  ;;  %v165_v52 = vld [vmem:[%s1972_s1 + $0x350] sm:$0xff]  ;;  %v1149_v54 = vpack.c.bf16 %v182_v45, %v181_v44  ;;  %v151_v56 = vld [vmem:[%s1972_s1 + $0x2e0] sm:$0xff] }
  0x2c   :  { %1138 = vmatprep.subr.bf16.mxu1 %v1137_v8  ;;  %325 = vmatprep.mubr.f32.mxu0 %v36_v16  ;;  %v18_v53 = vld [vmem:[%s1973_s0 + $0x38] sm:$0xff]  ;;  %v152_v57 = vld [vmem:[%s1972_s1 + $0x2e8] sm:$0xff]  ;;  %v183_v58 = vld [vmem:[%s1972_s1 + $0x3e0] sm:$0xff]  ;;  %v1119_v60 = vpack.c.bf16 %v134_v51, %v133_v47 }
  0x2d   :  { %410 = vmatprep.mubr.f32.mxu1 %v38_v17  ;;  %326 = vmatmul.mubr.f32.gmra.mrb[4].mxu0 %v35_v18  ;;  %v166_v55 = vld [vmem:[%s1972_s1 + $0x358] sm:$0xff]  ;;  %v184_v59 = vld [vmem:[%s1972_s1 + $0x3e8] sm:$0xff]  ;;  %v1121_v62 = vpack.c.bf16 %v152_v57, %v151_v56  ;;  %v135_v63 = vld [vmem:[%s1972_s1 + $0x260] sm:$0xff] }
  0x2e   :  { %1108 = vmatpush3.bf16.msra.mxu0 %v1107_v15  ;;  %411 = vmatmul.mubr.f32.gmra.mrb[4].mxu1 %v37_v23  ;;  %v1151_v61 = vpack.c.bf16 %v166_v55, %v165_v52  ;;  %v136_v0 = vld [vmem:[%s1972_s1 + $0x268] sm:$0xff]  ;;  %v167_v1 = vld [vmem:[%s1972_s1 + $0x360] sm:$0xff]  ;;  %v1153_v2 = vpack.c.bf16 %v184_v59, %v183_v58  ;;  %v153_v4 = vld [vmem:[%s1972_s1 + $0x2f0] sm:$0xff] }
  0x2f   :  { %1140 = vmatpush3.bf16.msra.mxu1 %v1139_v19  ;;  %1110 = vmatprep.subr.bf16.mxu0 %v1109_v20  ;;  %v168_v3 = vld [vmem:[%s1972_s1 + $0x368] sm:$0xff]  ;;  %v154_v5 = vld [vmem:[%s1972_s1 + $0x2f8] sm:$0xff]  ;;  %v185_v6 = vld [vmem:[%s1972_s1 + $0x3f0] sm:$0xff]  ;;  %v1123_v8 = vpack.c.bf16 %v136_v0, %v135_v63 }
  0x30   :  { %1142 = vmatprep.subr.bf16.mxu1 %v1141_v24  ;;  %330 = vmatprep.mubr.f32.mxu0 %v48_v32  ;;  %v186_v7 = vld [vmem:[%s1972_s1 + $0x3f8] sm:$0xff]  ;;  %v1155_v9 = vpack.c.bf16 %v168_v3, %v167_v1  ;;  %v1125_v10 = vpack.c.bf16 %v154_v5, %v153_v4  ;;  %v137_v11 = vld [vmem:[%s1972_s1 + $0x270] sm:$0xff]  ;;  %v203_v16 = vld [vmem:[%s1972_s1 + $0x480] sm:$0xff] }
  0x31   :  { %415 = vmatprep.mubr.f32.mxu1 %v50_v33  ;;  %331 = vmatmul.mubr.f32.gmra.mrb[6].mxu0 %v47_v34  ;;  %v138_v12 = vld [vmem:[%s1972_s1 + $0x278] sm:$0xff]  ;;  %v169_v13 = vld [vmem:[%s1972_s1 + $0x370] sm:$0xff]  ;;  %v1157_v14 = vpack.c.bf16 %v186_v7, %v185_v6  ;;  %v204_v17 = vld [vmem:[%s1972_s1 + $0x488] sm:$0xff] }
  0x32   :  { %1112 = vmatpush3.bf16.msra.mxu0 %v1111_v31  ;;  %416 = vmatmul.mubr.f32.gmra.mrb[6].mxu1 %v49_v39  ;;  %v170_v15 = vld [vmem:[%s1972_s1 + $0x378] sm:$0xff]  ;;  %v235_v18 = vld [vmem:[%s1972_s1 + $0x580] sm:$0xff]  ;;  %v236_v19 = vld [vmem:[%s1972_s1 + $0x588] sm:$0xff]  ;;  %v1127_v20 = vpack.c.bf16 %v138_v12, %v137_v11  ;;  %v1161_v22 = vpack.c.bf16 %v204_v17, %v203_v16 }
  0x33   :  { %1144 = vmatpush3.bf16.msra.mxu1 %v1143_v35  ;;  %1114 = vmatprep.subr.bf16.mxu0 %v1113_v36  ;;  %v1159_v21 = vpack.c.bf16 %v170_v15, %v169_v13  ;;  %v187_v23 = vld [vmem:[%s1972_s1 + $0x400] sm:$0xff]  ;;  %v188_v24 = vld [vmem:[%s1972_s1 + $0x408] sm:$0xff]  ;;  %v1193_v25 = vpack.c.bf16 %v236_v19, %v235_v18  ;;  %v205_v29 = vld [vmem:[%s1972_s1 + $0x490] sm:$0xff] }
  0x34   :  { %1146 = vmatprep.subr.bf16.mxu1 %v1145_v40  ;;  %485 = vmatprep.mubr.f32.mxu0 %v16_v48  ;;  %v219_v26 = vld [vmem:[%s1972_s1 + $0x500] sm:$0xff]  ;;  %v220_v27 = vld [vmem:[%s1972_s1 + $0x508] sm:$0xff]  ;;  %v206_v30 = vld [vmem:[%s1972_s1 + $0x498] sm:$0xff]  ;;  %v1163_v31 = vpack.c.bf16 %v188_v24, %v187_v23 }
  0x35   :  { %570 = vmatprep.mubr.f32.mxu1 %v18_v53  ;;  %v15_v28 = vld [vmem:[%s1973_s0 + $0x20] sm:$0xff]  ;;  %v17_v32 = vld [vmem:[%s1973_s0 + $0x30] sm:$0xff]  ;;  %v238_v34 = vld [vmem:[%s1972_s1 + $0x598] sm:$0xff]  ;;  %v1195_v35 = vpack.c.bf16 %v220_v27, %v219_v26  ;;  %v1165_v40 = vpack.c.bf16 %v206_v30, %v205_v29 }
  0x36   :  { %1116 = vmatpush3.bf16.msra.mxu0 %v1115_v46  ;;  %v237_v33 = vld [vmem:[%s1972_s1 + $0x590] sm:$0xff]  ;;  %v28_v36 = vld [vmem:[%s1973_s0 + $0x88] sm:$0xff]  ;;  %v190_v38 = vld [vmem:[%s1972_s1 + $0x418] sm:$0xff] }
  0x37   :  { %1148 = vmatpush3.bf16.msra.mxu1 %v1147_v49  ;;  %1118 = vmatprep.subr.bf16.mxu0 %v1117_v50  ;;  %v189_v37 = vld [vmem:[%s1972_s1 + $0x410] sm:$0xff]  ;;  %v27_v39 = vld [vmem:[%s1973_s0 + $0x80] sm:$0xff]  ;;  %v222_v42 = vld [vmem:[%s1972_s1 + $0x518] sm:$0xff]  ;;  %v1197_v44 = vpack.c.bf16 %v238_v34, %v237_v33 }
  0x38   :  { %1150 = vmatprep.subr.bf16.mxu1 %v1149_v54  ;;  %v221_v41 = vld [vmem:[%s1972_s1 + $0x510] sm:$0xff]  ;;  %v30_v43 = vld [vmem:[%s1973_s0 + $0x98] sm:$0xff]  ;;  %v207_v45 = vld [vmem:[%s1972_s1 + $0x4a0] sm:$0xff]  ;;  %v1167_v47 = vpack.c.bf16 %v190_v38, %v189_v37 }
  0x39   :  { %v208_v46 = vld [vmem:[%s1972_s1 + $0x4a8] sm:$0xff]  ;;  %v29_v48 = vld [vmem:[%s1973_s0 + $0x90] sm:$0xff]  ;;  %v239_v49 = vld [vmem:[%s1972_s1 + $0x5a0] sm:$0xff]  ;;  %v1199_v51 = vpack.c.bf16 %v222_v42, %v221_v41 }
  0x3a   :  { %1120 = vmatpush3.bf16.msra.mxu0 %v1119_v60  ;;  %v240_v50 = vld [vmem:[%s1972_s1 + $0x5a8] sm:$0xff]  ;;  %v191_v53 = vld [vmem:[%s1972_s1 + $0x420] sm:$0xff]  ;;  %v1169_v56 = vpack.c.bf16 %v208_v46, %v207_v45  ;;  %v42_v57 = vld [vmem:[%s1973_s0 + $0xf8] sm:$0xff] }
  0x3b   :  { %1152 = vmatpush3.bf16.msra.mxu1 %v1151_v61  ;;  %1122 = vmatprep.subr.bf16.mxu0 %v1121_v62  ;;  %v40_v52 = vld [vmem:[%s1973_s0 + $0xe8] sm:$0xff]  ;;  %v39_v55 = vld [vmem:[%s1973_s0 + $0xe0] sm:$0xff]  ;;  %v1201_v60 = vpack.c.bf16 %v240_v50, %v239_v49  ;;  %v41_v61 = vld [vmem:[%s1973_s0 + $0xf0] sm:$0xff] }
  0x3c   :  { %1154 = vmatprep.subr.bf16.mxu1 %v1153_v2  ;;  %v192_v54 = vld [vmem:[%s1972_s1 + $0x428] sm:$0xff]  ;;  %v223_v58 = vld [vmem:[%s1972_s1 + $0x520] sm:$0xff]  ;;  %v209_v62 = vld [vmem:[%s1972_s1 + $0x4b0] sm:$0xff] }
  0x3d   :  { %v224_v59 = vld [vmem:[%s1972_s1 + $0x528] sm:$0xff]  ;;  %v210_v63 = vld [vmem:[%s1972_s1 + $0x4b8] sm:$0xff]  ;;  %v1171_v0 = vpack.c.bf16 %v192_v54, %v191_v53  ;;  %v241_v2 = vld [vmem:[%s1972_s1 + $0x5b0] sm:$0xff] }
  0x3e   :  { %1124 = vmatpush3.bf16.msra.mxu0 %v1123_v8  ;;  %v52_v1 = vld [vmem:[%s1973_s0 + $0x148] sm:$0xff]  ;;  %v242_v3 = vld [vmem:[%s1972_s1 + $0x5b8] sm:$0xff]  ;;  %v1203_v4 = vpack.c.bf16 %v224_v59, %v223_v58  ;;  %v193_v5 = vld [vmem:[%s1972_s1 + $0x430] sm:$0xff]  ;;  %v1173_v8 = vpack.c.bf16 %v210_v63, %v209_v62 }
  0x3f   :  { %1156 = vmatpush3.bf16.msra.mxu1 %v1155_v9  ;;  %1126 = vmatprep.subr.bf16.mxu0 %v1125_v10  ;;  %v194_v6 = vld [vmem:[%s1972_s1 + $0x438] sm:$0xff]  ;;  %v225_v7 = vld [vmem:[%s1972_s1 + $0x530] sm:$0xff]  ;;  %v211_v10 = vld [vmem:[%s1972_s1 + $0x4c0] sm:$0xff]  ;;  %v1205_v13 = vpack.c.bf16 %v242_v3, %v241_v2 }
  0x40   :  { %1158 = vmatprep.subr.bf16.mxu1 %v1157_v14  ;;  %v226_v9 = vld [vmem:[%s1972_s1 + $0x538] sm:$0xff]  ;;  %v212_v11 = vld [vmem:[%s1972_s1 + $0x4c8] sm:$0xff]  ;;  %v243_v14 = vld [vmem:[%s1972_s1 + $0x5c0] sm:$0xff]  ;;  %v1175_v17 = vpack.c.bf16 %v194_v6, %v193_v5 }
  0x41   :  { %v54_v12 = vld [vmem:[%s1973_s0 + $0x158] sm:$0xff]  ;;  %v244_v15 = vld [vmem:[%s1972_s1 + $0x5c8] sm:$0xff]  ;;  %v51_v16 = vld [vmem:[%s1973_s0 + $0x140] sm:$0xff]  ;;  %v1207_v19 = vpack.c.bf16 %v226_v9, %v225_v7 }
  0x42   :  { %1128 = vmatpush3.bf16.msra.mxu0 %v1127_v20  ;;  %v53_v18 = vld [vmem:[%s1973_s0 + $0x150] sm:$0xff]  ;;  %v1177_v20 = vpack.c.bf16 %v212_v11, %v211_v10  ;;  %v227_v23 = vld [vmem:[%s1972_s1 + $0x540] sm:$0xff]  ;;  %v1209_v24 = vpack.c.bf16 %v244_v15, %v243_v14  ;;  %v214_v27 = vld [vmem:[%s1972_s1 + $0x4d8] sm:$0xff] }
  0x43   :  { %1160 = vmatpush3.bf16.msra.mxu1 %v1159_v21  ;;  %1162 = vmatprep.subr.bf16.mxu0 %v1161_v22  ;;  %v195_v21 = vld [vmem:[%s1972_s1 + $0x440] sm:$0xff]  ;;  %v196_v22 = vld [vmem:[%s1972_s1 + $0x448] sm:$0xff]  ;;  %v213_v26 = vld [vmem:[%s1972_s1 + $0x4d0] sm:$0xff] }
  0x44   :  { %1194 = vmatprep.subr.bf16.mxu1 %v1193_v25  ;;  %v228_v25 = vld [vmem:[%s1972_s1 + $0x548] sm:$0xff]  ;;  %v246_v29 = vld [vmem:[%s1972_s1 + $0x5d8] sm:$0xff]  ;;  %v1181_v34 = vpack.c.bf16 %v214_v27, %v213_v26  ;;  %v229_v37 = vld [vmem:[%s1972_s1 + $0x550] sm:$0xff] }
  0x45   :  { %486 = vmatmul.mubr.f32.vlgmr.msra.gmra.mrb[8].mxu0 %v15_v28  ;;  %v245_v28 = vld [vmem:[%s1972_s1 + $0x5d0] sm:$0xff]  ;;  %v20_v30 = vld [vmem:[%s1973_s0 + $0x48] sm:$0xff]  ;;  %v1211_v33 = vpack.c.bf16 %v228_v25, %v227_v23  ;;  %v247_v42 = vld [vmem:[%s1972_s1 + $0x5e0] sm:$0xff] }
  0x46   :  { %1164 = vmatpush3.bf16.msra.mxu0 %v1163_v31  ;;  %571 = vmatmul.mubr.f32.vlgmr.msra.gmra.mrb[8].mxu1 %v17_v32  ;;  %v1179_v31 = vpack.c.bf16 %v196_v22, %v195_v21  ;;  %v22_v32 = vld [vmem:[%s1973_s0 + $0x58] sm:$0xff]  ;;  %v1213_v38 = vpack.c.bf16 %v246_v29, %v245_v28  ;;  %v216_v41 = vld [vmem:[%s1972_s1 + $0x4e8] sm:$0xff]  ;;  %v231_v49 = vld [vmem:[%s1972_s1 + $0x560] sm:$0xff] }
  0x47   :  { %1196 = vmatpush3.bf16.msra.mxu1 %v1195_v35  ;;  %490 = vmatprep.mubr.f32.mxu0 %v28_v36  ;;  %v197_v35 = vld [vmem:[%s1972_s1 + $0x450] sm:$0xff]  ;;  %v198_v36 = vld [vmem:[%s1972_s1 + $0x458] sm:$0xff]  ;;  %v19_v2 = vld [vmem:[%s1973_s0 + $0x40] sm:$0xff] }
  0x48   :  { %1166 = vmatprep.subr.bf16.mxu0 %v1165_v40  ;;  %575 = vmatprep.mubr.f32.mxu1 %v30_v43  ;;  %v215_v40 = vld [vmem:[%s1972_s1 + $0x4e0] sm:$0xff]  ;;  %v248_v43 = vld [vmem:[%s1972_s1 + $0x5e8] sm:$0xff]  ;;  %v218_v53 = vld [vmem:[%s1972_s1 + $0x4f8] sm:$0xff] }
  0x49   :  { %491 = vmatmul.mubr.f32.gmra.mrb[10].mxu0 %v27_v39  ;;  %1198 = vmatprep.subr.bf16.mxu1 %v1197_v44  ;;  %v230_v39 = vld [vmem:[%s1972_s1 + $0x558] sm:$0xff]  ;;  %v1183_v44 = vpack.c.bf16 %v198_v36, %v197_v35  ;;  %v1185_v46 = vpack.c.bf16 %v216_v41, %v215_v40  ;;  %v1217_v50 = vpack.c.bf16 %v248_v43, %v247_v42  ;;  %v249_v54 = vld [vmem:[%s1972_s1 + $0x5f0] sm:$0xff]  ;;  %v31_v6 = vld [vmem:[%s1973_s0 + $0xa0] sm:$0xff] }
  0x4a   :  { %1168 = vmatpush3.bf16.msra.mxu0 %v1167_v47  ;;  %576 = vmatmul.mubr.f32.gmra.mrb[10].mxu1 %v29_v48  ;;  %v1215_v45 = vpack.c.bf16 %v230_v39, %v229_v37  ;;  %v199_v47 = vld [vmem:[%s1972_s1 + $0x460] sm:$0xff]  ;;  %v200_v48 = vld [vmem:[%s1972_s1 + $0x468] sm:$0xff]  ;;  %v201_v59 = vld [vmem:[%s1972_s1 + $0x470] sm:$0xff] }
  0x4b   :  { %1200 = vmatpush3.bf16.msra.mxu1 %v1199_v51  ;;  %495 = vmatprep.mubr.f32.mxu0 %v40_v52  ;;  %v232_v51 = vld [vmem:[%s1972_s1 + $0x568] sm:$0xff]  ;;  %v217_v52 = vld [vmem:[%s1972_s1 + $0x4f0] sm:$0xff]  ;;  %v234_v63 = vld [vmem:[%s1972_s1 + $0x578] sm:$0xff] }
  0x4c   :  { %1170 = vmatprep.subr.bf16.mxu0 %v1169_v56  ;;  %580 = vmatprep.mubr.f32.mxu1 %v42_v57  ;;  %v1187_v56 = vpack.c.bf16 %v200_v48, %v199_v47  ;;  %v1219_v57 = vpack.c.bf16 %v232_v51, %v231_v49  ;;  %v1189_v58 = vpack.c.bf16 %v218_v53, %v217_v52  ;;  %v233_v62 = vld [vmem:[%s1972_s1 + $0x570] sm:$0xff]  ;;  %v34_v5 = vld [vmem:[%s1973_s0 + $0xb8] sm:$0xff]  ;;  %v43_v10 = vld [vmem:[%s1973_s0 + $0x100] sm:$0xff] }
  0x4d   :  { %496 = vmatmul.mubr.f32.gmra.mrb[12].mxu0 %v39_v55  ;;  %1202 = vmatprep.subr.bf16.mxu1 %v1201_v60  ;;  %v250_v55 = vld [vmem:[%s1972_s1 + $0x5f8] sm:$0xff]  ;;  %v21_v3 = vld [vmem:[%s1973_s0 + $0x50] sm:$0xff]  ;;  %v55_v14 = vld [vmem:[%s1973_s0 + $0x160] sm:$0xff] }
  0x4e   :  { %1172 = vmatpush3.bf16.msra.mxu0 %v1171_v0  ;;  %581 = vmatmul.mubr.f32.gmra.mrb[12].mxu1 %v41_v61  ;;  %v202_v60 = vld [vmem:[%s1972_s1 + $0x478] sm:$0xff]  ;;  %v1221_v61 = vpack.c.bf16 %v250_v55, %v249_v54  ;;  %v33_v7 = vld [vmem:[%s1973_s0 + $0xb0] sm:$0xff] }
  0x4f   :  { %1204 = vmatpush3.bf16.msra.mxu1 %v1203_v4  ;;  %500 = vmatprep.mubr.f32.mxu0 %v52_v1  ;;  %v1191_v0 = vpack.c.bf16 %v202_v60, %v201_v59  ;;  %v1223_v1 = vpack.c.bf16 %v234_v63, %v233_v62  ;;  %v32_v4 = vld [vmem:[%s1973_s0 + $0xa8] sm:$0xff]  ;;  %v46_v9 = vld [vmem:[%s1973_s0 + $0x118] sm:$0xff]  ;;  %v45_v11 = vld [vmem:[%s1973_s0 + $0x110] sm:$0xff] }
  0x50   :  { %1174 = vmatprep.subr.bf16.mxu0 %v1173_v8  ;;  %585 = vmatprep.mubr.f32.mxu1 %v54_v12  ;;  %v44_v8 = vld [vmem:[%s1973_s0 + $0x108] sm:$0xff]  ;;  %v57_v15 = vld [vmem:[%s1973_s0 + $0x170] sm:$0xff] }
  0x51   :  { %501 = vmatmul.mubr.f32.gmra.mrb[14].mxu0 %v51_v16  ;;  %1206 = vmatprep.subr.bf16.mxu1 %v1205_v13  ;;  %v56_v12 = vld [vmem:[%s1973_s0 + $0x168] sm:$0xff]  ;;  %v58_v13 = vld [vmem:[%s1973_s0 + $0x178] sm:$0xff] }
  0x52   :  { %1176 = vmatpush3.bf16.msra.mxu0 %v1175_v17  ;;  %586 = vmatmul.mubr.f32.gmra.mrb[14].mxu1 %v53_v18 }
  0x53   :  { %1208 = vmatpush3.bf16.msra.mxu1 %v1207_v19  ;;  %1178 = vmatprep.subr.bf16.mxu0 %v1177_v20 }
  0x54   :  { %1210 = vmatprep.subr.bf16.mxu1 %v1209_v24  ;;  %655 = vmatprep.mubr.f32.mxu0 %v20_v30 }
  0x55   :  { %740 = vmatprep.mubr.f32.mxu1 %v22_v32 }
  0x56   :  { %1180 = vmatpush3.bf16.msra.mxu0 %v1179_v31 }
  0x57   :  { %1212 = vmatpush3.bf16.msra.mxu1 %v1211_v33  ;;  %1182 = vmatprep.subr.bf16.mxu0 %v1181_v34 }
  0x58   :  { %1214 = vmatprep.subr.bf16.mxu1 %v1213_v38 }
  0x5a   :  { %1184 = vmatpush3.bf16.msra.mxu0 %v1183_v44 }
  0x5b   :  { %1216 = vmatpush3.bf16.msra.mxu1 %v1215_v45  ;;  %1186 = vmatprep.subr.bf16.mxu0 %v1185_v46 }
  0x5c   :  { %1218 = vmatprep.subr.bf16.mxu1 %v1217_v50 }
  0x5e   :  { %1188 = vmatpush3.bf16.msra.mxu0 %v1187_v56 }
  0x5f   :  { %1220 = vmatpush3.bf16.msra.mxu1 %v1219_v57  ;;  %1190 = vmatprep.subr.bf16.mxu0 %v1189_v58 }
  0x60   :  { %1222 = vmatprep.subr.bf16.mxu1 %v1221_v61 }
  0x62   :  { %1192 = vmatpush3.bf16.msra.mxu0 %v1191_v0 }
  0x63   :  { %1224 = vmatpush3.bf16.msra.mxu1 %v1223_v1 }
  0x65   :  { %656 = vmatmul.mubr.f32.vlgmr.msra.gmra.mrb[16].mxu0 %v19_v2 }
  0x66   :  { %741 = vmatmul.mubr.f32.vlgmr.msra.gmra.mrb[16].mxu1 %v21_v3  ;;  %660 = vmatprep.mubr.f32.mxu0 %v32_v4 }
  0x67   :  { %745 = vmatprep.mubr.f32.mxu1 %v34_v5 }
  0x69   :  { %661 = vmatmul.mubr.f32.gmra.mrb[18].mxu0 %v31_v6 }
  0x6a   :  { %746 = vmatmul.mubr.f32.gmra.mrb[18].mxu1 %v33_v7  ;;  %665 = vmatprep.mubr.f32.mxu0 %v44_v8 }
  0x6b   :  { %750 = vmatprep.mubr.f32.mxu1 %v46_v9 }
  0x6d   :  { %666 = vmatmul.mubr.f32.gmra.mrb[20].mxu0 %v43_v10 }
  0x6e   :  { %751 = vmatmul.mubr.f32.gmra.mrb[20].mxu1 %v45_v11  ;;  %670 = vmatprep.mubr.f32.mxu0 %v56_v12 }
  0x6f   :  { %755 = vmatprep.mubr.f32.mxu1 %v58_v13 }
  0x71   :  { %671 = vmatmul.mubr.f32.gmra.mrb[22].mxu0 %v55_v14 }
  0x72   :  { %756 = vmatmul.mubr.f32.gmra.mrb[22].mxu1 %v57_v15 }
  0xf8   :  { %v801_v16 = vpop.f32.mrb[0].mxu0 }
  0xf9   :  { %v845_v17 = vpop.f32.mrb[0].mxu1  ;;  %v802_v18 = vpop.f32.mrb[1].mxu0 }
  0xfa   :  { %v803_v19 = vadd.f32 %v802_v18, %v801_v16  ;;  %v846_v20 = vpop.f32.mrb[1].mxu1 }
  0xfb   :  { %v847_v21 = vadd.f32 %v846_v20, %v845_v17 }
  0xfc   :  { %v804_v22 = vpop.f32.mrb[2].mxu0 }
  0xfd   :  { %v403_v23 = vadd.f32 %v847_v21, %v803_v19  ;;  %v848_v24 = vpop.f32.mrb[2].mxu1  ;;  %v805_v25 = vpop.f32.mrb[3].mxu0 }
  0xfe   :  { %v806_v26 = vadd.f32 %v805_v25, %v804_v22  ;;  %v849_v27 = vpop.f32.mrb[3].mxu1 }
  0xff   :  { %v850_v28 = vadd.f32 %v849_v27, %v848_v24 }
 0x100   :  { %v807_v29 = vpop.f32.mrb[4].mxu0 }
 0x101   :  { %v408_v30 = vadd.f32 %v850_v28, %v806_v26  ;;  %v851_v31 = vpop.f32.mrb[4].mxu1  ;;  %v808_v32 = vpop.f32.mrb[5].mxu0 }
 0x102   :  { %v809_v33 = vadd.f32 %v808_v32, %v807_v29  ;;  %v852_v34 = vpop.f32.mrb[5].mxu1 }
 0x103   :  { %v853_v35 = vadd.f32 %v852_v34, %v851_v31 }
 0x104   :  { %v810_v36 = vpop.f32.mrb[6].mxu0 }
 0x105   :  { %v413_v37 = vadd.f32 %v853_v35, %v809_v33  ;;  %v854_v38 = vpop.f32.mrb[6].mxu1  ;;  %v811_v39 = vpop.f32.mrb[7].mxu0 }
 0x106   :  { %v812_v40 = vadd.f32 %v811_v39, %v810_v36  ;;  %v855_v41 = vpop.f32.mrb[7].mxu1 }
 0x107   :  { %v856_v42 = vadd.f32 %v855_v41, %v854_v38 }
 0x109   :  { %v418_v43 = vadd.f32 %v856_v42, %v812_v40 }
 0x118   :  { %v889_v44 = vpop.f32.mrb[8].mxu0 }
 0x119   :  { %v890_v45 = vpop.f32.mrb[9].mxu0  ;;  %v933_v46 = vpop.f32.mrb[8].mxu1 }
 0x11a   :  { %v891_v47 = vadd.f32 %v890_v45, %v889_v44  ;;  %v934_v48 = vpop.f32.mrb[9].mxu1 }
 0x11b   :  { %v935_v49 = vadd.f32 %v934_v48, %v933_v46 }
 0x11c   :  { %v488_v50 = vadd.f32 %v891_v47, %v403_v23  ;;  %v892_v51 = vpop.f32.mrb[10].mxu0 }
 0x11d   :  { %v893_v52 = vpop.f32.mrb[11].mxu0  ;;  %v936_v53 = vpop.f32.mrb[10].mxu1 }
 0x11e   :  { %v573_v54 = vadd.f32 %v935_v49, %v488_v50  ;;  %v894_v55 = vadd.f32 %v893_v52, %v892_v51  ;;  %v937_v56 = vpop.f32.mrb[11].mxu1 }
 0x11f   :  { %v938_v57 = vadd.f32 %v937_v56, %v936_v53 }
 0x120   :  { %v493_v58 = vadd.f32 %v894_v55, %v408_v30  ;;  %v895_v59 = vpop.f32.mrb[12].mxu0 }
 0x121   :  { %v896_v60 = vpop.f32.mrb[13].mxu0  ;;  %v939_v61 = vpop.f32.mrb[12].mxu1 }
 0x122   :  { %v578_v62 = vadd.f32 %v938_v57, %v493_v58  ;;  %v897_v63 = vadd.f32 %v896_v60, %v895_v59  ;;  %v940_v0 = vpop.f32.mrb[13].mxu1 }
 0x123   :  { %v941_v1 = vadd.f32 %v940_v0, %v939_v61 }
 0x124   :  { %v498_v2 = vadd.f32 %v897_v63, %v413_v37  ;;  %v898_v3 = vpop.f32.mrb[14].mxu0 }
 0x125   :  { %v899_v4 = vpop.f32.mrb[15].mxu0  ;;  %v942_v5 = vpop.f32.mrb[14].mxu1 }
 0x126   :  { %v583_v6 = vadd.f32 %v941_v1, %v498_v2  ;;  %v900_v7 = vadd.f32 %v899_v4, %v898_v3  ;;  %v943_v8 = vpop.f32.mrb[15].mxu1 }
 0x127   :  { %v944_v9 = vadd.f32 %v943_v8, %v942_v5 }
 0x128   :  { %v503_v10 = vadd.f32 %v900_v7, %v418_v43 }
 0x12a   :  { %v588_v11 = vadd.f32 %v944_v9, %v503_v10 }
 0x138   :  { %v977_v12 = vpop.f32.mrb[16].mxu0 }
 0x139   :  { %v978_v13 = vpop.f32.mrb[17].mxu0  ;;  %v1021_v14 = vpop.f32.mrb[16].mxu1 }
 0x13a   :  { %v979_v15 = vadd.f32 %v978_v13, %v977_v12  ;;  %v1022_v16 = vpop.f32.mrb[17].mxu1 }
 0x13b   :  { %v1023_v17 = vadd.f32 %v1022_v16, %v1021_v14 }
 0x13c   :  { %v658_v18 = vadd.f32 %v979_v15, %v573_v54  ;;  %v980_v19 = vpop.f32.mrb[18].mxu0 }
 0x13d   :  { %v981_v20 = vpop.f32.mrb[19].mxu0  ;;  %v1024_v21 = vpop.f32.mrb[18].mxu1 }
 0x13e   :  { %v743_v22 = vadd.f32 %v1023_v17, %v658_v18  ;;  %v982_v23 = vadd.f32 %v981_v20, %v980_v19  ;;  %v1025_v24 = vpop.f32.mrb[19].mxu1 }
 0x13f   :  { %v1026_v25 = vadd.f32 %v1025_v24, %v1024_v21 }
 0x140   :  { %761 = vst [vmem:[%s1974_s2] sm:$0xff] %v743_v22  ;;  %v663_v26 = vadd.f32 %v982_v23, %v578_v62  ;;  %v983_v27 = vpop.f32.mrb[20].mxu0 }
 0x141   :  { %v984_v28 = vpop.f32.mrb[21].mxu0  ;;  %v1027_v29 = vpop.f32.mrb[20].mxu1 }
 0x142   :  { %v748_v30 = vadd.f32 %v1026_v25, %v663_v26  ;;  %v985_v31 = vadd.f32 %v984_v28, %v983_v27  ;;  %v1028_v32 = vpop.f32.mrb[21].mxu1 }
 0x143   :  { %v1029_v33 = vadd.f32 %v1028_v32, %v1027_v29 }
 0x144   :  { %762 = vst [vmem:[%s1974_s2 + $0x8] sm:$0xff] %v748_v30  ;;  %v668_v34 = vadd.f32 %v985_v31, %v583_v6  ;;  %v986_v35 = vpop.f32.mrb[22].mxu0 }
 0x145   :  { %v987_v36 = vpop.f32.mrb[23].mxu0  ;;  %v1030_v37 = vpop.f32.mrb[22].mxu1 }
 0x146   :  { %v753_v38 = vadd.f32 %v1029_v33, %v668_v34  ;;  %v988_v39 = vadd.f32 %v987_v36, %v986_v35  ;;  %v1031_v40 = vpop.f32.mrb[23].mxu1 }
 0x147   :  { %v1032_v41 = vadd.f32 %v1031_v40, %v1030_v37 }
 0x148   :  { %763 = vst [vmem:[%s1974_s2 + $0x10] sm:$0xff] %v753_v38  ;;  %v673_v42 = vadd.f32 %v988_v39, %v588_v11 }
 0x14a   :  { %v758_v43 = vadd.f32 %v1032_v41, %v673_v42 }
 0x14c   :  { %764 = vst [vmem:[%s1974_s2 + $0x18] sm:$0xff] %v758_v43 }

// kernel: forward.51
= control target key start
LH: loop header
LB: loop body
LE: loop exit
PB: predicated region body
PF: predicated region fallthrough
CT: control target
= control target key end

     0   :  { %s707_s1 = inlined_call_operand.vmem [shape: f32[512,128], index: 1, kind: input, shape index: {}]   ;;  %s708_s0 = inlined_call_operand.vmem [shape: f32[32,512], index: 0, kind: input, shape index: {}]   ;;  %s709_s2 = inlined_call_operand.vmem [shape: f32[1,128], index: 2, kind: input, shape index: {}]   ;;  %s710_s3 = inlined_call_operand.vmem [shape: f32[32,128], index: 3, kind: output, shape index: {}]  }
   0x1   :  { %v46_v0 = vld [vmem:[%s707_s1 + $0x80] sm:$0xff]  ;;  %v47_v1 = vld [vmem:[%s707_s1 + $0x88] sm:$0xff]  ;;  %v48_v11 = vld [vmem:[%s707_s1 + $0x90] sm:$0xff] }
   0x2   :  { %v30_v2 = vld [vmem:[%s707_s1] sm:$0xff]  ;;  %v368_v3 = vpack.c.bf16 %v47_v1, %v46_v0  ;;  %v31_v4 = vld [vmem:[%s707_s1 + $0x8] sm:$0xff]  ;;  %v49_v13 = vld [vmem:[%s707_s1 + $0x98] sm:$0xff] }
   0x3   :  { %v78_v5 = vld [vmem:[%s707_s1 + $0x180] sm:$0xff]  ;;  %v79_v6 = vld [vmem:[%s707_s1 + $0x188] sm:$0xff]  ;;  %v370_v7 = vpack.c.bf16 %v31_v4, %v30_v2  ;;  %v32_v14 = vld [vmem:[%s707_s1 + $0x10] sm:$0xff]  ;;  %v372_v16 = vpack.c.bf16 %v49_v13, %v48_v11 }
   0x4   :  { %v400_v8 = vpack.c.bf16 %v79_v6, %v78_v5  ;;  %v62_v9 = vld [vmem:[%s707_s1 + $0x100] sm:$0xff]  ;;  %v63_v10 = vld [vmem:[%s707_s1 + $0x108] sm:$0xff]  ;;  %369 = vmatprep.subr.bf16.mxu0 %v368_v3  ;;  %v33_v15 = vld [vmem:[%s707_s1 + $0x18] sm:$0xff] }
   0x5   :  { %v402_v12 = vpack.c.bf16 %v63_v10, %v62_v9  ;;  %371 = vmatpush3.bf16.msra.mxu0 %v370_v7  ;;  %v374_v17 = vpack.c.bf16 %v33_v15, %v32_v14  ;;  %v80_v18 = vld [vmem:[%s707_s1 + $0x190] sm:$0xff]  ;;  %v81_v19 = vld [vmem:[%s707_s1 + $0x198] sm:$0xff]  ;;  %v50_v23 = vld [vmem:[%s707_s1 + $0xa0] sm:$0xff] }
   0x6   :  { %401 = vmatprep.subr.bf16.mxu1 %v400_v8  ;;  %v64_v20 = vld [vmem:[%s707_s1 + $0x110] sm:$0xff]  ;;  %v404_v21 = vpack.c.bf16 %v81_v19, %v80_v18  ;;  %v65_v22 = vld [vmem:[%s707_s1 + $0x118] sm:$0xff]  ;;  %v51_v24 = vld [vmem:[%s707_s1 + $0xa8] sm:$0xff]  ;;  %373 = vmatprep.subr.bf16.mxu0 %v372_v16 }
   0x7   :  { %403 = vmatpush3.bf16.msra.mxu1 %v402_v12  ;;  %v406_v25 = vpack.c.bf16 %v65_v22, %v64_v20  ;;  %v376_v26 = vpack.c.bf16 %v51_v24, %v50_v23  ;;  %v34_v27 = vld [vmem:[%s707_s1 + $0x20] sm:$0xff]  ;;  %v35_v28 = vld [vmem:[%s707_s1 + $0x28] sm:$0xff]  ;;  %v52_v35 = vld [vmem:[%s707_s1 + $0xb0] sm:$0xff] }
   0x8   :  { %v82_v29 = vld [vmem:[%s707_s1 + $0x1a0] sm:$0xff]  ;;  %405 = vmatprep.subr.bf16.mxu1 %v404_v21  ;;  %v83_v30 = vld [vmem:[%s707_s1 + $0x1a8] sm:$0xff]  ;;  %v378_v33 = vpack.c.bf16 %v35_v28, %v34_v27  ;;  %v53_v36 = vld [vmem:[%s707_s1 + $0xb8] sm:$0xff] }
   0x9   :  { %v66_v31 = vld [vmem:[%s707_s1 + $0x120] sm:$0xff]  ;;  %v67_v32 = vld [vmem:[%s707_s1 + $0x128] sm:$0xff]  ;;  %375 = vmatpush3.bf16.msra.mxu0 %v374_v17  ;;  %v408_v34 = vpack.c.bf16 %v83_v30, %v82_v29  ;;  %v36_v37 = vld [vmem:[%s707_s1 + $0x30] sm:$0xff]  ;;  %v380_v39 = vpack.c.bf16 %v53_v36, %v52_v35 }
   0xa   :  { %377 = vmatprep.subr.bf16.mxu0 %v376_v26  ;;  %v410_v38 = vpack.c.bf16 %v67_v32, %v66_v31  ;;  %v37_v40 = vld [vmem:[%s707_s1 + $0x38] sm:$0xff]  ;;  %v84_v41 = vld [vmem:[%s707_s1 + $0x1b0] sm:$0xff]  ;;  %v54_v46 = vld [vmem:[%s707_s1 + $0xc0] sm:$0xff] }
   0xb   :  { %407 = vmatpush3.bf16.msra.mxu1 %v406_v25  ;;  %v85_v42 = vld [vmem:[%s707_s1 + $0x1b8] sm:$0xff]  ;;  %v68_v44 = vld [vmem:[%s707_s1 + $0x130] sm:$0xff]  ;;  %v55_v47 = vld [vmem:[%s707_s1 + $0xc8] sm:$0xff]  ;;  %v382_v48 = vpack.c.bf16 %v37_v40, %v36_v37 }
   0xc   :  { %409 = vmatprep.subr.bf16.mxu1 %v408_v34  ;;  %v412_v43 = vpack.c.bf16 %v85_v42, %v84_v41  ;;  %v69_v45 = vld [vmem:[%s707_s1 + $0x138] sm:$0xff]  ;;  %v86_v49 = vld [vmem:[%s707_s1 + $0x1c0] sm:$0xff]  ;;  %v87_v50 = vld [vmem:[%s707_s1 + $0x1c8] sm:$0xff]  ;;  %v384_v52 = vpack.c.bf16 %v55_v47, %v54_v46 }
   0xd   :  { %379 = vmatpush3.bf16.msra.mxu0 %v378_v33  ;;  %v414_v51 = vpack.c.bf16 %v69_v45, %v68_v44  ;;  %v38_v53 = vld [vmem:[%s707_s1 + $0x40] sm:$0xff]  ;;  %v39_v54 = vld [vmem:[%s707_s1 + $0x48] sm:$0xff]  ;;  %v416_v56 = vpack.c.bf16 %v87_v50, %v86_v49  ;;  %v56_v58 = vld [vmem:[%s707_s1 + $0xd0] sm:$0xff] }
   0xe   :  { %381 = vmatprep.subr.bf16.mxu0 %v380_v39  ;;  %v70_v55 = vld [vmem:[%s707_s1 + $0x140] sm:$0xff]  ;;  %v71_v57 = vld [vmem:[%s707_s1 + $0x148] sm:$0xff]  ;;  %v57_v59 = vld [vmem:[%s707_s1 + $0xd8] sm:$0xff]  ;;  %v386_v62 = vpack.c.bf16 %v39_v54, %v38_v53 }
   0xf   :  { %411 = vmatpush3.bf16.msra.mxu1 %v410_v38  ;;  %v88_v60 = vld [vmem:[%s707_s1 + $0x1d0] sm:$0xff]  ;;  %v89_v61 = vld [vmem:[%s707_s1 + $0x1d8] sm:$0xff]  ;;  %v418_v63 = vpack.c.bf16 %v71_v57, %v70_v55  ;;  %v388_v0 = vpack.c.bf16 %v57_v59, %v56_v58  ;;  %v58_v6 = vld [vmem:[%s707_s1 + $0xe0] sm:$0xff] }
  0x10   :  { %413 = vmatprep.subr.bf16.mxu1 %v412_v43  ;;  %v40_v1 = vld [vmem:[%s707_s1 + $0x50] sm:$0xff]  ;;  %v41_v2 = vld [vmem:[%s707_s1 + $0x58] sm:$0xff]  ;;  %v420_v4 = vpack.c.bf16 %v89_v61, %v88_v60  ;;  %v59_v7 = vld [vmem:[%s707_s1 + $0xe8] sm:$0xff] }
  0x11   :  { %383 = vmatpush3.bf16.msra.mxu0 %v382_v48  ;;  %v72_v3 = vld [vmem:[%s707_s1 + $0x150] sm:$0xff]  ;;  %v73_v5 = vld [vmem:[%s707_s1 + $0x158] sm:$0xff]  ;;  %v90_v8 = vld [vmem:[%s707_s1 + $0x1e0] sm:$0xff]  ;;  %v390_v10 = vpack.c.bf16 %v41_v2, %v40_v1  ;;  %v392_v14 = vpack.c.bf16 %v59_v7, %v58_v6 }
  0x12   :  { %385 = vmatprep.subr.bf16.mxu0 %v384_v52  ;;  %v91_v9 = vld [vmem:[%s707_s1 + $0x1e8] sm:$0xff]  ;;  %v42_v11 = vld [vmem:[%s707_s1 + $0x60] sm:$0xff]  ;;  %v422_v13 = vpack.c.bf16 %v73_v5, %v72_v3  ;;  %v60_v19 = vld [vmem:[%s707_s1 + $0xf0] sm:$0xff] }
  0x13   :  { %415 = vmatpush3.bf16.msra.mxu1 %v414_v51  ;;  %v43_v12 = vld [vmem:[%s707_s1 + $0x68] sm:$0xff]  ;;  %v74_v15 = vld [vmem:[%s707_s1 + $0x160] sm:$0xff]  ;;  %v424_v18 = vpack.c.bf16 %v91_v9, %v90_v8  ;;  %v61_v20 = vld [vmem:[%s707_s1 + $0xf8] sm:$0xff] }
  0x14   :  { %417 = vmatprep.subr.bf16.mxu1 %v416_v56  ;;  %v75_v16 = vld [vmem:[%s707_s1 + $0x168] sm:$0xff]  ;;  %v17_v21 = vld [vmem:[%s708_s0 + $0x18] sm:$0xff]  ;;  %v92_v22 = vld [vmem:[%s707_s1 + $0x1f0] sm:$0xff]  ;;  %v394_v24 = vpack.c.bf16 %v43_v12, %v42_v11  ;;  %v396_v26 = vpack.c.bf16 %v61_v20, %v60_v19 }
  0x15   :  { %387 = vmatpush3.bf16.msra.mxu0 %v386_v62  ;;  %v15_v17 = vld [vmem:[%s708_s0 + $0x8] sm:$0xff]  ;;  %v93_v23 = vld [vmem:[%s707_s1 + $0x1f8] sm:$0xff]  ;;  %250 = vmatprep.mubr.f32.mxu1 %v17_v21  ;;  %v426_v25 = vpack.c.bf16 %v75_v16, %v74_v15  ;;  %v44_v27 = vld [vmem:[%s707_s1 + $0x70] sm:$0xff] }
  0x16   :  { %389 = vmatprep.subr.bf16.mxu0 %v388_v0  ;;  %165 = vmatprep.mubr.f32.mxu0 %v15_v17  ;;  %v45_v28 = vld [vmem:[%s707_s1 + $0x78] sm:$0xff]  ;;  %v428_v29 = vpack.c.bf16 %v93_v23, %v92_v22  ;;  %v76_v30 = vld [vmem:[%s707_s1 + $0x170] sm:$0xff]  ;;  %v14_v34 = vld [vmem:[%s708_s0] sm:$0xff] }
  0x17   :  { %419 = vmatpush3.bf16.msra.mxu1 %v418_v63  ;;  %v77_v31 = vld [vmem:[%s707_s1 + $0x178] sm:$0xff]  ;;  %v398_v32 = vpack.c.bf16 %v45_v28, %v44_v27  ;;  %v16_v35 = vld [vmem:[%s708_s0 + $0x10] sm:$0xff]  ;;  %v19_v36 = vld [vmem:[%s708_s0 + $0x28] sm:$0xff] }
  0x18   :  { %421 = vmatprep.subr.bf16.mxu1 %v420_v4  ;;  %v430_v33 = vpack.c.bf16 %v77_v31, %v76_v30  ;;  %v21_v37 = vld [vmem:[%s708_s0 + $0x38] sm:$0xff]  ;;  %v18_v38 = vld [vmem:[%s708_s0 + $0x20] sm:$0xff]  ;;  %v20_v39 = vld [vmem:[%s708_s0 + $0x30] sm:$0xff] }
  0x19   :  { %391 = vmatpush3.bf16.msra.mxu0 %v390_v10  ;;  %v23_v40 = vld [vmem:[%s708_s0 + $0x48] sm:$0xff]  ;;  %v25_v41 = vld [vmem:[%s708_s0 + $0x58] sm:$0xff]  ;;  %v22_v42 = vld [vmem:[%s708_s0 + $0x40] sm:$0xff] }
  0x1a   :  { %393 = vmatprep.subr.bf16.mxu0 %v392_v14  ;;  %v24_v43 = vld [vmem:[%s708_s0 + $0x50] sm:$0xff]  ;;  %v27_v44 = vld [vmem:[%s708_s0 + $0x68] sm:$0xff]  ;;  %v29_v45 = vld [vmem:[%s708_s0 + $0x78] sm:$0xff] }
  0x1b   :  { %423 = vmatpush3.bf16.msra.mxu1 %v422_v13  ;;  %v26_v46 = vld [vmem:[%s708_s0 + $0x60] sm:$0xff]  ;;  %v28_v47 = vld [vmem:[%s708_s0 + $0x70] sm:$0xff] }
  0x1c   :  { %425 = vmatprep.subr.bf16.mxu1 %v424_v18  ;;  %v279_v49 = vld [vmem:[%s709_s2] ss:$0 sm:$0xff] }
  0x1d   :  { %395 = vmatpush3.bf16.msra.mxu0 %v394_v24 }
  0x1e   :  { %397 = vmatprep.subr.bf16.mxu0 %v396_v26 }
  0x1f   :  { %427 = vmatpush3.bf16.msra.mxu1 %v426_v25 }
  0x20   :  { %429 = vmatprep.subr.bf16.mxu1 %v428_v29 }
  0x21   :  { %399 = vmatpush3.bf16.msra.mxu0 %v398_v32 }
  0x23   :  { %431 = vmatpush3.bf16.msra.mxu1 %v430_v33 }
  0x24   :  { %166 = vmatmul.mubr.f32.vlgmr.msra.gmra.mrb[0].mxu0 %v14_v34 }
  0x25   :  { %170 = vmatprep.mubr.f32.mxu0 %v19_v36 }
  0x26   :  { %251 = vmatmul.mubr.f32.vlgmr.msra.gmra.mrb[0].mxu1 %v16_v35 }
  0x27   :  { %255 = vmatprep.mubr.f32.mxu1 %v21_v37 }
  0x28   :  { %171 = vmatmul.mubr.f32.gmra.mrb[2].mxu0 %v18_v38 }
  0x29   :  { %175 = vmatprep.mubr.f32.mxu0 %v23_v40 }
  0x2a   :  { %256 = vmatmul.mubr.f32.gmra.mrb[2].mxu1 %v20_v39 }
  0x2b   :  { %260 = vmatprep.mubr.f32.mxu1 %v25_v41 }
  0x2c   :  { %176 = vmatmul.mubr.f32.gmra.mrb[4].mxu0 %v22_v42 }
  0x2d   :  { %180 = vmatprep.mubr.f32.mxu0 %v27_v44 }
  0x2e   :  { %261 = vmatmul.mubr.f32.gmra.mrb[4].mxu1 %v24_v43 }
  0x2f   :  { %265 = vmatprep.mubr.f32.mxu1 %v29_v45 }
  0x30   :  { %181 = vmatmul.mubr.f32.gmra.mrb[6].mxu0 %v26_v46 }
  0x32   :  { %266 = vmatmul.mubr.f32.gmra.mrb[6].mxu1 %v28_v47 }
  0xf7   :  { %v312_v48 = vpop.f32.mrb[0].mxu0 }
  0xf8   :  { %v313_v50 = vpop.f32.mrb[1].mxu0 }
  0xf9   :  { %v356_v51 = vpop.f32.mrb[0].mxu1  ;;  %v314_v52 = vadd.f32 %v313_v50, %v312_v48 }
  0xfa   :  { %v357_v53 = vpop.f32.mrb[1].mxu1 }
  0xfb   :  { %v358_v54 = vadd.f32 %v357_v53, %v356_v51  ;;  %v168_v55 = vadd.f32 %v314_v52, %v279_v49  ;;  %v315_v56 = vpop.f32.mrb[2].mxu0 }
  0xfc   :  { %v316_v57 = vpop.f32.mrb[3].mxu0 }
  0xfd   :  { %v359_v58 = vpop.f32.mrb[2].mxu1  ;;  %v253_v59 = vadd.f32 %v358_v54, %v168_v55  ;;  %v317_v60 = vadd.f32 %v316_v57, %v315_v56 }
  0xfe   :  { %v360_v61 = vpop.f32.mrb[3].mxu1 }
  0xff   :  { %v361_v62 = vadd.f32 %v360_v61, %v359_v58  ;;  %271 = vst [vmem:[%s710_s3] sm:$0xff] %v253_v59  ;;  %v173_v63 = vadd.f32 %v317_v60, %v279_v49  ;;  %v318_v0 = vpop.f32.mrb[4].mxu0 }
 0x100   :  { %v319_v1 = vpop.f32.mrb[5].mxu0 }
 0x101   :  { %v362_v2 = vpop.f32.mrb[4].mxu1  ;;  %v258_v3 = vadd.f32 %v361_v62, %v173_v63  ;;  %v320_v4 = vadd.f32 %v319_v1, %v318_v0 }
 0x102   :  { %v363_v5 = vpop.f32.mrb[5].mxu1 }
 0x103   :  { %v364_v6 = vadd.f32 %v363_v5, %v362_v2  ;;  %272 = vst [vmem:[%s710_s3 + $0x8] sm:$0xff] %v258_v3  ;;  %v178_v7 = vadd.f32 %v320_v4, %v279_v49  ;;  %v321_v8 = vpop.f32.mrb[6].mxu0 }
 0x104   :  { %v322_v9 = vpop.f32.mrb[7].mxu0 }
 0x105   :  { %v365_v10 = vpop.f32.mrb[6].mxu1  ;;  %v263_v11 = vadd.f32 %v364_v6, %v178_v7  ;;  %v323_v12 = vadd.f32 %v322_v9, %v321_v8 }
 0x106   :  { %v366_v13 = vpop.f32.mrb[7].mxu1 }
 0x107   :  { %v367_v14 = vadd.f32 %v366_v13, %v365_v10  ;;  %273 = vst [vmem:[%s710_s3 + $0x10] sm:$0xff] %v263_v11  ;;  %v183_v15 = vadd.f32 %v323_v12, %v279_v49 }
 0x109   :  { %v268_v16 = vadd.f32 %v367_v14, %v183_v15 }
 0x10b   :  { %274 = vst [vmem:[%s710_s3 + $0x18] sm:$0xff] %v268_v16 }

</bundles_post_ra>
